<compile_context>
chip_gen: v5e
topology: v5e:2x2
jax: 0.10.0
libtpu: 0.0.40
codegen_flags: <defaults>
</compile_context>

<pallas_src>
import numpy as np

import jax
import jax.numpy as jnp
from jax.experimental import pallas as pl
from jax.experimental.pallas import tpu as pltpu


# (Cin, Cout, H=W of the layer input) for conv1..conv4
_CONV_DIMS = ((1, 2, 80), (2, 4, 40), (4, 8, 20), (8, 16, 10))
_BLOCK_B = 8          # images processed per grid step (multiple of 8)


# ----------------------------------------------------------------------------
# Fused Pallas kernel: Bb lane-stacked images per grid step, all in VMEM.
# ----------------------------------------------------------------------------
def _policy_kernel(
    x_ref, aux_ref,
    a1_ref, c1_ref, b1_ref,
    a2_ref, c2_ref, b2_ref,
    a3_ref, c3_ref, b3_ref,
    a4_ref, c4_ref, b4_ref,
    selq_ref, w1q_ref, w1a_ref, b1t_ref,
    w2_ref, b2f_ref,
    w3p_ref, b3p_ref,
    o_ref,
):
    f32 = jnp.float32

    # Lane-stacked activation: acts[c*H + h, b*W + w] = X[b, c, h, w].
    # conv1 has Cin = 1, so the input block is exactly the stacked image.
    acts = x_ref[0]                                               # (80, Bb*80)

    for a_ref, c_ref, b_ref in (
        (a1_ref, c1_ref, b1_ref),
        (a2_ref, c2_ref, b2_ref),
        (a3_ref, c3_ref, b3_ref),
        (a4_ref, c4_ref, b4_ref),
    ):
        # One merged A matmul for all 3 kw taps and all Bb images.
        u = jnp.dot(a_ref[...], acts, preferred_element_type=f32)   # (240, Bb*W)
        # Column-tap selection per kw via block-diagonal kron(I_Bb, C_kw);
        # sublane slices at multiples of 8 are free.  Independent partials.
        d0 = jnp.dot(u[0:80, :],    c_ref[0], preferred_element_type=f32)
        d1 = jnp.dot(u[80:160, :],  c_ref[1], preferred_element_type=f32)
        d2 = jnp.dot(u[160:240, :], c_ref[2], preferred_element_type=f32)
        acts = jnp.maximum((d0 + d1) + (d2 + b_ref[...]), 0.0)      # (80, Bb*OW)

    # acts is the stacked conv4 output: acts[o*5+p, b*5+q] = conv4[b,o,p,q]
    step = pl.program_id(0)
    aux_t = aux_ref[step]                                          # (5, Bb)

    # fc1 evaluated transposed (features on sublanes, batch on lanes).
    base = jnp.dot(w1a_ref[...], aux_t, preferred_element_type=f32) + b1t_ref[...]
    parts = []
    for q in range(5):
        gq = jnp.dot(acts, selq_ref[q], preferred_element_type=f32)     # (80, Bb)
        parts.append(jnp.dot(w1q_ref[q], gq, preferred_element_type=f32))  # (120, Bb)
    h1t = jnp.maximum(
        base + ((parts[0] + parts[1]) + (parts[2] + parts[3]) + parts[4]), 0.0
    )                                                              # (120, Bb)

    # Re-orient once, then batched lane-dense fc2 / fc3.
    h1 = h1t.T                                                     # (Bb, 120)
    h2 = jnp.maximum(
        jnp.dot(h1, w2_ref[...], preferred_element_type=f32) + b2f_ref[...], 0.0
    )                                                              # (Bb, 80)
    out = jnp.dot(h2, w3p_ref[...], preferred_element_type=f32) + b3p_ref[...]
    o_ref[...] = out.astype(o_ref.dtype)                           # (Bb, 128)


# ----------------------------------------------------------------------------
# Parameter construction (deterministic, synthetic, PyTorch layouts)
# ----------------------------------------------------------------------------
def init_params(key):
    def u(k, shape, fan_in):
        bound = 1.0 / float(np.sqrt(fan_in))
        return jax.random.uniform(k, shape, jnp.float32, -bound, bound)

    ks = jax.random.split(key, 14)
    p = {}
    # conv weights in PyTorch layout (Cout, Cin, 3, 3)
    p["w_c1"] = u(ks[0], (2, 1, 3, 3), 1 * 9);   p["b_c1"] = u(ks[1], (2,), 1 * 9)
    p["w_c2"] = u(ks[2], (4, 2, 3, 3), 2 * 9);   p["b_c2"] = u(ks[3], (4,), 2 * 9)
    p["w_c3"] = u(ks[4], (8, 4, 3, 3), 4 * 9);   p["b_c3"] = u(ks[5], (8,), 4 * 9)
    p["w_c4"] = u(ks[6], (16, 8, 3, 3), 8 * 9);  p["b_c4"] = u(ks[7], (16,), 8 * 9)
    # fc weights stored transposed to (in, out)
    p["w_fc1"] = u(ks[8], (405, 120), 405);  p["b_fc1"] = u(ks[9], (120,), 405)
    p["w_fc2"] = u(ks[10], (120, 80), 120);  p["b_fc2"] = u(ks[11], (80,), 120)
    p["w_fc3"] = u(ks[12], (80, 25), 80);    p["b_fc3"] = u(ks[13], (25,), 80)
    return p


def prepare_params(p, block_b=_BLOCK_B):
    """One-time fold of conv weights / flatten order into kernel-ready matrices."""
    bb = block_b
    eye_b = np.eye(bb, dtype=np.float32)
    prep = {}

    for idx, (cin, cout, h_in) in enumerate(_CONV_DIMS, start=1):
        oh = h_in // 2                       # square maps: H = W, OH = OW
        wgt = np.asarray(p[f"w_c{idx}"])     # (Cout, Cin, 3, 3)
        bias = np.asarray(p[f"b_c{idx}"])    # (Cout,)

        # Row-tap indicator  R[kh, p, h] = [h == 2p + kh - 1]   (stride 2, pad 1)
        # Column-tap selector C[kw, w, q] = [w == 2q + kw - 1]
        r_sel = np.zeros((3, oh, h_in), np.float32)
        c_sel = np.zeros((3, h_in, oh), np.float32)
        for k in range(3):
            for o in range(oh):
                src = 2 * o + k - 1
                if 0 <= src < h_in:
                    r_sel[k, o, src] = 1.0
                    c_sel[k, src, o] = 1.0

        # A_kw[o*OH + p, c*H + h] = sum_kh w[o,c,kh,kw] * R[kh, p, h]
        a = np.einsum("ocjk,jph->kopch", wgt, r_sel).reshape(3, cout * oh, cin * h_in)
        prep[f"A{idx}"] = jnp.asarray(a.reshape(3 * cout * oh, cin * h_in))   # (240, 80)
        # Block-diagonal lane selectors for the Bb lane-stacked images.
        cb = np.stack([np.kron(eye_b, c_sel[k]) for k in range(3)], axis=0)
        prep[f"C{idx}"] = jnp.asarray(cb)                        # (3, Bb*H, Bb*OH)
        prep[f"b{idx}"] = jnp.asarray(np.repeat(bias, oh).reshape(cout * oh, 1))

    # fc1: fold torch.nn.Flatten (NCHW -> o*25 + p*5 + q) and the aux concat.
    w1 = np.asarray(p["w_fc1"])                            # (405, 120)
    w1_img = w1[:400].reshape(16, 5, 5, 120)               # (o, p, q, n)
    # w1qT[q, n, r=o*5+p] = W1[r*5 + q, n]
    prep["w1qT"] = jnp.asarray(np.transpose(w1_img, (2, 3, 0, 1)).reshape(5, 120, 80))
    prep["w1auxT"] = jnp.asarray(w1[400:].T)               # (120, 5)
    prep["b1t"] = jnp.asarray(np.asarray(p["b_fc1"]).reshape(120, 1))

    # Column-of-each-image selector: Sel[q, b*5+q, b] = 1  (picks q-th output
    # column of every image from the lane-stacked conv4 output).
    sel = np.zeros((5, bb * 5, bb), np.float32)
    for q in range(5):
        for b in range(bb):
            sel[q, b * 5 + q, b] = 1.0
    prep["sel_q"] = jnp.asarray(sel)

    prep["w_fc2"] = jnp.asarray(np.asarray(p["w_fc2"]))
    prep["b_fc2"] = jnp.asarray(np.asarray(p["b_fc2"]).reshape(1, 80))
    # fc3 zero-padded to 128 output columns -> lane-dense output stores.
    w3p = np.zeros((80, 128), np.float32); w3p[:, :25] = np.asarray(p["w_fc3"])
    b3p = np.zeros((1, 128), np.float32);  b3p[0, :25] = np.asarray(p["b_fc3"])
    prep["w_fc3p"] = jnp.asarray(w3p)
    prep["b_fc3p"] = jnp.asarray(b3p)
    return prep


# ----------------------------------------------------------------------------
# Forward pass (matches Policy.forward semantics)
# ----------------------------------------------------------------------------
_VMEM = pl.BlockSpec(memory_space=pltpu.MemorySpace.VMEM)


@jax.jit
def policy_forward(prep, x_nchw, aux):
    b = x_nchw.shape[0]
    bb = _BLOCK_B
    b_pad = ((b + bb - 1) // bb) * bb
    nsteps = b_pad // bb

    x2 = x_nchw.astype(jnp.float32).reshape(b, 80, 80)     # drop Cin=1
    aux_f = aux.astype(jnp.float32)
    if b_pad != b:
        x2 = jnp.pad(x2, ((0, b_pad - b), (0, 0), (0, 0)))
        aux_f = jnp.pad(aux_f, ((0, b_pad - b), (0, 0)))

    # Lane-stack Bb images per grid step: x_st[i, h, l*80 + w] = X[i*Bb + l, h, w]
    x_st = jnp.transpose(
        x2.reshape(nsteps, bb, 80, 80), (0, 2, 1, 3)
    ).reshape(nsteps, 80, bb * 80)
    # aux transposed per step: aux_t[i, j, l] = aux[i*Bb + l, j]  (stays resident)
    aux_t = jnp.transpose(aux_f.reshape(nsteps, bb, 5), (0, 2, 1))

    grid_spec = pltpu.PrefetchScalarGridSpec(
        num_scalar_prefetch=0,
        grid=(nsteps,),
        in_specs=[
            pl.BlockSpec((1, 80, bb * 80), lambda i: (i, 0, 0)),  # Bb images / step
            _VMEM,                                                 # aux, resident
        ] + [_VMEM] * 20,                                          # resident weights
        out_specs=pl.BlockSpec((bb, 128), lambda i: (i, 0)),       # lane-dense
    )

    out = pl.pallas_call(
        _policy_kernel,
        out_shape=jax.ShapeDtypeStruct((b_pad, 128), jnp.float32),
        grid_spec=grid_spec,
        compiler_params=pltpu.CompilerParams(
            dimension_semantics=("parallel",),        # megacore split on v7x
            vmem_limit_bytes=32 * 1024 * 1024,
        ),
    )(
        x_st, aux_t,
        prep["A1"], prep["C1"], prep["b1"],
        prep["A2"], prep["C2"], prep["b2"],
        prep["A3"], prep["C3"], prep["b3"],
        prep["A4"], prep["C4"], prep["b4"],
        prep["sel_q"], prep["w1qT"], prep["w1auxT"], prep["b1t"],
        prep["w_fc2"], prep["b_fc2"],
        prep["w_fc3p"], prep["b_fc3p"],
    )
    return out[:b, :25]


# ----------------------------------------------------------------------------
# Pure-JAX reference (mirrors Policy.forward) for a correctness check.
# ----------------------------------------------------------------------------
def policy_forward_ref(p, x, aux):
    hp = jax.lax.Precision.HIGHEST

    def conv(h, w, bias):
        y = jax.lax.conv_general_dilated(
            h, w, window_strides=(2, 2), padding=((1, 1), (1, 1)),
            dimension_numbers=("NCHW", "OIHW", "NCHW"), precision=hp)
        return jax.nn.relu(y + bias.reshape(1, -1, 1, 1))

    h = conv(x.astype(jnp.float32), p["w_c1"], p["b_c1"])
    h = conv(h, p["w_c2"], p["b_c2"])
    h = conv(h, p["w_c3"], p["b_c3"])
    h = conv(h, p["w_c4"], p["b_c4"])
    flat = h.reshape(h.shape[0], -1)                       # NCHW flatten
    z = jnp.concatenate([flat, aux.astype(jnp.float32)], axis=1)
    z = jax.nn.relu(jnp.dot(z, p["w_fc1"], precision=hp) + p["b_fc1"])
    z = jax.nn.relu(jnp.dot(z, p["w_fc2"], precision=hp) + p["b_fc2"])
    return jnp.dot(z, p["w_fc3"], precision=hp) + p["b_fc3"]


# ----------------------------------------------------------------------------
if __name__ == "__main__":
    key = jax.random.PRNGKey(0)
    kp, kx, ka = jax.random.split(key, 3)

    params = init_params(kp)
    prep = prepare_params(params)

    B = 2
    x = jax.random.normal(kx, (B, 1, 80, 80), jnp.float32)   # NCHW, like PyTorch
    aux = jax.random.normal(ka, (B, 5), jnp.float32)

    out = policy_forward(prep, x, aux)
    jax.block_until_ready(out)
    assert out.shape == (B, 25), out.shape
    assert bool(jnp.all(jnp.isfinite(out)))

    ref = policy_forward_ref(params, x, aux)
    np.testing.assert_allclose(np.asarray(out), np.asarray(ref), rtol=2e-2, atol=2e-2)

    print("KERNEL_OK")
</pallas_src>

<mosaic_0001>
module attributes {stable_mosaic.version = 11 : i64} {
  func.func @_policy_kernel(%arg0: i32, %arg1: memref<1x80x640xf32, #tpu.memory_space<vmem>>, %arg2: memref<1x5x8xf32, #tpu.memory_space<vmem>>, %arg3: memref<240x80xf32, #tpu.memory_space<vmem>>, %arg4: memref<3x640x320xf32, #tpu.memory_space<vmem>>, %arg5: memref<80x1xf32, #tpu.memory_space<vmem>>, %arg6: memref<240x80xf32, #tpu.memory_space<vmem>>, %arg7: memref<3x320x160xf32, #tpu.memory_space<vmem>>, %arg8: memref<80x1xf32, #tpu.memory_space<vmem>>, %arg9: memref<240x80xf32, #tpu.memory_space<vmem>>, %arg10: memref<3x160x80xf32, #tpu.memory_space<vmem>>, %arg11: memref<80x1xf32, #tpu.memory_space<vmem>>, %arg12: memref<240x80xf32, #tpu.memory_space<vmem>>, %arg13: memref<3x80x40xf32, #tpu.memory_space<vmem>>, %arg14: memref<80x1xf32, #tpu.memory_space<vmem>>, %arg15: memref<5x40x8xf32, #tpu.memory_space<vmem>>, %arg16: memref<5x120x80xf32, #tpu.memory_space<vmem>>, %arg17: memref<120x5xf32, #tpu.memory_space<vmem>>, %arg18: memref<120x1xf32, #tpu.memory_space<vmem>>, %arg19: memref<120x80xf32, #tpu.memory_space<vmem>>, %arg20: memref<1x80xf32, #tpu.memory_space<vmem>>, %arg21: memref<80x128xf32, #tpu.memory_space<vmem>>, %arg22: memref<1x128xf32, #tpu.memory_space<vmem>>, %arg23: memref<8x128xf32, #tpu.memory_space<vmem>>) attributes {dimension_semantics = [#tpu.dimension_semantics<parallel>], iteration_bounds = array<i64: 1>, scalar_prefetch = 0 : i64, scratch_operands = 0 : i64, tpu.core_type = #tpu.core_type<tc>, window_params = [{transform_indices = @transform_0, window_bounds = array<i64: 1, 80, 640>}, {pipeline_mode = #tpu.pipeline_mode<synchronous>, transform_indices = @transform_1, window_bounds = array<i64: 1, 5, 8>}, {pipeline_mode = #tpu.pipeline_mode<synchronous>, transform_indices = @transform_2, window_bounds = array<i64: 240, 80>}, {pipeline_mode = #tpu.pipeline_mode<synchronous>, transform_indices = @transform_3, window_bounds = array<i64: 3, 640, 320>}, {pipeline_mode = #tpu.pipeline_mode<synchronous>, transform_indices = @transform_4, window_bounds = array<i64: 80, 1>}, {pipeline_mode = #tpu.pipeline_mode<synchronous>, transform_indices = @transform_5, window_bounds = array<i64: 240, 80>}, {pipeline_mode = #tpu.pipeline_mode<synchronous>, transform_indices = @transform_6, window_bounds = array<i64: 3, 320, 160>}, {pipeline_mode = #tpu.pipeline_mode<synchronous>, transform_indices = @transform_7, window_bounds = array<i64: 80, 1>}, {pipeline_mode = #tpu.pipeline_mode<synchronous>, transform_indices = @transform_8, window_bounds = array<i64: 240, 80>}, {pipeline_mode = #tpu.pipeline_mode<synchronous>, transform_indices = @transform_9, window_bounds = array<i64: 3, 160, 80>}, {pipeline_mode = #tpu.pipeline_mode<synchronous>, transform_indices = @transform_10, window_bounds = array<i64: 80, 1>}, {pipeline_mode = #tpu.pipeline_mode<synchronous>, transform_indices = @transform_11, window_bounds = array<i64: 240, 80>}, {pipeline_mode = #tpu.pipeline_mode<synchronous>, transform_indices = @transform_12, window_bounds = array<i64: 3, 80, 40>}, {pipeline_mode = #tpu.pipeline_mode<synchronous>, transform_indices = @transform_13, window_bounds = array<i64: 80, 1>}, {pipeline_mode = #tpu.pipeline_mode<synchronous>, transform_indices = @transform_14, window_bounds = array<i64: 5, 40, 8>}, {pipeline_mode = #tpu.pipeline_mode<synchronous>, transform_indices = @transform_15, window_bounds = array<i64: 5, 120, 80>}, {pipeline_mode = #tpu.pipeline_mode<synchronous>, transform_indices = @transform_16, window_bounds = array<i64: 120, 5>}, {pipeline_mode = #tpu.pipeline_mode<synchronous>, transform_indices = @transform_17, window_bounds = array<i64: 120, 1>}, {pipeline_mode = #tpu.pipeline_mode<synchronous>, transform_indices = @transform_18, window_bounds = array<i64: 120, 80>}, {pipeline_mode = #tpu.pipeline_mode<synchronous>, transform_indices = @transform_19, window_bounds = array<i64: 1, 80>}, {pipeline_mode = #tpu.pipeline_mode<synchronous>, transform_indices = @transform_20, window_bounds = array<i64: 80, 128>}, {pipeline_mode = #tpu.pipeline_mode<synchronous>, transform_indices = @transform_21, window_bounds = array<i64: 1, 128>}, {transform_indices = @transform_22, window_bounds = array<i64: 8, 128>}]} {
    %c0 = arith.constant 0 : index
    %c0_0 = arith.constant 0 : index
    %c0_1 = arith.constant 0 : index
    %0 = vector.load %arg1[%c0, %c0_0, %c0_1] : memref<1x80x640xf32, #tpu.memory_space<vmem>>, vector<1x80x640xf32>
    %1 = vector.shape_cast %0 : vector<1x80x640xf32> to vector<80x640xf32>
    %c0_2 = arith.constant 0 : index
    %c0_3 = arith.constant 0 : index
    %2 = vector.load %arg3[%c0_2, %c0_3] : memref<240x80xf32, #tpu.memory_space<vmem>>, vector<240x80xf32>
    %cst = arith.constant dense<0.000000e+00> : vector<240x640xf32>
    %3 = tpu.matmul %2, %1, %cst {dimension_numbers = #tpu.dot_dimension_numbers<[1], [0], [0], [1], [0, 0, 1, 1], [], []>} : vector<240x80xf32>, vector<80x640xf32>, vector<240x640xf32> -> vector<240x640xf32>
    %4 = vector.extract_strided_slice %3 {offsets = [0, 0], sizes = [80, 640], strides = [1, 1]} : vector<240x640xf32> to vector<80x640xf32>
    %c0_4 = arith.constant 0 : index
    %c0_5 = arith.constant 0 : index
    %c0_6 = arith.constant 0 : index
    %5 = vector.load %arg4[%c0_4, %c0_5, %c0_6] : memref<3x640x320xf32, #tpu.memory_space<vmem>>, vector<1x640x320xf32>
    %6 = vector.shape_cast %5 : vector<1x640x320xf32> to vector<640x320xf32>
    %cst_7 = arith.constant dense<0.000000e+00> : vector<80x320xf32>
    %7 = tpu.matmul %4, %6, %cst_7 {dimension_numbers = #tpu.dot_dimension_numbers<[1], [0], [0], [1], [0, 0, 1, 1], [], []>} : vector<80x640xf32>, vector<640x320xf32>, vector<80x320xf32> -> vector<80x320xf32>
    %8 = vector.extract_strided_slice %3 {offsets = [80, 0], sizes = [80, 640], strides = [1, 1]} : vector<240x640xf32> to vector<80x640xf32>
    %c1 = arith.constant 1 : index
    %c0_8 = arith.constant 0 : index
    %c0_9 = arith.constant 0 : index
    %9 = vector.load %arg4[%c1, %c0_8, %c0_9] : memref<3x640x320xf32, #tpu.memory_space<vmem>>, vector<1x640x320xf32>
    %10 = vector.shape_cast %9 : vector<1x640x320xf32> to vector<640x320xf32>
    %cst_10 = arith.constant dense<0.000000e+00> : vector<80x320xf32>
    %11 = tpu.matmul %8, %10, %cst_10 {dimension_numbers = #tpu.dot_dimension_numbers<[1], [0], [0], [1], [0, 0, 1, 1], [], []>} : vector<80x640xf32>, vector<640x320xf32>, vector<80x320xf32> -> vector<80x320xf32>
    %12 = vector.extract_strided_slice %3 {offsets = [160, 0], sizes = [80, 640], strides = [1, 1]} : vector<240x640xf32> to vector<80x640xf32>
    %c2 = arith.constant 2 : index
    %c0_11 = arith.constant 0 : index
    %c0_12 = arith.constant 0 : index
    %13 = vector.load %arg4[%c2, %c0_11, %c0_12] : memref<3x640x320xf32, #tpu.memory_space<vmem>>, vector<1x640x320xf32>
    %14 = vector.shape_cast %13 : vector<1x640x320xf32> to vector<640x320xf32>
    %cst_13 = arith.constant dense<0.000000e+00> : vector<80x320xf32>
    %15 = tpu.matmul %12, %14, %cst_13 {dimension_numbers = #tpu.dot_dimension_numbers<[1], [0], [0], [1], [0, 0, 1, 1], [], []>} : vector<80x640xf32>, vector<640x320xf32>, vector<80x320xf32> -> vector<80x320xf32>
    %16 = arith.addf %7, %11 : vector<80x320xf32>
    %c0_14 = arith.constant 0 : index
    %c0_15 = arith.constant 0 : index
    %17 = vector.load %arg5[%c0_14, %c0_15] : memref<80x1xf32, #tpu.memory_space<vmem>>, vector<80x1xf32>
    %18 = vector.broadcast %17 : vector<80x1xf32> to vector<80x320xf32>
    %19 = arith.addf %15, %18 : vector<80x320xf32>
    %20 = arith.addf %16, %19 : vector<80x320xf32>
    %cst_16 = arith.constant 0.000000e+00 : f32
    %21 = vector.broadcast %cst_16 : f32 to vector<80x320xf32>
    %22 = arith.maximumf %20, %21 : vector<80x320xf32>
    %c0_17 = arith.constant 0 : index
    %c0_18 = arith.constant 0 : index
    %23 = vector.load %arg6[%c0_17, %c0_18] : memref<240x80xf32, #tpu.memory_space<vmem>>, vector<240x80xf32>
    %cst_19 = arith.constant dense<0.000000e+00> : vector<240x320xf32>
    %24 = tpu.matmul %23, %22, %cst_19 {dimension_numbers = #tpu.dot_dimension_numbers<[1], [0], [0], [1], [0, 0, 1, 1], [], []>} : vector<240x80xf32>, vector<80x320xf32>, vector<240x320xf32> -> vector<240x320xf32>
    %25 = vector.extract_strided_slice %24 {offsets = [0, 0], sizes = [80, 320], strides = [1, 1]} : vector<240x320xf32> to vector<80x320xf32>
    %c0_20 = arith.constant 0 : index
    %c0_21 = arith.constant 0 : index
    %c0_22 = arith.constant 0 : index
    %26 = vector.load %arg7[%c0_20, %c0_21, %c0_22] : memref<3x320x160xf32, #tpu.memory_space<vmem>>, vector<1x320x160xf32>
    %27 = vector.shape_cast %26 : vector<1x320x160xf32> to vector<320x160xf32>
    %cst_23 = arith.constant dense<0.000000e+00> : vector<80x160xf32>
    %28 = tpu.matmul %25, %27, %cst_23 {dimension_numbers = #tpu.dot_dimension_numbers<[1], [0], [0], [1], [0, 0, 1, 1], [], []>} : vector<80x320xf32>, vector<320x160xf32>, vector<80x160xf32> -> vector<80x160xf32>
    %29 = vector.extract_strided_slice %24 {offsets = [80, 0], sizes = [80, 320], strides = [1, 1]} : vector<240x320xf32> to vector<80x320xf32>
    %c1_24 = arith.constant 1 : index
    %c0_25 = arith.constant 0 : index
    %c0_26 = arith.constant 0 : index
    %30 = vector.load %arg7[%c1_24, %c0_25, %c0_26] : memref<3x320x160xf32, #tpu.memory_space<vmem>>, vector<1x320x160xf32>
    %31 = vector.shape_cast %30 : vector<1x320x160xf32> to vector<320x160xf32>
    %cst_27 = arith.constant dense<0.000000e+00> : vector<80x160xf32>
    %32 = tpu.matmul %29, %31, %cst_27 {dimension_numbers = #tpu.dot_dimension_numbers<[1], [0], [0], [1], [0, 0, 1, 1], [], []>} : vector<80x320xf32>, vector<320x160xf32>, vector<80x160xf32> -> vector<80x160xf32>
    %33 = vector.extract_strided_slice %24 {offsets = [160, 0], sizes = [80, 320], strides = [1, 1]} : vector<240x320xf32> to vector<80x320xf32>
    %c2_28 = arith.constant 2 : index
    %c0_29 = arith.constant 0 : index
    %c0_30 = arith.constant 0 : index
    %34 = vector.load %arg7[%c2_28, %c0_29, %c0_30] : memref<3x320x160xf32, #tpu.memory_space<vmem>>, vector<1x320x160xf32>
    %35 = vector.shape_cast %34 : vector<1x320x160xf32> to vector<320x160xf32>
    %cst_31 = arith.constant dense<0.000000e+00> : vector<80x160xf32>
    %36 = tpu.matmul %33, %35, %cst_31 {dimension_numbers = #tpu.dot_dimension_numbers<[1], [0], [0], [1], [0, 0, 1, 1], [], []>} : vector<80x320xf32>, vector<320x160xf32>, vector<80x160xf32> -> vector<80x160xf32>
    %37 = arith.addf %28, %32 : vector<80x160xf32>
    %c0_32 = arith.constant 0 : index
    %c0_33 = arith.constant 0 : index
    %38 = vector.load %arg8[%c0_32, %c0_33] : memref<80x1xf32, #tpu.memory_space<vmem>>, vector<80x1xf32>
    %39 = vector.broadcast %38 : vector<80x1xf32> to vector<80x160xf32>
    %40 = arith.addf %36, %39 : vector<80x160xf32>
    %41 = arith.addf %37, %40 : vector<80x160xf32>
    %cst_34 = arith.constant 0.000000e+00 : f32
    %42 = vector.broadcast %cst_34 : f32 to vector<80x160xf32>
    %43 = arith.maximumf %41, %42 : vector<80x160xf32>
    %c0_35 = arith.constant 0 : index
    %c0_36 = arith.constant 0 : index
    %44 = vector.load %arg9[%c0_35, %c0_36] : memref<240x80xf32, #tpu.memory_space<vmem>>, vector<240x80xf32>
    %cst_37 = arith.constant dense<0.000000e+00> : vector<240x160xf32>
    %45 = tpu.matmul %44, %43, %cst_37 {dimension_numbers = #tpu.dot_dimension_numbers<[1], [0], [0], [1], [0, 0, 1, 1], [], []>} : vector<240x80xf32>, vector<80x160xf32>, vector<240x160xf32> -> vector<240x160xf32>
    %46 = vector.extract_strided_slice %45 {offsets = [0, 0], sizes = [80, 160], strides = [1, 1]} : vector<240x160xf32> to vector<80x160xf32>
    %c0_38 = arith.constant 0 : index
    %c0_39 = arith.constant 0 : index
    %c0_40 = arith.constant 0 : index
    %47 = vector.load %arg10[%c0_38, %c0_39, %c0_40] : memref<3x160x80xf32, #tpu.memory_space<vmem>>, vector<1x160x80xf32>
    %48 = vector.shape_cast %47 : vector<1x160x80xf32> to vector<160x80xf32>
    %cst_41 = arith.constant dense<0.000000e+00> : vector<80x80xf32>
    %49 = tpu.matmul %46, %48, %cst_41 {dimension_numbers = #tpu.dot_dimension_numbers<[1], [0], [0], [1], [0, 0, 1, 1], [], []>} : vector<80x160xf32>, vector<160x80xf32>, vector<80x80xf32> -> vector<80x80xf32>
    %50 = vector.extract_strided_slice %45 {offsets = [80, 0], sizes = [80, 160], strides = [1, 1]} : vector<240x160xf32> to vector<80x160xf32>
    %c1_42 = arith.constant 1 : index
    %c0_43 = arith.constant 0 : index
    %c0_44 = arith.constant 0 : index
    %51 = vector.load %arg10[%c1_42, %c0_43, %c0_44] : memref<3x160x80xf32, #tpu.memory_space<vmem>>, vector<1x160x80xf32>
    %52 = vector.shape_cast %51 : vector<1x160x80xf32> to vector<160x80xf32>
    %cst_45 = arith.constant dense<0.000000e+00> : vector<80x80xf32>
    %53 = tpu.matmul %50, %52, %cst_45 {dimension_numbers = #tpu.dot_dimension_numbers<[1], [0], [0], [1], [0, 0, 1, 1], [], []>} : vector<80x160xf32>, vector<160x80xf32>, vector<80x80xf32> -> vector<80x80xf32>
    %54 = vector.extract_strided_slice %45 {offsets = [160, 0], sizes = [80, 160], strides = [1, 1]} : vector<240x160xf32> to vector<80x160xf32>
    %c2_46 = arith.constant 2 : index
    %c0_47 = arith.constant 0 : index
    %c0_48 = arith.constant 0 : index
    %55 = vector.load %arg10[%c2_46, %c0_47, %c0_48] : memref<3x160x80xf32, #tpu.memory_space<vmem>>, vector<1x160x80xf32>
    %56 = vector.shape_cast %55 : vector<1x160x80xf32> to vector<160x80xf32>
    %cst_49 = arith.constant dense<0.000000e+00> : vector<80x80xf32>
    %57 = tpu.matmul %54, %56, %cst_49 {dimension_numbers = #tpu.dot_dimension_numbers<[1], [0], [0], [1], [0, 0, 1, 1], [], []>} : vector<80x160xf32>, vector<160x80xf32>, vector<80x80xf32> -> vector<80x80xf32>
    %58 = arith.addf %49, %53 : vector<80x80xf32>
    %c0_50 = arith.constant 0 : index
    %c0_51 = arith.constant 0 : index
    %59 = vector.load %arg11[%c0_50, %c0_51] : memref<80x1xf32, #tpu.memory_space<vmem>>, vector<80x1xf32>
    %60 = vector.broadcast %59 : vector<80x1xf32> to vector<80x80xf32>
    %61 = arith.addf %57, %60 : vector<80x80xf32>
    %62 = arith.addf %58, %61 : vector<80x80xf32>
    %cst_52 = arith.constant 0.000000e+00 : f32
    %63 = vector.broadcast %cst_52 : f32 to vector<80x80xf32>
    %64 = arith.maximumf %62, %63 : vector<80x80xf32>
    %c0_53 = arith.constant 0 : index
    %c0_54 = arith.constant 0 : index
    %65 = vector.load %arg12[%c0_53, %c0_54] : memref<240x80xf32, #tpu.memory_space<vmem>>, vector<240x80xf32>
    %cst_55 = arith.constant dense<0.000000e+00> : vector<240x80xf32>
    %66 = tpu.matmul %65, %64, %cst_55 {dimension_numbers = #tpu.dot_dimension_numbers<[1], [0], [0], [1], [0, 0, 1, 1], [], []>} : vector<240x80xf32>, vector<80x80xf32>, vector<240x80xf32> -> vector<240x80xf32>
    %67 = vector.extract_strided_slice %66 {offsets = [0, 0], sizes = [80, 80], strides = [1, 1]} : vector<240x80xf32> to vector<80x80xf32>
    %c0_56 = arith.constant 0 : index
    %c0_57 = arith.constant 0 : index
    %c0_58 = arith.constant 0 : index
    %68 = vector.load %arg13[%c0_56, %c0_57, %c0_58] : memref<3x80x40xf32, #tpu.memory_space<vmem>>, vector<1x80x40xf32>
    %69 = vector.shape_cast %68 : vector<1x80x40xf32> to vector<80x40xf32>
    %cst_59 = arith.constant dense<0.000000e+00> : vector<80x40xf32>
    %70 = tpu.matmul %67, %69, %cst_59 {dimension_numbers = #tpu.dot_dimension_numbers<[1], [0], [0], [1], [0, 0, 1, 1], [], []>} : vector<80x80xf32>, vector<80x40xf32>, vector<80x40xf32> -> vector<80x40xf32>
    %71 = vector.extract_strided_slice %66 {offsets = [80, 0], sizes = [80, 80], strides = [1, 1]} : vector<240x80xf32> to vector<80x80xf32>
    %c1_60 = arith.constant 1 : index
    %c0_61 = arith.constant 0 : index
    %c0_62 = arith.constant 0 : index
    %72 = vector.load %arg13[%c1_60, %c0_61, %c0_62] : memref<3x80x40xf32, #tpu.memory_space<vmem>>, vector<1x80x40xf32>
    %73 = vector.shape_cast %72 : vector<1x80x40xf32> to vector<80x40xf32>
    %cst_63 = arith.constant dense<0.000000e+00> : vector<80x40xf32>
    %74 = tpu.matmul %71, %73, %cst_63 {dimension_numbers = #tpu.dot_dimension_numbers<[1], [0], [0], [1], [0, 0, 1, 1], [], []>} : vector<80x80xf32>, vector<80x40xf32>, vector<80x40xf32> -> vector<80x40xf32>
    %75 = vector.extract_strided_slice %66 {offsets = [160, 0], sizes = [80, 80], strides = [1, 1]} : vector<240x80xf32> to vector<80x80xf32>
    %c2_64 = arith.constant 2 : index
    %c0_65 = arith.constant 0 : index
    %c0_66 = arith.constant 0 : index
    %76 = vector.load %arg13[%c2_64, %c0_65, %c0_66] : memref<3x80x40xf32, #tpu.memory_space<vmem>>, vector<1x80x40xf32>
    %77 = vector.shape_cast %76 : vector<1x80x40xf32> to vector<80x40xf32>
    %cst_67 = arith.constant dense<0.000000e+00> : vector<80x40xf32>
    %78 = tpu.matmul %75, %77, %cst_67 {dimension_numbers = #tpu.dot_dimension_numbers<[1], [0], [0], [1], [0, 0, 1, 1], [], []>} : vector<80x80xf32>, vector<80x40xf32>, vector<80x40xf32> -> vector<80x40xf32>
    %79 = arith.addf %70, %74 : vector<80x40xf32>
    %c0_68 = arith.constant 0 : index
    %c0_69 = arith.constant 0 : index
    %80 = vector.load %arg14[%c0_68, %c0_69] : memref<80x1xf32, #tpu.memory_space<vmem>>, vector<80x1xf32>
    %81 = vector.broadcast %80 : vector<80x1xf32> to vector<80x40xf32>
    %82 = arith.addf %78, %81 : vector<80x40xf32>
    %83 = arith.addf %79, %82 : vector<80x40xf32>
    %cst_70 = arith.constant 0.000000e+00 : f32
    %84 = vector.broadcast %cst_70 : f32 to vector<80x40xf32>
    %85 = arith.maximumf %83, %84 : vector<80x40xf32>
    %86 = arith.index_cast %arg0 : i32 to index
    %c0_71 = arith.constant 0 : index
    %c0_72 = arith.constant 0 : index
    %87 = vector.load %arg2[%86, %c0_71, %c0_72] : memref<1x5x8xf32, #tpu.memory_space<vmem>>, vector<1x5x8xf32>
    %88 = vector.shape_cast %87 : vector<1x5x8xf32> to vector<5x8xf32>
    %c0_73 = arith.constant 0 : index
    %c0_74 = arith.constant 0 : index
    %89 = vector.load %arg17[%c0_73, %c0_74] : memref<120x5xf32, #tpu.memory_space<vmem>>, vector<120x5xf32>
    %cst_75 = arith.constant dense<0.000000e+00> : vector<120x8xf32>
    %90 = tpu.matmul %89, %88, %cst_75 {dimension_numbers = #tpu.dot_dimension_numbers<[1], [0], [0], [1], [0, 0, 1, 1], [], []>} : vector<120x5xf32>, vector<5x8xf32>, vector<120x8xf32> -> vector<120x8xf32>
    %c0_76 = arith.constant 0 : index
    %c0_77 = arith.constant 0 : index
    %91 = vector.load %arg18[%c0_76, %c0_77] : memref<120x1xf32, #tpu.memory_space<vmem>>, vector<120x1xf32>
    %92 = vector.broadcast %91 : vector<120x1xf32> to vector<120x8xf32>
    %93 = arith.addf %90, %92 : vector<120x8xf32>
    %c0_78 = arith.constant 0 : index
    %c0_79 = arith.constant 0 : index
    %c0_80 = arith.constant 0 : index
    %94 = vector.load %arg15[%c0_78, %c0_79, %c0_80] : memref<5x40x8xf32, #tpu.memory_space<vmem>>, vector<1x40x8xf32>
    %95 = vector.shape_cast %94 : vector<1x40x8xf32> to vector<40x8xf32>
    %cst_81 = arith.constant dense<0.000000e+00> : vector<80x8xf32>
    %96 = tpu.matmul %85, %95, %cst_81 {dimension_numbers = #tpu.dot_dimension_numbers<[1], [0], [0], [1], [0, 0, 1, 1], [], []>} : vector<80x40xf32>, vector<40x8xf32>, vector<80x8xf32> -> vector<80x8xf32>
    %c0_82 = arith.constant 0 : index
    %c0_83 = arith.constant 0 : index
    %c0_84 = arith.constant 0 : index
    %97 = vector.load %arg16[%c0_82, %c0_83, %c0_84] : memref<5x120x80xf32, #tpu.memory_space<vmem>>, vector<1x120x80xf32>
    %98 = vector.shape_cast %97 : vector<1x120x80xf32> to vector<120x80xf32>
    %cst_85 = arith.constant dense<0.000000e+00> : vector<120x8xf32>
    %99 = tpu.matmul %98, %96, %cst_85 {dimension_numbers = #tpu.dot_dimension_numbers<[1], [0], [0], [1], [0, 0, 1, 1], [], []>} : vector<120x80xf32>, vector<80x8xf32>, vector<120x8xf32> -> vector<120x8xf32>
    %c1_86 = arith.constant 1 : index
    %c0_87 = arith.constant 0 : index
    %c0_88 = arith.constant 0 : index
    %100 = vector.load %arg15[%c1_86, %c0_87, %c0_88] : memref<5x40x8xf32, #tpu.memory_space<vmem>>, vector<1x40x8xf32>
    %101 = vector.shape_cast %100 : vector<1x40x8xf32> to vector<40x8xf32>
    %cst_89 = arith.constant dense<0.000000e+00> : vector<80x8xf32>
    %102 = tpu.matmul %85, %101, %cst_89 {dimension_numbers = #tpu.dot_dimension_numbers<[1], [0], [0], [1], [0, 0, 1, 1], [], []>} : vector<80x40xf32>, vector<40x8xf32>, vector<80x8xf32> -> vector<80x8xf32>
    %c1_90 = arith.constant 1 : index
    %c0_91 = arith.constant 0 : index
    %c0_92 = arith.constant 0 : index
    %103 = vector.load %arg16[%c1_90, %c0_91, %c0_92] : memref<5x120x80xf32, #tpu.memory_space<vmem>>, vector<1x120x80xf32>
    %104 = vector.shape_cast %103 : vector<1x120x80xf32> to vector<120x80xf32>
    %cst_93 = arith.constant dense<0.000000e+00> : vector<120x8xf32>
    %105 = tpu.matmul %104, %102, %cst_93 {dimension_numbers = #tpu.dot_dimension_numbers<[1], [0], [0], [1], [0, 0, 1, 1], [], []>} : vector<120x80xf32>, vector<80x8xf32>, vector<120x8xf32> -> vector<120x8xf32>
    %c2_94 = arith.constant 2 : index
    %c0_95 = arith.constant 0 : index
    %c0_96 = arith.constant 0 : index
    %106 = vector.load %arg15[%c2_94, %c0_95, %c0_96] : memref<5x40x8xf32, #tpu.memory_space<vmem>>, vector<1x40x8xf32>
    %107 = vector.shape_cast %106 : vector<1x40x8xf32> to vector<40x8xf32>
    %cst_97 = arith.constant dense<0.000000e+00> : vector<80x8xf32>
    %108 = tpu.matmul %85, %107, %cst_97 {dimension_numbers = #tpu.dot_dimension_numbers<[1], [0], [0], [1], [0, 0, 1, 1], [], []>} : vector<80x40xf32>, vector<40x8xf32>, vector<80x8xf32> -> vector<80x8xf32>
    %c2_98 = arith.constant 2 : index
    %c0_99 = arith.constant 0 : index
    %c0_100 = arith.constant 0 : index
    %109 = vector.load %arg16[%c2_98, %c0_99, %c0_100] : memref<5x120x80xf32, #tpu.memory_space<vmem>>, vector<1x120x80xf32>
    %110 = vector.shape_cast %109 : vector<1x120x80xf32> to vector<120x80xf32>
    %cst_101 = arith.constant dense<0.000000e+00> : vector<120x8xf32>
    %111 = tpu.matmul %110, %108, %cst_101 {dimension_numbers = #tpu.dot_dimension_numbers<[1], [0], [0], [1], [0, 0, 1, 1], [], []>} : vector<120x80xf32>, vector<80x8xf32>, vector<120x8xf32> -> vector<120x8xf32>
    %c3 = arith.constant 3 : index
    %c0_102 = arith.constant 0 : index
    %c0_103 = arith.constant 0 : index
    %112 = vector.load %arg15[%c3, %c0_102, %c0_103] : memref<5x40x8xf32, #tpu.memory_space<vmem>>, vector<1x40x8xf32>
    %113 = vector.shape_cast %112 : vector<1x40x8xf32> to vector<40x8xf32>
    %cst_104 = arith.constant dense<0.000000e+00> : vector<80x8xf32>
    %114 = tpu.matmul %85, %113, %cst_104 {dimension_numbers = #tpu.dot_dimension_numbers<[1], [0], [0], [1], [0, 0, 1, 1], [], []>} : vector<80x40xf32>, vector<40x8xf32>, vector<80x8xf32> -> vector<80x8xf32>
    %c3_105 = arith.constant 3 : index
    %c0_106 = arith.constant 0 : index
    %c0_107 = arith.constant 0 : index
    %115 = vector.load %arg16[%c3_105, %c0_106, %c0_107] : memref<5x120x80xf32, #tpu.memory_space<vmem>>, vector<1x120x80xf32>
    %116 = vector.shape_cast %115 : vector<1x120x80xf32> to vector<120x80xf32>
    %cst_108 = arith.constant dense<0.000000e+00> : vector<120x8xf32>
    %117 = tpu.matmul %116, %114, %cst_108 {dimension_numbers = #tpu.dot_dimension_numbers<[1], [0], [0], [1], [0, 0, 1, 1], [], []>} : vector<120x80xf32>, vector<80x8xf32>, vector<120x8xf32> -> vector<120x8xf32>
    %c4 = arith.constant 4 : index
    %c0_109 = arith.constant 0 : index
    %c0_110 = arith.constant 0 : index
    %118 = vector.load %arg15[%c4, %c0_109, %c0_110] : memref<5x40x8xf32, #tpu.memory_space<vmem>>, vector<1x40x8xf32>
    %119 = vector.shape_cast %118 : vector<1x40x8xf32> to vector<40x8xf32>
    %cst_111 = arith.constant dense<0.000000e+00> : vector<80x8xf32>
    %120 = tpu.matmul %85, %119, %cst_111 {dimension_numbers = #tpu.dot_dimension_numbers<[1], [0], [0], [1], [0, 0, 1, 1], [], []>} : vector<80x40xf32>, vector<40x8xf32>, vector<80x8xf32> -> vector<80x8xf32>
    %c4_112 = arith.constant 4 : index
    %c0_113 = arith.constant 0 : index
    %c0_114 = arith.constant 0 : index
    %121 = vector.load %arg16[%c4_112, %c0_113, %c0_114] : memref<5x120x80xf32, #tpu.memory_space<vmem>>, vector<1x120x80xf32>
    %122 = vector.shape_cast %121 : vector<1x120x80xf32> to vector<120x80xf32>
    %cst_115 = arith.constant dense<0.000000e+00> : vector<120x8xf32>
    %123 = tpu.matmul %122, %120, %cst_115 {dimension_numbers = #tpu.dot_dimension_numbers<[1], [0], [0], [1], [0, 0, 1, 1], [], []>} : vector<120x80xf32>, vector<80x8xf32>, vector<120x8xf32> -> vector<120x8xf32>
    %124 = arith.addf %99, %105 : vector<120x8xf32>
    %125 = arith.addf %111, %117 : vector<120x8xf32>
    %126 = arith.addf %124, %125 : vector<120x8xf32>
    %127 = arith.addf %126, %123 : vector<120x8xf32>
    %128 = arith.addf %93, %127 : vector<120x8xf32>
    %cst_116 = arith.constant 0.000000e+00 : f32
    %129 = vector.broadcast %cst_116 : f32 to vector<120x8xf32>
    %130 = arith.maximumf %128, %129 : vector<120x8xf32>
    %131 = tpu.transpose %130, [1, 0] : vector<120x8xf32> -> vector<8x120xf32>
    %c0_117 = arith.constant 0 : index
    %c0_118 = arith.constant 0 : index
    %132 = vector.load %arg19[%c0_117, %c0_118] : memref<120x80xf32, #tpu.memory_space<vmem>>, vector<120x80xf32>
    %cst_119 = arith.constant dense<0.000000e+00> : vector<8x80xf32>
    %133 = tpu.matmul %131, %132, %cst_119 {dimension_numbers = #tpu.dot_dimension_numbers<[1], [0], [0], [1], [0, 0, 1, 1], [], []>} : vector<8x120xf32>, vector<120x80xf32>, vector<8x80xf32> -> vector<8x80xf32>
    %c0_120 = arith.constant 0 : index
    %c0_121 = arith.constant 0 : index
    %134 = vector.load %arg20[%c0_120, %c0_121] : memref<1x80xf32, #tpu.memory_space<vmem>>, vector<1x80xf32>
    %135 = vector.broadcast %134 : vector<1x80xf32> to vector<8x80xf32>
    %136 = arith.addf %133, %135 : vector<8x80xf32>
    %cst_122 = arith.constant 0.000000e+00 : f32
    %137 = vector.broadcast %cst_122 : f32 to vector<8x80xf32>
    %138 = arith.maximumf %136, %137 : vector<8x80xf32>
    %c0_123 = arith.constant 0 : index
    %c0_124 = arith.constant 0 : index
    %139 = vector.load %arg21[%c0_123, %c0_124] : memref<80x128xf32, #tpu.memory_space<vmem>>, vector<80x128xf32>
    %cst_125 = arith.constant dense<0.000000e+00> : vector<8x128xf32>
    %140 = tpu.matmul %138, %139, %cst_125 {dimension_numbers = #tpu.dot_dimension_numbers<[1], [0], [0], [1], [0, 0, 1, 1], [], []>} : vector<8x80xf32>, vector<80x128xf32>, vector<8x128xf32> -> vector<8x128xf32>
    %c0_126 = arith.constant 0 : index
    %c0_127 = arith.constant 0 : index
    %141 = vector.load %arg22[%c0_126, %c0_127] : memref<1x128xf32, #tpu.memory_space<vmem>>, vector<1x128xf32>
    %142 = vector.broadcast %141 : vector<1x128xf32> to vector<8x128xf32>
    %143 = arith.addf %140, %142 : vector<8x128xf32>
    %c0_128 = arith.constant 0 : index
    %c0_129 = arith.constant 0 : index
    %144 = vector.load %arg23[%c0_128, %c0_129] : memref<8x128xf32, #tpu.memory_space<vmem>>, vector<8x128xf32>
    tpu.vector_store %arg23[%c0_128, %c0_129], %143 {strides = array<i32>} : memref<8x128xf32, #tpu.memory_space<vmem>>, vector<8x128xf32>,
    return
  }
  func.func @transform_0(%arg0: i32) -> (i32, i32, i32) {
    %c0_i32 = arith.constant 0 : i32
    %c0_i32_0 = arith.constant 0 : i32
    %c0_i32_1 = arith.constant 0 : i32
    return %arg0, %c0_i32, %c0_i32_0 : i32, i32, i32
  }
  func.func @transform_1(%arg0: i32) -> (i32, i32, i32) {
    %c0_i32 = arith.constant 0 : i32
    %c0_i32_0 = arith.constant 0 : i32
    %c0_i32_1 = arith.constant 0 : i32
    %c0_i32_2 = arith.constant 0 : i32
    return %c0_i32, %c0_i32_0, %c0_i32_1 : i32, i32, i32
  }
  func.func @transform_2(%arg0: i32) -> (i32, i32) {
    %c0_i32 = arith.constant 0 : i32
    %c0_i32_0 = arith.constant 0 : i32
    %c0_i32_1 = arith.constant 0 : i32
    return %c0_i32, %c0_i32_0 : i32, i32
  }
  func.func @transform_3(%arg0: i32) -> (i32, i32, i32) {
    %c0_i32 = arith.constant 0 : i32
    %c0_i32_0 = arith.constant 0 : i32
    %c0_i32_1 = arith.constant 0 : i32
    %c0_i32_2 = arith.constant 0 : i32
    return %c0_i32, %c0_i32_0, %c0_i32_1 : i32, i32, i32
  }
  func.func @transform_4(%arg0: i32) -> (i32, i32) {
    %c0_i32 = arith.constant 0 : i32
    %c0_i32_0 = arith.constant 0 : i32
    %c0_i32_1 = arith.constant 0 : i32
    return %c0_i32, %c0_i32_0 : i32, i32
  }
  func.func @transform_5(%arg0: i32) -> (i32, i32) {
    %c0_i32 = arith.constant 0 : i32
    %c0_i32_0 = arith.constant 0 : i32
    %c0_i32_1 = arith.constant 0 : i32
    return %c0_i32, %c0_i32_0 : i32, i32
  }
  func.func @transform_6(%arg0: i32) -> (i32, i32, i32) {
    %c0_i32 = arith.constant 0 : i32
    %c0_i32_0 = arith.constant 0 : i32
    %c0_i32_1 = arith.constant 0 : i32
    %c0_i32_2 = arith.constant 0 : i32
    return %c0_i32, %c0_i32_0, %c0_i32_1 : i32, i32, i32
  }
  func.func @transform_7(%arg0: i32) -> (i32, i32) {
    %c0_i32 = arith.constant 0 : i32
    %c0_i32_0 = arith.constant 0 : i32
    %c0_i32_1 = arith.constant 0 : i32
    return %c0_i32, %c0_i32_0 : i32, i32
  }
  func.func @transform_8(%arg0: i32) -> (i32, i32) {
    %c0_i32 = arith.constant 0 : i32
    %c0_i32_0 = arith.constant 0 : i32
    %c0_i32_1 = arith.constant 0 : i32
    return %c0_i32, %c0_i32_0 : i32, i32
  }
  func.func @transform_9(%arg0: i32) -> (i32, i32, i32) {
    %c0_i32 = arith.constant 0 : i32
    %c0_i32_0 = arith.constant 0 : i32
    %c0_i32_1 = arith.constant 0 : i32
    %c0_i32_2 = arith.constant 0 : i32
    return %c0_i32, %c0_i32_0, %c0_i32_1 : i32, i32, i32
  }
  func.func @transform_10(%arg0: i32) -> (i32, i32) {
    %c0_i32 = arith.constant 0 : i32
    %c0_i32_0 = arith.constant 0 : i32
    %c0_i32_1 = arith.constant 0 : i32
    return %c0_i32, %c0_i32_0 : i32, i32
  }
  func.func @transform_11(%arg0: i32) -> (i32, i32) {
    %c0_i32 = arith.constant 0 : i32
    %c0_i32_0 = arith.constant 0 : i32
    %c0_i32_1 = arith.constant 0 : i32
    return %c0_i32, %c0_i32_0 : i32, i32
  }
  func.func @transform_12(%arg0: i32) -> (i32, i32, i32) {
    %c0_i32 = arith.constant 0 : i32
    %c0_i32_0 = arith.constant 0 : i32
    %c0_i32_1 = arith.constant 0 : i32
    %c0_i32_2 = arith.constant 0 : i32
    return %c0_i32, %c0_i32_0, %c0_i32_1 : i32, i32, i32
  }
  func.func @transform_13(%arg0: i32) -> (i32, i32) {
    %c0_i32 = arith.constant 0 : i32
    %c0_i32_0 = arith.constant 0 : i32
    %c0_i32_1 = arith.constant 0 : i32
    return %c0_i32, %c0_i32_0 : i32, i32
  }
  func.func @transform_14(%arg0: i32) -> (i32, i32, i32) {
    %c0_i32 = arith.constant 0 : i32
    %c0_i32_0 = arith.constant 0 : i32
    %c0_i32_1 = arith.constant 0 : i32
    %c0_i32_2 = arith.constant 0 : i32
    return %c0_i32, %c0_i32_0, %c0_i32_1 : i32, i32, i32
  }
  func.func @transform_15(%arg0: i32) -> (i32, i32, i32) {
    %c0_i32 = arith.constant 0 : i32
    %c0_i32_0 = arith.constant 0 : i32
    %c0_i32_1 = arith.constant 0 : i32
    %c0_i32_2 = arith.constant 0 : i32
    return %c0_i32, %c0_i32_0, %c0_i32_1 : i32, i32, i32
  }
  func.func @transform_16(%arg0: i32) -> (i32, i32) {
    %c0_i32 = arith.constant 0 : i32
    %c0_i32_0 = arith.constant 0 : i32
    %c0_i32_1 = arith.constant 0 : i32
    return %c0_i32, %c0_i32_0 : i32, i32
  }
  func.func @transform_17(%arg0: i32) -> (i32, i32) {
    %c0_i32 = arith.constant 0 : i32
    %c0_i32_0 = arith.constant 0 : i32
    %c0_i32_1 = arith.constant 0 : i32
    return %c0_i32, %c0_i32_0 : i32, i32
  }
  func.func @transform_18(%arg0: i32) -> (i32, i32) {
    %c0_i32 = arith.constant 0 : i32
    %c0_i32_0 = arith.constant 0 : i32
    %c0_i32_1 = arith.constant 0 : i32
    return %c0_i32, %c0_i32_0 : i32, i32
  }
  func.func @transform_19(%arg0: i32) -> (i32, i32) {
    %c0_i32 = arith.constant 0 : i32
    %c0_i32_0 = arith.constant 0 : i32
    %c0_i32_1 = arith.constant 0 : i32
    return %c0_i32, %c0_i32_0 : i32, i32
  }
  func.func @transform_20(%arg0: i32) -> (i32, i32) {
    %c0_i32 = arith.constant 0 : i32
    %c0_i32_0 = arith.constant 0 : i32
    %c0_i32_1 = arith.constant 0 : i32
    return %c0_i32, %c0_i32_0 : i32, i32
  }
  func.func @transform_21(%arg0: i32) -> (i32, i32) {
    %c0_i32 = arith.constant 0 : i32
    %c0_i32_0 = arith.constant 0 : i32
    %c0_i32_1 = arith.constant 0 : i32
    return %c0_i32, %c0_i32_0 : i32, i32
  }
  func.func @transform_22(%arg0: i32) -> (i32, i32) {
    %c0_i32 = arith.constant 0 : i32
    %c0_i32_0 = arith.constant 0 : i32
    return %arg0, %c0_i32 : i32, i32
  }
}

</mosaic_0001>

<bundles_post_ra>
// kernel: policy_forward.1
= control target key start
LH: loop header
LB: loop body
LE: loop exit
PB: predicated region body
PF: predicated region fallthrough
CT: control target
= control target key end

     0   :  { %vm151_vm0 = vcmask 654336   ;;  %vm4336_vm1 = vcmask 523264   ;;  %vm5829_vm2 = vcmask 261120   ;;  %vm7027_vm3 = vcmask 1044480   ;;  %s18150_s0 = inlined_call_operand.vmem [shape: f32[1,80,640], index: 0, kind: input, shape index: {}]   ;;  %s18151_s2 = inlined_call_operand.vmem [shape: f32[240,80], index: 2, kind: input, shape index: {}]   ;;  %s18152_s3 = inlined_call_operand.vmem [shape: f32[3,640,320], index: 3, kind: input, shape index: {}]   ;;  %s18153_s4 = inlined_call_operand.vmem [shape: f32[80,1], index: 4, kind: input, shape index: {}]   ;;  %s18154_s7 = inlined_call_operand.vmem [shape: f32[80,1], index: 7, kind: input, shape index: {}]   ;;  %s18155_s10 = inlined_call_operand.vmem [shape: f32[80,1], index: 10, kind: input, shape index: {}]   ;;  %s18156_s13 = inlined_call_operand.vmem [shape: f32[80,1], index: 13, kind: input, shape index: {}]   ;;  %s18157_s17 = inlined_call_operand.vmem [shape: f32[120,1], index: 17, kind: input, shape index: {}]   ;;  %s18158_s5 = inlined_call_operand.vmem [shape: f32[240,80], index: 5, kind: input, shape index: {}]   ;;  %s18159_s6 = inlined_call_operand.vmem [shape: f32[3,320,160], index: 6, kind: input, shape index: {}]   ;;  %s18160_s8 = inlined_call_operand.vmem [shape: f32[240,80], index: 8, kind: input, shape index: {}]   ;;  %s18161_s9 = inlined_call_operand.vmem [shape: f32[3,160,80], index: 9, kind: input, shape index: {}]   ;;  %s18162_s11 = inlined_call_operand.vmem [shape: f32[240,80], index: 11, kind: input, shape index: {}]   ;;  %s18163_s12 = inlined_call_operand.vmem [shape: f32[3,80,40], index: 12, kind: input, shape index: {}]   ;;  %s18164_s1 = inlined_call_operand.vmem [shape: f32[1,5,8], index: 1, kind: input, shape index: {}]   ;;  %s18165_s16 = inlined_call_operand.vmem [shape: f32[120,5], index: 16, kind: input, shape index: {}]   ;;  %s18166_s14 = inlined_call_operand.vmem [shape: f32[5,40,8], index: 14, kind: input, shape index: {}]   ;;  %s18167_s15 = inlined_call_operand.vmem [shape: f32[5,120,80], index: 15, kind: input, shape index: {}]   ;;  %s18168_s19 = inlined_call_operand.vmem [shape: f32[1,80], index: 19, kind: input, shape index: {}]   ;;  %s18169_s18 = inlined_call_operand.vmem [shape: f32[120,80], index: 18, kind: input, shape index: {}]   ;;  %s18170_s20 = inlined_call_operand.vmem [shape: f32[80,128], index: 20, kind: input, shape index: {}]   ;;  %s18171_s21 = inlined_call_operand.vmem [shape: f32[1,128], index: 21, kind: input, shape index: {}]   ;;  %s18172_s22 = inlined_call_operand.vmem [shape: f32[8,128], index: 22, kind: output, shape index: {}]  }
   0x1   :  { %18359 = sst [smem:[#allocation116_spill]] %s18150_s0  ;;  %vm6981_vm4 = vcmask 39936   ;;  %vm7098_vm5 = vcmask 326656   ;;  %vm8113_vm6 = vcmask 982016  }
   0x2   :  { %18360 = sst [smem:[#allocation117_spill]] %s18151_s2 }
   0x3   :  { %18361 = sst [smem:[#allocation118_spill]] %s18152_s3 }
   0x4   :  { %18362 = sst [smem:[#allocation119_spill]] %s18153_s4 }
   0x5   :  { %18363 = sst [smem:[#allocation120_spill]] %s18154_s7 }
   0x6   :  { %18364 = sst [smem:[#allocation121_spill]] %s18155_s10 }
   0x7   :  { %18365 = sst [smem:[#allocation122_spill]] %s18156_s13 }
   0x8   :  { %s18366_s29 = sld [smem:[#allocation116_spill]] }
   0x9   :  { %s18367_s3 = sld [smem:[#allocation117_spill]] }
   0xa   :  { %s18393_s4 = sld [smem:[#allocation118_spill]] }
   0xb   :  { %s18590_s25 = sld [smem:[#allocation119_spill]] }
   0xc   :  { %s18665_s13 = sld [smem:[#allocation120_spill]] }
   0xd   :  { %s18678_s24 = sld [smem:[#allocation121_spill]] }
   0xe   :  { %v116_v0 = vld [vmem:[%s18366_s29 + $0x168] sm:$0xff]  ;;  %v117_v1 = vld [vmem:[%s18366_s29 + $0x170] sm:$0xff]  ;;  %v111_v2 = vld [vmem:[%s18366_s29 + $0x140] sm:$0xff]  ;;  %s18688_s2 = sld [smem:[#allocation122_spill]] }
   0xf   :  { %248 = vmatpush.msra.mxu0 %v116_v0  ;;  %9553 = vmatpush.msra.mxu2 %v116_v0  ;;  %v112_v3 = vld [vmem:[%s18366_s29 + $0x148] sm:$0xff]  ;;  %v106_v4 = vld [vmem:[%s18366_s29 + $0x118] sm:$0xff]  ;;  %v107_v5 = vld [vmem:[%s18366_s29 + $0x120] sm:$0xff] }
  0x10   :  { %355 = vmatpush.msra.mxu1 %v117_v1  ;;  %v101_v6 = vld [vmem:[%s18366_s29 + $0xf0] sm:$0xff]  ;;  %v102_v7 = vld [vmem:[%s18366_s29 + $0xf8] sm:$0xff]  ;;  %v96_v8 = vld [vmem:[%s18366_s29 + $0xc8] sm:$0xff] }
  0x11   :  { %249 = vmatpush.msra.mxu0 %v111_v2  ;;  %9554 = vmatpush.msra.mxu2 %v111_v2  ;;  %v97_v9 = vld [vmem:[%s18366_s29 + $0xd0] sm:$0xff]  ;;  %v119_v10 = vld [vmem:[%s18366_s29 + $0x180] sm:$0xff]  ;;  %v114_v11 = vld [vmem:[%s18366_s29 + $0x158] sm:$0xff] }
  0x12   :  { %356 = vmatpush.msra.mxu1 %v112_v3  ;;  %v91_v12 = vld [vmem:[%s18366_s29 + $0xa0] sm:$0xff]  ;;  %569 = vmatpush.msra.mxu3 %v119_v10  ;;  %v92_v13 = vld [vmem:[%s18366_s29 + $0xa8] sm:$0xff]  ;;  %v109_v14 = vld [vmem:[%s18366_s29 + $0x130] sm:$0xff] }
  0x13   :  { %250 = vmatpush.msra.mxu0 %v106_v4  ;;  %9555 = vmatpush.msra.mxu2 %v106_v4  ;;  %v86_v15 = vld [vmem:[%s18366_s29 + $0x78] sm:$0xff]  ;;  %v87_v16 = vld [vmem:[%s18366_s29 + $0x80] sm:$0xff]  ;;  %v104_v17 = vld [vmem:[%s18366_s29 + $0x108] sm:$0xff] }
  0x14   :  { %357 = vmatpush.msra.mxu1 %v107_v5  ;;  %570 = vmatpush.msra.mxu3 %v114_v11  ;;  %v81_v18 = vld [vmem:[%s18366_s29 + $0x50] sm:$0xff]  ;;  %v82_v19 = vld [vmem:[%s18366_s29 + $0x58] sm:$0xff]  ;;  %v99_v20 = vld [vmem:[%s18366_s29 + $0xe0] sm:$0xff] }
  0x15   :  { %251 = vmatpush.msra.mxu0 %v101_v6  ;;  %9556 = vmatpush.msra.mxu2 %v101_v6  ;;  %v76_v21 = vld [vmem:[%s18366_s29 + $0x28] sm:$0xff]  ;;  %v77_v22 = vld [vmem:[%s18366_s29 + $0x30] sm:$0xff]  ;;  %v94_v23 = vld [vmem:[%s18366_s29 + $0xb8] sm:$0xff] }
  0x16   :  { %358 = vmatpush.msra.mxu1 %v102_v7  ;;  %571 = vmatpush.msra.mxu3 %v109_v14  ;;  %v71_v24 = vld [vmem:[%s18366_s29] sm:$0xff]  ;;  %v72_v25 = vld [vmem:[%s18366_s29 + $0x8] sm:$0xff]  ;;  %v89_v28 = vld [vmem:[%s18366_s29 + $0x90] sm:$0xff] }
  0x17   :  { %252 = vmatpush.msra.mxu0 %v96_v8  ;;  %9557 = vmatpush.msra.mxu2 %v96_v8  ;;  %v9793_v26 = vld [vmem:[%s18367_s3] sm:$0xff]  ;;  %v118_v29 = vld [vmem:[%s18366_s29 + $0x178] sm:$0xff]  ;;  %v84_v30 = vld [vmem:[%s18366_s29 + $0x68] sm:$0xff] }
  0x18   :  { %359 = vmatpush.msra.mxu1 %v97_v9  ;;  %572 = vmatpush.msra.mxu3 %v104_v17  ;;  %v9798_v27 = vld [vmem:[%s18367_s3 + $0xc0] sm:$0xff]  ;;  %v113_v31 = vld [vmem:[%s18366_s29 + $0x150] sm:$0xff]  ;;  %v108_v33 = vld [vmem:[%s18366_s29 + $0x128] sm:$0xff] }
  0x19   :  { %253 = vmatpush.msra.mxu0 %v91_v12  ;;  %9558 = vmatpush.msra.mxu2 %v91_v12  ;;  %v79_v32 = vld [vmem:[%s18366_s29 + $0x40] sm:$0xff]  ;;  %v9827_v34 = vld [vmem:[%s18367_s3 + $0x8] sm:$0xff]  ;;  %v74_v35 = vld [vmem:[%s18366_s29 + $0x18] sm:$0xff] }
  0x1a   :  { %360 = vmatpush.msra.mxu1 %v92_v13  ;;  %573 = vmatpush.msra.mxu3 %v99_v20  ;;  %v9835_v36 = vld [vmem:[%s18367_s3 + $0xc8] sm:$0xff]  ;;  %v103_v37 = vld [vmem:[%s18366_s29 + $0x100] sm:$0xff]  ;;  %v98_v38 = vld [vmem:[%s18366_s29 + $0xd8] sm:$0xff] }
  0x1b   :  { %254 = vmatpush.msra.mxu0 %v86_v15  ;;  %9559 = vmatpush.msra.mxu2 %v86_v15  ;;  %v93_v39 = vld [vmem:[%s18366_s29 + $0xb0] sm:$0xff]  ;;  %v88_v41 = vld [vmem:[%s18366_s29 + $0x88] sm:$0xff]  ;;  %v83_v43 = vld [vmem:[%s18366_s29 + $0x60] sm:$0xff] }
  0x1c   :  { %361 = vmatpush.msra.mxu1 %v87_v16  ;;  %574 = vmatpush.msra.mxu3 %v94_v23  ;;  %v9857_v40 = vld [vmem:[%s18367_s3 + $0x10] sm:$0xff]  ;;  %v78_v44 = vld [vmem:[%s18366_s29 + $0x38] sm:$0xff]  ;;  %v9905_v48 = vld [vmem:[%s18367_s3 + $0x20] sm:$0xff] }
  0x1d   :  { %255 = vmatpush.msra.mxu0 %v81_v18  ;;  %9560 = vmatpush.msra.mxu2 %v81_v18  ;;  %v9865_v42 = vld [vmem:[%s18367_s3 + $0xd0] sm:$0xff]  ;;  %v9887_v46 = vld [vmem:[%s18367_s3 + $0x18] sm:$0xff]  ;;  %v9910_v49 = vld [vmem:[%s18367_s3 + $0xe0] sm:$0xff] }
  0x1e   :  { %362 = vmatpush.msra.mxu1 %v82_v19  ;;  %575 = vmatpush.msra.mxu3 %v89_v28  ;;  %v73_v45 = vld [vmem:[%s18366_s29 + $0x10] sm:$0xff]  ;;  %v9892_v47 = vld [vmem:[%s18367_s3 + $0xd8] sm:$0xff]  ;;  %v9923_v50 = vld [vmem:[%s18367_s3 + $0x28] sm:$0xff] }
  0x1f   :  { %256 = vmatpush.msra.mxu0 %v76_v21  ;;  %9561 = vmatpush.msra.mxu2 %v76_v21  ;;  %v9928_v51 = vld [vmem:[%s18367_s3 + $0xe8] sm:$0xff]  ;;  %v9941_v52 = vld [vmem:[%s18367_s3 + $0x30] sm:$0xff]  ;;  %v9954_v53 = vld [vmem:[%s18367_s3 + $0x38] sm:$0xff] }
  0x20   :  { %363 = vmatpush.msra.mxu1 %v77_v22  ;;  %576 = vmatpush.msra.mxu3 %v84_v30  ;;  %v9967_v54 = vld [vmem:[%s18367_s3 + $0x40] sm:$0xff]  ;;  %v9980_v55 = vld [vmem:[%s18367_s3 + $0x48] sm:$0xff]  ;;  %v9993_v56 = vld [vmem:[%s18367_s3 + $0x50] sm:$0xff] }
  0x21   :  { %257 = vmatpush.msra.mxu0 %v71_v24  ;;  %9562 = vmatpush.msra.mxu2 %v71_v24  ;;  %v10006_v57 = vld [vmem:[%s18367_s3 + $0x58] sm:$0xff]  ;;  %v10019_v58 = vld [vmem:[%s18367_s3 + $0x60] sm:$0xff]  ;;  %v10032_v59 = vld [vmem:[%s18367_s3 + $0x68] sm:$0xff] }
  0x22   :  { %364 = vmatpush.msra.mxu1 %v72_v25  ;;  %8180 = vmatmul.msk.f32.vlgmr.msra.gmra.mxu0 %vm151_vm0, %v9793_v26  ;;  %v10045_v60 = vld [vmem:[%s18367_s3 + $0x70] sm:$0xff]  ;;  %v10058_v61 = vld [vmem:[%s18367_s3 + $0x78] sm:$0xff]  ;;  %v10073_v63 = vld [vmem:[%s18367_s3 + $0x80] sm:$0xff] }
  0x23   :  { %8204 = vmatmul.msk.f32.vlgmr.msra.gmra.mxu2 %vm151_vm0, %v9798_v27  ;;  %8210 = vmatmul.msk.f32.vlgmr.msra.gmra.mxu1 %vm151_vm0, %v9793_v26  ;;  %v10092_v3 = vld [vmem:[%s18367_s3 + $0x88] sm:$0xff]  ;;  %v10111_v7 = vld [vmem:[%s18367_s3 + $0x90] sm:$0xff]  ;;  %v115_v11 = vld [vmem:[%s18366_s29 + $0x160] sm:$0xff] }
  0x24   :  { %462 = vmatpush.msrb.mxu2 %v118_v29  ;;  %577 = vmatpush.msra.mxu3 %v79_v32  ;;  %v120_v9 = vld [vmem:[%s18366_s29 + $0x188] sm:$0xff]  ;;  %v110_v12 = vld [vmem:[%s18366_s29 + $0x138] sm:$0xff]  ;;  %v105_v13 = vld [vmem:[%s18366_s29 + $0x110] sm:$0xff] }
  0x25   :  { %676 = vmatpush.msrb.mxu0 %v120_v9  ;;  %v10144_v16 = vld [vmem:[%s18367_s3 + $0x98] sm:$0xff]  ;;  %v100_v19 = vld [vmem:[%s18366_s29 + $0xe8] sm:$0xff]  ;;  %v95_v20 = vld [vmem:[%s18366_s29 + $0xc0] sm:$0xff] }
  0x26   :  { %463 = vmatpush.msrb.mxu2 %v113_v31  ;;  %578 = vmatpush.msra.mxu3 %v74_v35  ;;  %v90_v21 = vld [vmem:[%s18366_s29 + $0x98] sm:$0xff]  ;;  %v10174_v24 = vld [vmem:[%s18367_s3 + $0xa0] sm:$0xff]  ;;  %v85_v29 = vld [vmem:[%s18366_s29 + $0x70] sm:$0xff] }
  0x27   :  { %8270 = vmatmul.msk.f32.vlgmr.msra.gmra.mxu3 %vm151_vm0, %v9793_v26  ;;  %677 = vmatpush.msrb.mxu0 %v115_v11  ;;  %v80_v30 = vld [vmem:[%s18366_s29 + $0x48] sm:$0xff]  ;;  %v75_v31 = vld [vmem:[%s18366_s29 + $0x20] sm:$0xff]  ;;  %v8372_v11 = vld [vmem:[%s18393_s4 + $0x8d0] sm:$0xff] }
  0x28   :  { %464 = vmatpush.msrb.mxu2 %v108_v33  ;;  %v10204_v35 = vld [vmem:[%s18367_s3 + $0xa8] sm:$0xff] }
  0x29   :  { %678 = vmatpush.msrb.mxu0 %v110_v12  ;;  %v8375_v9 = vld [vmem:[%s18393_s4 + $0x8e8] sm:$0xff] }
  0x2a   :  { %8181 = vmatmul.msk.f32.gmra.mxu0 %vm151_vm0, %v9827_v34  ;;  %465 = vmatpush.msrb.mxu2 %v103_v37 }
  0x2b   :  { %8205 = vmatmul.msk.f32.gmra.mxu2 %vm151_vm0, %v9835_v36  ;;  %8211 = vmatmul.msk.f32.gmra.mxu1 %vm151_vm0, %v9827_v34 }
  0x2c   :  { %466 = vmatpush.msrb.mxu2 %v98_v38  ;;  %679 = vmatpush.msrb.mxu0 %v105_v13 }
  0x2d   :  { %1258 = vmatpush.msrb.mxu1 %v8375_v9  ;;  %v8360_v9 = vld [vmem:[%s18393_s4 + $0x870] sm:$0xff] }
  0x2e   :  { %467 = vmatpush.msrb.mxu2 %v93_v39  ;;  %680 = vmatpush.msrb.mxu0 %v100_v19  ;;  %v10252_v19 = vld [vmem:[%s18367_s3 + $0xb8] sm:$0xff] }
  0x2f   :  { %8271 = vmatmul.msk.f32.gmra.mxu3 %vm151_vm0, %v9827_v34  ;;  %1259 = vmatpush.msrb.mxu1 %v8372_v11 }
  0x30   :  { %468 = vmatpush.msrb.mxu2 %v88_v41  ;;  %681 = vmatpush.msrb.mxu0 %v95_v20 }
  0x32   :  { %8182 = vmatmul.msk.f32.gmra.mxu0 %vm151_vm0, %v9857_v40  ;;  %469 = vmatpush.msrb.mxu2 %v83_v43  ;;  %v10225_v43 = vld [vmem:[%s18367_s3 + $0xb0] sm:$0xff] }
  0x33   :  { %8206 = vmatmul.msk.f32.gmra.mxu2 %vm151_vm0, %v9865_v42  ;;  %8212 = vmatmul.msk.f32.gmra.mxu1 %vm151_vm0, %v9857_v40 }
  0x34   :  { %470 = vmatpush.msrb.mxu2 %v78_v44  ;;  %682 = vmatpush.msrb.mxu0 %v90_v21  ;;  %v8369_v21 = vld [vmem:[%s18393_s4 + $0x8b8] sm:$0xff] }
  0x35   :  { %1260 = vmatpush.msrb.mxu1 %v8369_v21 }
  0x36   :  { %471 = vmatpush.msrb.mxu2 %v73_v45  ;;  %683 = vmatpush.msrb.mxu0 %v85_v29 }
  0x37   :  { %8272 = vmatmul.msk.f32.gmra.mxu3 %vm151_vm0, %v9857_v40 }
  0x38   :  { %684 = vmatpush.msrb.mxu0 %v80_v30  ;;  %v8366_v30 = vld [vmem:[%s18393_s4 + $0x8a0] sm:$0xff] }
  0x39   :  { %1261 = vmatpush.msrb.mxu1 %v8366_v30 }
  0x3a   :  { %8183 = vmatmul.msk.f32.gmra.mxu0 %vm151_vm0, %v9887_v46 }
  0x3b   :  { %8207 = vmatmul.msk.f32.gmra.mxu2 %vm151_vm0, %v9892_v47  ;;  %8213 = vmatmul.msk.f32.gmra.mxu1 %vm151_vm0, %v9887_v46 }
  0x3c   :  { %685 = vmatpush.msrb.mxu0 %v75_v31  ;;  %v8363_v31 = vld [vmem:[%s18393_s4 + $0x888] sm:$0xff] }
  0x3d   :  { %1262 = vmatpush.msrb.mxu1 %v8363_v31  ;;  %v8354_v31 = vld [vmem:[%s18393_s4 + $0x840] sm:$0xff] }
  0x3f   :  { %8273 = vmatmul.msk.f32.gmra.mxu3 %vm151_vm0, %v9887_v46  ;;  %1263 = vmatpush.msrb.mxu1 %v8360_v9  ;;  %v8351_v9 = vld [vmem:[%s18393_s4 + $0x828] sm:$0xff] }
  0x42   :  { %8184 = vmatmul.msk.f32.gmra.mxu0 %vm151_vm0, %v9905_v48 }
  0x43   :  { %8208 = vmatmul.msk.f32.gmra.mxu2 %vm151_vm0, %v9910_v49  ;;  %8214 = vmatmul.msk.f32.gmra.mxu1 %vm151_vm0, %v9905_v48 }
  0x47   :  { %8274 = vmatmul.msk.f32.gmra.mxu3 %vm151_vm0, %v9905_v48 }
  0x4a   :  { %8185 = vmatmul.msk.f32.gmra.mxu0 %vm151_vm0, %v9923_v50 }
  0x4b   :  { %8209 = vmatmul.msk.f32.gmra.mxu2 %vm151_vm0, %v9928_v51  ;;  %8215 = vmatmul.msk.f32.gmra.mxu1 %vm151_vm0, %v9923_v50 }
  0x4f   :  { %8275 = vmatmul.msk.f32.gmra.mxu3 %vm151_vm0, %v9923_v50 }
  0x52   :  { %8186 = vmatmul.msk.f32.gmra.mxu0 %vm151_vm0, %v9941_v52 }
  0x53   :  { %8216 = vmatmul.msk.f32.gmra.mxu1 %vm151_vm0, %v9941_v52  ;;  %8240 = vmatmul.msk.f32.vlgmr.msrb.gmra.mxu2 %vm151_vm0, %v9793_v26 }
  0x57   :  { %8276 = vmatmul.msk.f32.gmra.mxu3 %vm151_vm0, %v9941_v52 }
  0x5a   :  { %8187 = vmatmul.msk.f32.gmra.mxu0 %vm151_vm0, %v9954_v53 }
  0x5b   :  { %8217 = vmatmul.msk.f32.gmra.mxu1 %vm151_vm0, %v9954_v53  ;;  %8241 = vmatmul.msk.f32.gmra.mxu2 %vm151_vm0, %v9827_v34 }
  0x5f   :  { %8277 = vmatmul.msk.f32.gmra.mxu3 %vm151_vm0, %v9954_v53 }
  0x62   :  { %8188 = vmatmul.msk.f32.gmra.mxu0 %vm151_vm0, %v9967_v54 }
  0x63   :  { %8218 = vmatmul.msk.f32.gmra.mxu1 %vm151_vm0, %v9967_v54  ;;  %8242 = vmatmul.msk.f32.gmra.mxu2 %vm151_vm0, %v9857_v40 }
  0x67   :  { %8278 = vmatmul.msk.f32.gmra.mxu3 %vm151_vm0, %v9967_v54 }
  0x6a   :  { %8189 = vmatmul.msk.f32.gmra.mxu0 %vm151_vm0, %v9980_v55 }
  0x6b   :  { %8219 = vmatmul.msk.f32.gmra.mxu1 %vm151_vm0, %v9980_v55  ;;  %8243 = vmatmul.msk.f32.gmra.mxu2 %vm151_vm0, %v9887_v46 }
  0x6f   :  { %8279 = vmatmul.msk.f32.gmra.mxu3 %vm151_vm0, %v9980_v55 }
  0x72   :  { %8190 = vmatmul.msk.f32.gmra.mxu0 %vm151_vm0, %v9993_v56 }
  0x73   :  { %8220 = vmatmul.msk.f32.gmra.mxu1 %vm151_vm0, %v9993_v56  ;;  %8244 = vmatmul.msk.f32.gmra.mxu2 %vm151_vm0, %v9905_v48 }
  0x77   :  { %8280 = vmatmul.msk.f32.gmra.mxu3 %vm151_vm0, %v9993_v56 }
  0x7a   :  { %8191 = vmatmul.msk.f32.gmra.mxu0 %vm151_vm0, %v10006_v57 }
  0x7b   :  { %8221 = vmatmul.msk.f32.gmra.mxu1 %vm151_vm0, %v10006_v57  ;;  %8245 = vmatmul.msk.f32.gmra.mxu2 %vm151_vm0, %v9923_v50 }
  0x7f   :  { %8281 = vmatmul.msk.f32.gmra.mxu3 %vm151_vm0, %v10006_v57 }
  0x82   :  { %8192 = vmatmul.msk.f32.gmra.mxu0 %vm151_vm0, %v10019_v58 }
  0x83   :  { %8222 = vmatmul.msk.f32.gmra.mxu1 %vm151_vm0, %v10019_v58  ;;  %8246 = vmatmul.msk.f32.gmra.mxu2 %vm151_vm0, %v9941_v52 }
  0x87   :  { %8282 = vmatmul.msk.f32.gmra.mxu3 %vm151_vm0, %v10019_v58 }
  0x8a   :  { %8193 = vmatmul.msk.f32.gmra.mxu0 %vm151_vm0, %v10032_v59 }
  0x8b   :  { %8223 = vmatmul.msk.f32.gmra.mxu1 %vm151_vm0, %v10032_v59  ;;  %8247 = vmatmul.msk.f32.gmra.mxu2 %vm151_vm0, %v9954_v53 }
  0x8f   :  { %8283 = vmatmul.msk.f32.gmra.mxu3 %vm151_vm0, %v10032_v59 }
  0x92   :  { %8194 = vmatmul.msk.f32.gmra.mxu0 %vm151_vm0, %v10045_v60 }
  0x93   :  { %8224 = vmatmul.msk.f32.gmra.mxu1 %vm151_vm0, %v10045_v60  ;;  %8248 = vmatmul.msk.f32.gmra.mxu2 %vm151_vm0, %v9967_v54 }
  0x97   :  { %8284 = vmatmul.msk.f32.gmra.mxu3 %vm151_vm0, %v10045_v60 }
  0x9a   :  { %8195 = vmatmul.msk.f32.gmra.mxu0 %vm151_vm0, %v10058_v61 }
  0x9b   :  { %8225 = vmatmul.msk.f32.gmra.mxu1 %vm151_vm0, %v10058_v61  ;;  %8249 = vmatmul.msk.f32.gmra.mxu2 %vm151_vm0, %v9980_v55 }
  0x9f   :  { %v10068_v62 = vpop.f32.mrf.mxu0  ;;  %8285 = vmatmul.msk.f32.gmra.mxu3 %vm151_vm0, %v10058_v61 }
  0xa0   :  { %18368 = vst [vmem:[#allocation2_spill] sm:$0xff] %v10068_v62  ;;  %v10075_v0 = vpop.f32.mrf.mxu1 }
  0xa1   :  { %18369 = vst [vmem:[#allocation3_spill] sm:$0xff] %v10075_v0  ;;  %v8473_v0 = vld [vmem:[%s18393_s4 + $0xbf8] sm:$0xff] }
  0xa2   :  { %8196 = vmatmul.msk.f32.gmra.mxu0 %vm151_vm0, %v10073_v63 }
  0xa3   :  { %8226 = vmatmul.msk.f32.gmra.mxu1 %vm151_vm0, %v10073_v63  ;;  %8250 = vmatmul.msk.f32.gmra.mxu2 %vm151_vm0, %v9993_v56 }
  0xa6   :  { %v10085_v1 = vpop.f32.mrf.mxu2 }
  0xa7   :  { %18370 = vst [vmem:[#allocation4_spill] sm:$0xff] %v10085_v1  ;;  %v10087_v2 = vpop.f32.mrf.mxu0  ;;  %8286 = vmatmul.msk.f32.gmra.mxu3 %vm151_vm0, %v10073_v63  ;;  %v8468_v1 = vld [vmem:[%s18393_s4 + $0xbd0] sm:$0xff] }
  0xa8   :  { %18371 = vst [vmem:[#allocation5_spill] sm:$0xff] %v10087_v2  ;;  %v10094_v4 = vpop.f32.mrf.mxu1 }
  0xa9   :  { %18372 = vst [vmem:[#allocation6_spill] sm:$0xff] %v10094_v4  ;;  %v9595_v4 = vld [vmem:[%s18367_s3 + $0xe8] sm:$0xff] }
  0xaa   :  { %8197 = vmatmul.msk.f32.gmra.mxu0 %vm151_vm0, %v10092_v3  ;;  %v10113_v8 = vpop.f32.mrf.mxu3 }
  0xab   :  { %8227 = vmatmul.msk.f32.gmra.mxu1 %vm151_vm0, %v10092_v3  ;;  %8251 = vmatmul.msk.f32.gmra.mxu2 %vm151_vm0, %v10006_v57  ;;  %18375 = vst [vmem:[#allocation9_spill] sm:$0xff] %v10113_v8 }
  0xae   :  { %v10104_v5 = vpop.f32.mrf.mxu2 }
  0xaf   :  { %18373 = vst [vmem:[#allocation7_spill] sm:$0xff] %v10104_v5  ;;  %v10106_v6 = vpop.f32.mrf.mxu0  ;;  %8287 = vmatmul.msk.f32.gmra.mxu3 %vm151_vm0, %v10092_v3  ;;  %v8471_v5 = vld [vmem:[%s18393_s4 + $0xbe8] sm:$0xff] }
  0xb0   :  { %18374 = vst [vmem:[#allocation8_spill] sm:$0xff] %v10106_v6  ;;  %v10118_v10 = vpop.f32.mrf.mxu1  ;;  %1352 = vmatpush.msrb.mxu3 %v8471_v5  ;;  %v8339_v5 = vld [vmem:[%s18393_s4 + $0x7c8] sm:$0xff]  ;;  %v8402_v6 = vld [vmem:[%s18393_s4 + $0x9c0] sm:$0xff] }
  0xb1   :  { %18376 = vst [vmem:[#allocation10_spill] sm:$0xff] %v10118_v10 }
  0xb2   :  { %8198 = vmatmul.msk.f32.gmra.mxu0 %vm151_vm0, %v10111_v7  ;;  %v10146_v17 = vpop.f32.mrf.mxu3  ;;  %1353 = vmatpush.msrb.mxu3 %v8468_v1  ;;  %v8333_v1 = vld [vmem:[%s18393_s4 + $0x798] sm:$0xff] }
  0xb3   :  { %8228 = vmatmul.msk.f32.gmra.mxu1 %vm151_vm0, %v10111_v7  ;;  %8252 = vmatmul.msk.f32.gmra.mxu2 %vm151_vm0, %v10019_v58  ;;  %18379 = vst [vmem:[#allocation13_spill] sm:$0xff] %v10146_v17 }
  0xb6   :  { %v10137_v14 = vpop.f32.mrf.mxu2 }
  0xb7   :  { %18377 = vst [vmem:[#allocation11_spill] sm:$0xff] %v10137_v14  ;;  %v10139_v15 = vpop.f32.mrf.mxu0  ;;  %8288 = vmatmul.msk.f32.gmra.mxu3 %vm151_vm0, %v10111_v7  ;;  %v8345_v14 = vld [vmem:[%s18393_s4 + $0x7f8] sm:$0xff] }
  0xb8   :  { %18378 = vst [vmem:[#allocation12_spill] sm:$0xff] %v10139_v15  ;;  %v10148_v18 = vpop.f32.mrf.mxu1 }
  0xb9   :  { %18380 = vst [vmem:[#allocation14_spill] sm:$0xff] %v10148_v18  ;;  %v8466_v18 = vld [vmem:[%s18393_s4 + $0xbc0] sm:$0xff] }
  0xba   :  { %8199 = vmatmul.msk.f32.gmra.mxu0 %vm151_vm0, %v10144_v16  ;;  %v10176_v25 = vpop.f32.mrf.mxu3 }
  0xbb   :  { %8229 = vmatmul.msk.f32.gmra.mxu1 %vm151_vm0, %v10144_v16  ;;  %8253 = vmatmul.msk.f32.gmra.mxu2 %vm151_vm0, %v10032_v59  ;;  %18383 = vst [vmem:[#allocation17_spill] sm:$0xff] %v10176_v25 }
  0xbe   :  { %v10167_v22 = vpop.f32.mrf.mxu2 }
  0xbf   :  { %18381 = vst [vmem:[#allocation15_spill] sm:$0xff] %v10167_v22  ;;  %v10169_v23 = vpop.f32.mrf.mxu0  ;;  %8289 = vmatmul.msk.f32.gmra.mxu3 %vm151_vm0, %v10144_v16 }
  0xc0   :  { %18382 = vst [vmem:[#allocation16_spill] sm:$0xff] %v10169_v23  ;;  %v10178_v28 = vpop.f32.mrf.mxu1 }
  0xc1   :  { %18384 = vst [vmem:[#allocation18_spill] sm:$0xff] %v10178_v28 }
  0xc2   :  { %8200 = vmatmul.msk.f32.gmra.mxu0 %vm151_vm0, %v10174_v24  ;;  %v10206_v37 = vpop.f32.mrf.mxu3 }
  0xc3   :  { %8230 = vmatmul.msk.f32.gmra.mxu1 %vm151_vm0, %v10174_v24  ;;  %8254 = vmatmul.msk.f32.gmra.mxu2 %vm151_vm0, %v10045_v60  ;;  %18387 = vst [vmem:[#allocation21_spill] sm:$0xff] %v10206_v37  ;;  %v8414_v37 = vld [vmem:[%s18393_s4 + $0xa20] sm:$0xff] }
  0xc6   :  { %v10197_v32 = vpop.f32.mrf.mxu2 }
  0xc7   :  { %18385 = vst [vmem:[#allocation19_spill] sm:$0xff] %v10197_v32  ;;  %v10199_v33 = vpop.f32.mrf.mxu0  ;;  %8290 = vmatmul.msk.f32.gmra.mxu3 %vm151_vm0, %v10174_v24 }
  0xc8   :  { %18386 = vst [vmem:[#allocation20_spill] sm:$0xff] %v10199_v33  ;;  %v10208_v38 = vpop.f32.mrf.mxu1  ;;  %v8435_v33 = vld [vmem:[%s18393_s4 + $0xac8] sm:$0xff] }
  0xc9   :  { %18388 = vst [vmem:[#allocation22_spill] sm:$0xff] %v10208_v38  ;;  %v9593_v38 = vld [vmem:[%s18367_s3 + $0xd8] sm:$0xff] }
  0xca   :  { %8201 = vmatmul.msk.f32.gmra.mxu0 %vm151_vm0, %v10204_v35  ;;  %v10227_v44 = vpop.f32.mrf.mxu3 }
  0xcb   :  { %8231 = vmatmul.msk.f32.gmra.mxu1 %vm151_vm0, %v10204_v35  ;;  %8255 = vmatmul.msk.f32.gmra.mxu2 %vm151_vm0, %v10058_v61  ;;  %18391 = vst [vmem:[#allocation25_spill] sm:$0xff] %v10227_v44 }
  0xce   :  { %v10218_v39 = vpop.f32.mrf.mxu2 }
  0xcf   :  { %18389 = vst [vmem:[#allocation23_spill] sm:$0xff] %v10218_v39  ;;  %v10220_v41 = vpop.f32.mrf.mxu0  ;;  %8291 = vmatmul.msk.f32.gmra.mxu3 %vm151_vm0, %v10204_v35  ;;  %v8357_v39 = vld [vmem:[%s18393_s4 + $0x858] sm:$0xff] }
  0xd0   :  { %18390 = vst [vmem:[#allocation24_spill] sm:$0xff] %v10220_v41  ;;  %v10229_v45 = vpop.f32.mrf.mxu1  ;;  %1264 = vmatpush.msrb.mxu1 %v8357_v39  ;;  %v8348_v39 = vld [vmem:[%s18393_s4 + $0x810] sm:$0xff] }
  0xd1   :  { %18392 = vst [vmem:[#allocation26_spill] sm:$0xff] %v10229_v45 }
  0xd2   :  { %8202 = vmatmul.msk.f32.gmra.mxu0 %vm151_vm0, %v10225_v43  ;;  %v10254_v20 = vpop.f32.mrf.mxu3  ;;  %1265 = vmatpush.msrb.mxu1 %v8354_v31 }
  0xd3   :  { %8232 = vmatmul.msk.f32.gmra.mxu1 %vm151_vm0, %v10225_v43  ;;  %8256 = vmatmul.msk.f32.gmra.mxu2 %vm151_vm0, %v10073_v63  ;;  %18396 = vst [vmem:[#allocation29_spill] sm:$0xff] %v10254_v20 }
  0xd4   :  { %1266 = vmatpush.msrb.mxu1 %v8351_v9 }
  0xd6   :  { %v10245_v12 = vpop.f32.mrf.mxu2  ;;  %1267 = vmatpush.msrb.mxu1 %v8348_v39  ;;  %v8342_v39 = vld [vmem:[%s18393_s4 + $0x7e0] sm:$0xff] }
  0xd7   :  { %18394 = vst [vmem:[#allocation27_spill] sm:$0xff] %v10245_v12  ;;  %v10247_v13 = vpop.f32.mrf.mxu0  ;;  %8292 = vmatmul.msk.f32.gmra.mxu3 %vm151_vm0, %v10225_v43 }
  0xd8   :  { %18395 = vst [vmem:[#allocation28_spill] sm:$0xff] %v10247_v13  ;;  %v10259_v29 = vpop.f32.mrf.mxu1  ;;  %1268 = vmatpush.msrb.mxu1 %v8345_v14  ;;  %v8336_v14 = vld [vmem:[%s18393_s4 + $0x7b0] sm:$0xff] }
  0xd9   :  { %18397 = vst [vmem:[#allocation30_spill] sm:$0xff] %v10259_v29 }
  0xda   :  { %8203 = vmatmul.msk.f32.gmra.mxu0 %vm151_vm0, %v10252_v19  ;;  %v10282_v30 = vpop.f32.mrf.mxu3  ;;  %1269 = vmatpush.msrb.mxu1 %v8342_v39 }
  0xdb   :  { %8233 = vmatmul.msk.f32.gmra.mxu1 %vm151_vm0, %v10252_v19  ;;  %8257 = vmatmul.msk.f32.gmra.mxu2 %vm151_vm0, %v10092_v3  ;;  %18400 = vst [vmem:[#allocation33_spill] sm:$0xff] %v10282_v30 }
  0xdc   :  { %1270 = vmatpush.msrb.mxu1 %v8339_v5 }
  0xde   :  { %v10278_v11 = vpop.f32.mrf.mxu2  ;;  %1271 = vmatpush.msrb.mxu1 %v8336_v14  ;;  %v8330_v14 = vld [vmem:[%s18393_s4 + $0x780] sm:$0xff] }
  0xdf   :  { %18398 = vst [vmem:[#allocation31_spill] sm:$0xff] %v10278_v11  ;;  %v10280_v21 = vpop.f32.mrf.mxu0  ;;  %8293 = vmatmul.msk.f32.gmra.mxu3 %vm151_vm0, %v10252_v19 }
  0xe0   :  { %18399 = vst [vmem:[#allocation32_spill] sm:$0xff] %v10280_v21  ;;  %v10287_v32 = vpop.f32.mrf.mxu1  ;;  %1272 = vmatpush.msrb.mxu1 %v8333_v1 }
  0xe1   :  { %18401 = vst [vmem:[#allocation34_spill] sm:$0xff] %v10287_v32 }
  0xe2   :  { %8300 = vmatmul.msk.f32.vlgmr.msrb.gmra.mxu0 %vm151_vm0, %v9793_v26  ;;  %v10310_v22 = vpop.f32.mrf.mxu3  ;;  %1273 = vmatpush.msrb.mxu1 %v8330_v14 }
  0xe3   :  { %8234 = vmatmul.msk.f32.gmra.mxu1 %vm151_vm0, %v9798_v27  ;;  %8258 = vmatmul.msk.f32.gmra.mxu2 %vm151_vm0, %v10111_v7  ;;  %18404 = vst [vmem:[#allocation37_spill] sm:$0xff] %v10310_v22 }
  0xe6   :  { %v10306_v26 = vpop.f32.mrf.mxu2 }
  0xe7   :  { %18402 = vst [vmem:[#allocation35_spill] sm:$0xff] %v10306_v26  ;;  %v10308_v31 = vpop.f32.mrf.mxu0  ;;  %8294 = vmatmul.msk.f32.gmra.mxu3 %vm151_vm0, %v9798_v27  ;;  %v8377_v26 = vld [vmem:[%s18393_s4 + $0x8f8] sm:$0xff] }
  0xe8   :  { %18403 = vst [vmem:[#allocation36_spill] sm:$0xff] %v10308_v31  ;;  %v10318_v9 = vpop.f32.mrf.mxu1  ;;  %v8462_v31 = vld [vmem:[%s18393_s4 + $0xba0] sm:$0xff] }
  0xe9   :  { %18405 = vst [vmem:[#allocation38_spill] sm:$0xff] %v10318_v9 }
  0xea   :  { %8301 = vmatmul.msk.f32.gmra.mxu0 %vm151_vm0, %v9827_v34  ;;  %v8465_v34 = vld [vmem:[%s18393_s4 + $0xbb8] sm:$0xff]  ;;  %v10350_v22 = vpop.f32.mrf.mxu3 }
  0xeb   :  { %8235 = vmatmul.msk.f32.gmra.mxu1 %vm151_vm0, %v9835_v36  ;;  %8259 = vmatmul.msk.f32.gmra.mxu2 %vm151_vm0, %v10144_v16  ;;  %18407 = vst [vmem:[#allocation40_spill] sm:$0xff] %v10350_v22  ;;  %v8459_v22 = vld [vmem:[%s18393_s4 + $0xb88] sm:$0xff] }
  0xec   :  { %1354 = vmatpush.msrb.mxu3 %v8465_v34  ;;  %v8453_v34 = vld [vmem:[%s18393_s4 + $0xb58] sm:$0xff] }
  0xee   :  { %v10343_v39 = vpop.f32.mrf.mxu2  ;;  %1355 = vmatpush.msrb.mxu3 %v8462_v31  ;;  %v8456_v31 = vld [vmem:[%s18393_s4 + $0xb70] sm:$0xff] }
  0xef   :  { %18406 = vst [vmem:[#allocation39_spill] sm:$0xff] %v10343_v39  ;;  %v10348_v21 = vpop.f32.mrf.mxu0  ;;  %8295 = vmatmul.msk.f32.gmra.mxu3 %vm151_vm0, %v9835_v36  ;;  %v8472_v39 = vld [vmem:[%s18393_s4 + $0xbf0] sm:$0xff] }
  0xf0   :  { %v10355_v5 = vpop.f32.mrf.mxu1  ;;  %1356 = vmatpush.msrb.mxu3 %v8459_v22  ;;  %v8450_v22 = vld [vmem:[%s18393_s4 + $0xb40] sm:$0xff] }
  0xf2   :  { %8302 = vmatmul.msk.f32.gmra.mxu0 %vm151_vm0, %v9857_v40  ;;  %v10381_v14 = vpop.f32.mrf.mxu3  ;;  %1357 = vmatpush.msrb.mxu3 %v8456_v31  ;;  %v8447_v31 = vld [vmem:[%s18393_s4 + $0xb28] sm:$0xff] }
  0xf3   :  { %8236 = vmatmul.msk.f32.gmra.mxu1 %vm151_vm0, %v9865_v42  ;;  %8260 = vmatmul.msk.f32.gmra.mxu2 %vm151_vm0, %v10174_v24  ;;  %18409 = vst [vmem:[#allocation42_spill] sm:$0xff] %v10381_v14 }
  0xf4   :  { %1358 = vmatpush.msrb.mxu3 %v8453_v34 }
  0xf6   :  { %v10374_v40 = vpop.f32.mrf.mxu2  ;;  %1359 = vmatpush.msrb.mxu3 %v8450_v22  ;;  %v8441_v22 = vld [vmem:[%s18393_s4 + $0xaf8] sm:$0xff] }
  0xf7   :  { %18408 = vst [vmem:[#allocation41_spill] sm:$0xff] %v10374_v40  ;;  %v10379_v1 = vpop.f32.mrf.mxu0  ;;  %8296 = vmatmul.msk.f32.gmra.mxu3 %vm151_vm0, %v9865_v42 }
  0xf8   :  { %v10383_v13 = vpop.f32.mrf.mxu1  ;;  %1360 = vmatpush.msrb.mxu3 %v8447_v31  ;;  %v8423_v31 = vld [vmem:[%s18393_s4 + $0xa68] sm:$0xff] }
  0xf9   :  { %18410 = vst [vmem:[#allocation43_spill] sm:$0xff] %v10383_v13  ;;  %1305 = vmatpush.msra.mxu2 %v8423_v31 }
  0xfa   :  { %8303 = vmatmul.msk.f32.gmra.mxu0 %vm151_vm0, %v9887_v46  ;;  %v8444_v46 = vld [vmem:[%s18393_s4 + $0xb10] sm:$0xff]  ;;  %v10406_v30 = vpop.f32.mrf.mxu3 }
  0xfb   :  { %8237 = vmatmul.msk.f32.gmra.mxu1 %vm151_vm0, %v9892_v47  ;;  %8261 = vmatmul.msk.f32.gmra.mxu2 %vm151_vm0, %v10204_v35 }
  0xfc   :  { %1361 = vmatpush.msrb.mxu3 %v8444_v46  ;;  %v8420_v46 = vld [vmem:[%s18393_s4 + $0xa50] sm:$0xff] }
  0xfd   :  { %1306 = vmatpush.msra.mxu2 %v8420_v46  ;;  %v8432_v46 = vld [vmem:[%s18393_s4 + $0xab0] sm:$0xff] }
  0xfe   :  { %v10399_v34 = vpop.f32.mrf.mxu2  ;;  %1362 = vmatpush.msrb.mxu3 %v8441_v22  ;;  %v8417_v22 = vld [vmem:[%s18393_s4 + $0xa38] sm:$0xff] }
  0xff   :  { %18411 = vst [vmem:[#allocation44_spill] sm:$0xff] %v10399_v34  ;;  %v10404_v14 = vpop.f32.mrf.mxu0  ;;  %8297 = vmatmul.msk.f32.gmra.mxu3 %vm151_vm0, %v9892_v47  ;;  %1307 = vmatpush.msra.mxu2 %v8417_v22  ;;  %v8426_v22 = vld [vmem:[%s18393_s4 + $0xa80] sm:$0xff] }
 0x100   :  { %v10408_v41 = vpop.f32.mrf.mxu1 }
 0x101   :  { %18412 = vst [vmem:[#allocation45_spill] sm:$0xff] %v10408_v41  ;;  %1308 = vmatpush.msra.mxu2 %v8414_v37 }
 0x102   :  { %8304 = vmatmul.msk.f32.gmra.mxu0 %vm151_vm0, %v9905_v48  ;;  %v8438_v48 = vld [vmem:[%s18393_s4 + $0xae0] sm:$0xff]  ;;  %v10437_v23 = vpop.f32.mrf.mxu3 }
 0x103   :  { %8238 = vmatmul.msk.f32.gmra.mxu1 %vm151_vm0, %v9910_v49  ;;  %8262 = vmatmul.msk.f32.gmra.mxu2 %vm151_vm0, %v10225_v43 }
 0x104   :  { %1363 = vmatpush.msrb.mxu3 %v8438_v48  ;;  %v8411_v48 = vld [vmem:[%s18393_s4 + $0xa08] sm:$0xff] }
 0x105   :  { %1309 = vmatpush.msra.mxu2 %v8411_v48 }
 0x106   :  { %v10430_v20 = vpop.f32.mrf.mxu2  ;;  %1364 = vmatpush.msrb.mxu3 %v8435_v33  ;;  %v8408_v33 = vld [vmem:[%s18393_s4 + $0x9f0] sm:$0xff] }
 0x107   :  { %18413 = vst [vmem:[#allocation46_spill] sm:$0xff] %v10430_v20  ;;  %v10435_v44 = vpop.f32.mrf.mxu0  ;;  %8298 = vmatmul.msk.f32.gmra.mxu3 %vm151_vm0, %v9910_v49  ;;  %1310 = vmatpush.msra.mxu2 %v8408_v33  ;;  %v8396_v33 = vld [vmem:[%s18393_s4 + $0x990] sm:$0xff]  ;;  %v8373_v20 = vld [vmem:[%s18393_s4 + $0x8d8] sm:$0xff] }
 0x108   :  { %v10442_v31 = vpop.f32.mrf.mxu1  ;;  %1365 = vmatpush.msrb.mxu3 %v8432_v46  ;;  %v8405_v46 = vld [vmem:[%s18393_s4 + $0x9d8] sm:$0xff] }
 0x109   :  { %18414 = vst [vmem:[#allocation47_spill] sm:$0xff] %v10442_v31  ;;  %1311 = vmatpush.msra.mxu2 %v8405_v46 }
 0x10a   :  { %8305 = vmatmul.msk.f32.gmra.mxu0 %vm151_vm0, %v9923_v50  ;;  %v8429_v50 = vld [vmem:[%s18393_s4 + $0xa98] sm:$0xff]  ;;  %v10474_v25 = vpop.f32.mrf.mxu3 }
 0x10b   :  { %8239 = vmatmul.msk.f32.gmra.mxu1 %vm151_vm0, %v9928_v51  ;;  %8263 = vmatmul.msk.f32.gmra.mxu2 %vm151_vm0, %v10252_v19 }
 0x10c   :  { %1366 = vmatpush.msrb.mxu3 %v8429_v50  ;;  %1312 = vmatpush.msra.mxu2 %v8402_v6  ;;  %v8399_v50 = vld [vmem:[%s18393_s4 + $0x9a8] sm:$0xff]  ;;  %v8393_v6 = vld [vmem:[%s18393_s4 + $0x978] sm:$0xff] }
 0x10e   :  { %v10467_v37 = vpop.f32.mrf.mxu2  ;;  %1367 = vmatpush.msrb.mxu3 %v8426_v22  ;;  %1313 = vmatpush.msra.mxu2 %v8399_v50  ;;  %v8390_v50 = vld [vmem:[%s18393_s4 + $0x960] sm:$0xff] }
 0x10f   :  { %18415 = vst [vmem:[#allocation48_spill] sm:$0xff] %v10467_v37  ;;  %v10472_v15 = vpop.f32.mrf.mxu0  ;;  %8299 = vmatmul.msk.f32.gmra.mxu3 %vm151_vm0, %v9928_v51 }
 0x110   :  { %v10479_v48 = vpop.f32.mrf.mxu1  ;;  %1314 = vmatpush.msra.mxu2 %v8396_v33  ;;  %v8387_v33 = vld [vmem:[%s18393_s4 + $0x948] sm:$0xff] }
 0x111   :  { %18416 = vst [vmem:[#allocation49_spill] sm:$0xff] %v10479_v48 }
 0x112   :  { %8306 = vmatmul.msk.f32.gmra.mxu0 %vm151_vm0, %v9941_v52  ;;  %1315 = vmatpush.msra.mxu2 %v8393_v6  ;;  %v8384_v6 = vld [vmem:[%s18393_s4 + $0x930] sm:$0xff] }
 0x113   :  { %8264 = vmatmul.msk.f32.gmra.mxu2 %vm151_vm0, %v9798_v27  ;;  %1274 = vmatmul.f32.vlgmr.msrb.gmra.mxu1 %v10348_v21  ;;  %v10501_v27 = vpop.f32.mrf.mxu3 }
 0x114   :  { %1316 = vmatpush.msra.mxu2 %v8390_v50 }
 0x116   :  { %v10497_v22 = vpop.f32.mrf.mxu2  ;;  %1317 = vmatpush.msra.mxu2 %v8387_v33  ;;  %v8378_v33 = vld [vmem:[%s18393_s4 + $0x900] sm:$0xff] }
 0x117   :  { %18417 = vst [vmem:[#allocation50_spill] sm:$0xff] %v10497_v22  ;;  %v10499_v52 = vpop.f32.mrf.mxu0 }
 0x118   :  { %v10506_v46 = vpop.f32.mrf.mxu1  ;;  %1318 = vmatpush.msra.mxu2 %v8384_v6  ;;  %v8519_v6 = vld [vmem:[%s18393_s4 + $0xd68] sm:$0xff] }
 0x119   :  { %18418 = vst [vmem:[#allocation51_spill] sm:$0xff] %v10506_v46  ;;  %1399 = vmatpush.msra.mxu1 %v8519_v6  ;;  %v8510_v6 = vld [vmem:[%s18393_s4 + $0xd20] sm:$0xff] }
 0x11a   :  { %8307 = vmatmul.msk.f32.gmra.mxu0 %vm151_vm0, %v9954_v53 }
 0x11b   :  { %8265 = vmatmul.msk.f32.gmra.mxu2 %vm151_vm0, %v9835_v36  ;;  %1277 = vmatmul.f32.gmra.mxu1 %v10379_v1  ;;  %v10526_v53 = vpop.f32.mrf.mxu3  ;;  %v8381_v36 = vld [vmem:[%s18393_s4 + $0x918] sm:$0xff] }
 0x11c   :  { %1319 = vmatpush.msra.mxu2 %v8381_v36  ;;  %v8516_v36 = vld [vmem:[%s18393_s4 + $0xd50] sm:$0xff] }
 0x11d   :  { %1400 = vmatpush.msra.mxu1 %v8516_v36  ;;  %v8507_v36 = vld [vmem:[%s18393_s4 + $0xd08] sm:$0xff] }
 0x11e   :  { %v10522_v22 = vpop.f32.mrf.mxu2  ;;  %1320 = vmatpush.msra.mxu2 %v8378_v33 }
 0x11f   :  { %18419 = vst [vmem:[#allocation52_spill] sm:$0xff] %v10522_v22  ;;  %v10524_v9 = vpop.f32.mrf.mxu0 }
 0x120   :  { %v10531_v50 = vpop.f32.mrf.mxu1 }
 0x121   :  { %18420 = vst [vmem:[#allocation53_spill] sm:$0xff] %v10531_v50 }
 0x122   :  { %8308 = vmatmul.msk.f32.gmra.mxu0 %vm151_vm0, %v9967_v54 }
 0x123   :  { %8266 = vmatmul.msk.f32.gmra.mxu2 %vm151_vm0, %v9865_v42  ;;  %1280 = vmatmul.f32.gmra.mxu1 %v10404_v14  ;;  %v10552_v33 = vpop.f32.mrf.mxu3  ;;  %v8513_v42 = vld [vmem:[%s18393_s4 + $0xd38] sm:$0xff] }
 0x124   :  { %1401 = vmatpush.msra.mxu1 %v8513_v42  ;;  %v8504_v42 = vld [vmem:[%s18393_s4 + $0xcf0] sm:$0xff] }
 0x126   :  { %v10547_v22 = vpop.f32.mrf.mxu2  ;;  %1402 = vmatpush.msra.mxu1 %v8510_v6 }
 0x127   :  { %1368 = vmatmul.f32.vlgmr.msrb.gmra.mxu3 %v10547_v22  ;;  %v10550_v54 = vpop.f32.mrf.mxu0 }
 0x128   :  { %v10557_v17 = vpop.f32.mrf.mxu1  ;;  %1403 = vmatpush.msra.mxu1 %v8507_v36  ;;  %v8498_v36 = vld [vmem:[%s18393_s4 + $0xcc0] sm:$0xff] }
 0x129   :  { %18421 = vst [vmem:[#allocation54_spill] sm:$0xff] %v10557_v17 }
 0x12a   :  { %8309 = vmatmul.msk.f32.gmra.mxu0 %vm151_vm0, %v9980_v55  ;;  %1404 = vmatpush.msra.mxu1 %v8504_v42  ;;  %v8495_v42 = vld [vmem:[%s18393_s4 + $0xca8] sm:$0xff] }
 0x12b   :  { %8267 = vmatmul.msk.f32.gmra.mxu2 %vm151_vm0, %v9892_v47  ;;  %1283 = vmatmul.f32.gmra.mxu1 %v10435_v44  ;;  %v10578_v6 = vpop.f32.mrf.mxu3  ;;  %v8501_v47 = vld [vmem:[%s18393_s4 + $0xcd8] sm:$0xff] }
 0x12c   :  { %1405 = vmatpush.msra.mxu1 %v8501_v47  ;;  %v8492_v47 = vld [vmem:[%s18393_s4 + $0xc90] sm:$0xff] }
 0x12e   :  { %v10573_v37 = vpop.f32.mrf.mxu2  ;;  %1406 = vmatpush.msra.mxu1 %v8498_v36 }
 0x12f   :  { %1371 = vmatmul.f32.gmra.mxu3 %v10573_v37  ;;  %v10576_v55 = vpop.f32.mrf.mxu0 }
 0x130   :  { %v10583_v2 = vpop.f32.mrf.mxu1  ;;  %1407 = vmatpush.msra.mxu1 %v8495_v42  ;;  %v8376_v42 = vld [vmem:[%s18393_s4 + $0x8f0] sm:$0xff] }
 0x131   :  { %18422 = vst [vmem:[#allocation55_spill] sm:$0xff] %v10583_v2  ;;  %1493 = vmatpush.msra.mxu3 %v8376_v42  ;;  %v8370_v42 = vld [vmem:[%s18393_s4 + $0x8c0] sm:$0xff] }
 0x132   :  { %8310 = vmatmul.msk.f32.gmra.mxu0 %vm151_vm0, %v9993_v56  ;;  %1408 = vmatpush.msra.mxu1 %v8492_v47  ;;  %v8486_v47 = vld [vmem:[%s18393_s4 + $0xc60] sm:$0xff] }
 0x133   :  { %8268 = vmatmul.msk.f32.gmra.mxu2 %vm151_vm0, %v9910_v49  ;;  %1286 = vmatmul.f32.gmra.mxu1 %v10472_v15  ;;  %v10604_v36 = vpop.f32.mrf.mxu3  ;;  %v8489_v49 = vld [vmem:[%s18393_s4 + $0xc78] sm:$0xff] }
 0x134   :  { %1409 = vmatpush.msra.mxu1 %v8489_v49  ;;  %v8483_v49 = vld [vmem:[%s18393_s4 + $0xc48] sm:$0xff]  ;;  %1494 = vmatpush.msra.mxu3 %v8373_v20  ;;  %v8477_v20 = vld [vmem:[%s18393_s4 + $0xc18] sm:$0xff] }
 0x136   :  { %v10599_v32 = vpop.f32.mrf.mxu2  ;;  %1410 = vmatpush.msra.mxu1 %v8486_v47  ;;  %1495 = vmatpush.msra.mxu3 %v8370_v42  ;;  %v8474_v42 = vld [vmem:[%s18393_s4 + $0xc00] sm:$0xff] }
 0x137   :  { %1374 = vmatmul.f32.gmra.mxu3 %v10599_v32  ;;  %v10602_v56 = vpop.f32.mrf.mxu0 }
 0x138   :  { %v10612_v8 = vpop.f32.mrf.mxu1  ;;  %1411 = vmatpush.msra.mxu1 %v8483_v49  ;;  %v8364_v49 = vld [vmem:[%s18393_s4 + $0x890] sm:$0xff] }
 0x139   :  { %18423 = vst [vmem:[#allocation56_spill] sm:$0xff] %v10612_v8 }
 0x13a   :  { %8311 = vmatmul.msk.f32.gmra.mxu0 %vm151_vm0, %v10006_v57  ;;  %v8480_v57 = vld [vmem:[%s18393_s4 + $0xc30] sm:$0xff] }
 0x13b   :  { %8269 = vmatmul.msk.f32.gmra.mxu2 %vm151_vm0, %v9928_v51  ;;  %1289 = vmatmul.f32.gmra.mxu1 %v10499_v52  ;;  %v8367_v51 = vld [vmem:[%s18393_s4 + $0x8a8] sm:$0xff]  ;;  %v10642_v29 = vpop.f32.mrf.mxu3 }
 0x13c   :  { %1412 = vmatpush.msra.mxu1 %v8480_v57  ;;  %1496 = vmatpush.msra.mxu3 %v8367_v51  ;;  %v8361_v57 = vld [vmem:[%s18393_s4 + $0x878] sm:$0xff]  ;;  %v8358_v51 = vld [vmem:[%s18393_s4 + $0x860] sm:$0xff] }
 0x13e   :  { %v10637_v47 = vpop.f32.mrf.mxu2  ;;  %1413 = vmatpush.msra.mxu1 %v8477_v20  ;;  %1497 = vmatpush.msra.mxu3 %v8364_v49  ;;  %v8355_v20 = vld [vmem:[%s18393_s4 + $0x848] sm:$0xff] }
 0x13f   :  { %1377 = vmatmul.f32.gmra.mxu3 %v10637_v47  ;;  %v10640_v62 = vpop.f32.mrf.mxu0 }
 0x140   :  { %18424 = vst [vmem:[#allocation57_spill] sm:$0xff] %v10640_v62  ;;  %v10650_v34 = vpop.f32.mrf.mxu1  ;;  %1414 = vmatpush.msra.mxu1 %v8474_v42  ;;  %1498 = vmatpush.msra.mxu3 %v8361_v57  ;;  %v8352_v62 = vld [vmem:[%s18393_s4 + $0x830] sm:$0xff]  ;;  %v8349_v42 = vld [vmem:[%s18393_s4 + $0x818] sm:$0xff]  ;;  %v8346_v57 = vld [vmem:[%s18393_s4 + $0x800] sm:$0xff] }
 0x141   :  { %18425 = vst [vmem:[#allocation58_spill] sm:$0xff] %v10650_v34 }
 0x142   :  { %8312 = vmatmul.msk.f32.gmra.mxu0 %vm151_vm0, %v10019_v58  ;;  %1499 = vmatpush.msra.mxu3 %v8358_v51  ;;  %v8343_v51 = vld [vmem:[%s18393_s4 + $0x7e8] sm:$0xff] }
 0x143   :  { %1292 = vmatmul.f32.gmra.mxu1 %v10524_v9  ;;  %1321 = vmatmul.f32.vlgmr.msra.gmra.mxu2 %v10355_v5  ;;  %v10673_v49 = vpop.f32.mrf.mxu3 }
 0x144   :  { %1500 = vmatpush.msra.mxu3 %v8355_v20 }
 0x146   :  { %v10668_v34 = vpop.f32.mrf.mxu2  ;;  %1501 = vmatpush.msra.mxu3 %v8352_v62 }
 0x147   :  { %1380 = vmatmul.f32.gmra.mxu3 %v10668_v34  ;;  %v10671_v58 = vpop.f32.mrf.mxu0 }
 0x148   :  { %18426 = vst [vmem:[#allocation59_spill] sm:$0xff] %v10671_v58  ;;  %v10678_v45 = vpop.f32.mrf.mxu1  ;;  %1502 = vmatpush.msra.mxu3 %v8349_v42  ;;  %v8337_v42 = vld [vmem:[%s18393_s4 + $0x7b8] sm:$0xff] }
 0x149   :  { %18427 = vst [vmem:[#allocation60_spill] sm:$0xff] %v10678_v45  ;;  %v8340_v45 = vld [vmem:[%s18393_s4 + $0x7d0] sm:$0xff] }
 0x14a   :  { %8313 = vmatmul.msk.f32.gmra.mxu0 %vm151_vm0, %v10032_v59  ;;  %1503 = vmatpush.msra.mxu3 %v8346_v57  ;;  %v8334_v57 = vld [vmem:[%s18393_s4 + $0x7a0] sm:$0xff] }
 0x14b   :  { %1295 = vmatmul.f32.gmra.mxu1 %v10550_v54  ;;  %1324 = vmatmul.f32.gmra.mxu2 %v10383_v13  ;;  %v10698_v62 = vpop.f32.mrf.mxu3 }
 0x14c   :  { %18429 = vst [vmem:[#allocation62_spill] sm:$0xff] %v10698_v62  ;;  %1504 = vmatpush.msra.mxu3 %v8343_v51  ;;  %v8331_v51 = vld [vmem:[%s18393_s4 + $0x788] sm:$0xff] }
 0x14e   :  { %v10693_v20 = vpop.f32.mrf.mxu2  ;;  %1505 = vmatpush.msra.mxu3 %v8340_v45 }
 0x14f   :  { %1383 = vmatmul.f32.gmra.mxu3 %v10693_v20  ;;  %v10696_v59 = vpop.f32.mrf.mxu0 }
 0x150   :  { %18428 = vst [vmem:[#allocation61_spill] sm:$0xff] %v10696_v59  ;;  %v10703_v58 = vpop.f32.mrf.mxu1  ;;  %1506 = vmatpush.msra.mxu3 %v8337_v42 }
 0x151   :  { %18430 = vst [vmem:[#allocation63_spill] sm:$0xff] %v10703_v58 }
 0x152   :  { %8314 = vmatmul.msk.f32.gmra.mxu0 %vm151_vm0, %v10045_v60  ;;  %1507 = vmatpush.msra.mxu3 %v8334_v57 }
 0x153   :  { %1298 = vmatmul.f32.gmra.mxu1 %v10576_v55  ;;  %1327 = vmatmul.f32.gmra.mxu2 %v10408_v41  ;;  %v10723_v45 = vpop.f32.mrf.mxu3 }
 0x154   :  { %18432 = vst [vmem:[#allocation65_spill] sm:$0xff] %v10723_v45  ;;  %1508 = vmatpush.msra.mxu3 %v8331_v51 }
 0x156   :  { %v10718_v58 = vpop.f32.mrf.mxu2 }
 0x157   :  { %1386 = vmatmul.f32.gmra.mxu3 %v10718_v58  ;;  %v10721_v60 = vpop.f32.mrf.mxu0 }
 0x158   :  { %18431 = vst [vmem:[#allocation64_spill] sm:$0xff] %v10721_v60  ;;  %v10725_v62 = vpop.f32.mrf.mxu1 }
 0x159   :  { %18433 = vst [vmem:[#allocation66_spill] sm:$0xff] %v10725_v62 }
 0x15a   :  { %8315 = vmatmul.msk.f32.gmra.mxu0 %vm151_vm0, %v10058_v61 }
 0x15b   :  { %1301 = vmatmul.f32.gmra.mxu1 %v10602_v56  ;;  %1330 = vmatmul.f32.gmra.mxu2 %v10442_v31  ;;  %v10736_v59 = vpop.f32.mrf.mxu3 }
 0x15c   :  { %18435 = vst [vmem:[#allocation68_spill] sm:$0xff] %v10736_v59 }
 0x15e   :  { %v10731_v42 = vpop.f32.mrf.mxu2 }
 0x15f   :  { %1389 = vmatmul.f32.gmra.mxu3 %v10731_v42  ;;  %v10734_v57 = vpop.f32.mrf.mxu0 }
 0x160   :  { %18434 = vst [vmem:[#allocation67_spill] sm:$0xff] %v10734_v57  ;;  %v10738_v60 = vpop.f32.mrf.mxu1 }
 0x161   :  { %18436 = vst [vmem:[#allocation69_spill] sm:$0xff] %v10738_v60 }
 0x162   :  { %8316 = vmatmul.msk.f32.gmra.mxu0 %vm151_vm0, %v10073_v63 }
 0x163   :  { %1333 = vmatmul.f32.gmra.mxu2 %v10479_v48  ;;  %1415 = vmatmul.f32.vlgmr.msra.gmra.mxu1 %v10406_v30  ;;  %v10749_v62 = vpop.f32.mrf.mxu3 }
 0x164   :  { %18438 = vst [vmem:[#allocation71_spill] sm:$0xff] %v10749_v62 }
 0x166   :  { %v10744_v61 = vpop.f32.mrf.mxu2 }
 0x167   :  { %1392 = vmatmul.f32.gmra.mxu3 %v10744_v61  ;;  %v10747_v51 = vpop.f32.mrf.mxu0 }
 0x168   :  { %18437 = vst [vmem:[#allocation70_spill] sm:$0xff] %v10747_v51  ;;  %v10751_v45 = vpop.f32.mrf.mxu1 }
 0x169   :  { %18439 = vst [vmem:[#allocation72_spill] sm:$0xff] %v10751_v45  ;;  %v8567_v45 = vld [vmem:[%s18393_s4 + $0xee8] sm:$0xff] }
 0x16a   :  { %8317 = vmatmul.msk.f32.gmra.mxu0 %vm151_vm0, %v10092_v3  ;;  %1446 = vmatpush.msrb.mxu2 %v8567_v45  ;;  %v8564_v3 = vld [vmem:[%s18393_s4 + $0xed0] sm:$0xff]  ;;  %v8561_v45 = vld [vmem:[%s18393_s4 + $0xeb8] sm:$0xff] }
 0x16b   :  { %1336 = vmatmul.f32.gmra.mxu2 %v10506_v46  ;;  %1418 = vmatmul.f32.gmra.mxu1 %v10437_v23  ;;  %v10762_v59 = vpop.f32.mrf.mxu3 }
 0x16c   :  { %18441 = vst [vmem:[#allocation74_spill] sm:$0xff] %v10762_v59  ;;  %1447 = vmatpush.msrb.mxu2 %v8564_v3  ;;  %v8418_v3 = vld [vmem:[%s18393_s4 + $0xa40] sm:$0xff] }
 0x16e   :  { %v10757_v63 = vpop.f32.mrf.mxu2  ;;  %1448 = vmatpush.msrb.mxu2 %v8561_v45  ;;  %v8555_v45 = vld [vmem:[%s18393_s4 + $0xe88] sm:$0xff] }
 0x16f   :  { %1395 = vmatmul.f32.gmra.mxu3 %v10757_v63  ;;  %v10760_v60 = vpop.f32.mrf.mxu0 }
 0x170   :  { %18440 = vst [vmem:[#allocation73_spill] sm:$0xff] %v10760_v60  ;;  %v10764_v51 = vpop.f32.mrf.mxu1 }
 0x171   :  { %18442 = vst [vmem:[#allocation75_spill] sm:$0xff] %v10764_v51  ;;  %v8424_v51 = vld [vmem:[%s18393_s4 + $0xa70] sm:$0xff] }
 0x172   :  { %8318 = vmatmul.msk.f32.gmra.mxu0 %vm151_vm0, %v10111_v7  ;;  %1540 = vmatpush.msrb.mxu1 %v8424_v51  ;;  %v8421_v7 = vld [vmem:[%s18393_s4 + $0xa58] sm:$0xff]  ;;  %v8558_v51 = vld [vmem:[%s18393_s4 + $0xea0] sm:$0xff] }
 0x173   :  { %1339 = vmatmul.f32.gmra.mxu2 %v10531_v50  ;;  %1421 = vmatmul.f32.gmra.mxu1 %v10474_v25  ;;  %v10798_v57 = vpop.f32.mrf.mxu3 }
 0x174   :  { %1541 = vmatpush.msrb.mxu1 %v8421_v7  ;;  %18446 = vst [vmem:[#allocation79_spill] sm:$0xff] %v10798_v57  ;;  %1449 = vmatpush.msrb.mxu2 %v8558_v51  ;;  %v8415_v7 = vld [vmem:[%s18393_s4 + $0xa28] sm:$0xff]  ;;  %v8552_v51 = vld [vmem:[%s18393_s4 + $0xe70] sm:$0xff] }
 0x176   :  { %v10785_v59 = vpop.f32.mrf.mxu2  ;;  %1542 = vmatpush.msrb.mxu1 %v8418_v3  ;;  %1450 = vmatpush.msrb.mxu2 %v8555_v45  ;;  %v8412_v3 = vld [vmem:[%s18393_s4 + $0xa10] sm:$0xff] }
 0x177   :  { %18443 = vst [vmem:[#allocation76_spill] sm:$0xff] %v10785_v59  ;;  %1509 = vmatmul.f32.vlgmr.msra.gmra.mxu3 %v10348_v21  ;;  %v10788_v62 = vpop.f32.mrf.mxu0 }
 0x178   :  { %18444 = vst [vmem:[#allocation77_spill] sm:$0xff] %v10788_v62  ;;  %v10796_v60 = vpop.f32.mrf.mxu1  ;;  %1543 = vmatpush.msrb.mxu1 %v8415_v7  ;;  %1451 = vmatpush.msrb.mxu2 %v8552_v51  ;;  %v8546_v7 = vld [vmem:[%s18393_s4 + $0xe40] sm:$0xff] }
 0x179   :  { %18445 = vst [vmem:[#allocation78_spill] sm:$0xff] %v10796_v60  ;;  %v8549_v60 = vld [vmem:[%s18393_s4 + $0xe58] sm:$0xff]  ;;  %v8406_v51 = vld [vmem:[%s18393_s4 + $0x9e0] sm:$0xff] }
 0x17a   :  { %8319 = vmatmul.msk.f32.gmra.mxu0 %vm151_vm0, %v10144_v16  ;;  %v8409_v16 = vld [vmem:[%s18393_s4 + $0x9f8] sm:$0xff]  ;;  %1544 = vmatpush.msrb.mxu1 %v8412_v3  ;;  %v8403_v3 = vld [vmem:[%s18393_s4 + $0x9c8] sm:$0xff] }
 0x17b   :  { %1342 = vmatmul.f32.gmra.mxu2 %v10557_v17  ;;  %1424 = vmatmul.f32.gmra.mxu1 %v10501_v27 }
 0x17c   :  { %1452 = vmatpush.msrb.mxu2 %v8549_v60  ;;  %1545 = vmatpush.msrb.mxu1 %v8409_v16  ;;  %v8543_v60 = vld [vmem:[%s18393_s4 + $0xe28] sm:$0xff]  ;;  %v8540_v16 = vld [vmem:[%s18393_s4 + $0xe10] sm:$0xff] }
 0x17e   :  { %v10822_v45 = vpop.f32.mrf.mxu2  ;;  %1453 = vmatpush.msrb.mxu2 %v8546_v7  ;;  %1546 = vmatpush.msrb.mxu1 %v8406_v51  ;;  %v8400_v7 = vld [vmem:[%s18393_s4 + $0x9b0] sm:$0xff]  ;;  %v8397_v51 = vld [vmem:[%s18393_s4 + $0x998] sm:$0xff] }
 0x17f   :  { %18447 = vst [vmem:[#allocation80_spill] sm:$0xff] %v10822_v45  ;;  %1512 = vmatmul.f32.gmra.mxu3 %v10379_v1  ;;  %v10825_v57 = vpop.f32.mrf.mxu0  ;;  %v10843_v45 = vpop.f32.mrf.mxu3 }
 0x180   :  { %18448 = vst [vmem:[#allocation81_spill] sm:$0xff] %v10825_v57  ;;  %v10833_v59 = vpop.f32.mrf.mxu1  ;;  %1454 = vmatpush.msrb.mxu2 %v8543_v60  ;;  %1547 = vmatpush.msrb.mxu1 %v8403_v3  ;;  %v8534_v60 = vld [vmem:[%s18393_s4 + $0xde0] sm:$0xff]  ;;  %v8520_v3 = vld [vmem:[%s18393_s4 + $0xd70] sm:$0xff] }
 0x181   :  { %18449 = vst [vmem:[#allocation82_spill] sm:$0xff] %v10833_v59  ;;  %1634 = vmatpush.msrb.mxu3 %v8520_v3 }
 0x182   :  { %8320 = vmatmul.msk.f32.gmra.mxu0 %vm151_vm0, %v10174_v24  ;;  %18450 = vst [vmem:[#allocation83_spill] sm:$0xff] %v10843_v45  ;;  %v8537_v24 = vld [vmem:[%s18393_s4 + $0xdf8] sm:$0xff]  ;;  %1455 = vmatpush.msrb.mxu2 %v8540_v16  ;;  %v8394_v16 = vld [vmem:[%s18393_s4 + $0x980] sm:$0xff] }
 0x183   :  { %1345 = vmatmul.f32.gmra.mxu2 %v10583_v2  ;;  %1427 = vmatmul.f32.gmra.mxu1 %v10526_v53 }
 0x184   :  { %1548 = vmatpush.msrb.mxu1 %v8400_v7  ;;  %1456 = vmatpush.msrb.mxu2 %v8537_v24  ;;  %v8531_v7 = vld [vmem:[%s18393_s4 + $0xdc8] sm:$0xff] }
 0x185   :  { %v8391_v24 = vld [vmem:[%s18393_s4 + $0x968] sm:$0xff] }
 0x186   :  { %v10859_v59 = vpop.f32.mrf.mxu2  ;;  %1549 = vmatpush.msrb.mxu1 %v8397_v51  ;;  %1457 = vmatpush.msrb.mxu2 %v8534_v60  ;;  %v8528_v51 = vld [vmem:[%s18393_s4 + $0xdb0] sm:$0xff]  ;;  %v8514_v60 = vld [vmem:[%s18393_s4 + $0xd40] sm:$0xff] }
 0x187   :  { %18451 = vst [vmem:[#allocation84_spill] sm:$0xff] %v10859_v59  ;;  %1515 = vmatmul.f32.gmra.mxu3 %v10404_v14  ;;  %v10862_v45 = vpop.f32.mrf.mxu0  ;;  %v8517_v59 = vld [vmem:[%s18393_s4 + $0xd58] sm:$0xff]  ;;  %v10891_v3 = vpop.f32.mrf.mxu3 }
 0x188   :  { %18452 = vst [vmem:[#allocation85_spill] sm:$0xff] %v10862_v45  ;;  %v10870_v57 = vpop.f32.mrf.mxu1  ;;  %1550 = vmatpush.msrb.mxu1 %v8394_v16  ;;  %1458 = vmatpush.msrb.mxu2 %v8531_v7  ;;  %v8525_v45 = vld [vmem:[%s18393_s4 + $0xd98] sm:$0xff] }
 0x189   :  { %18453 = vst [vmem:[#allocation86_spill] sm:$0xff] %v10870_v57  ;;  %1635 = vmatpush.msrb.mxu3 %v8517_v59  ;;  %v8385_v59 = vld [vmem:[%s18393_s4 + $0x938] sm:$0xff] }
 0x18a   :  { %8321 = vmatmul.msk.f32.gmra.mxu0 %vm151_vm0, %v10204_v35  ;;  %18454 = vst [vmem:[#allocation87_spill] sm:$0xff] %v10891_v3  ;;  %v8388_v35 = vld [vmem:[%s18393_s4 + $0x950] sm:$0xff]  ;;  %1551 = vmatpush.msrb.mxu1 %v8391_v24  ;;  %v8511_v24 = vld [vmem:[%s18393_s4 + $0xd28] sm:$0xff]  ;;  %v8382_v3 = vld [vmem:[%s18393_s4 + $0x920] sm:$0xff] }
 0x18b   :  { %1348 = vmatmul.f32.gmra.mxu2 %v10612_v8  ;;  %1430 = vmatmul.f32.gmra.mxu1 %v10552_v33 }
 0x18c   :  { %1459 = vmatpush.msrb.mxu2 %v8528_v51  ;;  %1552 = vmatpush.msrb.mxu1 %v8388_v35  ;;  %v8522_v51 = vld [vmem:[%s18393_s4 + $0xd80] sm:$0xff]  ;;  %v8508_v35 = vld [vmem:[%s18393_s4 + $0xd10] sm:$0xff] }
 0x18d   :  { %1636 = vmatpush.msrb.mxu3 %v8514_v60  ;;  %v8568_v60 = vld [vmem:[%s18393_s4 + $0xef0] sm:$0xff] }
 0x18e   :  { %v10899_v57 = vpop.f32.mrf.mxu2  ;;  %1460 = vmatpush.msrb.mxu2 %v8525_v45  ;;  %1553 = vmatpush.msrb.mxu1 %v8385_v59  ;;  %v8379_v45 = vld [vmem:[%s18393_s4 + $0x908] sm:$0xff]  ;;  %v8565_v59 = vld [vmem:[%s18393_s4 + $0xed8] sm:$0xff] }
 0x18f   :  { %18455 = vst [vmem:[#allocation88_spill] sm:$0xff] %v10899_v57  ;;  %1518 = vmatmul.f32.gmra.mxu3 %v10435_v44  ;;  %v10905_v16 = vpop.f32.mrf.mxu0  ;;  %1681 = vmatpush.msra.mxu0 %v8568_v60  ;;  %v10941_v57 = vpop.f32.mrf.mxu3  ;;  %v8559_v60 = vld [vmem:[%s18393_s4 + $0xea8] sm:$0xff] }
 0x190   :  { %18456 = vst [vmem:[#allocation89_spill] sm:$0xff] %v10905_v16  ;;  %v10910_v7 = vpop.f32.mrf.mxu1  ;;  %1637 = vmatpush.msrb.mxu3 %v8511_v24  ;;  %1461 = vmatpush.msrb.mxu2 %v8522_v51  ;;  %v8562_v51 = vld [vmem:[%s18393_s4 + $0xec0] sm:$0xff] }
 0x191   :  { %1554 = vmatpush.msrb.mxu1 %v8382_v3  ;;  %18458 = vst [vmem:[#allocation91_spill] sm:$0xff] %v10941_v57  ;;  %v8502_v3 = vld [vmem:[%s18393_s4 + $0xce0] sm:$0xff]  ;;  %1682 = vmatpush.msra.mxu0 %v8565_v59  ;;  %v8496_v59 = vld [vmem:[%s18393_s4 + $0xcb0] sm:$0xff] }
 0x192   :  { %8322 = vmatmul.msk.f32.gmra.mxu0 %vm151_vm0, %v10225_v43  ;;  %1638 = vmatpush.msrb.mxu3 %v8508_v35  ;;  %v8505_v43 = vld [vmem:[%s18393_s4 + $0xcf8] sm:$0xff] }
 0x193   :  { %1433 = vmatmul.f32.gmra.mxu1 %v10578_v6  ;;  %1683 = vmatpush.msra.mxu0 %v8562_v51  ;;  %v8493_v51 = vld [vmem:[%s18393_s4 + $0xc98] sm:$0xff] }
 0x194   :  { %1555 = vmatpush.msrb.mxu1 %v8379_v45  ;;  %1639 = vmatpush.msrb.mxu3 %v8505_v43  ;;  %v8499_v45 = vld [vmem:[%s18393_s4 + $0xcc8] sm:$0xff]  ;;  %v8556_v43 = vld [vmem:[%s18393_s4 + $0xe90] sm:$0xff] }
 0x195   :  { %1684 = vmatpush.msra.mxu0 %v8559_v60  ;;  %1587 = vmatpush.msra.mxu2 %v8472_v39  ;;  %v8374_v39 = vld [vmem:[%s18393_s4 + $0x8e0] sm:$0xff] }
 0x196   :  { %v10939_v24 = vpop.f32.mrf.mxu2  ;;  %1640 = vmatpush.msrb.mxu3 %v8502_v3  ;;  %1728 = vmatpush.msra.mxu1 %v8377_v26  ;;  %v8463_v26 = vld [vmem:[%s18393_s4 + $0xba8] sm:$0xff] }
 0x197   :  { %18457 = vst [vmem:[#allocation90_spill] sm:$0xff] %v10939_v24  ;;  %1521 = vmatmul.f32.gmra.mxu3 %v10472_v15  ;;  %v10944_v16 = vpop.f32.mrf.mxu0  ;;  %1685 = vmatpush.msra.mxu0 %v8556_v43  ;;  %v8550_v43 = vld [vmem:[%s18393_s4 + $0xe60] sm:$0xff]  ;;  %v10988_v24 = vpop.f32.mrf.mxu3 }
 0x198   :  { %18459 = vst [vmem:[#allocation92_spill] sm:$0xff] %v10944_v16  ;;  %v10952_v35 = vpop.f32.mrf.mxu1  ;;  %1641 = vmatpush.msrb.mxu3 %v8499_v45  ;;  %v8490_v45 = vld [vmem:[%s18393_s4 + $0xc80] sm:$0xff]  ;;  %1729 = vmatpush.msra.mxu1 %v8374_v39  ;;  %v8368_v39 = vld [vmem:[%s18393_s4 + $0x8b0] sm:$0xff] }
 0x199   :  { %18462 = vst [vmem:[#allocation95_spill] sm:$0xff] %v10988_v24  ;;  %v8481_v24 = vld [vmem:[%s18393_s4 + $0xc38] sm:$0xff] }
 0x19a   :  { %8323 = vmatmul.msk.f32.gmra.mxu0 %vm151_vm0, %v10252_v19  ;;  %v8553_v19 = vld [vmem:[%s18393_s4 + $0xe78] sm:$0xff]  ;;  %1642 = vmatpush.msrb.mxu3 %v8496_v59  ;;  %v8487_v59 = vld [vmem:[%s18393_s4 + $0xc68] sm:$0xff] }
 0x19b   :  { %1436 = vmatmul.f32.gmra.mxu1 %v10604_v36  ;;  %1686 = vmatpush.msra.mxu0 %v8553_v19  ;;  %v9590_v19 = vld [vmem:[%s18367_s3 + $0xc0] sm:$0xff] }
 0x19c   :  { %1643 = vmatpush.msrb.mxu3 %v8493_v51  ;;  %v8484_v51 = vld [vmem:[%s18393_s4 + $0xc50] sm:$0xff] }
 0x19d   :  { %1687 = vmatpush.msra.mxu0 %v8550_v43  ;;  %v8544_v43 = vld [vmem:[%s18393_s4 + $0xe30] sm:$0xff] }
 0x19e   :  { %v10975_v3 = vpop.f32.mrf.mxu2  ;;  %1644 = vmatpush.msrb.mxu3 %v8490_v45  ;;  %v8541_v45 = vld [vmem:[%s18393_s4 + $0xe18] sm:$0xff] }
 0x19f   :  { %18460 = vst [vmem:[#allocation93_spill] sm:$0xff] %v10975_v3  ;;  %1524 = vmatmul.f32.gmra.mxu3 %v10499_v52  ;;  %v10978_v60 = vpop.f32.mrf.mxu0  ;;  %v8547_v3 = vld [vmem:[%s18393_s4 + $0xe48] sm:$0xff] }
 0x1a0   :  { %18461 = vst [vmem:[#allocation94_spill] sm:$0xff] %v10978_v60  ;;  %v10986_v57 = vpop.f32.mrf.mxu1  ;;  %1688 = vmatpush.msra.mxu0 %v8547_v3  ;;  %1645 = vmatpush.msrb.mxu3 %v8487_v59  ;;  %v8478_v59 = vld [vmem:[%s18393_s4 + $0xc20] sm:$0xff] }
 0x1a2   :  { %8324 = vmatmul.msk.f32.gmra.mxu0 %vm151_vm0, %v9590_v19  ;;  %1646 = vmatpush.msrb.mxu3 %v8484_v51  ;;  %v8475_v51 = vld [vmem:[%s18393_s4 + $0xc08] sm:$0xff] }
 0x1a3   :  { %1439 = vmatmul.f32.gmra.mxu1 %v10642_v29  ;;  %1689 = vmatpush.msra.mxu0 %v8544_v43  ;;  %v8538_v43 = vld [vmem:[%s18393_s4 + $0xe00] sm:$0xff] }
 0x1a4   :  { %1647 = vmatpush.msrb.mxu3 %v8481_v24  ;;  %v8532_v24 = vld [vmem:[%s18393_s4 + $0xdd0] sm:$0xff] }
 0x1a5   :  { %1690 = vmatpush.msra.mxu0 %v8541_v45  ;;  %v9591_v45 = vld [vmem:[%s18367_s3 + $0xc8] sm:$0xff] }
 0x1a6   :  { %v11013_v19 = vpop.f32.mrf.mxu2  ;;  %1648 = vmatpush.msrb.mxu3 %v8478_v59 }
 0x1a7   :  { %18463 = vst [vmem:[#allocation96_spill] sm:$0xff] %v11013_v19  ;;  %1527 = vmatmul.f32.gmra.mxu3 %v10524_v9  ;;  %v11016_v3 = vpop.f32.mrf.mxu0  ;;  %1691 = vmatpush.msra.mxu0 %v8538_v43  ;;  %v8535_v19 = vld [vmem:[%s18393_s4 + $0xde8] sm:$0xff]  ;;  %v8529_v43 = vld [vmem:[%s18393_s4 + $0xdb8] sm:$0xff] }
 0x1a8   :  { %18464 = vst [vmem:[#allocation97_spill] sm:$0xff] %v11016_v3  ;;  %v11024_v60 = vpop.f32.mrf.mxu1  ;;  %1649 = vmatpush.msrb.mxu3 %v8475_v51  ;;  %v8523_v51 = vld [vmem:[%s18393_s4 + $0xd88] sm:$0xff] }
 0x1a9   :  { %1692 = vmatpush.msra.mxu0 %v8535_v19  ;;  %v8526_v19 = vld [vmem:[%s18393_s4 + $0xda0] sm:$0xff] }
 0x1aa   :  { %v1369_v3 = vpop.f32.mrf.mxu3  ;;  %8325 = vmatmul.msk.f32.gmra.mxu0 %vm151_vm0, %v9591_v45  ;;  %1822 = vmatpush.msra.mxu3 %v8473_v0  ;;  %v8433_v0 = vld [vmem:[%s18393_s4 + $0xab8] sm:$0xff] }
 0x1ab   :  { %1442 = vmatmul.f32.gmra.mxu1 %v10673_v49  ;;  %1693 = vmatpush.msra.mxu0 %v8532_v24  ;;  %v9592_v24 = vld [vmem:[%s18367_s3 + $0xd0] sm:$0xff] }
 0x1ad   :  { %1694 = vmatpush.msra.mxu0 %v8529_v43 }
 0x1ae   :  { %v11043_v16 = vpop.f32.mrf.mxu2 }
 0x1af   :  { %18465 = vst [vmem:[#allocation98_spill] sm:$0xff] %v11043_v16  ;;  %1530 = vmatmul.f32.gmra.mxu3 %v10550_v54  ;;  %v11046_v62 = vpop.f32.mrf.mxu0  ;;  %1695 = vmatpush.msra.mxu0 %v8526_v19 }
 0x1b0   :  { %v11051_v59 = vpop.f32.mrf.mxu1  ;;  %1462 = vmatmul.f32.vlgmr.msrb.gmra.mxu2 %v11046_v62 }
 0x1b1   :  { %1696 = vmatpush.msra.mxu0 %v8523_v51 }
 0x1b2   :  { %v11057_v45 = vpop.f32.mrf.mxu3  ;;  %8326 = vmatmul.msk.f32.gmra.mxu0 %vm151_vm0, %v9592_v24 }
 0x1b3   :  { %1556 = vmatmul.f32.vlgmr.msrb.gmra.mxu1 %v10355_v5 }
 0x1b6   :  { %v11064_v43 = vpop.f32.mrf.mxu2 }
 0x1b7   :  { %18466 = vst [vmem:[#allocation99_spill] sm:$0xff] %v11064_v43  ;;  %1533 = vmatmul.f32.gmra.mxu3 %v10576_v55  ;;  %v11067_v19 = vpop.f32.mrf.mxu0 }
 0x1b8   :  { %18467 = vst [vmem:[#allocation100_spill] sm:$0xff] %v11067_v19  ;;  %v11069_v16 = vpop.f32.mrf.mxu1  ;;  %1465 = vmatmul.f32.gmra.mxu2 %v11067_v19 }
 0x1ba   :  { %v11072_v40 = vpop.f32.mrf.mxu3  ;;  %8327 = vmatmul.msk.f32.gmra.mxu0 %vm151_vm0, %v9593_v38  ;;  %v9594_v38 = vld [vmem:[%s18367_s3 + $0xe0] sm:$0xff] }
 0x1bb   :  { %1559 = vmatmul.f32.gmra.mxu1 %v10383_v13 }
 0x1be   :  { %v11079_v51 = vpop.f32.mrf.mxu2 }
 0x1bf   :  { %18468 = vst [vmem:[#allocation101_spill] sm:$0xff] %v11079_v51  ;;  %1536 = vmatmul.f32.gmra.mxu3 %v10602_v56  ;;  %v11082_v24 = vpop.f32.mrf.mxu0  ;;  %v8469_v51 = vld [vmem:[%s18393_s4 + $0xbd8] sm:$0xff] }
 0x1c0   :  { %v11084_v43 = vpop.f32.mrf.mxu1  ;;  %1468 = vmatmul.f32.gmra.mxu2 %v11082_v24 }
 0x1c1   :  { %1588 = vmatpush.msra.mxu2 %v8469_v51  ;;  %v8371_v51 = vld [vmem:[%s18393_s4 + $0x8c8] sm:$0xff] }
 0x1c2   :  { %v11090_v28 = vpop.f32.mrf.mxu3  ;;  %8328 = vmatmul.msk.f32.gmra.mxu0 %vm151_vm0, %v9594_v38  ;;  %1730 = vmatpush.msra.mxu1 %v8371_v51 }
 0x1c3   :  { %1562 = vmatmul.f32.gmra.mxu1 %v10408_v41  ;;  %1589 = vmatpush.msra.mxu2 %v8466_v18  ;;  %v8470_v41 = vld [vmem:[%s18393_s4 + $0xbe0] sm:$0xff] }
 0x1c4   :  { %1731 = vmatpush.msra.mxu1 %v8368_v39  ;;  %1823 = vmatpush.msra.mxu3 %v8470_v41 }
 0x1c5   :  { %1590 = vmatpush.msra.mxu2 %v8463_v26  ;;  %v8454_v26 = vld [vmem:[%s18393_s4 + $0xb60] sm:$0xff] }
 0x1c6   :  { %v1322_v38 = vpop.f32.mrf.mxu2 }
 0x1c7   :  { %v1323_v11 = vadd.f32 %v1322_v38, %v10910_v7  ;;  %1650 = vmatmul.f32.vlgmr.msrb.gmra.mxu3 %v10406_v30  ;;  %v11111_v10 = vpop.f32.mrf.mxu0  ;;  %v8460_v7 = vld [vmem:[%s18393_s4 + $0xb90] sm:$0xff] }
 0x1c8   :  { %18469 = vst [vmem:[#allocation102_spill] sm:$0xff] %v11111_v10  ;;  %v11119_v12 = vpop.f32.mrf.mxu1  ;;  %1471 = vmatmul.f32.gmra.mxu2 %v11111_v10 }
 0x1c9   :  { %v11122_v18 = vadd.f32 %v1369_v3, %v1323_v11  ;;  %1591 = vmatpush.msra.mxu2 %v8460_v7  ;;  %v8457_v11 = vld [vmem:[%s18393_s4 + $0xb78] sm:$0xff] }
 0x1ca   :  { %v11130_v38 = vpop.f32.mrf.mxu3  ;;  %8329 = vmatmul.msk.f32.gmra.mxu0 %vm151_vm0, %v9595_v4  ;;  %v8365_v3 = vld [vmem:[%s18393_s4 + $0x898] sm:$0xff]  ;;  %v8362_v4 = vld [vmem:[%s18393_s4 + $0x880] sm:$0xff] }
 0x1cb   :  { %1565 = vmatmul.f32.gmra.mxu1 %v10442_v31  ;;  %1592 = vmatpush.msra.mxu2 %v8457_v11  ;;  %v8451_v11 = vld [vmem:[%s18393_s4 + $0xb48] sm:$0xff] }
 0x1cc   :  { %1732 = vmatpush.msra.mxu1 %v8365_v3  ;;  %v8359_v3 = vld [vmem:[%s18393_s4 + $0x868] sm:$0xff] }
 0x1cd   :  { %1593 = vmatpush.msra.mxu2 %v8454_v26  ;;  %v8448_v26 = vld [vmem:[%s18393_s4 + $0xb30] sm:$0xff] }
 0x1ce   :  { %v1325_v51 = vpop.f32.mrf.mxu2  ;;  %1733 = vmatpush.msra.mxu1 %v8362_v4  ;;  %v8356_v4 = vld [vmem:[%s18393_s4 + $0x850] sm:$0xff] }
 0x1cf   :  { %v1326_v7 = vadd.f32 %v1325_v51, %v10952_v35  ;;  %1653 = vmatmul.f32.gmra.mxu3 %v10437_v23  ;;  %v11151_v39 = vpop.f32.mrf.mxu0  ;;  %1594 = vmatpush.msra.mxu2 %v8451_v11  ;;  %v8442_v11 = vld [vmem:[%s18393_s4 + $0xb00] sm:$0xff] }
 0x1d0   :  { %18470 = vst [vmem:[#allocation103_spill] sm:$0xff] %v11151_v39  ;;  %v11159_v31 = vpop.f32.mrf.mxu1  ;;  %1474 = vmatmul.f32.gmra.mxu2 %v11151_v39  ;;  %1734 = vmatpush.msra.mxu1 %v8359_v3  ;;  %v8350_v3 = vld [vmem:[%s18393_s4 + $0x820] sm:$0xff] }
 0x1d1   :  { %v11163_v35 = vadd.f32 %v11057_v45, %v1326_v7  ;;  %1595 = vmatpush.msra.mxu2 %v8448_v26  ;;  %v8445_v45 = vld [vmem:[%s18393_s4 + $0xb18] sm:$0xff] }
 0x1d2   :  { %v11171_v51 = vpop.f32.mrf.mxu3  ;;  %1697 = vmatmul.f32.vlgmr.msra.gmra.mxu0 %v11046_v62  ;;  %1735 = vmatpush.msra.mxu1 %v8356_v4  ;;  %v8353_v7 = vld [vmem:[%s18393_s4 + $0x838] sm:$0xff] }
 0x1d3   :  { %1568 = vmatmul.f32.gmra.mxu1 %v10479_v48  ;;  %1596 = vmatpush.msra.mxu2 %v8445_v45  ;;  %v8439_v45 = vld [vmem:[%s18393_s4 + $0xae8] sm:$0xff] }
 0x1d4   :  { %1736 = vmatpush.msra.mxu1 %v8353_v7  ;;  %v8347_v7 = vld [vmem:[%s18393_s4 + $0x808] sm:$0xff] }
 0x1d5   :  { %1597 = vmatpush.msra.mxu2 %v8442_v11  ;;  %v8436_v11 = vld [vmem:[%s18393_s4 + $0xad0] sm:$0xff] }
 0x1d6   :  { %v1328_v4 = vpop.f32.mrf.mxu2  ;;  %1737 = vmatpush.msra.mxu1 %v8350_v3 }
 0x1d7   :  { %v1329_v26 = vadd.f32 %v1328_v4, %v10986_v57  ;;  %1656 = vmatmul.f32.gmra.mxu3 %v10474_v25  ;;  %v11189_v48 = vpop.f32.mrf.mxu0  ;;  %1598 = vmatpush.msra.mxu2 %v8439_v45  ;;  %v8344_v4 = vld [vmem:[%s18393_s4 + $0x7f0] sm:$0xff]  ;;  %v8430_v45 = vld [vmem:[%s18393_s4 + $0xaa0] sm:$0xff] }
 0x1d8   :  { %v11200_v3 = vpop.f32.mrf.mxu1  ;;  %1477 = vmatmul.f32.gmra.mxu2 %v11189_v48  ;;  %1738 = vmatpush.msra.mxu1 %v8347_v7  ;;  %v8338_v7 = vld [vmem:[%s18393_s4 + $0x7c0] sm:$0xff] }
 0x1d9   :  { %v11204_v57 = vadd.f32 %v11072_v40, %v1329_v26  ;;  %1599 = vmatpush.msra.mxu2 %v8436_v11  ;;  %v8341_v40 = vld [vmem:[%s18393_s4 + $0x7d8] sm:$0xff]  ;;  %v8467_v26 = vld [vmem:[%s18393_s4 + $0xbc8] sm:$0xff]  ;;  %v8464_v11 = vld [vmem:[%s18393_s4 + $0xbb0] sm:$0xff] }
 0x1da   :  { %v11215_v13 = vpop.f32.mrf.mxu3  ;;  %1700 = vmatmul.f32.gmra.mxu0 %v11067_v19  ;;  %1739 = vmatpush.msra.mxu1 %v8344_v4 }
 0x1db   :  { %1571 = vmatmul.f32.gmra.mxu1 %v10506_v46  ;;  %1600 = vmatpush.msra.mxu2 %v8433_v0  ;;  %v8427_v0 = vld [vmem:[%s18393_s4 + $0xa88] sm:$0xff] }
 0x1dc   :  { %1740 = vmatpush.msra.mxu1 %v8341_v40  ;;  %1824 = vmatpush.msra.mxu3 %v8467_v26  ;;  %v8335_v40 = vld [vmem:[%s18393_s4 + $0x7a8] sm:$0xff]  ;;  %v8461_v26 = vld [vmem:[%s18393_s4 + $0xb98] sm:$0xff] }
 0x1dd   :  { %1601 = vmatpush.msra.mxu2 %v8430_v45  ;;  %v8332_v45 = vld [vmem:[%s18393_s4 + $0x790] sm:$0xff] }
 0x1de   :  { %v1331_v4 = vpop.f32.mrf.mxu2  ;;  %1741 = vmatpush.msra.mxu1 %v8338_v7  ;;  %1825 = vmatpush.msra.mxu3 %v8464_v11  ;;  %v8452_v11 = vld [vmem:[%s18393_s4 + $0xb50] sm:$0xff] }
 0x1df   :  { %v1332_v46 = vadd.f32 %v1331_v4, %v11024_v60  ;;  %1659 = vmatmul.f32.gmra.mxu3 %v10501_v27  ;;  %v11239_v41 = vpop.f32.mrf.mxu0  ;;  %1602 = vmatpush.msra.mxu2 %v8427_v0  ;;  %v8458_v4 = vld [vmem:[%s18393_s4 + $0xb80] sm:$0xff] }
 0x1e0   :  { %v11250_v7 = vpop.f32.mrf.mxu1  ;;  %1480 = vmatmul.f32.gmra.mxu2 %v11239_v41  ;;  %1742 = vmatpush.msra.mxu1 %v8335_v40  ;;  %v8518_v0 = vld [vmem:[%s18393_s4 + $0xd60] sm:$0xff] }
 0x1e1   :  { %v11254_v60 = vadd.f32 %v11090_v28, %v1332_v46  ;;  %1826 = vmatpush.msra.mxu3 %v8461_v26  ;;  %v8455_v28 = vld [vmem:[%s18393_s4 + $0xb68] sm:$0xff]  ;;  %v8521_v46 = vld [vmem:[%s18393_s4 + $0xd78] sm:$0xff] }
 0x1e2   :  { %v11262_v19 = vpop.f32.mrf.mxu3  ;;  %1703 = vmatmul.f32.gmra.mxu0 %v11082_v24  ;;  %1743 = vmatpush.msra.mxu1 %v8332_v45  ;;  %v8449_v45 = vld [vmem:[%s18393_s4 + $0xb38] sm:$0xff] }
 0x1e3   :  { %1574 = vmatmul.f32.gmra.mxu1 %v10531_v50  ;;  %1827 = vmatpush.msra.mxu3 %v8458_v4  ;;  %v8515_v4 = vld [vmem:[%s18393_s4 + $0xd48] sm:$0xff] }
 0x1e4   :  { %1869 = vmatpush.msrb.mxu0 %v8521_v46 }
 0x1e5   :  { %1828 = vmatpush.msra.mxu3 %v8455_v28  ;;  %v8446_v28 = vld [vmem:[%s18393_s4 + $0xb20] sm:$0xff] }
 0x1e6   :  { %v1334_v40 = vpop.f32.mrf.mxu2  ;;  %1870 = vmatpush.msrb.mxu0 %v8518_v0  ;;  %v8512_v0 = vld [vmem:[%s18393_s4 + $0xd30] sm:$0xff] }
 0x1e7   :  { %v1335_v26 = vadd.f32 %v1334_v40, %v11051_v59  ;;  %1662 = vmatmul.f32.gmra.mxu3 %v10526_v53  ;;  %v11280_v50 = vpop.f32.mrf.mxu0 }
 0x1e8   :  { %v11288_v46 = vpop.f32.mrf.mxu1  ;;  %1483 = vmatmul.f32.gmra.mxu2 %v11280_v50  ;;  %1829 = vmatpush.msra.mxu3 %v8452_v11  ;;  %v8509_v11 = vld [vmem:[%s18393_s4 + $0xd18] sm:$0xff] }
 0x1e9   :  { %v11292_v59 = vadd.f32 %v11130_v38, %v1335_v26  ;;  %1871 = vmatpush.msrb.mxu0 %v8515_v4  ;;  %v8443_v38 = vld [vmem:[%s18393_s4 + $0xb08] sm:$0xff]  ;;  %v8440_v26 = vld [vmem:[%s18393_s4 + $0xaf0] sm:$0xff] }
 0x1ea   :  { %v11300_v40 = vpop.f32.mrf.mxu3  ;;  %1706 = vmatmul.f32.gmra.mxu0 %v11111_v10  ;;  %1830 = vmatpush.msra.mxu3 %v8449_v45  ;;  %v8506_v45 = vld [vmem:[%s18393_s4 + $0xd00] sm:$0xff] }
 0x1eb   :  { %1577 = vmatmul.f32.gmra.mxu1 %v10557_v17  ;;  %1872 = vmatpush.msrb.mxu0 %v8512_v0 }
 0x1ec   :  { %1831 = vmatpush.msra.mxu3 %v8446_v28  ;;  %v8437_v28 = vld [vmem:[%s18393_s4 + $0xad8] sm:$0xff] }
 0x1ed   :  { %1873 = vmatpush.msrb.mxu0 %v8509_v11  ;;  %v8503_v11 = vld [vmem:[%s18393_s4 + $0xce8] sm:$0xff] }
 0x1ee   :  { %v1337_v4 = vpop.f32.mrf.mxu2  ;;  %1832 = vmatpush.msra.mxu3 %v8443_v38  ;;  %v8434_v38 = vld [vmem:[%s18393_s4 + $0xac0] sm:$0xff] }
 0x1ef   :  { %v1338_v0 = vadd.f32 %v1337_v4, %v11069_v16  ;;  %1665 = vmatmul.f32.gmra.mxu3 %v10552_v33  ;;  %v11318_v17 = vpop.f32.mrf.mxu0  ;;  %1874 = vmatpush.msrb.mxu0 %v8506_v45  ;;  %v8500_v45 = vld [vmem:[%s18393_s4 + $0xcd0] sm:$0xff] }
 0x1f0   :  { %v11326_v10 = vpop.f32.mrf.mxu1  ;;  %1486 = vmatmul.f32.gmra.mxu2 %v11318_v17  ;;  %1833 = vmatpush.msra.mxu3 %v8440_v26  ;;  %v8497_v26 = vld [vmem:[%s18393_s4 + $0xcb8] sm:$0xff] }
 0x1f1   :  { %v11330_v16 = vadd.f32 %v11171_v51, %v1338_v0  ;;  %1875 = vmatpush.msrb.mxu0 %v8503_v11  ;;  %v8431_v51 = vld [vmem:[%s18393_s4 + $0xaa8] sm:$0xff]  ;;  %v8494_v0 = vld [vmem:[%s18393_s4 + $0xca0] sm:$0xff] }
 0x1f2   :  { %v1396_v4 = vpop.f32.mrf.mxu3  ;;  %1709 = vmatmul.f32.gmra.mxu0 %v11151_v39  ;;  %1834 = vmatpush.msra.mxu3 %v8437_v28  ;;  %v8428_v28 = vld [vmem:[%s18393_s4 + $0xa90] sm:$0xff] }
 0x1f3   :  { %1580 = vmatmul.f32.gmra.mxu1 %v10583_v2  ;;  %1876 = vmatpush.msrb.mxu0 %v8500_v45 }
 0x1f4   :  { %1835 = vmatpush.msra.mxu3 %v8434_v38  ;;  %v8491_v38 = vld [vmem:[%s18393_s4 + $0xc88] sm:$0xff] }
 0x1f5   :  { %1877 = vmatpush.msrb.mxu0 %v8497_v26 }
 0x1f6   :  { %v1340_v11 = vpop.f32.mrf.mxu2  ;;  %1836 = vmatpush.msra.mxu3 %v8431_v51 }
 0x1f7   :  { %v1341_v45 = vadd.f32 %v1340_v11, %v11084_v43  ;;  %1668 = vmatmul.f32.gmra.mxu3 %v10578_v6  ;;  %v11354_v2 = vpop.f32.mrf.mxu0  ;;  %1878 = vmatpush.msrb.mxu0 %v8494_v0  ;;  %v8488_v43 = vld [vmem:[%s18393_s4 + $0xc70] sm:$0xff]  ;;  %v8485_v0 = vld [vmem:[%s18393_s4 + $0xc58] sm:$0xff] }
 0x1f8   :  { %v11359_v39 = vpop.f32.mrf.mxu1  ;;  %1489 = vmatmul.f32.gmra.mxu2 %v11354_v2  ;;  %1837 = vmatpush.msra.mxu3 %v8428_v28 }
 0x1f9   :  { %v11363_v26 = vadd.f32 %v11215_v13, %v1341_v45  ;;  %1879 = vmatpush.msrb.mxu0 %v8491_v38  ;;  %v8482_v13 = vld [vmem:[%s18393_s4 + $0xc40] sm:$0xff]  ;;  %v8479_v38 = vld [vmem:[%s18393_s4 + $0xc28] sm:$0xff] }
 0x1fa   :  { %v11368_v51 = vpop.f32.mrf.mxu3  ;;  %1712 = vmatmul.f32.gmra.mxu0 %v11189_v48 }
 0x1fb   :  { %1583 = vmatmul.f32.gmra.mxu1 %v10612_v8  ;;  %1880 = vmatpush.msrb.mxu0 %v8488_v43 }
 0x1fd   :  { %1881 = vmatpush.msrb.mxu0 %v8485_v0 }
 0x1fe   :  { %v1343_v28 = vpop.f32.mrf.mxu2 }
 0x1ff   :  { %v1344_v11 = vadd.f32 %v1343_v28, %v11119_v12  ;;  %1671 = vmatmul.f32.gmra.mxu3 %v10604_v36  ;;  %v11380_v45 = vpop.f32.mrf.mxu0  ;;  %1882 = vmatpush.msrb.mxu0 %v8482_v13  ;;  %v8476_v12 = vld [vmem:[%s18393_s4 + $0xc10] sm:$0xff] }
 0x200   :  { %18471 = vst [vmem:[#allocation104_spill] sm:$0xff] %v11380_v45  ;;  %v11385_v43 = vpop.f32.mrf.mxu1  ;;  %1603 = vmatmul.f32.vlgmr.msra.gmra.mxu2 %v10547_v22 }
 0x201   :  { %v11389_v8 = vadd.f32 %v11262_v19, %v1344_v11  ;;  %1883 = vmatpush.msrb.mxu0 %v8479_v38 }
 0x202   :  { %v11394_v0 = vpop.f32.mrf.mxu3  ;;  %1715 = vmatmul.f32.gmra.mxu0 %v11239_v41 }
 0x203   :  { %1744 = vmatmul.f32.vlgmr.msra.gmra.mxu1 %v10348_v21  ;;  %1884 = vmatpush.msrb.mxu0 %v8476_v12 }
 0x206   :  { %v1346_v13 = vpop.f32.mrf.mxu2 }
 0x207   :  { %v1347_v28 = vadd.f32 %v1346_v13, %v11159_v31  ;;  %1674 = vmatmul.f32.gmra.mxu3 %v10642_v29  ;;  %v11400_v45 = vpop.f32.mrf.mxu0 }
 0x208   :  { %18472 = vst [vmem:[#allocation105_spill] sm:$0xff] %v11400_v45  ;;  %v11402_v19 = vpop.f32.mrf.mxu1  ;;  %1606 = vmatmul.f32.gmra.mxu2 %v10573_v37 }
 0x209   :  { %v11406_v11 = vadd.f32 %v11300_v40, %v1347_v28  ;;  %v8425_v40 = vld [vmem:[%s18393_s4 + $0xa78] sm:$0xff] }
 0x20a   :  { %v11408_v38 = vpop.f32.mrf.mxu3  ;;  %1718 = vmatmul.f32.gmra.mxu0 %v11280_v50  ;;  %1775 = vmatpush.msrb.mxu2 %v8425_v40  ;;  %v8563_v40 = vld [vmem:[%s18393_s4 + $0xec8] sm:$0xff] }
 0x20b   :  { %1747 = vmatmul.f32.gmra.mxu1 %v10379_v1  ;;  %v8422_v1 = vld [vmem:[%s18393_s4 + $0xa60] sm:$0xff] }
 0x20c   :  { %1776 = vmatpush.msrb.mxu2 %v8422_v1 }
 0x20e   :  { %v1349_v21 = vpop.f32.mrf.mxu2 }
 0x20f   :  { %v1350_v31 = vadd.f32 %v1349_v21, %v11200_v3  ;;  %1677 = vmatmul.f32.gmra.mxu3 %v10673_v49  ;;  %v11414_v12 = vpop.f32.mrf.mxu0  ;;  %v8569_v3 = vld [vmem:[%s18393_s4 + $0xef8] sm:$0xff]  ;;  %v8566_v21 = vld [vmem:[%s18393_s4 + $0xee0] sm:$0xff] }
 0x210   :  { %18473 = vst [vmem:[#allocation106_spill] sm:$0xff] %v11414_v12  ;;  %v11416_v13 = vpop.f32.mrf.mxu1  ;;  %1609 = vmatmul.f32.gmra.mxu2 %v10599_v32  ;;  %1916 = vmatpush.msrb.mxu1 %v8569_v3  ;;  %v8560_v3 = vld [vmem:[%s18393_s4 + $0xeb0] sm:$0xff] }
 0x211   :  { %v11419_v45 = vadd.f32 %v1396_v4, %v1350_v31  ;;  %v8419_v4 = vld [vmem:[%s18393_s4 + $0xa48] sm:$0xff]  ;;  %v8416_v31 = vld [vmem:[%s18393_s4 + $0xa30] sm:$0xff] }
 0x212   :  { %v11424_v28 = vpop.f32.mrf.mxu3  ;;  %1721 = vmatmul.f32.gmra.mxu0 %v11318_v17  ;;  %1777 = vmatpush.msrb.mxu2 %v8419_v4 }
 0x213   :  { %1750 = vmatmul.f32.gmra.mxu1 %v10404_v14 }
 0x214   :  { %1917 = vmatpush.msrb.mxu1 %v8566_v21  ;;  %1778 = vmatpush.msrb.mxu2 %v8416_v31  ;;  %v8410_v21 = vld [vmem:[%s18393_s4 + $0xa00] sm:$0xff]  ;;  %v8557_v31 = vld [vmem:[%s18393_s4 + $0xe98] sm:$0xff] }
 0x216   :  { %1918 = vmatpush.msrb.mxu1 %v8563_v40  ;;  %v8407_v40 = vld [vmem:[%s18393_s4 + $0x9e8] sm:$0xff] }
 0x217   :  { %1838 = vmatmul.f32.vlgmr.msra.gmra.mxu3 %v10547_v22  ;;  %v11441_v14 = vpop.f32.mrf.mxu0  ;;  %v8413_v22 = vld [vmem:[%s18393_s4 + $0xa18] sm:$0xff] }
 0x218   :  { %18474 = vst [vmem:[#allocation107_spill] sm:$0xff] %v11441_v14  ;;  %v11449_v1 = vpop.f32.mrf.mxu1  ;;  %1612 = vmatmul.f32.gmra.mxu2 %v10637_v47  ;;  %1919 = vmatpush.msrb.mxu1 %v8560_v3  ;;  %v8554_v3 = vld [vmem:[%s18393_s4 + $0xe80] sm:$0xff] }
 0x219   :  { %1779 = vmatpush.msrb.mxu2 %v8413_v22  ;;  %v8404_v22 = vld [vmem:[%s18393_s4 + $0x9d0] sm:$0xff] }
 0x21a   :  { %v11458_v4 = vpop.f32.mrf.mxu3  ;;  %1724 = vmatmul.f32.gmra.mxu0 %v11354_v2  ;;  %1920 = vmatpush.msrb.mxu1 %v8557_v31  ;;  %v8551_v31 = vld [vmem:[%s18393_s4 + $0xe68] sm:$0xff] }
 0x21b   :  { %1753 = vmatmul.f32.gmra.mxu1 %v10435_v44  ;;  %1780 = vmatpush.msrb.mxu2 %v8410_v21  ;;  %v8548_v21 = vld [vmem:[%s18393_s4 + $0xe50] sm:$0xff] }
 0x21c   :  { %1921 = vmatpush.msrb.mxu1 %v8554_v3  ;;  %v8398_v3 = vld [vmem:[%s18393_s4 + $0x9a0] sm:$0xff] }
 0x21d   :  { %1781 = vmatpush.msrb.mxu2 %v8407_v40 }
 0x21e   :  { %1922 = vmatpush.msrb.mxu1 %v8551_v31  ;;  %v8395_v31 = vld [vmem:[%s18393_s4 + $0x988] sm:$0xff] }
 0x21f   :  { %1841 = vmatmul.f32.gmra.mxu3 %v10573_v37  ;;  %v11475_v44 = vpop.f32.mrf.mxu0  ;;  %1782 = vmatpush.msrb.mxu2 %v8404_v22  ;;  %v8401_v37 = vld [vmem:[%s18393_s4 + $0x9b8] sm:$0xff] }
 0x220   :  { %18475 = vst [vmem:[#allocation108_spill] sm:$0xff] %v11475_v44  ;;  %v11483_v14 = vpop.f32.mrf.mxu1  ;;  %1615 = vmatmul.f32.gmra.mxu2 %v10668_v34  ;;  %1923 = vmatpush.msrb.mxu1 %v8548_v21  ;;  %v8545_v22 = vld [vmem:[%s18393_s4 + $0xe38] sm:$0xff]  ;;  %v8539_v21 = vld [vmem:[%s18393_s4 + $0xe08] sm:$0xff] }
 0x221   :  { %1783 = vmatpush.msrb.mxu2 %v8401_v37  ;;  %v8392_v37 = vld [vmem:[%s18393_s4 + $0x970] sm:$0xff] }
 0x222   :  { %v11492_v40 = vpop.f32.mrf.mxu3  ;;  %1885 = vmatmul.f32.vlgmr.msrb.gmra.mxu0 %v10406_v30  ;;  %1924 = vmatpush.msrb.mxu1 %v8545_v22  ;;  %v8542_v30 = vld [vmem:[%s18393_s4 + $0xe20] sm:$0xff]  ;;  %v870_v22 = vld [vmem:[%s18393_s4 + $0x2e8] sm:$0xff] }
 0x223   :  { %1756 = vmatmul.f32.gmra.mxu1 %v10472_v15  ;;  %1784 = vmatpush.msrb.mxu2 %v8398_v3  ;;  %v8536_v3 = vld [vmem:[%s18393_s4 + $0xdf0] sm:$0xff] }
 0x224   :  { %1925 = vmatpush.msrb.mxu1 %v8542_v30  ;;  %2251 = vmatpush.msrb.mxu3 %v870_v22  ;;  %v864_v22 = vld [vmem:[%s18393_s4 + $0x2b8] sm:$0xff] }
 0x225   :  { %1785 = vmatpush.msrb.mxu2 %v8395_v31  ;;  %v867_v31 = vld [vmem:[%s18393_s4 + $0x2d0] sm:$0xff] }
 0x226   :  { %1926 = vmatpush.msrb.mxu1 %v8539_v21  ;;  %v8533_v21 = vld [vmem:[%s18393_s4 + $0xdd8] sm:$0xff]  ;;  %2252 = vmatpush.msrb.mxu3 %v867_v31  ;;  %v8380_v31 = vld [vmem:[%s18393_s4 + $0x910] sm:$0xff] }
 0x227   :  { %1844 = vmatmul.f32.gmra.mxu3 %v10599_v32  ;;  %v11509_v15 = vpop.f32.mrf.mxu0  ;;  %1786 = vmatpush.msrb.mxu2 %v8392_v37  ;;  %v8389_v32 = vld [vmem:[%s18393_s4 + $0x958] sm:$0xff]  ;;  %v8386_v37 = vld [vmem:[%s18393_s4 + $0x940] sm:$0xff] }
 0x228   :  { %18476 = vst [vmem:[#allocation109_spill] sm:$0xff] %v11509_v15  ;;  %v11520_v44 = vpop.f32.mrf.mxu1  ;;  %1618 = vmatmul.f32.gmra.mxu2 %v10693_v20  ;;  %1927 = vmatpush.msrb.mxu1 %v8536_v3 }
 0x229   :  { %1787 = vmatpush.msrb.mxu2 %v8389_v32  ;;  %v861_v32 = vld [vmem:[%s18393_s4 + $0x2a0] sm:$0xff]  ;;  %2253 = vmatpush.msrb.mxu3 %v864_v22  ;;  %v855_v22 = vld [vmem:[%s18393_s4 + $0x270] sm:$0xff] }
 0x22a   :  { %v11532_v30 = vpop.f32.mrf.mxu3  ;;  %1888 = vmatmul.f32.gmra.mxu0 %v10437_v23  ;;  %1928 = vmatpush.msrb.mxu1 %v8533_v21  ;;  %v8383_v23 = vld [vmem:[%s18393_s4 + $0x928] sm:$0xff] }
 0x22b   :  { %1759 = vmatmul.f32.gmra.mxu1 %v10499_v52  ;;  %v8530_v52 = vld [vmem:[%s18393_s4 + $0xdc0] sm:$0xff]  ;;  %1788 = vmatpush.msrb.mxu2 %v8386_v37  ;;  %v8527_v21 = vld [vmem:[%s18393_s4 + $0xda8] sm:$0xff] }
 0x22c   :  { %1929 = vmatpush.msrb.mxu1 %v8530_v52  ;;  %v858_v37 = vld [vmem:[%s18393_s4 + $0x288] sm:$0xff]  ;;  %2254 = vmatpush.msrb.mxu3 %v861_v32 }
 0x22d   :  { %1789 = vmatpush.msrb.mxu2 %v8383_v23  ;;  %v1417_v23 = vadd.f32 %v11250_v7, %v11122_v18  ;;  %v846_v7 = vld [vmem:[%s18393_s4 + $0x228] sm:$0xff] }
 0x22e   :  { %1930 = vmatpush.msrb.mxu1 %v8527_v21  ;;  %2255 = vmatpush.msrb.mxu3 %v858_v37  ;;  %v918_v21 = vld [vmem:[%s18393_s4 + $0x468] sm:$0xff]  ;;  %v912_v37 = vld [vmem:[%s18393_s4 + $0x438] sm:$0xff] }
 0x22f   :  { %1847 = vmatmul.f32.gmra.mxu3 %v10637_v47  ;;  %v11555_v3 = vpop.f32.mrf.mxu0  ;;  %1790 = vmatpush.msrb.mxu2 %v8380_v31  ;;  %v8524_v47 = vld [vmem:[%s18393_s4 + $0xd90] sm:$0xff]  ;;  %v852_v31 = vld [vmem:[%s18393_s4 + $0x258] sm:$0xff] }
 0x230   :  { %18477 = vst [vmem:[#allocation110_spill] sm:$0xff] %v11555_v3  ;;  %v11566_v15 = vpop.f32.mrf.mxu1  ;;  %1621 = vmatmul.f32.gmra.mxu2 %v10718_v58  ;;  %1931 = vmatpush.msrb.mxu1 %v8524_v47 }
 0x231   :  { %2256 = vmatpush.msrb.mxu3 %v855_v22  ;;  %2298 = vmatpush.msra.mxu0 %v918_v21  ;;  %v909_v22 = vld [vmem:[%s18393_s4 + $0x420] sm:$0xff]  ;;  %v840_v21 = vld [vmem:[%s18393_s4 + $0x1f8] sm:$0xff] }
 0x232   :  { %v11577_v52 = vpop.f32.mrf.mxu3  ;;  %1891 = vmatmul.f32.gmra.mxu0 %v10474_v25  ;;  %v915_v25 = vld [vmem:[%s18393_s4 + $0x450] sm:$0xff] }
 0x233   :  { %1762 = vmatmul.f32.gmra.mxu1 %v10524_v9  ;;  %v1463_v32 = vpop.f32.mrf.mxu2  ;;  %v849_v9 = vld [vmem:[%s18393_s4 + $0x240] sm:$0xff]  ;;  %2257 = vmatpush.msrb.mxu3 %v852_v31 }
 0x234   :  { %v11587_v3 = vadd.f32 %v1463_v32, %v1417_v23  ;;  %2299 = vmatpush.msra.mxu0 %v915_v25  ;;  %v1420_v23 = vadd.f32 %v11288_v46, %v11163_v35  ;;  %v906_v25 = vld [vmem:[%s18393_s4 + $0x408] sm:$0xff] }
 0x235   :  { %2258 = vmatpush.msrb.mxu3 %v849_v9  ;;  %v834_v46 = vld [vmem:[%s18393_s4 + $0x1c8] sm:$0xff] }
 0x236   :  { %2300 = vmatpush.msra.mxu0 %v912_v37 }
 0x237   :  { %1850 = vmatmul.f32.gmra.mxu3 %v10668_v34  ;;  %v11596_v18 = vpop.f32.mrf.mxu0  ;;  %v843_v34 = vld [vmem:[%s18393_s4 + $0x210] sm:$0xff] }
 0x238   :  { %18478 = vst [vmem:[#allocation111_spill] sm:$0xff] %v11596_v18  ;;  %v11604_v47 = vpop.f32.mrf.mxu1  ;;  %1624 = vmatmul.f32.gmra.mxu2 %v10731_v42  ;;  %2259 = vmatpush.msrb.mxu3 %v846_v7  ;;  %v900_v7 = vld [vmem:[%s18393_s4 + $0x3d8] sm:$0xff]  ;;  %v1558_v18 = vadd.f32 %v11566_v15, %v11368_v51  ;;  %v802_v51 = vld [vmem:[%s18393_s4 + $0xc8] sm:$0xff] }
 0x239   :  { %2301 = vmatpush.msra.mxu0 %v909_v22  ;;  %v1423_v22 = vadd.f32 %v11326_v10, %v11204_v57  ;;  %v891_v10 = vld [vmem:[%s18393_s4 + $0x390] sm:$0xff]  ;;  %v888_v57 = vld [vmem:[%s18393_s4 + $0x378] sm:$0xff] }
 0x23a   :  { %v11615_v32 = vpop.f32.mrf.mxu3  ;;  %1894 = vmatmul.f32.gmra.mxu0 %v10501_v27  ;;  %2260 = vmatpush.msrb.mxu3 %v843_v34  ;;  %v903_v27 = vld [vmem:[%s18393_s4 + $0x3f0] sm:$0xff]  ;;  %v897_v34 = vld [vmem:[%s18393_s4 + $0x3c0] sm:$0xff] }
 0x23b   :  { %1765 = vmatmul.f32.gmra.mxu1 %v10550_v54  ;;  %v1466_v31 = vpop.f32.mrf.mxu2  ;;  %2302 = vmatpush.msra.mxu0 %v906_v25  ;;  %v837_v54 = vld [vmem:[%s18393_s4 + $0x1e0] sm:$0xff]  ;;  %v894_v25 = vld [vmem:[%s18393_s4 + $0x3a8] sm:$0xff] }
 0x23c   :  { %v11625_v9 = vadd.f32 %v1466_v31, %v1420_v23  ;;  %2261 = vmatpush.msrb.mxu3 %v840_v21  ;;  %v828_v21 = vld [vmem:[%s18393_s4 + $0x198] sm:$0xff] }
 0x23d   :  { %2303 = vmatpush.msra.mxu0 %v903_v27 }
 0x23e   :  { %2262 = vmatpush.msrb.mxu3 %v837_v54 }
 0x23f   :  { %1853 = vmatmul.f32.gmra.mxu3 %v10693_v20  ;;  %v11634_v35 = vpop.f32.mrf.mxu0  ;;  %2304 = vmatpush.msra.mxu0 %v900_v7  ;;  %v831_v20 = vld [vmem:[%s18393_s4 + $0x1b0] sm:$0xff] }
 0x240   :  { %18479 = vst [vmem:[#allocation112_spill] sm:$0xff] %v11634_v35  ;;  %v11642_v37 = vpop.f32.mrf.mxu1  ;;  %1627 = vmatmul.f32.gmra.mxu2 %v10744_v61  ;;  %2263 = vmatpush.msrb.mxu3 %v834_v46  ;;  %v885_v46 = vld [vmem:[%s18393_s4 + $0x360] sm:$0xff] }
 0x241   :  { %2305 = vmatpush.msra.mxu0 %v897_v34  ;;  %v882_v34 = vld [vmem:[%s18393_s4 + $0x348] sm:$0xff]  ;;  %v18501_v35 = vld [vmem:[#allocation14_spill] sm:$0xff] }
 0x242   :  { %v11653_v23 = vpop.f32.mrf.mxu3  ;;  %1897 = vmatmul.f32.gmra.mxu0 %v10526_v53  ;;  %2264 = vmatpush.msrb.mxu3 %v831_v20  ;;  %v825_v53 = vld [vmem:[%s18393_s4 + $0x180] sm:$0xff] }
 0x243   :  { %1768 = vmatmul.f32.gmra.mxu1 %v10576_v55  ;;  %v1469_v31 = vpop.f32.mrf.mxu2  ;;  %2306 = vmatpush.msra.mxu0 %v894_v25 }
 0x244   :  { %v11663_v27 = vadd.f32 %v1469_v31, %v1423_v22  ;;  %2265 = vmatpush.msrb.mxu3 %v828_v21  ;;  %v879_v31 = vld [vmem:[%s18393_s4 + $0x330] sm:$0xff]  ;;  %v1429_v21 = vadd.f32 %v11385_v43, %v11292_v59  ;;  %v1432_v59 = vadd.f32 %v11402_v19, %v11330_v16  ;;  %v822_v16 = vld [vmem:[%s18393_s4 + $0x168] sm:$0xff] }
 0x245   :  { %2307 = vmatpush.msra.mxu0 %v891_v10  ;;  %2204 = vmatpush.msra.mxu2 %v822_v16  ;;  %v18490_v16 = vld [vmem:[#allocation102_spill] sm:$0xff] }
 0x246   :  { %2266 = vmatpush.msrb.mxu3 %v825_v53 }
 0x247   :  { %1856 = vmatmul.f32.gmra.mxu3 %v10718_v58  ;;  %v11672_v55 = vpop.f32.mrf.mxu0  ;;  %2308 = vmatpush.msra.mxu0 %v888_v57  ;;  %v1426_v58 = vadd.f32 %v11359_v39, %v11254_v60  ;;  %v873_v60 = vld [vmem:[%s18393_s4 + $0x300] sm:$0xff]  ;;  %v18483_v57 = vld [vmem:[#allocation43_spill] sm:$0xff] }
 0x248   :  { %18480 = vst [vmem:[#allocation113_spill] sm:$0xff] %v11672_v55  ;;  %v11677_v54 = vpop.f32.mrf.mxu1  ;;  %1630 = vmatmul.f32.gmra.mxu2 %v10757_v63 }
 0x249   :  { %2309 = vmatpush.msra.mxu0 %v885_v46 }
 0x24a   :  { %v11685_v7 = vpop.f32.mrf.mxu3  ;;  %1900 = vmatmul.f32.gmra.mxu0 %v10552_v33  ;;  %v876_v33 = vld [vmem:[%s18393_s4 + $0x318] sm:$0xff] }
 0x24b   :  { %1771 = vmatmul.f32.gmra.mxu1 %v10602_v56  ;;  %v1472_v20 = vpop.f32.mrf.mxu2  ;;  %2310 = vmatpush.msra.mxu0 %v882_v34  ;;  %v819_v34 = vld [vmem:[%s18393_s4 + $0x150] sm:$0xff] }
 0x24c   :  { %v11692_v22 = vadd.f32 %v1472_v20, %v1426_v58  ;;  %v18486_v20 = vld [vmem:[#allocation45_spill] sm:$0xff]  ;;  %2205 = vmatpush.msra.mxu2 %v819_v34  ;;  %v954_v34 = vld [vmem:[%s18393_s4 + $0x588] sm:$0xff] }
 0x24d   :  { %2311 = vmatpush.msra.mxu0 %v879_v31  ;;  %v966_v31 = vld [vmem:[%s18393_s4 + $0x5e8] sm:$0xff] }
 0x24e   :  { %18481 = vst [vmem:[#allocation114_spill] sm:$0xff] %v11692_v22  ;;  %2345 = vmatpush.msra.mxu1 %v966_v31 }
 0x24f   :  { %1859 = vmatmul.f32.gmra.mxu3 %v10731_v42  ;;  %v11698_v39 = vpop.f32.mrf.mxu0  ;;  %2312 = vmatpush.msra.mxu0 %v876_v33 }
 0x250   :  { %v11703_v56 = vpop.f32.mrf.mxu1  ;;  %1791 = vmatmul.f32.vlgmr.msrb.gmra.mxu2 %v10355_v5 }
 0x251   :  { %2313 = vmatpush.msra.mxu0 %v873_v60  ;;  %v813_v60 = vld [vmem:[%s18393_s4 + $0x120] sm:$0xff] }
 0x252   :  { %v11711_v42 = vpop.f32.mrf.mxu3  ;;  %1903 = vmatmul.f32.gmra.mxu0 %v10578_v6  ;;  %v18484_v6 = vld [vmem:[#allocation100_spill] sm:$0xff] }
 0x253   :  { %1932 = vmatmul.f32.vlgmr.msrb.gmra.mxu1 %v11046_v62  ;;  %v1475_v25 = vpop.f32.mrf.mxu2 }
 0x254   :  { %v11715_v10 = vadd.f32 %v1475_v25, %v1429_v21  ;;  %v960_v21 = vld [vmem:[%s18393_s4 + $0x5b8] sm:$0xff] }
 0x256   :  { %18482 = vst [vmem:[#allocation115_spill] sm:$0xff] %v11715_v10  ;;  %v18522_v10 = vld [vmem:[#allocation5_spill] sm:$0xff] }
 0x257   :  { %1862 = vmatmul.f32.gmra.mxu3 %v10744_v61  ;;  %v11718_v5 = vpop.f32.mrf.mxu0 }
 0x258   :  { %v11720_v53 = vpop.f32.mrf.mxu1  ;;  %1794 = vmatmul.f32.gmra.mxu2 %v18483_v57  ;;  %v18489_v57 = vld [vmem:[#allocation47_spill] sm:$0xff] }
 0x25a   :  { %v11725_v43 = vpop.f32.mrf.mxu3  ;;  %1906 = vmatmul.f32.gmra.mxu0 %v10604_v36  ;;  %v1435_v36 = vadd.f32 %v11416_v13, %v11363_v26  ;;  %v18488_v26 = vld [vmem:[#allocation3_spill] sm:$0xff] }
 0x25b   :  { %1935 = vmatmul.f32.gmra.mxu1 %v18484_v6  ;;  %v1478_v62 = vpop.f32.mrf.mxu2  ;;  %v957_v6 = vld [vmem:[%s18393_s4 + $0x5a0] sm:$0xff] }
 0x25c   :  { %v11729_v46 = vadd.f32 %v1478_v62, %v1432_v59  ;;  %v810_v59 = vld [vmem:[%s18393_s4 + $0x108] sm:$0xff]  ;;  %v1438_v62 = vadd.f32 %v11449_v1, %v11389_v8  ;;  %v804_v8 = vld [vmem:[%s18393_s4 + $0xd8] sm:$0xff]  ;;  %v18492_v1 = vld [vmem:[#allocation6_spill] sm:$0xff] }
 0x25e   :  { %18485 = vst [vmem:[#allocation43_spill] sm:$0xff] %v11729_v46 }
 0x25f   :  { %1865 = vmatmul.f32.gmra.mxu3 %v10757_v63  ;;  %v11732_v61 = vpop.f32.mrf.mxu0 }
 0x260   :  { %v11734_v58 = vpop.f32.mrf.mxu1  ;;  %1797 = vmatmul.f32.gmra.mxu2 %v18486_v20 }
 0x262   :  { %v11742_v19 = vpop.f32.mrf.mxu3  ;;  %1909 = vmatmul.f32.gmra.mxu0 %v10642_v29  ;;  %v816_v29 = vld [vmem:[%s18393_s4 + $0x138] sm:$0xff] }
 0x263   :  { %1938 = vmatmul.f32.gmra.mxu1 %v11082_v24  ;;  %v1481_v63 = vpop.f32.mrf.mxu2  ;;  %v963_v24 = vld [vmem:[%s18393_s4 + $0x5d0] sm:$0xff]  ;;  %2206 = vmatpush.msra.mxu2 %v816_v29 }
 0x264   :  { %v11752_v33 = vadd.f32 %v1481_v63, %v1435_v36  ;;  %2346 = vmatpush.msra.mxu1 %v963_v24  ;;  %v807_v63 = vld [vmem:[%s18393_s4 + $0xf0] sm:$0xff]  ;;  %v801_v24 = vld [vmem:[%s18393_s4 + $0xc0] sm:$0xff] }
 0x265   :  { %2207 = vmatpush.msra.mxu2 %v813_v60  ;;  %v948_v60 = vld [vmem:[%s18393_s4 + $0x558] sm:$0xff] }
 0x266   :  { %18487 = vst [vmem:[#allocation100_spill] sm:$0xff] %v11752_v33  ;;  %2347 = vmatpush.msra.mxu1 %v960_v21  ;;  %v18511_v33 = vld [vmem:[#allocation41_spill] sm:$0xff] }
 0x267   :  { %2267 = vmatmul.f32.vlgmr.msrb.gmra.mxu3 %v18488_v26  ;;  %v11761_v13 = vpop.f32.mrf.mxu0  ;;  %2208 = vmatpush.msra.mxu2 %v810_v59  ;;  %v798_v59 = vld [vmem:[%s18393_s4 + $0xa8] sm:$0xff] }
 0x268   :  { %v11769_v25 = vpop.f32.mrf.mxu1  ;;  %1800 = vmatmul.f32.gmra.mxu2 %v18489_v57  ;;  %2348 = vmatpush.msra.mxu1 %v957_v6  ;;  %v18493_v57 = vld [vmem:[#allocation49_spill] sm:$0xff]  ;;  %v945_v6 = vld [vmem:[%s18393_s4 + $0x540] sm:$0xff] }
 0x269   :  { %2209 = vmatpush.msra.mxu2 %v807_v63  ;;  %v18495_v63 = vld [vmem:[#allocation103_spill] sm:$0xff] }
 0x26a   :  { %v11780_v20 = vpop.f32.mrf.mxu3  ;;  %1912 = vmatmul.f32.gmra.mxu0 %v10673_v49  ;;  %2349 = vmatpush.msra.mxu1 %v954_v34  ;;  %v951_v49 = vld [vmem:[%s18393_s4 + $0x570] sm:$0xff] }
 0x26b   :  { %1941 = vmatmul.f32.gmra.mxu1 %v18490_v16  ;;  %v1484_v36 = vpop.f32.mrf.mxu2  ;;  %2210 = vmatpush.msra.mxu2 %v804_v8  ;;  %v795_v8 = vld [vmem:[%s18393_s4 + $0x90] sm:$0xff] }
 0x26c   :  { %v11790_v31 = vadd.f32 %v1484_v36, %v1438_v62  ;;  %2350 = vmatpush.msra.mxu1 %v951_v49  ;;  %v1441_v62 = vadd.f32 %v11483_v14, %v11406_v11  ;;  %v18494_v36 = vld [vmem:[#allocation27_spill] sm:$0xff]  ;;  %v792_v11 = vld [vmem:[%s18393_s4 + $0x78] sm:$0xff]  ;;  %v939_v14 = vld [vmem:[%s18393_s4 + $0x510] sm:$0xff] }
 0x26d   :  { %2211 = vmatpush.msra.mxu2 %v801_v24  ;;  %v942_v49 = vld [vmem:[%s18393_s4 + $0x528] sm:$0xff] }
 0x26e   :  { %18491 = vst [vmem:[#allocation45_spill] sm:$0xff] %v11790_v31  ;;  %2351 = vmatpush.msra.mxu1 %v948_v60  ;;  %v18497_v60 = vld [vmem:[#allocation10_spill] sm:$0xff]  ;;  %v18507_v31 = vld [vmem:[#allocation39_spill] sm:$0xff] }
 0x26f   :  { %2270 = vmatmul.f32.gmra.mxu3 %v18492_v1  ;;  %v11799_v29 = vpop.f32.mrf.mxu0  ;;  %2212 = vmatpush.msra.mxu2 %v798_v59  ;;  %v789_v59 = vld [vmem:[%s18393_s4 + $0x60] sm:$0xff] }
 0x270   :  { %v11807_v21 = vpop.f32.mrf.mxu1  ;;  %1803 = vmatmul.f32.gmra.mxu2 %v18493_v57  ;;  %2352 = vmatpush.msra.mxu1 %v945_v6  ;;  %v936_v6 = vld [vmem:[%s18393_s4 + $0x4f8] sm:$0xff] }
 0x271   :  { %2213 = vmatpush.msra.mxu2 %v795_v8  ;;  %v786_v8 = vld [vmem:[%s18393_s4 + $0x48] sm:$0xff] }
 0x272   :  { %v11818_v16 = vpop.f32.mrf.mxu3  ;;  %2314 = vmatmul.f32.vlgmr.msra.gmra.mxu0 %v18494_v36  ;;  %2353 = vmatpush.msra.mxu1 %v942_v49  ;;  %v933_v49 = vld [vmem:[%s18393_s4 + $0x4e0] sm:$0xff] }
 0x273   :  { %1944 = vmatmul.f32.gmra.mxu1 %v18495_v63  ;;  %v1487_v34 = vpop.f32.mrf.mxu2  ;;  %2214 = vmatpush.msra.mxu2 %v792_v11  ;;  %v820_v11 = vld [vmem:[%s18393_s4 + $0x158] sm:$0xff] }
 0x274   :  { %v11828_v24 = vadd.f32 %v1487_v34, %v1441_v62  ;;  %2354 = vmatpush.msra.mxu1 %v939_v14  ;;  %v823_v62 = vld [vmem:[%s18393_s4 + $0x170] sm:$0xff]  ;;  %v18498_v34 = vld [vmem:[#allocation51_spill] sm:$0xff]  ;;  %v1444_v14 = vadd.f32 %v11520_v44, %v11419_v45  ;;  %v817_v45 = vld [vmem:[%s18393_s4 + $0x140] sm:$0xff] }
 0x275   :  { %2215 = vmatpush.msra.mxu2 %v789_v59  ;;  %2439 = vmatpush.msra.mxu3 %v823_v62  ;;  %v783_v62 = vld [vmem:[%s18393_s4 + $0x30] sm:$0xff] }
 0x276   :  { %18496 = vst [vmem:[#allocation47_spill] sm:$0xff] %v11828_v24  ;;  %2355 = vmatpush.msra.mxu1 %v936_v6  ;;  %v18499_v6 = vld [vmem:[#allocation31_spill] sm:$0xff] }
 0x277   :  { %2273 = vmatmul.f32.gmra.mxu3 %v18497_v60  ;;  %v11837_v57 = vpop.f32.mrf.mxu0  ;;  %2216 = vmatpush.msra.mxu2 %v786_v8  ;;  %v927_v8 = vld [vmem:[%s18393_s4 + $0x4b0] sm:$0xff] }
 0x278   :  { %v11848_v63 = vpop.f32.mrf.mxu1  ;;  %1806 = vmatmul.f32.gmra.mxu2 %v18498_v34  ;;  %2356 = vmatpush.msra.mxu1 %v933_v49  ;;  %v930_v34 = vld [vmem:[%s18393_s4 + $0x4c8] sm:$0xff] }
 0x279   :  { %2440 = vmatpush.msra.mxu3 %v820_v11  ;;  %2217 = vmatpush.msra.mxu2 %v783_v62  ;;  %v814_v49 = vld [vmem:[%s18393_s4 + $0x128] sm:$0xff]  ;;  %v777_v11 = vld [vmem:[%s18393_s4] sm:$0xff]  ;;  %v811_v62 = vld [vmem:[%s18393_s4 + $0x110] sm:$0xff] }
 0x27a   :  { %v11862_v55 = vpop.f32.mrf.mxu3  ;;  %2317 = vmatmul.f32.gmra.mxu0 %v18499_v6  ;;  %2357 = vmatpush.msra.mxu1 %v930_v34 }
 0x27b   :  { %1947 = vmatmul.f32.gmra.mxu1 %v11189_v48  ;;  %v1490_v59 = vpop.f32.mrf.mxu2  ;;  %v780_v48 = vld [vmem:[%s18393_s4 + $0x18] sm:$0xff]  ;;  %2441 = vmatpush.msra.mxu3 %v817_v45 }
 0x27c   :  { %v11875_v44 = vadd.f32 %v1490_v59, %v1444_v14  ;;  %2358 = vmatpush.msra.mxu1 %v927_v8  ;;  %2218 = vmatpush.msra.mxu2 %v780_v48  ;;  %v924_v59 = vld [vmem:[%s18393_s4 + $0x498] sm:$0xff]  ;;  %v921_v48 = vld [vmem:[%s18393_s4 + $0x480] sm:$0xff] }
 0x27d   :  { %v18502_v45 = vld [vmem:[#allocation53_spill] sm:$0xff]  ;;  %2442 = vmatpush.msra.mxu3 %v814_v49 }
 0x27e   :  { %18500 = vst [vmem:[#allocation102_spill] sm:$0xff] %v11875_v44  ;;  %2219 = vmatpush.msra.mxu2 %v777_v11  ;;  %2359 = vmatpush.msra.mxu1 %v924_v59  ;;  %v808_v8 = vld [vmem:[%s18393_s4 + $0xf8] sm:$0xff]  ;;  %v18503_v44 = vld [vmem:[#allocation35_spill] sm:$0xff]  ;;  %v805_v11 = vld [vmem:[%s18393_s4 + $0xe0] sm:$0xff] }
 0x27f   :  { %2276 = vmatmul.f32.gmra.mxu3 %v18501_v35  ;;  %v11887_v14 = vpop.f32.mrf.mxu0  ;;  %v871_v59 = vld [vmem:[%s18393_s4 + $0x2f0] sm:$0xff] }
 0x280   :  { %v11898_v34 = vpop.f32.mrf.mxu1  ;;  %1809 = vmatmul.f32.gmra.mxu2 %v18502_v45  ;;  %2443 = vmatpush.msra.mxu3 %v811_v62  ;;  %v18504_v62 = vld [vmem:[#allocation18_spill] sm:$0xff] }
 0x281   :  { %2360 = vmatpush.msra.mxu1 %v921_v48  ;;  %2486 = vmatpush.msrb.mxu0 %v871_v59  ;;  %v865_v48 = vld [vmem:[%s18393_s4 + $0x2c0] sm:$0xff]  ;;  %v862_v59 = vld [vmem:[%s18393_s4 + $0x2a8] sm:$0xff] }
 0x282   :  { %v11909_v12 = vpop.f32.mrf.mxu3  ;;  %2320 = vmatmul.f32.gmra.mxu0 %v18503_v44  ;;  %2444 = vmatpush.msra.mxu3 %v808_v8 }
 0x283   :  { %1950 = vmatmul.f32.gmra.mxu1 %v11239_v41  ;;  %v1604_v49 = vpop.f32.mrf.mxu2  ;;  %v868_v41 = vld [vmem:[%s18393_s4 + $0x2d8] sm:$0xff] }
 0x284   :  { %v1605_v45 = vadd.f32 %v1604_v49, %v1558_v18  ;;  %2445 = vmatpush.msra.mxu3 %v805_v11  ;;  %2487 = vmatpush.msrb.mxu0 %v868_v41  ;;  %v799_v18 = vld [vmem:[%s18393_s4 + $0xb0] sm:$0xff]  ;;  %v18505_v49 = vld [vmem:[#allocation54_spill] sm:$0xff]  ;;  %v796_v11 = vld [vmem:[%s18393_s4 + $0x98] sm:$0xff] }
 0x286   :  { %v1652_v15 = vadd.f32 %v11685_v7, %v1605_v45  ;;  %2446 = vmatpush.msra.mxu3 %v802_v51  ;;  %2488 = vmatpush.msrb.mxu0 %v865_v48  ;;  %v1561_v45 = vadd.f32 %v11604_v47, %v11394_v0  ;;  %v793_v51 = vld [vmem:[%s18393_s4 + $0x80] sm:$0xff]  ;;  %v790_v0 = vld [vmem:[%s18393_s4 + $0x68] sm:$0xff] }
 0x287   :  { %2279 = vmatmul.f32.gmra.mxu3 %v18504_v62  ;;  %v11927_v24 = vpop.f32.mrf.mxu0 }
 0x288   :  { %v11935_v8 = vpop.f32.mrf.mxu1  ;;  %1812 = vmatmul.f32.gmra.mxu2 %v18505_v49  ;;  %v11939_v7 = vadd.f32 %v11698_v39, %v1652_v15  ;;  %2447 = vmatpush.msra.mxu3 %v799_v18  ;;  %v859_v15 = vld [vmem:[%s18393_s4 + $0x290] sm:$0xff]  ;;  %v18508_v18 = vld [vmem:[#allocation22_spill] sm:$0xff] }
 0x289   :  { %2489 = vmatpush.msrb.mxu0 %v862_v59  ;;  %v853_v59 = vld [vmem:[%s18393_s4 + $0x260] sm:$0xff] }
 0x28a   :  { %18506 = vst [vmem:[#allocation49_spill] sm:$0xff] %v11939_v7  ;;  %v11949_v41 = vpop.f32.mrf.mxu3  ;;  %2323 = vmatmul.f32.gmra.mxu0 %v18507_v31  ;;  %2448 = vmatpush.msra.mxu3 %v796_v11  ;;  %v787_v11 = vld [vmem:[%s18393_s4 + $0x50] sm:$0xff] }
 0x28b   :  { %1953 = vmatmul.f32.gmra.mxu1 %v11280_v50  ;;  %v1607_v39 = vpop.f32.mrf.mxu2  ;;  %2490 = vmatpush.msrb.mxu0 %v859_v15  ;;  %v856_v50 = vld [vmem:[%s18393_s4 + $0x278] sm:$0xff]  ;;  %v850_v15 = vld [vmem:[%s18393_s4 + $0x248] sm:$0xff] }
 0x28c   :  { %v1608_v48 = vadd.f32 %v1607_v39, %v1561_v45  ;;  %2449 = vmatpush.msra.mxu3 %v793_v51  ;;  %v18509_v39 = vld [vmem:[#allocation55_spill] sm:$0xff]  ;;  %v784_v51 = vld [vmem:[%s18393_s4 + $0x38] sm:$0xff] }
 0x28d   :  { %2491 = vmatpush.msrb.mxu0 %v856_v50 }
 0x28e   :  { %v1655_v47 = vadd.f32 %v11711_v42, %v1608_v48  ;;  %2450 = vmatpush.msra.mxu3 %v790_v0  ;;  %v1564_v48 = vadd.f32 %v11642_v37, %v11408_v38  ;;  %v781_v0 = vld [vmem:[%s18393_s4 + $0x20] sm:$0xff]  ;;  %v778_v38 = vld [vmem:[%s18393_s4 + $0x8] sm:$0xff] }
 0x28f   :  { %2282 = vmatmul.f32.gmra.mxu3 %v18508_v18  ;;  %v11967_v49 = vpop.f32.mrf.mxu0  ;;  %2492 = vmatpush.msrb.mxu0 %v853_v59 }
 0x290   :  { %v11975_v45 = vpop.f32.mrf.mxu1  ;;  %1815 = vmatmul.f32.gmra.mxu2 %v18509_v39  ;;  %v11979_v42 = vadd.f32 %v11718_v5, %v1655_v47  ;;  %2451 = vmatpush.msra.mxu3 %v787_v11  ;;  %v847_v47 = vld [vmem:[%s18393_s4 + $0x230] sm:$0xff]  ;;  %v18512_v11 = vld [vmem:[#allocation26_spill] sm:$0xff] }
 0x291   :  { %2493 = vmatpush.msrb.mxu0 %v850_v15 }
 0x292   :  { %18510 = vst [vmem:[#allocation27_spill] sm:$0xff] %v11979_v42  ;;  %v11989_v50 = vpop.f32.mrf.mxu3  ;;  %2326 = vmatmul.f32.gmra.mxu0 %v18511_v33  ;;  %2452 = vmatpush.msra.mxu3 %v784_v51  ;;  %v841_v51 = vld [vmem:[%s18393_s4 + $0x200] sm:$0xff] }
 0x293   :  { %1956 = vmatmul.f32.gmra.mxu1 %v11318_v17  ;;  %v1610_v5 = vpop.f32.mrf.mxu2  ;;  %2494 = vmatpush.msrb.mxu0 %v847_v47  ;;  %v844_v17 = vld [vmem:[%s18393_s4 + $0x218] sm:$0xff] }
 0x294   :  { %v1611_v59 = vadd.f32 %v1610_v5, %v1564_v48  ;;  %2453 = vmatpush.msra.mxu3 %v781_v0  ;;  %v18513_v48 = vld [vmem:[#allocation56_spill] sm:$0xff]  ;;  %v1567_v0 = vadd.f32 %v11677_v54, %v11424_v28  ;;  %v18516_v54 = vld [vmem:[#allocation30_spill] sm:$0xff] }
 0x295   :  { %2495 = vmatpush.msrb.mxu0 %v844_v17 }
 0x296   :  { %v1658_v37 = vadd.f32 %v11725_v43, %v1611_v59  ;;  %2454 = vmatpush.msra.mxu3 %v778_v38  ;;  %v838_v43 = vld [vmem:[%s18393_s4 + $0x1e8] sm:$0xff]  ;;  %v18515_v59 = vld [vmem:[#allocation44_spill] sm:$0xff] }
 0x297   :  { %2285 = vmatmul.f32.gmra.mxu3 %v18512_v11  ;;  %v12007_v39 = vpop.f32.mrf.mxu0  ;;  %2496 = vmatpush.msrb.mxu0 %v841_v51 }
 0x298   :  { %v12012_v15 = vpop.f32.mrf.mxu1  ;;  %1818 = vmatmul.f32.gmra.mxu2 %v18513_v48  ;;  %v12016_v5 = vadd.f32 %v11732_v61, %v1658_v37  ;;  %v835_v61 = vld [vmem:[%s18393_s4 + $0x1d0] sm:$0xff]  ;;  %v832_v37 = vld [vmem:[%s18393_s4 + $0x1b8] sm:$0xff] }
 0x299   :  { %2497 = vmatpush.msrb.mxu0 %v838_v43  ;;  %v18517_v43 = vld [vmem:[#allocation2_spill] sm:$0xff] }
 0x29a   :  { %18514 = vst [vmem:[#allocation103_spill] sm:$0xff] %v12016_v5  ;;  %v12023_v47 = vpop.f32.mrf.mxu3  ;;  %2329 = vmatmul.f32.gmra.mxu0 %v18515_v59 }
 0x29b   :  { %1959 = vmatmul.f32.gmra.mxu1 %v11354_v2  ;;  %v1613_v17 = vpop.f32.mrf.mxu2  ;;  %2498 = vmatpush.msrb.mxu0 %v835_v61  ;;  %v829_v2 = vld [vmem:[%s18393_s4 + $0x1a0] sm:$0xff] }
 0x29c   :  { %v1614_v38 = vadd.f32 %v1613_v17, %v1567_v0  ;;  %v1570_v17 = vadd.f32 %v11703_v56, %v11458_v4  ;;  %v1573_v56 = vadd.f32 %v11720_v53, %v11492_v40  ;;  %v1014_v53 = vld [vmem:[%s18393_s4 + $0x768] sm:$0xff] }
 0x29d   :  { %2499 = vmatpush.msrb.mxu0 %v832_v37  ;;  %v18520_v37 = vld [vmem:[#allocation9_spill] sm:$0xff]  ;;  %2392 = vmatpush.msrb.mxu2 %v1014_v53 }
 0x29e   :  { %v1661_v28 = vadd.f32 %v11742_v19, %v1614_v38  ;;  %v826_v19 = vld [vmem:[%s18393_s4 + $0x188] sm:$0xff]  ;;  %v18519_v38 = vld [vmem:[#allocation46_spill] sm:$0xff] }
 0x29f   :  { %2288 = vmatmul.f32.gmra.mxu3 %v18516_v54  ;;  %v12035_v51 = vpop.f32.mrf.mxu0  ;;  %2500 = vmatpush.msrb.mxu0 %v829_v2 }
 0x2a0   :  { %v12040_v48 = vpop.f32.mrf.mxu1  ;;  %2220 = vmatmul.f32.vlgmr.msra.gmra.mxu2 %v18517_v43  ;;  %v12044_v0 = vadd.f32 %v11761_v13, %v1661_v28  ;;  %v18521_v28 = vld [vmem:[#allocation34_spill] sm:$0xff] }
 0x2a1   :  { %2501 = vmatpush.msrb.mxu0 %v826_v19  ;;  %v18524_v19 = vld [vmem:[#allocation48_spill] sm:$0xff] }
 0x2a2   :  { %18518 = vst [vmem:[#allocation51_spill] sm:$0xff] %v12044_v0  ;;  %v12051_v61 = vpop.f32.mrf.mxu3  ;;  %2332 = vmatmul.f32.gmra.mxu0 %v18519_v38 }
 0x2a3   :  { %2361 = vmatmul.f32.vlgmr.msra.gmra.mxu1 %v18520_v37  ;;  %v1616_v46 = vpop.f32.mrf.mxu2  ;;  %v18526_v37 = vld [vmem:[#allocation38_spill] sm:$0xff] }
 0x2a4   :  { %v1617_v5 = vadd.f32 %v1616_v46, %v1570_v17  ;;  %v18525_v46 = vld [vmem:[#allocation13_spill] sm:$0xff] }
 0x2a6   :  { %v1664_v13 = vadd.f32 %v11780_v20, %v1617_v5 }
 0x2a7   :  { %2291 = vmatmul.f32.gmra.mxu3 %v18521_v28  ;;  %v12057_v2 = vpop.f32.mrf.mxu0 }
 0x2a8   :  { %v12059_v0 = vpop.f32.mrf.mxu1  ;;  %2223 = vmatmul.f32.gmra.mxu2 %v18522_v10  ;;  %v12063_v4 = vadd.f32 %v11799_v29, %v1664_v13  ;;  %v18527_v29 = vld [vmem:[#allocation8_spill] sm:$0xff]  ;;  %v1576_v13 = vadd.f32 %v11734_v58, %v11532_v30  ;;  %v1008_v30 = vld [vmem:[%s18393_s4 + $0x738] sm:$0xff] }
 0x2a9   :  { %v916_v58 = vld [vmem:[%s18393_s4 + $0x458] sm:$0xff] }
 0x2aa   :  { %18523 = vst [vmem:[#allocation31_spill] sm:$0xff] %v12063_v4  ;;  %v12067_v42 = vpop.f32.mrf.mxu3  ;;  %2335 = vmatmul.f32.gmra.mxu0 %v18524_v19 }
 0x2ab   :  { %2364 = vmatmul.f32.gmra.mxu1 %v18525_v46  ;;  %v1619_v20 = vpop.f32.mrf.mxu2  ;;  %v18533_v46 = vld [vmem:[#allocation52_spill] sm:$0xff] }
 0x2ac   :  { %v1620_v5 = vadd.f32 %v1619_v20, %v1573_v56  ;;  %v18530_v20 = vld [vmem:[#allocation17_spill] sm:$0xff] }
 0x2ae   :  { %v1667_v17 = vadd.f32 %v11818_v16, %v1620_v5  ;;  %v18529_v16 = vld [vmem:[#allocation50_spill] sm:$0xff] }
 0x2af   :  { %2294 = vmatmul.f32.gmra.mxu3 %v18526_v37  ;;  %v12073_v22 = vpop.f32.mrf.mxu0 }
 0x2b0   :  { %v12075_v7 = vpop.f32.mrf.mxu1  ;;  %2226 = vmatmul.f32.gmra.mxu2 %v18527_v29  ;;  %v12079_v40 = vadd.f32 %v11837_v57, %v1667_v17  ;;  %v1011_v57 = vld [vmem:[%s18393_s4 + $0x750] sm:$0xff] }
 0x2b1   :  { %v919_v17 = vld [vmem:[%s18393_s4 + $0x470] sm:$0xff]  ;;  %2393 = vmatpush.msrb.mxu2 %v1011_v57 }
 0x2b2   :  { %18528 = vst [vmem:[#allocation14_spill] sm:$0xff] %v12079_v40  ;;  %v12086_v56 = vpop.f32.mrf.mxu3  ;;  %2338 = vmatmul.f32.gmra.mxu0 %v18529_v16  ;;  %2533 = vmatpush.msrb.mxu1 %v919_v17  ;;  %v18531_v17 = vld [vmem:[#allocation12_spill] sm:$0xff] }
 0x2b3   :  { %2367 = vmatmul.f32.gmra.mxu1 %v18530_v20  ;;  %v1622_v5 = vpop.f32.mrf.mxu2  ;;  %2394 = vmatpush.msrb.mxu2 %v1008_v30  ;;  %v910_v30 = vld [vmem:[%s18393_s4 + $0x428] sm:$0xff] }
 0x2b4   :  { %v1623_v40 = vadd.f32 %v1622_v5, %v1576_v13  ;;  %2534 = vmatpush.msrb.mxu1 %v916_v58  ;;  %v1005_v13 = vld [vmem:[%s18393_s4 + $0x720] sm:$0xff]  ;;  %v1579_v58 = vadd.f32 %v11769_v25, %v11577_v52  ;;  %v996_v52 = vld [vmem:[%s18393_s4 + $0x6d8] sm:$0xff] }
 0x2b5   :  { %v913_v5 = vld [vmem:[%s18393_s4 + $0x440] sm:$0xff]  ;;  %2395 = vmatpush.msrb.mxu2 %v1005_v13  ;;  %v907_v13 = vld [vmem:[%s18393_s4 + $0x410] sm:$0xff]  ;;  %v904_v25 = vld [vmem:[%s18393_s4 + $0x3f8] sm:$0xff] }
 0x2b6   :  { %v1670_v53 = vadd.f32 %v11862_v55, %v1623_v40  ;;  %2535 = vmatpush.msrb.mxu1 %v913_v5  ;;  %v1002_v40 = vld [vmem:[%s18393_s4 + $0x708] sm:$0xff]  ;;  %v18534_v5 = vld [vmem:[#allocation21_spill] sm:$0xff] }
 0x2b7   :  { %2455 = vmatmul.f32.vlgmr.msra.gmra.mxu3 %v18517_v43  ;;  %v12104_v4 = vpop.f32.mrf.mxu0  ;;  %2396 = vmatpush.msrb.mxu2 %v1002_v40 }
 0x2b8   :  { %v12112_v57 = vpop.f32.mrf.mxu1  ;;  %2229 = vmatmul.f32.gmra.mxu2 %v18531_v17  ;;  %v12116_v55 = vadd.f32 %v11887_v14, %v1670_v53  ;;  %2536 = vmatpush.msrb.mxu1 %v910_v30  ;;  %v999_v53 = vld [vmem:[%s18393_s4 + $0x6f0] sm:$0xff] }
 0x2b9   :  { %2397 = vmatpush.msrb.mxu2 %v999_v53 }
 0x2ba   :  { %18532 = vst [vmem:[#allocation53_spill] sm:$0xff] %v12116_v55  ;;  %v12126_v20 = vpop.f32.mrf.mxu3  ;;  %2341 = vmatmul.f32.gmra.mxu0 %v18533_v46  ;;  %2537 = vmatpush.msrb.mxu1 %v907_v13  ;;  %v18535_v13 = vld [vmem:[#allocation16_spill] sm:$0xff] }
 0x2bb   :  { %2370 = vmatmul.f32.gmra.mxu1 %v18534_v5  ;;  %v1625_v14 = vpop.f32.mrf.mxu2  ;;  %2398 = vmatpush.msrb.mxu2 %v996_v52  ;;  %v898_v52 = vld [vmem:[%s18393_s4 + $0x3c8] sm:$0xff] }
 0x2bc   :  { %v1626_v55 = vadd.f32 %v1625_v14, %v1579_v58  ;;  %2538 = vmatpush.msrb.mxu1 %v904_v25  ;;  %v993_v58 = vld [vmem:[%s18393_s4 + $0x6c0] sm:$0xff]  ;;  %v1582_v25 = vadd.f32 %v11807_v21, %v11615_v32  ;;  %v984_v32 = vld [vmem:[%s18393_s4 + $0x678] sm:$0xff] }
 0x2bd   :  { %v901_v14 = vld [vmem:[%s18393_s4 + $0x3e0] sm:$0xff]  ;;  %2399 = vmatpush.msrb.mxu2 %v993_v58  ;;  %v895_v58 = vld [vmem:[%s18393_s4 + $0x3b0] sm:$0xff]  ;;  %v892_v21 = vld [vmem:[%s18393_s4 + $0x398] sm:$0xff] }
 0x2be   :  { %v1673_v40 = vadd.f32 %v11909_v12, %v1626_v55  ;;  %2539 = vmatpush.msrb.mxu1 %v901_v14  ;;  %v990_v55 = vld [vmem:[%s18393_s4 + $0x6a8] sm:$0xff]  ;;  %v18537_v14 = vld [vmem:[#allocation25_spill] sm:$0xff] }
 0x2bf   :  { %2458 = vmatmul.f32.gmra.mxu3 %v18522_v10  ;;  %v12144_v30 = vpop.f32.mrf.mxu0  ;;  %2400 = vmatpush.msrb.mxu2 %v990_v55 }
 0x2c0   :  { %v12152_v53 = vpop.f32.mrf.mxu1  ;;  %2232 = vmatmul.f32.gmra.mxu2 %v18535_v13  ;;  %v12156_v12 = vadd.f32 %v11927_v24, %v1673_v40  ;;  %2540 = vmatpush.msrb.mxu1 %v898_v52  ;;  %v987_v40 = vld [vmem:[%s18393_s4 + $0x690] sm:$0xff] }
 0x2c1   :  { %2401 = vmatpush.msrb.mxu2 %v987_v40  ;;  %v1015_v40 = vld [vmem:[%s18393_s4 + $0x770] sm:$0xff] }
 0x2c2   :  { %18536 = vst [vmem:[#allocation35_spill] sm:$0xff] %v12156_v12  ;;  %v12166_v5 = vpop.f32.mrf.mxu3  ;;  %2502 = vmatmul.f32.vlgmr.msrb.gmra.mxu0 %v18488_v26  ;;  %2541 = vmatpush.msrb.mxu1 %v895_v58 }
 0x2c3   :  { %2373 = vmatmul.f32.gmra.mxu1 %v18537_v14  ;;  %v1628_v24 = vpop.f32.mrf.mxu2  ;;  %2402 = vmatpush.msrb.mxu2 %v984_v32  ;;  %v978_v32 = vld [vmem:[%s18393_s4 + $0x648] sm:$0xff]  ;;  %v1012_v14 = vld [vmem:[%s18393_s4 + $0x758] sm:$0xff] }
 0x2c4   :  { %v1629_v12 = vadd.f32 %v1628_v24, %v1582_v25  ;;  %2542 = vmatpush.msrb.mxu1 %v892_v21  ;;  %v981_v25 = vld [vmem:[%s18393_s4 + $0x660] sm:$0xff]  ;;  %2627 = vmatpush.msrb.mxu3 %v1015_v40  ;;  %v886_v21 = vld [vmem:[%s18393_s4 + $0x368] sm:$0xff]  ;;  %v883_v40 = vld [vmem:[%s18393_s4 + $0x350] sm:$0xff] }
 0x2c5   :  { %v889_v24 = vld [vmem:[%s18393_s4 + $0x380] sm:$0xff]  ;;  %2403 = vmatpush.msrb.mxu2 %v981_v25  ;;  %v975_v25 = vld [vmem:[%s18393_s4 + $0x630] sm:$0xff] }
 0x2c6   :  { %v1676_v55 = vadd.f32 %v11949_v41, %v1629_v12  ;;  %v18538_v41 = vld [vmem:[#allocation20_spill] sm:$0xff]  ;;  %2543 = vmatpush.msrb.mxu1 %v889_v24  ;;  %v1585_v24 = vadd.f32 %v11848_v63, %v11653_v23  ;;  %v1009_v23 = vld [vmem:[%s18393_s4 + $0x740] sm:$0xff]  ;;  %2628 = vmatpush.msrb.mxu3 %v1012_v14 }
 0x2c7   :  { %2461 = vmatmul.f32.gmra.mxu3 %v18527_v29  ;;  %v12184_v52 = vpop.f32.mrf.mxu0  ;;  %2404 = vmatpush.msrb.mxu2 %v978_v32  ;;  %v972_v32 = vld [vmem:[%s18393_s4 + $0x618] sm:$0xff] }
 0x2c8   :  { %v12195_v58 = vpop.f32.mrf.mxu1  ;;  %2235 = vmatmul.f32.gmra.mxu2 %v18538_v41  ;;  %v12199_v12 = vadd.f32 %v11967_v49, %v1676_v55  ;;  %2544 = vmatpush.msrb.mxu1 %v886_v21  ;;  %v18540_v49 = vld [vmem:[#allocation29_spill] sm:$0xff] }
 0x2c9   :  { %2405 = vmatpush.msrb.mxu2 %v975_v25  ;;  %v880_v21 = vld [vmem:[%s18393_s4 + $0x338] sm:$0xff]  ;;  %2629 = vmatpush.msrb.mxu3 %v1009_v23  ;;  %v1003_v25 = vld [vmem:[%s18393_s4 + $0x710] sm:$0xff] }
 0x2ca   :  { %18539 = vst [vmem:[#allocation18_spill] sm:$0xff] %v12199_v12  ;;  %v12212_v26 = vpop.f32.mrf.mxu3  ;;  %2505 = vmatmul.f32.gmra.mxu0 %v18492_v1  ;;  %2545 = vmatpush.msrb.mxu1 %v883_v40  ;;  %v1006_v12 = vld [vmem:[%s18393_s4 + $0x728] sm:$0xff]  ;;  %v18541_v40 = vld [vmem:[#allocation24_spill] sm:$0xff]  ;;  %v18543_v1 = vld [vmem:[#allocation33_spill] sm:$0xff] }
 0x2cb   :  { %2376 = vmatmul.f32.gmra.mxu1 %v18540_v49  ;;  %v1631_v55 = vpop.f32.mrf.mxu2  ;;  %2406 = vmatpush.msrb.mxu2 %v972_v32  ;;  %v1000_v32 = vld [vmem:[%s18393_s4 + $0x6f8] sm:$0xff] }
 0x2cc   :  { %v1632_v63 = vadd.f32 %v1631_v55, %v1585_v24  ;;  %2546 = vmatpush.msrb.mxu1 %v880_v21  ;;  %v969_v24 = vld [vmem:[%s18393_s4 + $0x600] sm:$0xff]  ;;  %2630 = vmatpush.msrb.mxu3 %v1006_v12 }
 0x2cd   :  { %v877_v55 = vld [vmem:[%s18393_s4 + $0x320] sm:$0xff]  ;;  %2407 = vmatpush.msrb.mxu2 %v969_v24 }
 0x2ce   :  { %v1679_v49 = vadd.f32 %v11989_v50, %v1632_v63  ;;  %2547 = vmatpush.msrb.mxu1 %v877_v55  ;;  %v874_v63 = vld [vmem:[%s18393_s4 + $0x308] sm:$0xff]  ;;  %2631 = vmatpush.msrb.mxu3 %v1003_v25  ;;  %v821_v25 = vld [vmem:[%s18393_s4 + $0x160] sm:$0xff] }
 0x2cf   :  { %2464 = vmatmul.f32.gmra.mxu3 %v18531_v17  ;;  %v12236_v14 = vpop.f32.mrf.mxu0  ;;  %v994_v55 = vld [vmem:[%s18393_s4 + $0x6c8] sm:$0xff] }
 0x2d0   :  { %v1933_v50 = vpop.f32.mrf.mxu1  ;;  %2238 = vmatmul.f32.gmra.mxu2 %v18541_v40  ;;  %v12249_v23 = vadd.f32 %v12007_v39, %v1679_v49  ;;  %v997_v39 = vld [vmem:[%s18393_s4 + $0x6e0] sm:$0xff]  ;;  %v824_v49 = vld [vmem:[%s18393_s4 + $0x178] sm:$0xff]  ;;  %2548 = vmatpush.msrb.mxu1 %v874_v63  ;;  %v818_v63 = vld [vmem:[%s18393_s4 + $0x148] sm:$0xff] }
 0x2d1   :  { %2632 = vmatpush.msrb.mxu3 %v1000_v32  ;;  %2674 = vmatpush.msra.mxu0 %v824_v49  ;;  %v815_v49 = vld [vmem:[%s18393_s4 + $0x130] sm:$0xff] }
 0x2d2   :  { %18542 = vst [vmem:[#allocation54_spill] sm:$0xff] %v12249_v23  ;;  %v12257_v21 = vpop.f32.mrf.mxu3  ;;  %2508 = vmatmul.f32.gmra.mxu0 %v18497_v60  ;;  %v18546_v60 = vld [vmem:[#allocation37_spill] sm:$0xff] }
 0x2d3   :  { %2379 = vmatmul.f32.gmra.mxu1 %v18543_v1  ;;  %v1792_v12 = vpop.f32.mrf.mxu2  ;;  %2633 = vmatpush.msrb.mxu3 %v997_v39  ;;  %v988_v39 = vld [vmem:[%s18393_s4 + $0x698] sm:$0xff] }
 0x2d4   :  { %v1793_v24 = vadd.f32 %v1792_v12, %v11898_v34  ;;  %2675 = vmatpush.msra.mxu0 %v821_v25  ;;  %v991_v34 = vld [vmem:[%s18393_s4 + $0x6b0] sm:$0xff] }
 0x2d5   :  { %v18544_v12 = vld [vmem:[#allocation28_spill] sm:$0xff]  ;;  %2634 = vmatpush.msrb.mxu3 %v994_v55 }
 0x2d6   :  { %v1840_v23 = vadd.f32 %v12023_v47, %v1793_v24  ;;  %2676 = vmatpush.msra.mxu0 %v818_v63 }
 0x2d7   :  { %2467 = vmatmul.f32.gmra.mxu3 %v18535_v13  ;;  %v12276_v1 = vpop.f32.mrf.mxu0 }
 0x2d8   :  { %v1936_v32 = vpop.f32.mrf.mxu1  ;;  %2241 = vmatmul.f32.gmra.mxu2 %v18544_v12  ;;  %v1887_v47 = vadd.f32 %v12035_v51, %v1840_v23  ;;  %2635 = vmatpush.msrb.mxu3 %v991_v34  ;;  %v985_v51 = vld [vmem:[%s18393_s4 + $0x680] sm:$0xff]  ;;  %v812_v23 = vld [vmem:[%s18393_s4 + $0x118] sm:$0xff] }
 0x2d9   :  { %2677 = vmatpush.msra.mxu0 %v815_v49  ;;  %v809_v34 = vld [vmem:[%s18393_s4 + $0x100] sm:$0xff] }
 0x2da   :  { %v12292_v24 = vpop.f32.mrf.mxu3  ;;  %2511 = vmatmul.f32.gmra.mxu0 %v18501_v35  ;;  %v12295_v25 = vadd.f32 %v1933_v50, %v1887_v47  ;;  %2636 = vmatpush.msrb.mxu3 %v988_v39  ;;  %v982_v50 = vld [vmem:[%s18393_s4 + $0x668] sm:$0xff] }
 0x2db   :  { %2382 = vmatmul.f32.gmra.mxu1 %v18546_v60  ;;  %v1795_v55 = vpop.f32.mrf.mxu2  ;;  %2678 = vmatpush.msra.mxu0 %v812_v23  ;;  %v806_v39 = vld [vmem:[%s18393_s4 + $0xe8] sm:$0xff]  ;;  %v18547_v23 = vld [vmem:[#allocation32_spill] sm:$0xff] }
 0x2dc   :  { %18545 = vst [vmem:[#allocation39_spill] sm:$0xff] %v12295_v25  ;;  %v1796_v63 = vadd.f32 %v1795_v55, %v11935_v8  ;;  %2637 = vmatpush.msrb.mxu3 %v985_v51  ;;  %v979_v8 = vld [vmem:[%s18393_s4 + $0x650] sm:$0xff]  ;;  %v976_v51 = vld [vmem:[%s18393_s4 + $0x638] sm:$0xff] }
 0x2dd   :  { %2679 = vmatpush.msra.mxu0 %v809_v34  ;;  %v18549_v60 = vld [vmem:[#allocation40_spill] sm:$0xff] }
 0x2de   :  { %v1843_v47 = vadd.f32 %v12051_v61, %v1796_v63  ;;  %2638 = vmatpush.msrb.mxu3 %v982_v50  ;;  %v803_v63 = vld [vmem:[%s18393_s4 + $0xd0] sm:$0xff] }
 0x2df   :  { %2470 = vmatmul.f32.gmra.mxu3 %v18538_v41  ;;  %v12313_v49 = vpop.f32.mrf.mxu0  ;;  %2680 = vmatpush.msra.mxu0 %v806_v39 }
 0x2e0   :  { %v1939_v55 = vpop.f32.mrf.mxu1  ;;  %2244 = vmatmul.f32.gmra.mxu2 %v18547_v23  ;;  %v1890_v61 = vadd.f32 %v12057_v2, %v1843_v47  ;;  %2639 = vmatpush.msrb.mxu3 %v979_v8  ;;  %v973_v2 = vld [vmem:[%s18393_s4 + $0x620] sm:$0xff]  ;;  %v800_v47 = vld [vmem:[%s18393_s4 + $0xb8] sm:$0xff] }
 0x2e1   :  { %2681 = vmatpush.msra.mxu0 %v803_v63  ;;  %v797_v8 = vld [vmem:[%s18393_s4 + $0xa0] sm:$0xff] }
 0x2e2   :  { %v12329_v34 = vpop.f32.mrf.mxu3  ;;  %2514 = vmatmul.f32.gmra.mxu0 %v18504_v62  ;;  %v12332_v25 = vadd.f32 %v1936_v32, %v1890_v61  ;;  %2640 = vmatpush.msrb.mxu3 %v976_v51  ;;  %v970_v32 = vld [vmem:[%s18393_s4 + $0x608] sm:$0xff] }
 0x2e3   :  { %2385 = vmatmul.f32.gmra.mxu1 %v18549_v60  ;;  %v1798_v50 = vpop.f32.mrf.mxu2  ;;  %2682 = vmatpush.msra.mxu0 %v800_v47 }
 0x2e4   :  { %18548 = vst [vmem:[#allocation22_spill] sm:$0xff] %v12332_v25  ;;  %v1799_v39 = vadd.f32 %v1798_v50, %v11975_v45  ;;  %2641 = vmatpush.msrb.mxu3 %v973_v2  ;;  %v794_v45 = vld [vmem:[%s18393_s4 + $0x88] sm:$0xff]  ;;  %v18550_v50 = vld [vmem:[#allocation36_spill] sm:$0xff] }
 0x2e5   :  { %2683 = vmatpush.msra.mxu0 %v797_v8  ;;  %v18552_v8 = vld [vmem:[#allocation42_spill] sm:$0xff] }
 0x2e6   :  { %v1846_v61 = vadd.f32 %v12067_v42, %v1799_v39  ;;  %2642 = vmatpush.msrb.mxu3 %v970_v32  ;;  %v791_v42 = vld [vmem:[%s18393_s4 + $0x70] sm:$0xff]  ;;  %v788_v32 = vld [vmem:[%s18393_s4 + $0x58] sm:$0xff] }
 0x2e7   :  { %2473 = vmatmul.f32.gmra.mxu3 %v18541_v40  ;;  %v12350_v63 = vpop.f32.mrf.mxu0  ;;  %2684 = vmatpush.msra.mxu0 %v794_v45 }
 0x2e8   :  { %v1942_v51 = vpop.f32.mrf.mxu1  ;;  %2247 = vmatmul.f32.gmra.mxu2 %v18550_v50  ;;  %v1893_v47 = vadd.f32 %v12073_v22, %v1846_v61  ;;  %v785_v61 = vld [vmem:[%s18393_s4 + $0x40] sm:$0xff] }
 0x2e9   :  { %2685 = vmatpush.msra.mxu0 %v791_v42 }
 0x2ea   :  { %v12360_v2 = vpop.f32.mrf.mxu3  ;;  %2517 = vmatmul.f32.gmra.mxu0 %v18508_v18  ;;  %v12363_v39 = vadd.f32 %v1939_v55, %v1893_v47  ;;  %v782_v47 = vld [vmem:[%s18393_s4 + $0x28] sm:$0xff] }
 0x2eb   :  { %2388 = vmatmul.f32.gmra.mxu1 %v18552_v8  ;;  %v1801_v25 = vpop.f32.mrf.mxu2  ;;  %2686 = vmatpush.msra.mxu0 %v788_v32 }
 0x2ec   :  { %18551 = vst [vmem:[#allocation55_spill] sm:$0xff] %v12363_v39  ;;  %v1802_v22 = vadd.f32 %v1801_v25, %v12012_v15  ;;  %v18553_v39 = vld [vmem:[#allocation67_spill] sm:$0xff]  ;;  %v779_v25 = vld [vmem:[%s18393_s4 + $0x10] sm:$0xff] }
 0x2ed   :  { %2687 = vmatpush.msra.mxu0 %v785_v61 }
 0x2ee   :  { %v1849_v45 = vadd.f32 %v12086_v56, %v1802_v22 }
 0x2ef   :  { %2476 = vmatmul.f32.gmra.mxu3 %v18544_v12  ;;  %v12375_v55 = vpop.f32.mrf.mxu0  ;;  %2688 = vmatpush.msra.mxu0 %v782_v47  ;;  %v18555_v47 = vld [vmem:[#allocation70_spill] sm:$0xff] }
 0x2f0   :  { %v1945_v42 = vpop.f32.mrf.mxu1  ;;  %2408 = vmatmul.f32.vlgmr.msrb.gmra.mxu2 %v18553_v39  ;;  %v1896_v15 = vadd.f32 %v12104_v4, %v1849_v45 }
 0x2f1   :  { %2689 = vmatpush.msra.mxu0 %v779_v25 }
 0x2f2   :  { %v12385_v56 = vpop.f32.mrf.mxu3  ;;  %2520 = vmatmul.f32.gmra.mxu0 %v18512_v11  ;;  %v12388_v32 = vadd.f32 %v1942_v51, %v1896_v15 }
 0x2f3   :  { %2549 = vmatmul.f32.vlgmr.msrb.gmra.mxu1 %v18494_v36  ;;  %v1804_v22 = vpop.f32.mrf.mxu2 }
 0x2f4   :  { %18554 = vst [vmem:[#allocation41_spill] sm:$0xff] %v12388_v32  ;;  %v1805_v61 = vadd.f32 %v1804_v22, %v12040_v48  ;;  %v18576_v32 = vld [vmem:[#allocation13_spill] sm:$0xff] }
 0x2f6   :  { %v1852_v8 = vadd.f32 %v12126_v20, %v1805_v61  ;;  %v18557_v61 = vld [vmem:[#allocation73_spill] sm:$0xff] }
 0x2f7   :  { %2479 = vmatmul.f32.gmra.mxu3 %v18547_v23  ;;  %v12394_v4 = vpop.f32.mrf.mxu0 }
 0x2f8   :  { %v1948_v45 = vpop.f32.mrf.mxu1  ;;  %2411 = vmatmul.f32.gmra.mxu2 %v18555_v47  ;;  %v1899_v60 = vadd.f32 %v12144_v30, %v1852_v8 }
 0x2fa   :  { %v12398_v11 = vpop.f32.mrf.mxu3  ;;  %2523 = vmatmul.f32.gmra.mxu0 %v18516_v54  ;;  %v12401_v51 = vadd.f32 %v1945_v42, %v1899_v60  ;;  %v967_v60 = vld [vmem:[%s18393_s4 + $0x5f0] sm:$0xff]  ;;  %v964_v42 = vld [vmem:[%s18393_s4 + $0x5d8] sm:$0xff] }
 0x2fb   :  { %2552 = vmatmul.f32.gmra.mxu1 %v18499_v6  ;;  %v1807_v48 = vpop.f32.mrf.mxu2  ;;  %2580 = vmatpush.msra.mxu2 %v967_v60  ;;  %v866_v60 = vld [vmem:[%s18393_s4 + $0x2c8] sm:$0xff] }
 0x2fc   :  { %18556 = vst [vmem:[#allocation56_spill] sm:$0xff] %v12401_v51  ;;  %v1808_v20 = vadd.f32 %v1807_v48, %v12059_v0 }
 0x2fd   :  { %2581 = vmatpush.msra.mxu2 %v964_v42  ;;  %v18559_v42 = vld [vmem:[#allocation77_spill] sm:$0xff] }
 0x2fe   :  { %v1855_v15 = vadd.f32 %v12166_v5, %v1808_v20  ;;  %v869_v20 = vld [vmem:[%s18393_s4 + $0x2e0] sm:$0xff] }
 0x2ff   :  { %2482 = vmatmul.f32.gmra.mxu3 %v18550_v50  ;;  %v12407_v25 = vpop.f32.mrf.mxu0 }
 0x300   :  { %v1951_v22 = vpop.f32.mrf.mxu1  ;;  %2414 = vmatmul.f32.gmra.mxu2 %v18557_v61  ;;  %v1902_v30 = vadd.f32 %v12184_v52, %v1855_v15  ;;  %v872_v52 = vld [vmem:[%s18393_s4 + $0x2f8] sm:$0xff] }
 0x301   :  { %2721 = vmatpush.msra.mxu1 %v872_v52  ;;  %v955_v52 = vld [vmem:[%s18393_s4 + $0x590] sm:$0xff] }
 0x302   :  { %v12414_v8 = vpop.f32.mrf.mxu3  ;;  %2526 = vmatmul.f32.gmra.mxu0 %v18521_v28  ;;  %v12417_v0 = vadd.f32 %v1948_v45, %v1902_v30  ;;  %v961_v45 = vld [vmem:[%s18393_s4 + $0x5c0] sm:$0xff] }
 0x303   :  { %2555 = vmatmul.f32.gmra.mxu1 %v18503_v44  ;;  %v1810_v5 = vpop.f32.mrf.mxu2  ;;  %2582 = vmatpush.msra.mxu2 %v961_v45 }
 0x304   :  { %18558 = vst [vmem:[#allocation44_spill] sm:$0xff] %v12417_v0  ;;  %v1811_v48 = vadd.f32 %v1810_v5, %v12075_v7  ;;  %2722 = vmatpush.msra.mxu1 %v869_v20  ;;  %v958_v7 = vld [vmem:[%s18393_s4 + $0x5a8] sm:$0xff] }
 0x305   :  { %2583 = vmatpush.msra.mxu2 %v958_v7  ;;  %v18575_v0 = vld [vmem:[#allocation115_spill] sm:$0xff] }
 0x306   :  { %v1858_v15 = vadd.f32 %v12212_v26, %v1811_v48  ;;  %2723 = vmatpush.msra.mxu1 %v866_v60  ;;  %v863_v48 = vld [vmem:[%s18393_s4 + $0x2b0] sm:$0xff] }
 0x307   :  { %2643 = vmatmul.f32.vlgmr.msrb.gmra.mxu3 %v18553_v39  ;;  %v12435_v30 = vpop.f32.mrf.mxu0  ;;  %2584 = vmatpush.msra.mxu2 %v955_v52 }
 0x308   :  { %v1954_v5 = vpop.f32.mrf.mxu1  ;;  %2417 = vmatmul.f32.gmra.mxu2 %v18559_v42  ;;  %v1905_v26 = vadd.f32 %v12236_v14, %v1858_v15  ;;  %2724 = vmatpush.msra.mxu1 %v863_v48  ;;  %v952_v14 = vld [vmem:[%s18393_s4 + $0x578] sm:$0xff] }
 0x309   :  { %v860_v15 = vld [vmem:[%s18393_s4 + $0x298] sm:$0xff]  ;;  %2585 = vmatpush.msra.mxu2 %v952_v14 }
 0x30a   :  { %v12451_v45 = vpop.f32.mrf.mxu3  ;;  %2529 = vmatmul.f32.gmra.mxu0 %v18526_v37  ;;  %v12454_v20 = vadd.f32 %v1951_v22, %v1905_v26  ;;  %2725 = vmatpush.msra.mxu1 %v860_v15  ;;  %v949_v22 = vld [vmem:[%s18393_s4 + $0x560] sm:$0xff]  ;;  %v18561_v15 = vld [vmem:[#allocation81_spill] sm:$0xff] }
 0x30b   :  { %2558 = vmatmul.f32.gmra.mxu1 %v18507_v31  ;;  %v1813_v60 = vpop.f32.mrf.mxu2  ;;  %v857_v26 = vld [vmem:[%s18393_s4 + $0x280] sm:$0xff]  ;;  %2586 = vmatpush.msra.mxu2 %v949_v22  ;;  %v851_v22 = vld [vmem:[%s18393_s4 + $0x250] sm:$0xff] }
 0x30c   :  { %18560 = vst [vmem:[#allocation30_spill] sm:$0xff] %v12454_v20  ;;  %v1814_v7 = vadd.f32 %v1813_v60, %v12112_v57  ;;  %2726 = vmatpush.msra.mxu1 %v857_v26  ;;  %v946_v57 = vld [vmem:[%s18393_s4 + $0x548] sm:$0xff] }
 0x30d   :  { %v854_v60 = vld [vmem:[%s18393_s4 + $0x268] sm:$0xff]  ;;  %2587 = vmatpush.msra.mxu2 %v946_v57 }
 0x30e   :  { %v1861_v52 = vadd.f32 %v12257_v21, %v1814_v7  ;;  %2727 = vmatpush.msra.mxu1 %v854_v60  ;;  %v943_v7 = vld [vmem:[%s18393_s4 + $0x530] sm:$0xff] }
 0x30f   :  { %2646 = vmatmul.f32.gmra.mxu3 %v18555_v47  ;;  %v12472_v48 = vpop.f32.mrf.mxu0  ;;  %2588 = vmatpush.msra.mxu2 %v943_v7 }
 0x310   :  { %v1957_v14 = vpop.f32.mrf.mxu1  ;;  %2420 = vmatmul.f32.gmra.mxu2 %v18561_v15  ;;  %v1908_v21 = vadd.f32 %v12276_v1, %v1861_v52  ;;  %2728 = vmatpush.msra.mxu1 %v851_v22  ;;  %v940_v1 = vld [vmem:[%s18393_s4 + $0x518] sm:$0xff]  ;;  %v842_v22 = vld [vmem:[%s18393_s4 + $0x208] sm:$0xff] }
 0x311   :  { %v848_v52 = vld [vmem:[%s18393_s4 + $0x238] sm:$0xff]  ;;  %2589 = vmatpush.msra.mxu2 %v940_v1 }
 0x312   :  { %v12488_v26 = vpop.f32.mrf.mxu3  ;;  %2690 = vmatmul.f32.vlgmr.msra.gmra.mxu0 %v18517_v43  ;;  %v12491_v20 = vadd.f32 %v1954_v5, %v1908_v21  ;;  %2729 = vmatpush.msra.mxu1 %v848_v52  ;;  %v937_v43 = vld [vmem:[%s18393_s4 + $0x500] sm:$0xff] }
 0x313   :  { %2561 = vmatmul.f32.gmra.mxu1 %v18511_v33  ;;  %v1816_v60 = vpop.f32.mrf.mxu2  ;;  %v845_v5 = vld [vmem:[%s18393_s4 + $0x220] sm:$0xff]  ;;  %2590 = vmatpush.msra.mxu2 %v937_v43  ;;  %v839_v43 = vld [vmem:[%s18393_s4 + $0x1f0] sm:$0xff] }
 0x314   :  { %18562 = vst [vmem:[#allocation2_spill] sm:$0xff] %v12491_v20  ;;  %v1817_v57 = vadd.f32 %v1816_v60, %v12152_v53  ;;  %2730 = vmatpush.msra.mxu1 %v845_v5  ;;  %v934_v53 = vld [vmem:[%s18393_s4 + $0x4e8] sm:$0xff]  ;;  %v968_v60 = vld [vmem:[%s18393_s4 + $0x5f8] sm:$0xff]  ;;  %v965_v5 = vld [vmem:[%s18393_s4 + $0x5e0] sm:$0xff] }
 0x315   :  { %2591 = vmatpush.msra.mxu2 %v934_v53  ;;  %2815 = vmatpush.msra.mxu3 %v968_v60  ;;  %v928_v53 = vld [vmem:[%s18393_s4 + $0x4b8] sm:$0xff]  ;;  %v962_v60 = vld [vmem:[%s18393_s4 + $0x5c8] sm:$0xff] }
 0x316   :  { %v1864_v21 = vadd.f32 %v12292_v24, %v1817_v57  ;;  %v18563_v24 = vld [vmem:[#allocation85_spill] sm:$0xff]  ;;  %2731 = vmatpush.msra.mxu1 %v842_v22  ;;  %v931_v57 = vld [vmem:[%s18393_s4 + $0x4d0] sm:$0xff] }
 0x317   :  { %2649 = vmatmul.f32.gmra.mxu3 %v18557_v61  ;;  %v12509_v7 = vpop.f32.mrf.mxu0  ;;  %2592 = vmatpush.msra.mxu2 %v931_v57  ;;  %v836_v22 = vld [vmem:[%s18393_s4 + $0x1d8] sm:$0xff]  ;;  %v959_v57 = vld [vmem:[%s18393_s4 + $0x5b0] sm:$0xff] }
 0x318   :  { %v1960_v1 = vpop.f32.mrf.mxu1  ;;  %2423 = vmatmul.f32.gmra.mxu2 %v18563_v24  ;;  %v1911_v52 = vadd.f32 %v12313_v49, %v1864_v21  ;;  %2732 = vmatpush.msra.mxu1 %v839_v43 }
 0x319   :  { %2816 = vmatpush.msra.mxu3 %v965_v5  ;;  %2593 = vmatpush.msra.mxu2 %v928_v53  ;;  %v922_v5 = vld [vmem:[%s18393_s4 + $0x488] sm:$0xff]  ;;  %v956_v53 = vld [vmem:[%s18393_s4 + $0x598] sm:$0xff] }
 0x31a   :  { %v12531_v20 = vpop.f32.mrf.mxu3  ;;  %2693 = vmatmul.f32.gmra.mxu0 %v18522_v10  ;;  %v12534_v49 = vadd.f32 %v1957_v14, %v1911_v52  ;;  %2733 = vmatpush.msra.mxu1 %v836_v22  ;;  %v925_v14 = vld [vmem:[%s18393_s4 + $0x4a0] sm:$0xff]  ;;  %v18565_v22 = vld [vmem:[#allocation89_spill] sm:$0xff] }
 0x31b   :  { %2564 = vmatmul.f32.gmra.mxu1 %v18515_v59  ;;  %v1819_v21 = vpop.f32.mrf.mxu2  ;;  %v833_v52 = vld [vmem:[%s18393_s4 + $0x1c0] sm:$0xff]  ;;  %2817 = vmatpush.msra.mxu3 %v962_v60 }
 0x31c   :  { %18564 = vst [vmem:[#allocation46_spill] sm:$0xff] %v12534_v49  ;;  %v1820_v10 = vadd.f32 %v1819_v21, %v12195_v58  ;;  %2734 = vmatpush.msra.mxu1 %v833_v52  ;;  %2594 = vmatpush.msra.mxu2 %v925_v14  ;;  %v830_v21 = vld [vmem:[%s18393_s4 + $0x1a8] sm:$0xff]  ;;  %v953_v14 = vld [vmem:[%s18393_s4 + $0x580] sm:$0xff] }
 0x31d   :  { %2818 = vmatpush.msra.mxu3 %v959_v57  ;;  %v950_v57 = vld [vmem:[%s18393_s4 + $0x568] sm:$0xff] }
 0x31e   :  { %v1867_v43 = vadd.f32 %v12329_v34, %v1820_v10  ;;  %2595 = vmatpush.msra.mxu2 %v922_v5  ;;  %2735 = vmatpush.msra.mxu1 %v830_v21  ;;  %v827_v10 = vld [vmem:[%s18393_s4 + $0x190] sm:$0xff] }
 0x31f   :  { %2652 = vmatmul.f32.gmra.mxu3 %v18559_v42  ;;  %v12558_v58 = vpop.f32.mrf.mxu0 }
 0x320   :  { %v2362_v34 = vpop.f32.mrf.mxu1  ;;  %2426 = vmatmul.f32.gmra.mxu2 %v18565_v22  ;;  %v1914_v60 = vadd.f32 %v12350_v63, %v1867_v43  ;;  %2819 = vmatpush.msra.mxu3 %v956_v53  ;;  %v1016_v43 = vld [vmem:[%s18393_s4 + $0x778] sm:$0xff] }
 0x321   :  { %2736 = vmatpush.msra.mxu1 %v827_v10  ;;  %2862 = vmatpush.msrb.mxu0 %v1016_v43 }
 0x322   :  { %v12577_v52 = vpop.f32.mrf.mxu3  ;;  %2696 = vmatmul.f32.gmra.mxu0 %v18527_v29  ;;  %v12580_v49 = vadd.f32 %v1960_v1, %v1914_v60  ;;  %2820 = vmatpush.msra.mxu3 %v953_v14  ;;  %v947_v29 = vld [vmem:[%s18393_s4 + $0x550] sm:$0xff]  ;;  %v1013_v1 = vld [vmem:[%s18393_s4 + $0x760] sm:$0xff]  ;;  %v1010_v60 = vld [vmem:[%s18393_s4 + $0x748] sm:$0xff] }
 0x323   :  { %2567 = vmatmul.f32.gmra.mxu1 %v18519_v38  ;;  %v2221_v63 = vpop.f32.mrf.mxu2  ;;  %2863 = vmatpush.msrb.mxu0 %v1013_v1  ;;  %v18567_v14 = vld [vmem:[#allocation92_spill] sm:$0xff]  ;;  %v1004_v1 = vld [vmem:[%s18393_s4 + $0x718] sm:$0xff] }
 0x324   :  { %18566 = vst [vmem:[#allocation34_spill] sm:$0xff] %v12580_v49  ;;  %v2222_v5 = vadd.f32 %v2221_v63, %v11587_v3  ;;  %2821 = vmatpush.msra.mxu3 %v950_v57  ;;  %v944_v3 = vld [vmem:[%s18393_s4 + $0x538] sm:$0xff]  ;;  %v941_v63 = vld [vmem:[%s18393_s4 + $0x520] sm:$0xff]  ;;  %v1007_v57 = vld [vmem:[%s18393_s4 + $0x730] sm:$0xff] }
 0x325   :  { %2864 = vmatpush.msrb.mxu0 %v1010_v60 }
 0x326   :  { %v2269_v21 = vadd.f32 %v12360_v2, %v2222_v5  ;;  %2822 = vmatpush.msra.mxu3 %v947_v29 }
 0x327   :  { %2655 = vmatmul.f32.gmra.mxu3 %v18561_v15  ;;  %v12598_v53 = vpop.f32.mrf.mxu0  ;;  %2865 = vmatpush.msrb.mxu0 %v1007_v57  ;;  %v18568_v57 = vld [vmem:[#allocation94_spill] sm:$0xff] }
 0x328   :  { %v2365_v10 = vpop.f32.mrf.mxu1  ;;  %2429 = vmatmul.f32.gmra.mxu2 %v18567_v14  ;;  %v2316_v2 = vadd.f32 %v12375_v55, %v2269_v21  ;;  %2823 = vmatpush.msra.mxu3 %v944_v3  ;;  %v938_v55 = vld [vmem:[%s18393_s4 + $0x508] sm:$0xff] }
 0x329   :  { %2866 = vmatpush.msrb.mxu0 %v1004_v1 }
 0x32a   :  { %v12614_v43 = vpop.f32.mrf.mxu3  ;;  %2699 = vmatmul.f32.gmra.mxu0 %v18531_v17  ;;  %v12617_v5 = vadd.f32 %v2362_v34, %v2316_v2  ;;  %2824 = vmatpush.msra.mxu3 %v941_v63  ;;  %v935_v17 = vld [vmem:[%s18393_s4 + $0x4f0] sm:$0xff]  ;;  %v1001_v34 = vld [vmem:[%s18393_s4 + $0x700] sm:$0xff]  ;;  %v998_v2 = vld [vmem:[%s18393_s4 + $0x6e8] sm:$0xff] }
 0x32b   :  { %2570 = vmatmul.f32.gmra.mxu1 %v18524_v19  ;;  %v2224_v29 = vpop.f32.mrf.mxu2  ;;  %2867 = vmatpush.msrb.mxu0 %v1001_v34  ;;  %v992_v34 = vld [vmem:[%s18393_s4 + $0x6b8] sm:$0xff] }
 0x32c   :  { %v2225_v21 = vadd.f32 %v2224_v29, %v11625_v9  ;;  %2825 = vmatpush.msra.mxu3 %v938_v55  ;;  %v932_v9 = vld [vmem:[%s18393_s4 + $0x4d8] sm:$0xff]  ;;  %v929_v29 = vld [vmem:[%s18393_s4 + $0x4c0] sm:$0xff]  ;;  %v995_v55 = vld [vmem:[%s18393_s4 + $0x6d0] sm:$0xff] }
 0x32d   :  { %2868 = vmatpush.msrb.mxu0 %v998_v2 }
 0x32e   :  { %v2272_v3 = vadd.f32 %v12385_v56, %v2225_v21  ;;  %2826 = vmatpush.msra.mxu3 %v935_v17 }
 0x32f   :  { %2658 = vmatmul.f32.gmra.mxu3 %v18563_v24  ;;  %v12635_v60 = vpop.f32.mrf.mxu0  ;;  %2869 = vmatpush.msrb.mxu0 %v995_v55 }
 0x330   :  { %v2368_v63 = vpop.f32.mrf.mxu1  ;;  %2432 = vmatmul.f32.gmra.mxu2 %v18568_v57  ;;  %v2319_v56 = vadd.f32 %v12394_v4, %v2272_v3  ;;  %2827 = vmatpush.msra.mxu3 %v932_v9  ;;  %v926_v4 = vld [vmem:[%s18393_s4 + $0x4a8] sm:$0xff] }
 0x331   :  { %2870 = vmatpush.msrb.mxu0 %v992_v34  ;;  %v18570_v34 = vld [vmem:[#allocation49_spill] sm:$0xff] }
 0x332   :  { %v12651_v1 = vpop.f32.mrf.mxu3  ;;  %2702 = vmatmul.f32.gmra.mxu0 %v18535_v13  ;;  %v12654_v21 = vadd.f32 %v2365_v10, %v2319_v56  ;;  %2828 = vmatpush.msra.mxu3 %v929_v29  ;;  %v923_v13 = vld [vmem:[%s18393_s4 + $0x490] sm:$0xff]  ;;  %v989_v10 = vld [vmem:[%s18393_s4 + $0x6a0] sm:$0xff]  ;;  %v18569_v29 = vld [vmem:[#allocation97_spill] sm:$0xff] }
 0x333   :  { %2573 = vmatmul.f32.gmra.mxu1 %v18529_v16  ;;  %v2227_v17 = vpop.f32.mrf.mxu2  ;;  %2871 = vmatpush.msrb.mxu0 %v989_v10 }
 0x334   :  { %v2228_v3 = vadd.f32 %v2227_v17, %v11663_v27  ;;  %2829 = vmatpush.msra.mxu3 %v926_v4  ;;  %v986_v27 = vld [vmem:[%s18393_s4 + $0x688] sm:$0xff] }
 0x335   :  { %2872 = vmatpush.msrb.mxu0 %v986_v27 }
 0x336   :  { %v2275_v9 = vadd.f32 %v12398_v11, %v2228_v3  ;;  %2830 = vmatpush.msra.mxu3 %v923_v13  ;;  %v983_v11 = vld [vmem:[%s18393_s4 + $0x670] sm:$0xff]  ;;  %v18571_v13 = vld [vmem:[#allocation114_spill] sm:$0xff] }
 0x337   :  { %2661 = vmatmul.f32.gmra.mxu3 %v18565_v22  ;;  %v12672_v2 = vpop.f32.mrf.mxu0  ;;  %2873 = vmatpush.msrb.mxu0 %v983_v11 }
 0x338   :  { %v2371_v56 = vpop.f32.mrf.mxu1  ;;  %2435 = vmatmul.f32.gmra.mxu2 %v18569_v29  ;;  %v2322_v55 = vadd.f32 %v12407_v25, %v2275_v9  ;;  %v980_v25 = vld [vmem:[%s18393_s4 + $0x658] sm:$0xff] }
 0x339   :  { %2874 = vmatpush.msrb.mxu0 %v980_v25 }
 0x33a   :  { %v2456_v17 = vpop.f32.mrf.mxu3  ;;  %2705 = vmatmul.f32.gmra.mxu0 %v18538_v41  ;;  %v12683_v4 = vadd.f32 %v2368_v63, %v2322_v55  ;;  %v977_v41 = vld [vmem:[%s18393_s4 + $0x640] sm:$0xff]  ;;  %v974_v55 = vld [vmem:[%s18393_s4 + $0x628] sm:$0xff] }
 0x33b   :  { %v12686_v3 = vadd.f32 %v2456_v17, %v18570_v34  ;;  %2576 = vmatmul.f32.gmra.mxu1 %v18533_v46  ;;  %v2230_v10 = vpop.f32.mrf.mxu2  ;;  %2875 = vmatpush.msrb.mxu0 %v977_v41  ;;  %v18572_v17 = vld [vmem:[#allocation9_spill] sm:$0xff]  ;;  %v18574_v41 = vld [vmem:[#allocation3_spill] sm:$0xff] }
 0x33c   :  { %v2231_v9 = vadd.f32 %v2230_v10, %v18571_v13  ;;  %v971_v10 = vld [vmem:[%s18393_s4 + $0x610] sm:$0xff]  ;;  %v18573_v13 = vld [vmem:[#allocation27_spill] sm:$0xff] }
 0x33d   :  { %2876 = vmatpush.msrb.mxu0 %v974_v55 }
 0x33e   :  { %v2278_v63 = vadd.f32 %v12414_v8, %v2231_v9 }
 0x33f   :  { %2664 = vmatmul.f32.gmra.mxu3 %v18567_v14  ;;  %v12698_v27 = vpop.f32.mrf.mxu0  ;;  %2877 = vmatpush.msrb.mxu0 %v971_v10 }
 0x340   :  { %v2374_v11 = vpop.f32.mrf.mxu1  ;;  %2596 = vmatmul.f32.vlgmr.msra.gmra.mxu2 %v18572_v17  ;;  %v2325_v34 = vadd.f32 %v12435_v30, %v2278_v63 }
 0x342   :  { %v2459_v8 = vpop.f32.mrf.mxu3  ;;  %2708 = vmatmul.f32.gmra.mxu0 %v18541_v40  ;;  %v12709_v25 = vadd.f32 %v2371_v56, %v2325_v34 }
 0x343   :  { %v12712_v9 = vadd.f32 %v2459_v8, %v18573_v13  ;;  %2737 = vmatmul.f32.vlgmr.msra.gmra.mxu1 %v18574_v41  ;;  %v2233_v49 = vpop.f32.mrf.mxu2  ;;  %v18577_v8 = vld [vmem:[#allocation103_spill] sm:$0xff] }
 0x344   :  { %v2234_v51 = vadd.f32 %v2233_v49, %v18575_v0  ;;  %v18578_v0 = vld [vmem:[#allocation6_spill] sm:$0xff] }
 0x346   :  { %v2281_v30 = vadd.f32 %v12451_v45, %v2234_v51  ;;  %v18579_v45 = vld [vmem:[#allocation43_spill] sm:$0xff] }
 0x347   :  { %2667 = vmatmul.f32.gmra.mxu3 %v18568_v57  ;;  %v12718_v63 = vpop.f32.mrf.mxu0 }
 0x348   :  { %v2377_v55 = vpop.f32.mrf.mxu1  ;;  %2599 = vmatmul.f32.gmra.mxu2 %v18576_v32  ;;  %v2328_v40 = vadd.f32 %v12472_v48, %v2281_v30  ;;  %v18580_v30 = vld [vmem:[#allocation17_spill] sm:$0xff] }
 0x34a   :  { %v2462_v56 = vpop.f32.mrf.mxu3  ;;  %2711 = vmatmul.f32.gmra.mxu0 %v18544_v12  ;;  %v12723_v34 = vadd.f32 %v2374_v11, %v2328_v40  ;;  %v920_v11 = vld [vmem:[%s18393_s4 + $0x478] sm:$0xff] }
 0x34b   :  { %v12726_v10 = vadd.f32 %v2462_v56, %v18577_v8  ;;  %2740 = vmatmul.f32.gmra.mxu1 %v18578_v0  ;;  %v2236_v51 = vpop.f32.mrf.mxu2  ;;  %2768 = vmatpush.msrb.mxu2 %v920_v11  ;;  %v18582_v0 = vld [vmem:[#allocation10_spill] sm:$0xff] }
 0x34c   :  { %v2237_v49 = vadd.f32 %v2236_v51, %v18579_v45  ;;  %v8615_v45 = vld [vmem:[%s18393_s4 + $0x1068] sm:$0xff] }
 0x34d   :  { %2969 = vmatpush.msrb.mxu1 %v8615_v45 }
 0x34e   :  { %v2284_v13 = vadd.f32 %v12488_v26, %v2237_v49  ;;  %v18581_v26 = vld [vmem:[#allocation51_spill] sm:$0xff]  ;;  %v18583_v49 = vld [vmem:[#allocation100_spill] sm:$0xff] }
 0x34f   :  { %2670 = vmatmul.f32.gmra.mxu3 %v18569_v29  ;;  %v12732_v41 = vpop.f32.mrf.mxu0 }
 0x350   :  { %v2380_v48 = vpop.f32.mrf.mxu1  ;;  %2602 = vmatmul.f32.gmra.mxu2 %v18580_v30  ;;  %v2331_v12 = vadd.f32 %v12509_v7, %v2284_v13  ;;  %v917_v7 = vld [vmem:[%s18393_s4 + $0x460] sm:$0xff] }
 0x351   :  { %2769 = vmatpush.msrb.mxu2 %v917_v7  ;;  %v8606_v7 = vld [vmem:[%s18393_s4 + $0x1020] sm:$0xff] }
 0x352   :  { %v2465_v40 = vpop.f32.mrf.mxu3  ;;  %2714 = vmatmul.f32.gmra.mxu0 %v18547_v23  ;;  %v12740_v56 = vadd.f32 %v2377_v55, %v2331_v12  ;;  %v914_v23 = vld [vmem:[%s18393_s4 + $0x448] sm:$0xff]  ;;  %v8612_v55 = vld [vmem:[%s18393_s4 + $0x1050] sm:$0xff] }
 0x353   :  { %v12743_v8 = vadd.f32 %v2465_v40, %v18581_v26  ;;  %2743 = vmatmul.f32.gmra.mxu1 %v18582_v0  ;;  %v2239_v51 = vpop.f32.mrf.mxu2  ;;  %2770 = vmatpush.msrb.mxu2 %v914_v23  ;;  %v911_v40 = vld [vmem:[%s18393_s4 + $0x430] sm:$0xff]  ;;  %v8609_v26 = vld [vmem:[%s18393_s4 + $0x1038] sm:$0xff] }
 0x354   :  { %v2240_v13 = vadd.f32 %v2239_v51, %v18583_v49  ;;  %2970 = vmatpush.msrb.mxu1 %v8612_v55  ;;  %v18584_v51 = vld [vmem:[#allocation21_spill] sm:$0xff]  ;;  %v905_v55 = vld [vmem:[%s18393_s4 + $0x400] sm:$0xff] }
 0x355   :  { %2771 = vmatpush.msrb.mxu2 %v911_v40  ;;  %v18586_v40 = vld [vmem:[#allocation45_spill] sm:$0xff] }
 0x356   :  { %v2287_v12 = vadd.f32 %v12531_v20, %v2240_v13  ;;  %2971 = vmatpush.msrb.mxu1 %v8609_v26  ;;  %v18585_v13 = vld [vmem:[#allocation31_spill] sm:$0xff] }
 0x357   :  { %2831 = vmatmul.f32.vlgmr.msra.gmra.mxu3 %v18572_v17  ;;  %v12761_v11 = vpop.f32.mrf.mxu0  ;;  %v908_v17 = vld [vmem:[%s18393_s4 + $0x418] sm:$0xff] }
 0x358   :  { %v2383_v0 = vpop.f32.mrf.mxu1  ;;  %2605 = vmatmul.f32.gmra.mxu2 %v18584_v51  ;;  %v2334_v20 = vadd.f32 %v12558_v58, %v2287_v12  ;;  %2972 = vmatpush.msrb.mxu1 %v8606_v7  ;;  %v8603_v12 = vld [vmem:[%s18393_s4 + $0x1008] sm:$0xff]  ;;  %v8597_v7 = vld [vmem:[%s18393_s4 + $0xfd8] sm:$0xff] }
 0x359   :  { %2772 = vmatpush.msrb.mxu2 %v908_v17  ;;  %v899_v17 = vld [vmem:[%s18393_s4 + $0x3d0] sm:$0xff] }
 0x35a   :  { %v2468_v45 = vpop.f32.mrf.mxu3  ;;  %2717 = vmatmul.f32.gmra.mxu0 %v18550_v50  ;;  %v12778_v49 = vadd.f32 %v2380_v48, %v2334_v20  ;;  %2973 = vmatpush.msrb.mxu1 %v8603_v12  ;;  %v902_v48 = vld [vmem:[%s18393_s4 + $0x3e8] sm:$0xff] }
 0x35b   :  { %v12781_v23 = vadd.f32 %v2468_v45, %v18585_v13  ;;  %2746 = vmatmul.f32.gmra.mxu1 %v18501_v35  ;;  %v2242_v58 = vpop.f32.mrf.mxu2  ;;  %v8600_v35 = vld [vmem:[%s18393_s4 + $0xff0] sm:$0xff]  ;;  %2773 = vmatpush.msrb.mxu2 %v905_v55  ;;  %v18587_v13 = vld [vmem:[#allocation25_spill] sm:$0xff] }
 0x35c   :  { %v2243_v50 = vadd.f32 %v2242_v58, %v18586_v40  ;;  %2974 = vmatpush.msrb.mxu1 %v8600_v35  ;;  %v8594_v58 = vld [vmem:[%s18393_s4 + $0xfc0] sm:$0xff]  ;;  %v8591_v35 = vld [vmem:[%s18393_s4 + $0xfa8] sm:$0xff] }
 0x35d   :  { %2774 = vmatpush.msrb.mxu2 %v902_v48  ;;  %v18588_v40 = vld [vmem:[#allocation14_spill] sm:$0xff] }
 0x35e   :  { %v2290_v26 = vadd.f32 %v12577_v52, %v2243_v50  ;;  %2975 = vmatpush.msrb.mxu1 %v8597_v7  ;;  %v893_v48 = vld [vmem:[%s18393_s4 + $0x3a0] sm:$0xff]  ;;  %v9596_v7 = vmov 0  }
 0x35f   :  { %2834 = vmatmul.f32.gmra.mxu3 %v18576_v32  ;;  %v12799_v20 = vpop.f32.mrf.mxu0  ;;  %2775 = vmatpush.msrb.mxu2 %v899_v17  ;;  %v896_v32 = vld [vmem:[%s18393_s4 + $0x3b8] sm:$0xff]  ;;  %v8588_v17 = vld [vmem:[%s18393_s4 + $0xf90] sm:$0xff] }
 0x360   :  { %v2386_v45 = vpop.f32.mrf.mxu1  ;;  %2608 = vmatmul.f32.gmra.mxu2 %v18587_v13  ;;  %v2337_v52 = vadd.f32 %v12598_v53, %v2290_v26  ;;  %2976 = vmatpush.msrb.mxu1 %v8594_v58  ;;  %v18589_v26 = vld [vmem:[#allocation47_spill] sm:$0xff]  ;;  %v887_v58 = vld [vmem:[%s18393_s4 + $0x370] sm:$0xff] }
 0x361   :  { %2776 = vmatpush.msrb.mxu2 %v896_v32  ;;  %9585 = vset.pattern.permute.xlu0 %v9596_v7 }
 0x362   :  { %v2471_v55 = vpop.f32.mrf.mxu3  ;;  %2878 = vmatmul.f32.vlgmr.msrb.gmra.mxu0 %v18553_v39  ;;  %v12816_v12 = vadd.f32 %v2383_v0, %v2337_v52  ;;  %2977 = vmatpush.msrb.mxu1 %v8591_v35  ;;  %v2918_v0 = vld [vmem:[%s18590_s25 + $0x48] sm:$0xff]  ;;  %v8582_v35 = vld [vmem:[%s18393_s4 + $0xf60] sm:$0xff] }
 0x363   :  { %v12819_v50 = vadd.f32 %v2471_v55, %v18588_v40  ;;  %2749 = vmatmul.f32.gmra.mxu1 %v18504_v62  ;;  %v2245_v53 = vpop.f32.mrf.mxu2  ;;  %v890_v62 = vld [vmem:[%s18393_s4 + $0x388] sm:$0xff]  ;;  %2777 = vmatpush.msrb.mxu2 %v893_v48  ;;  %v8585_v55 = vld [vmem:[%s18393_s4 + $0xf78] sm:$0xff] }
 0x364   :  { %v2246_v39 = vadd.f32 %v2245_v53, %v18589_v26  ;;  %2966 = vperm.xlu0 %9585, %v2918_v0   ;;  %2978 = vmatpush.msrb.mxu1 %v8588_v17  ;;  %v8711_v40 = vld [vmem:[%s18393_s4 + $0x1368] sm:$0xff]  ;;  %v18591_v53 = vld [vmem:[#allocation29_spill] sm:$0xff]  ;;  %v8708_v26 = vld [vmem:[%s18393_s4 + $0x1350] sm:$0xff] }
 0x365   :  { %2778 = vmatpush.msrb.mxu2 %v890_v62  ;;  %3063 = vmatpush.msrb.mxu3 %v8711_v40  ;;  %v884_v48 = vld [vmem:[%s18393_s4 + $0x358] sm:$0xff]  ;;  %v878_v40 = vld [vmem:[%s18393_s4 + $0x328] sm:$0xff] }
 0x366   :  { %v2293_v52 = vadd.f32 %v12614_v43, %v2246_v39  ;;  %2979 = vmatpush.msrb.mxu1 %v8585_v55  ;;  %9586 = vset.pattern.permute.xlu1 %v9596_v7 }
 0x367   :  { %2837 = vmatmul.f32.gmra.mxu3 %v18580_v30  ;;  %v12841_v32 = vpop.f32.mrf.mxu0  ;;  %2779 = vmatpush.msrb.mxu2 %v887_v58  ;;  %v8579_v58 = vld [vmem:[%s18393_s4 + $0xf48] sm:$0xff] }
 0x368   :  { %v2389_v43 = vpop.f32.mrf.mxu1  ;;  %2611 = vmatmul.f32.gmra.mxu2 %v18591_v53  ;;  %v2340_v30 = vadd.f32 %v12635_v60, %v2293_v52  ;;  %2980 = vmatpush.msrb.mxu1 %v8582_v35  ;;  %v18592_v60 = vld [vmem:[#allocation53_spill] sm:$0xff]  ;;  %v881_v52 = vld [vmem:[%s18393_s4 + $0x340] sm:$0xff] }
 0x369   :  { %2780 = vmatpush.msrb.mxu2 %v884_v48  ;;  %3064 = vmatpush.msrb.mxu3 %v8708_v26  ;;  %v8702_v35 = vld [vmem:[%s18393_s4 + $0x1320] sm:$0xff] }
 0x36a   :  { %v2474_v39 = vpop.f32.mrf.mxu3  ;;  %2881 = vmatmul.f32.gmra.mxu0 %v18555_v47  ;;  %v12864_v0 = vadd.f32 %v2386_v45, %v2340_v30  ;;  %v8705_v47 = vld [vmem:[%s18393_s4 + $0x1338] sm:$0xff]  ;;  %v18593_v45 = vld [vmem:[#allocation102_spill] sm:$0xff]  ;;  %2981 = vmatpush.msrb.mxu1 %v8579_v58  ;;  %v8576_v30 = vld [vmem:[%s18393_s4 + $0xf30] sm:$0xff] }
 0x36b   :  { %v12867_v62 = vadd.f32 %v2474_v39, %v18592_v60  ;;  %2752 = vmatmul.f32.gmra.mxu1 %v18508_v18  ;;  %v2248_v17 = vpop.f32.mrf.mxu2  ;;  %v2917_v18 = vld [vmem:[%s18590_s25 + $0x40] sm:$0xff]  ;;  %2781 = vmatpush.msrb.mxu2 %v881_v52  ;;  %v875_v39 = vld [vmem:[%s18393_s4 + $0x310] sm:$0xff]  ;;  %v8573_v60 = vld [vmem:[%s18393_s4 + $0xf18] sm:$0xff] }
 0x36c   :  { %v2249_v55 = vadd.f32 %v2248_v17, %v18593_v45  ;;  %3065 = vmatpush.msrb.mxu3 %v8705_v47  ;;  %2961 = vperm.xlu0 %9585, %v2917_v18   ;;  %v18594_v17 = vld [vmem:[#allocation33_spill] sm:$0xff]  ;;  %v8570_v58 = vld [vmem:[%s18393_s4 + $0xf00] sm:$0xff]  ;;  %v8696_v45 = vld [vmem:[%s18393_s4 + $0x12f0] sm:$0xff] }
 0x36d   :  { %2782 = vmatpush.msrb.mxu2 %v878_v40  ;;  %2982 = vmatpush.msrb.mxu1 %v8576_v30  ;;  %v18595_v18 = vld [vmem:[#allocation35_spill] sm:$0xff] }
 0x36e   :  { %v2296_v48 = vadd.f32 %v12651_v1, %v2249_v55  ;;  %3066 = vmatpush.msrb.mxu3 %v8702_v35  ;;  %v8756_v35 = vld [vmem:[%s18393_s4 + $0x14d0] sm:$0xff]  ;;  %9587 = vset.pattern.permute.xlu2 %v9596_v7  ;;  %v8687_v7 = vld [vmem:[%s18393_s4 + $0x12a8] sm:$0xff] }
 0x36f   :  { %2840 = vmatmul.f32.gmra.mxu3 %v18584_v51  ;;  %v12895_v26 = vpop.f32.mrf.mxu0  ;;  %v8699_v51 = vld [vmem:[%s18393_s4 + $0x1308] sm:$0xff]  ;;  %2783 = vmatpush.msrb.mxu2 %v875_v39  ;;  %v8693_v39 = vld [vmem:[%s18393_s4 + $0x12d8] sm:$0xff] }
 0x370   :  { %v12903_v1 = vpop.f32.mrf.mxu1  ;;  %2614 = vmatmul.f32.gmra.mxu2 %v18594_v17  ;;  %v2343_v52 = vadd.f32 %v12672_v2, %v2296_v48  ;;  %2983 = vmatpush.msrb.mxu1 %v8573_v60  ;;  %v18596_v2 = vld [vmem:[#allocation26_spill] sm:$0xff]  ;;  %v8759_v48 = vld [vmem:[%s18393_s4 + $0x14e8] sm:$0xff] }
 0x371   :  { %3067 = vmatpush.msrb.mxu3 %v8699_v51  ;;  %3110 = vmatpush.msra.mxu0 %v8759_v48  ;;  %v8690_v60 = vld [vmem:[%s18393_s4 + $0x12c0] sm:$0xff]  ;;  %v8753_v51 = vld [vmem:[%s18393_s4 + $0x14b8] sm:$0xff]  ;;  %v8747_v48 = vld [vmem:[%s18393_s4 + $0x1488] sm:$0xff] }
 0x372   :  { %v2477_v47 = vpop.f32.mrf.mxu3  ;;  %2884 = vmatmul.f32.gmra.mxu0 %v18557_v61  ;;  %v12917_v55 = vadd.f32 %v2389_v43, %v2343_v52  ;;  %2984 = vmatpush.msrb.mxu1 %v8570_v58  ;;  %v2912_v43 = vld [vmem:[%s18590_s25 + $0x18] sm:$0xff] }
 0x373   :  { %v12920_v40 = vadd.f32 %v2477_v47, %v18595_v18  ;;  %2755 = vmatmul.f32.gmra.mxu1 %v18596_v2  ;;  %v2409_v30 = vpop.f32.mrf.mxu2  ;;  %3068 = vmatpush.msrb.mxu3 %v8696_v45  ;;  %v18598_v58 = vld [vmem:[#allocation37_spill] sm:$0xff]  ;;  %v18599_v45 = vld [vmem:[#allocation18_spill] sm:$0xff] }
 0x374   :  { %v12927_v61 = vadd.f32 %v2409_v30, %v12617_v5  ;;  %2936 = vperm.xlu0 %9585, %v2912_v43   ;;  %3111 = vmatpush.msra.mxu0 %v8756_v35  ;;  %v8684_v30 = vld [vmem:[%s18393_s4 + $0x1290] sm:$0xff]  ;;  %v8681_v35 = vld [vmem:[%s18393_s4 + $0x1278] sm:$0xff] }
 0x375   :  { %3069 = vmatpush.msrb.mxu3 %v8693_v39 }
 0x376   :  { %18597 = vst [vmem:[#allocation5_spill] sm:$0xff] %v12927_v61  ;;  %3112 = vmatpush.msra.mxu0 %v8753_v51  ;;  %v8741_v51 = vld [vmem:[%s18393_s4 + $0x1458] sm:$0xff] }
 0x377   :  { %2843 = vmatmul.f32.gmra.mxu3 %v18587_v13  ;;  %v12940_v5 = vpop.f32.mrf.mxu0  ;;  %v8750_v13 = vld [vmem:[%s18393_s4 + $0x14a0] sm:$0xff] }
 0x378   :  { %v12948_v52 = vpop.f32.mrf.mxu1  ;;  %2617 = vmatmul.f32.gmra.mxu2 %v18598_v58  ;;  %3070 = vmatpush.msrb.mxu3 %v8690_v60  ;;  %v8678_v60 = vld [vmem:[%s18393_s4 + $0x1260] sm:$0xff] }
 0x379   :  { %3113 = vmatpush.msra.mxu0 %v8750_v13  ;;  %v18601_v13 = vld [vmem:[#allocation40_spill] sm:$0xff] }
 0x37a   :  { %v2480_v47 = vpop.f32.mrf.mxu3  ;;  %2887 = vmatmul.f32.gmra.mxu0 %v18559_v42  ;;  %3071 = vmatpush.msrb.mxu3 %v8687_v7  ;;  %v2916_v42 = vld [vmem:[%s18590_s25 + $0x38] sm:$0xff] }
 0x37b   :  { %v12959_v18 = vadd.f32 %v2480_v47, %v18599_v45  ;;  %2758 = vmatmul.f32.gmra.mxu1 %v18516_v54  ;;  %v2412_v2 = vpop.f32.mrf.mxu2  ;;  %v2909_v54 = vld [vmem:[%s18590_s25] sm:$0xff]  ;;  %3114 = vmatpush.msra.mxu0 %v8747_v48 }
 0x37c   :  { %v12969_v43 = vadd.f32 %v2412_v2, %v12654_v21  ;;  %2956 = vperm.xlu1 %9586, %v2916_v42   ;;  %v8744_v21 = vld [vmem:[%s18393_s4 + $0x1470] sm:$0xff]  ;;  %3072 = vmatpush.msrb.mxu3 %v8684_v30  ;;  %v8738_v47 = vld [vmem:[%s18393_s4 + $0x1440] sm:$0xff] }
 0x37d   :  { %2921 = vperm.xlu0 %9585, %v2909_v54   ;;  %3115 = vmatpush.msra.mxu0 %v8744_v21  ;;  %v18602_v2 = vld [vmem:[#allocation54_spill] sm:$0xff]  ;;  %v8672_v42 = vld [vmem:[%s18393_s4 + $0x1230] sm:$0xff]  ;;  %v8735_v54 = vld [vmem:[%s18393_s4 + $0x1428] sm:$0xff] }
 0x37e   :  { %18600 = vst [vmem:[#allocation48_spill] sm:$0xff] %v12969_v43  ;;  %3073 = vmatpush.msrb.mxu3 %v8681_v35  ;;  %v8669_v21 = vld [vmem:[%s18393_s4 + $0x1218] sm:$0xff] }
 0x37f   :  { %2846 = vmatmul.f32.gmra.mxu3 %v18591_v53  ;;  %v12984_v39 = vpop.f32.mrf.mxu0  ;;  %v8675_v53 = vld [vmem:[%s18393_s4 + $0x1248] sm:$0xff]  ;;  %3116 = vmatpush.msra.mxu0 %v8741_v51  ;;  %v8729_v51 = vld [vmem:[%s18393_s4 + $0x13f8] sm:$0xff] }
 0x380   :  { %v12992_v7 = vpop.f32.mrf.mxu1  ;;  %2620 = vmatmul.f32.gmra.mxu2 %v18601_v13  ;;  %3074 = vmatpush.msrb.mxu3 %v8678_v60  ;;  %v8666_v60 = vld [vmem:[%s18393_s4 + $0x1200] sm:$0xff] }
 0x381   :  { %3117 = vmatpush.msra.mxu0 %v8738_v47  ;;  %v18604_v47 = vld [vmem:[#allocation42_spill] sm:$0xff] }
 0x382   :  { %v2483_v45 = vpop.f32.mrf.mxu3  ;;  %2890 = vmatmul.f32.gmra.mxu0 %v18561_v15  ;;  %3075 = vmatpush.msrb.mxu3 %v8675_v53  ;;  %v2915_v15 = vld [vmem:[%s18590_s25 + $0x30] sm:$0xff] }
 0x383   :  { %v13003_v30 = vadd.f32 %v2483_v45, %v18602_v2  ;;  %2761 = vmatmul.f32.gmra.mxu1 %v18521_v28  ;;  %v2415_v48 = vpop.f32.mrf.mxu2  ;;  %v8732_v28 = vld [vmem:[%s18393_s4 + $0x1410] sm:$0xff]  ;;  %3118 = vmatpush.msra.mxu0 %v8735_v54  ;;  %v2914_v54 = vld [vmem:[%s18590_s25 + $0x28] sm:$0xff] }
 0x384   :  { %v13013_v35 = vadd.f32 %v2415_v48, %v12683_v4  ;;  %2951 = vperm.xlu1 %9586, %v2915_v15   ;;  %3076 = vmatpush.msrb.mxu3 %v8672_v42  ;;  %v8723_v48 = vld [vmem:[%s18393_s4 + $0x13c8] sm:$0xff] }
 0x385   :  { %3119 = vmatpush.msra.mxu0 %v8732_v28  ;;  %2946 = vperm.xlu2 %9587, %v2914_v54   ;;  %v18608_v54 = vld [vmem:[#allocation59_spill] sm:$0xff] }
 0x386   :  { %18603 = vst [vmem:[#allocation38_spill] sm:$0xff] %v13013_v35  ;;  %3077 = vmatpush.msrb.mxu3 %v8669_v21  ;;  %v8714_v21 = vld [vmem:[%s18393_s4 + $0x1380] sm:$0xff]  ;;  %v18619_v35 = vld [vmem:[#allocation84_spill] sm:$0xff] }
 0x387   :  { %2849 = vmatmul.f32.gmra.mxu3 %v18594_v17  ;;  %v13025_v4 = vpop.f32.mrf.mxu0  ;;  %3120 = vmatpush.msra.mxu0 %v8729_v51  ;;  %v8726_v17 = vld [vmem:[%s18393_s4 + $0x13e0] sm:$0xff] }
 0x388   :  { %v13033_v53 = vpop.f32.mrf.mxu1  ;;  %2623 = vmatmul.f32.gmra.mxu2 %v18604_v47  ;;  %3078 = vmatpush.msrb.mxu3 %v8666_v60 }
 0x389   :  { %3121 = vmatpush.msra.mxu0 %v8726_v17 }
 0x38a   :  { %v13039_v45 = vpop.f32.mrf.mxu3  ;;  %2893 = vmatmul.f32.gmra.mxu0 %v18563_v24  ;;  %v2911_v24 = vld [vmem:[%s18590_s25 + $0x10] sm:$0xff] }
 0x38b   :  { %2764 = vmatmul.f32.gmra.mxu1 %v18526_v37  ;;  %v2418_v2 = vpop.f32.mrf.mxu2  ;;  %v8720_v37 = vld [vmem:[%s18393_s4 + $0x13b0] sm:$0xff]  ;;  %3122 = vmatpush.msra.mxu0 %v8723_v48 }
 0x38c   :  { %v13047_v42 = vadd.f32 %v2418_v2, %v12709_v25  ;;  %2931 = vperm.xlu1 %9586, %v2911_v24   ;;  %v8717_v25 = vld [vmem:[%s18393_s4 + $0x1398] sm:$0xff] }
 0x38d   :  { %3123 = vmatpush.msra.mxu0 %v8720_v37 }
 0x38e   :  { %18605 = vst [vmem:[#allocation8_spill] sm:$0xff] %v13047_v42 }
 0x38f   :  { %2852 = vmatmul.f32.gmra.mxu3 %v18598_v58  ;;  %v13059_v15 = vpop.f32.mrf.mxu0  ;;  %3124 = vmatpush.msra.mxu0 %v8717_v25  ;;  %v18606_v58 = vld [vmem:[#allocation57_spill] sm:$0xff] }
 0x390   :  { %v13064_v28 = vpop.f32.mrf.mxu1  ;;  %2784 = vmatmul.f32.vlgmr.msrb.gmra.mxu2 %v18494_v36  ;;  %v2913_v36 = vld [vmem:[%s18590_s25 + $0x20] sm:$0xff] }
 0x391   :  { %3125 = vmatpush.msra.mxu0 %v8714_v21  ;;  %2941 = vperm.xlu2 %9587, %v2913_v36   ;;  %v8804_v36 = vld [vmem:[%s18393_s4 + $0x1650] sm:$0xff] }
 0x392   :  { %v13070_v60 = vpop.f32.mrf.mxu3  ;;  %2896 = vmatmul.f32.gmra.mxu0 %v18565_v22 }
 0x393   :  { %2985 = vmatmul.f32.vlgmr.msrb.gmra.mxu1 %v18606_v58  ;;  %v2421_v51 = vpop.f32.mrf.mxu2 }
 0x394   :  { %v13075_v17 = vadd.f32 %v2421_v51, %v12723_v34 }
 0x396   :  { %18607 = vst [vmem:[#allocation50_spill] sm:$0xff] %v13075_v17 }
 0x397   :  { %2855 = vmatmul.f32.gmra.mxu3 %v18601_v13  ;;  %v13081_v2 = vpop.f32.mrf.mxu0  ;;  %v2910_v13 = vld [vmem:[%s18590_s25 + $0x8] sm:$0xff] }
 0x398   :  { %v13083_v48 = vpop.f32.mrf.mxu1  ;;  %2787 = vmatmul.f32.gmra.mxu2 %v18499_v6 }
 0x399   :  { %2926 = vperm.xlu2 %9587, %v2910_v13  }
 0x39a   :  { %v13086_v22 = vpop.f32.mrf.mxu3  ;;  %2899 = vmatmul.f32.gmra.mxu0 %v18567_v14  ;;  %v8663_v14 = vld [vmem:[%s18393_s4 + $0x11e8] sm:$0xff] }
 0x39b   :  { %2988 = vmatmul.f32.gmra.mxu1 %v18608_v54  ;;  %v2424_v34 = vpop.f32.mrf.mxu2  ;;  %3016 = vmatpush.msra.mxu2 %v8663_v14  ;;  %v8801_v14 = vld [vmem:[%s18393_s4 + $0x1638] sm:$0xff] }
 0x39c   :  { %v13091_v24 = vadd.f32 %v2424_v34, %v12740_v56  ;;  %v18610_v56 = vld [vmem:[#allocation61_spill] sm:$0xff]  ;;  %v18612_v34 = vld [vmem:[#allocation76_spill] sm:$0xff] }
 0x39e   :  { %18609 = vst [vmem:[#allocation12_spill] sm:$0xff] %v13091_v24  ;;  %v18616_v24 = vld [vmem:[#allocation62_spill] sm:$0xff] }
 0x39f   :  { %2858 = vmatmul.f32.gmra.mxu3 %v18604_v47  ;;  %v13097_v37 = vpop.f32.mrf.mxu0  ;;  %v8660_v47 = vld [vmem:[%s18393_s4 + $0x11d0] sm:$0xff] }
 0x3a0   :  { %v13099_v6 = vpop.f32.mrf.mxu1  ;;  %2790 = vmatmul.f32.gmra.mxu2 %v18503_v44  ;;  %v8807_v44 = vld [vmem:[%s18393_s4 + $0x1668] sm:$0xff] }
 0x3a1   :  { %3017 = vmatpush.msra.mxu2 %v8660_v47  ;;  %3157 = vmatpush.msra.mxu1 %v8807_v44  ;;  %v8651_v47 = vld [vmem:[%s18393_s4 + $0x1188] sm:$0xff]  ;;  %v8798_v44 = vld [vmem:[%s18393_s4 + $0x1620] sm:$0xff] }
 0x3a2   :  { %v13105_v25 = vpop.f32.mrf.mxu3  ;;  %2902 = vmatmul.f32.gmra.mxu0 %v18568_v57  ;;  %v8657_v57 = vld [vmem:[%s18393_s4 + $0x11b8] sm:$0xff] }
 0x3a3   :  { %2991 = vmatmul.f32.gmra.mxu1 %v18610_v56  ;;  %v2427_v21 = vpop.f32.mrf.mxu2  ;;  %3018 = vmatpush.msra.mxu2 %v8657_v57 }
 0x3a4   :  { %v13116_v51 = vadd.f32 %v2427_v21, %v12778_v49  ;;  %3158 = vmatpush.msra.mxu1 %v8804_v36  ;;  %v8654_v49 = vld [vmem:[%s18393_s4 + $0x11a0] sm:$0xff]  ;;  %v18613_v36 = vld [vmem:[#allocation64_spill] sm:$0xff] }
 0x3a5   :  { %3019 = vmatpush.msra.mxu2 %v8654_v49  ;;  %v8795_v49 = vld [vmem:[%s18393_s4 + $0x1608] sm:$0xff] }
 0x3a6   :  { %18611 = vst [vmem:[#allocation52_spill] sm:$0xff] %v13116_v51  ;;  %3159 = vmatpush.msra.mxu1 %v8801_v14  ;;  %v18617_v51 = vld [vmem:[#allocation4_spill] sm:$0xff] }
 0x3a7   :  { %3079 = vmatmul.f32.vlgmr.msrb.gmra.mxu3 %v18612_v34  ;;  %v13125_v13 = vpop.f32.mrf.mxu0  ;;  %3020 = vmatpush.msra.mxu2 %v8651_v47  ;;  %v8792_v47 = vld [vmem:[%s18393_s4 + $0x15f0] sm:$0xff] }
 0x3a8   :  { %v13133_v21 = vpop.f32.mrf.mxu1  ;;  %2793 = vmatmul.f32.gmra.mxu2 %v18507_v31  ;;  %3160 = vmatpush.msra.mxu1 %v8798_v44  ;;  %v8648_v31 = vld [vmem:[%s18393_s4 + $0x1170] sm:$0xff] }
 0x3a9   :  { %3021 = vmatpush.msra.mxu2 %v8648_v31  ;;  %v18615_v44 = vld [vmem:[#allocation80_spill] sm:$0xff] }
 0x3aa   :  { %v13142_v57 = vpop.f32.mrf.mxu3  ;;  %2905 = vmatmul.f32.gmra.mxu0 %v18569_v29  ;;  %3161 = vmatpush.msra.mxu1 %v8795_v49  ;;  %v8645_v29 = vld [vmem:[%s18393_s4 + $0x1158] sm:$0xff]  ;;  %v8639_v49 = vld [vmem:[%s18393_s4 + $0x1128] sm:$0xff] }
 0x3ab   :  { %2994 = vmatmul.f32.gmra.mxu1 %v18613_v36  ;;  %v2430_v42 = vpop.f32.mrf.mxu2  ;;  %3022 = vmatpush.msra.mxu2 %v8645_v29  ;;  %v8786_v29 = vld [vmem:[%s18393_s4 + $0x15c0] sm:$0xff] }
 0x3ac   :  { %v13153_v14 = vadd.f32 %v2430_v42, %v12816_v12  ;;  %3162 = vmatpush.msra.mxu1 %v8792_v47  ;;  %v8642_v12 = vld [vmem:[%s18393_s4 + $0x1140] sm:$0xff]  ;;  %v8789_v42 = vld [vmem:[%s18393_s4 + $0x15d8] sm:$0xff] }
 0x3ad   :  { %3023 = vmatpush.msra.mxu2 %v8642_v12  ;;  %v8783_v12 = vld [vmem:[%s18393_s4 + $0x15a8] sm:$0xff]  ;;  %v8658_v36 = vld [vmem:[%s18393_s4 + $0x11c0] sm:$0xff] }
 0x3ae   :  { %18614 = vst [vmem:[#allocation16_spill] sm:$0xff] %v13153_v14  ;;  %3163 = vmatpush.msra.mxu1 %v8789_v42 }
 0x3af   :  { %3082 = vmatmul.f32.gmra.mxu3 %v18615_v44  ;;  %v13162_v17 = vpop.f32.mrf.mxu0  ;;  %3024 = vmatpush.msra.mxu2 %v8639_v49  ;;  %v8780_v49 = vld [vmem:[%s18393_s4 + $0x1590] sm:$0xff] }
 0x3b0   :  { %v13170_v31 = vpop.f32.mrf.mxu1  ;;  %2796 = vmatmul.f32.gmra.mxu2 %v18511_v33  ;;  %3164 = vmatpush.msra.mxu1 %v8786_v29  ;;  %v8636_v33 = vld [vmem:[%s18393_s4 + $0x1110] sm:$0xff]  ;;  %v8633_v29 = vld [vmem:[%s18393_s4 + $0x10f8] sm:$0xff] }
 0x3b1   :  { %3025 = vmatpush.msra.mxu2 %v8636_v33  ;;  %v8664_v33 = vld [vmem:[%s18393_s4 + $0x11f0] sm:$0xff] }
 0x3b2   :  { %v13179_v47 = vpop.f32.mrf.mxu3  ;;  %3126 = vmatmul.f32.vlgmr.msra.gmra.mxu0 %v18616_v24  ;;  %3165 = vmatpush.msra.mxu1 %v8783_v12 }
 0x3b3   :  { %2997 = vmatmul.f32.gmra.mxu1 %v18617_v51  ;;  %v2433_v14 = vpop.f32.mrf.mxu2  ;;  %3026 = vmatpush.msra.mxu2 %v8633_v29  ;;  %v8627_v29 = vld [vmem:[%s18393_s4 + $0x10c8] sm:$0xff]  ;;  %v18620_v51 = vld [vmem:[#allocation65_spill] sm:$0xff] }
 0x3b4   :  { %v13190_v42 = vadd.f32 %v2433_v14, %v12864_v0  ;;  %3166 = vmatpush.msra.mxu1 %v8780_v49  ;;  %v8630_v0 = vld [vmem:[%s18393_s4 + $0x10e0] sm:$0xff]  ;;  %v8777_v14 = vld [vmem:[%s18393_s4 + $0x1578] sm:$0xff]  ;;  %3251 = vmatpush.msra.mxu3 %v8664_v33  ;;  %v8771_v33 = vld [vmem:[%s18393_s4 + $0x1548] sm:$0xff] }
 0x3b5   :  { %3027 = vmatpush.msra.mxu2 %v8630_v0  ;;  %v8774_v49 = vld [vmem:[%s18393_s4 + $0x1560] sm:$0xff] }
 0x3b6   :  { %18618 = vst [vmem:[#allocation20_spill] sm:$0xff] %v13190_v42  ;;  %3167 = vmatpush.msra.mxu1 %v8777_v14  ;;  %v8661_v42 = vld [vmem:[%s18393_s4 + $0x11d8] sm:$0xff]  ;;  %v8624_v14 = vld [vmem:[%s18393_s4 + $0x10b0] sm:$0xff] }
 0x3b7   :  { %3085 = vmatmul.f32.gmra.mxu3 %v18619_v35  ;;  %v13199_v43 = vpop.f32.mrf.mxu0  ;;  %3028 = vmatpush.msra.mxu2 %v8627_v29  ;;  %v8621_v29 = vld [vmem:[%s18393_s4 + $0x1098] sm:$0xff] }
 0x3b8   :  { %v13210_v12 = vpop.f32.mrf.mxu1  ;;  %2799 = vmatmul.f32.gmra.mxu2 %v18515_v59  ;;  %3168 = vmatpush.msra.mxu1 %v8774_v49  ;;  %v18621_v59 = vld [vmem:[#allocation7_spill] sm:$0xff]  ;;  %v8768_v49 = vld [vmem:[%s18393_s4 + $0x1530] sm:$0xff] }
 0x3b9   :  { %3252 = vmatpush.msra.mxu3 %v8661_v42  ;;  %3029 = vmatpush.msra.mxu2 %v8624_v14  ;;  %v8618_v42 = vld [vmem:[%s18393_s4 + $0x1080] sm:$0xff]  ;;  %v8652_v14 = vld [vmem:[%s18393_s4 + $0x1190] sm:$0xff] }
 0x3ba   :  { %v13222_v61 = vpop.f32.mrf.mxu3  ;;  %3129 = vmatmul.f32.gmra.mxu0 %v18620_v51  ;;  %3169 = vmatpush.msra.mxu1 %v8771_v33  ;;  %v18623_v51 = vld [vmem:[#allocation88_spill] sm:$0xff] }
 0x3bb   :  { %3000 = vmatmul.f32.gmra.mxu1 %v18621_v59  ;;  %v2436_v0 = vpop.f32.mrf.mxu2  ;;  %v8655_v59 = vld [vmem:[%s18393_s4 + $0x11a8] sm:$0xff]  ;;  %3253 = vmatpush.msra.mxu3 %v8658_v36  ;;  %v2504_v36 = vadd.f32 %v12698_v27, %v12686_v3  ;;  %v18625_v3 = vld [vmem:[#allocation68_spill] sm:$0xff] }
 0x3bc   :  { %v13236_v56 = vadd.f32 %v2436_v0, %v12917_v55  ;;  %3170 = vmatpush.msra.mxu1 %v8768_v49  ;;  %3030 = vmatpush.msra.mxu2 %v8621_v29  ;;  %v8765_v0 = vld [vmem:[%s18393_s4 + $0x1518] sm:$0xff]  ;;  %v8762_v29 = vld [vmem:[%s18393_s4 + $0x1500] sm:$0xff]  ;;  %v18626_v27 = vld [vmem:[#allocation11_spill] sm:$0xff] }
 0x3bd   :  { %3254 = vmatpush.msra.mxu3 %v8655_v59  ;;  %v8649_v49 = vld [vmem:[%s18393_s4 + $0x1178] sm:$0xff]  ;;  %v8646_v59 = vld [vmem:[%s18393_s4 + $0x1160] sm:$0xff] }
 0x3be   :  { %18622 = vst [vmem:[#allocation24_spill] sm:$0xff] %v13236_v56  ;;  %3031 = vmatpush.msra.mxu2 %v8618_v42  ;;  %3171 = vmatpush.msra.mxu1 %v8765_v0  ;;  %v2551_v56 = vadd.f32 %v12903_v1, %v2504_v36  ;;  %v8712_v42 = vld [vmem:[%s18393_s4 + $0x1370] sm:$0xff]  ;;  %v8643_v1 = vld [vmem:[%s18393_s4 + $0x1148] sm:$0xff] }
 0x3bf   :  { %3088 = vmatmul.f32.gmra.mxu3 %v18623_v51  ;;  %v13248_v55 = vpop.f32.mrf.mxu0  ;;  %3298 = vmatpush.msrb.mxu0 %v8712_v42 }
 0x3c0   :  { %18624 = vst [vmem:[#allocation28_spill] sm:$0xff] %v13248_v55  ;;  %v13261_v33 = vpop.f32.mrf.mxu1  ;;  %2802 = vmatmul.f32.gmra.mxu2 %v18519_v38  ;;  %3255 = vmatpush.msra.mxu3 %v8652_v14  ;;  %v8709_v14 = vld [vmem:[%s18393_s4 + $0x1358] sm:$0xff] }
 0x3c1   :  { %3172 = vmatpush.msra.mxu1 %v8762_v29  ;;  %3299 = vmatpush.msrb.mxu0 %v8709_v14  ;;  %v8706_v29 = vld [vmem:[%s18393_s4 + $0x1340] sm:$0xff]  ;;  %v18629_v14 = vld [vmem:[#allocation71_spill] sm:$0xff] }
 0x3c2   :  { %v13271_v55 = vpop.f32.mrf.mxu3  ;;  %3132 = vmatmul.f32.gmra.mxu0 %v18625_v3  ;;  %3256 = vmatpush.msra.mxu3 %v8649_v49  ;;  %v2507_v49 = vadd.f32 %v12718_v63, %v12712_v9  ;;  %v18630_v9 = vld [vmem:[#allocation15_spill] sm:$0xff]  ;;  %v8634_v63 = vld [vmem:[%s18393_s4 + $0x1100] sm:$0xff] }
 0x3c3   :  { %3003 = vmatmul.f32.gmra.mxu1 %v18626_v27  ;;  %v2597_v38 = vpop.f32.mrf.mxu2  ;;  %v18628_v27 = vld [vmem:[#allocation90_spill] sm:$0xff]  ;;  %3300 = vmatpush.msrb.mxu0 %v8706_v29 }
 0x3c4   :  { %v2598_v0 = vadd.f32 %v2597_v38, %v2551_v56  ;;  %3257 = vmatpush.msra.mxu3 %v8646_v59  ;;  %v8640_v56 = vld [vmem:[%s18393_s4 + $0x1130] sm:$0xff]  ;;  %v8703_v59 = vld [vmem:[%s18393_s4 + $0x1328] sm:$0xff]  ;;  %v2554_v42 = vadd.f32 %v12948_v52, %v2507_v49 }
 0x3c5   :  { %3301 = vmatpush.msrb.mxu0 %v8703_v59  ;;  %v8631_v52 = vld [vmem:[%s18393_s4 + $0x10e8] sm:$0xff]  ;;  %v18632_v59 = vld [vmem:[#allocation93_spill] sm:$0xff] }
 0x3c6   :  { %v13288_v36 = vadd.f32 %v13039_v45, %v2598_v0  ;;  %3258 = vmatpush.msra.mxu3 %v8643_v1  ;;  %v8637_v45 = vld [vmem:[%s18393_s4 + $0x1118] sm:$0xff]  ;;  %v8700_v1 = vld [vmem:[%s18393_s4 + $0x1310] sm:$0xff] }
 0x3c7   :  { %3091 = vmatmul.f32.gmra.mxu3 %v18628_v27  ;;  %v13291_v3 = vpop.f32.mrf.mxu0  ;;  %3302 = vmatpush.msrb.mxu0 %v8700_v1 }
 0x3c8   :  { %18627 = vst [vmem:[#allocation32_spill] sm:$0xff] %v13288_v36  ;;  %v13301_v38 = vpop.f32.mrf.mxu1  ;;  %2805 = vmatmul.f32.gmra.mxu2 %v18524_v19  ;;  %3259 = vmatpush.msra.mxu3 %v8640_v56  ;;  %v8697_v56 = vld [vmem:[%s18393_s4 + $0x12f8] sm:$0xff] }
 0x3c9   :  { %3303 = vmatpush.msrb.mxu0 %v8697_v56 }
 0x3ca   :  { %v13311_v0 = vpop.f32.mrf.mxu3  ;;  %3135 = vmatmul.f32.gmra.mxu0 %v18629_v14  ;;  %3260 = vmatpush.msra.mxu3 %v8637_v45  ;;  %v8628_v45 = vld [vmem:[%s18393_s4 + $0x10d0] sm:$0xff] }
 0x3cb   :  { %3006 = vmatmul.f32.gmra.mxu1 %v18630_v9  ;;  %v2600_v19 = vpop.f32.mrf.mxu2  ;;  %v18646_v9 = vld [vmem:[#allocation99_spill] sm:$0xff] }
 0x3cc   :  { %v2601_v29 = vadd.f32 %v2600_v19, %v2554_v42  ;;  %3261 = vmatpush.msra.mxu3 %v8634_v63  ;;  %v8694_v42 = vld [vmem:[%s18393_s4 + $0x12e0] sm:$0xff]  ;;  %v2510_v19 = vadd.f32 %v12732_v41, %v12726_v10  ;;  %v8691_v63 = vld [vmem:[%s18393_s4 + $0x12c8] sm:$0xff] }
 0x3cd   :  { %3304 = vmatpush.msrb.mxu0 %v8694_v42  ;;  %v18634_v10 = vld [vmem:[#allocation19_spill] sm:$0xff]  ;;  %v8622_v41 = vld [vmem:[%s18393_s4 + $0x10a0] sm:$0xff] }
 0x3ce   :  { %v13328_v49 = vadd.f32 %v13070_v60, %v2601_v29  ;;  %3262 = vmatpush.msra.mxu3 %v8631_v52  ;;  %v8625_v60 = vld [vmem:[%s18393_s4 + $0x10b8] sm:$0xff]  ;;  %v2557_v29 = vadd.f32 %v12992_v7, %v2510_v19  ;;  %v8688_v52 = vld [vmem:[%s18393_s4 + $0x12b0] sm:$0xff]  ;;  %v8619_v7 = vld [vmem:[%s18393_s4 + $0x1088] sm:$0xff] }
 0x3cf   :  { %3094 = vmatmul.f32.gmra.mxu3 %v18632_v59  ;;  %v13331_v36 = vpop.f32.mrf.mxu0  ;;  %3305 = vmatpush.msrb.mxu0 %v8691_v63  ;;  %v18636_v63 = vld [vmem:[#allocation96_spill] sm:$0xff] }
 0x3d0   :  { %18631 = vst [vmem:[#allocation36_spill] sm:$0xff] %v13328_v49  ;;  %v13341_v1 = vpop.f32.mrf.mxu1  ;;  %2808 = vmatmul.f32.gmra.mxu2 %v18529_v16  ;;  %v18633_v49 = vld [vmem:[#allocation74_spill] sm:$0xff]  ;;  %3263 = vmatpush.msra.mxu3 %v8628_v45  ;;  %v8685_v45 = vld [vmem:[%s18393_s4 + $0x1298] sm:$0xff] }
 0x3d1   :  { %3306 = vmatpush.msrb.mxu0 %v8688_v52 }
 0x3d2   :  { %v13351_v56 = vpop.f32.mrf.mxu3  ;;  %3138 = vmatmul.f32.gmra.mxu0 %v18633_v49  ;;  %3264 = vmatpush.msra.mxu3 %v8625_v60  ;;  %v8682_v60 = vld [vmem:[%s18393_s4 + $0x1280] sm:$0xff] }
 0x3d3   :  { %3009 = vmatmul.f32.gmra.mxu1 %v18634_v10  ;;  %v2603_v16 = vpop.f32.mrf.mxu2  ;;  %3307 = vmatpush.msrb.mxu0 %v8685_v45  ;;  %v18639_v45 = vld [vmem:[#allocation23_spill] sm:$0xff] }
 0x3d4   :  { %v2604_v42 = vadd.f32 %v2603_v16, %v2557_v29  ;;  %3265 = vmatpush.msra.mxu3 %v8622_v41  ;;  %v2513_v29 = vadd.f32 %v12761_v11, %v12743_v8  ;;  %v8673_v11 = vld [vmem:[%s18393_s4 + $0x1238] sm:$0xff] }
 0x3d5   :  { %3308 = vmatpush.msrb.mxu0 %v8682_v60 }
 0x3d6   :  { %v13368_v19 = vadd.f32 %v13086_v22, %v2604_v42  ;;  %3266 = vmatpush.msra.mxu3 %v8619_v7  ;;  %v8679_v22 = vld [vmem:[%s18393_s4 + $0x1268] sm:$0xff]  ;;  %v2560_v41 = vadd.f32 %v13033_v53, %v2513_v29  ;;  %v18641_v7 = vld [vmem:[#allocation98_spill] sm:$0xff] }
 0x3d7   :  { %3097 = vmatmul.f32.gmra.mxu3 %v18636_v63  ;;  %v13371_v10 = vpop.f32.mrf.mxu0  ;;  %v18638_v42 = vld [vmem:[#allocation79_spill] sm:$0xff]  ;;  %3309 = vmatpush.msrb.mxu0 %v8679_v22  ;;  %v8670_v29 = vld [vmem:[%s18393_s4 + $0x1220] sm:$0xff] }
 0x3d8   :  { %18635 = vst [vmem:[#allocation67_spill] sm:$0xff] %v13368_v19  ;;  %v13378_v16 = vpop.f32.mrf.mxu1  ;;  %2811 = vmatmul.f32.gmra.mxu2 %v18533_v46  ;;  %v8676_v46 = vld [vmem:[%s18393_s4 + $0x1250] sm:$0xff] }
 0x3d9   :  { %18637 = vst [vmem:[#allocation70_spill] sm:$0xff] %v13371_v10  ;;  %3310 = vmatpush.msrb.mxu0 %v8676_v46 }
 0x3da   :  { %v13385_v52 = vpop.f32.mrf.mxu3  ;;  %3141 = vmatmul.f32.gmra.mxu0 %v18638_v42  ;;  %v2519_v42 = vadd.f32 %v12841_v32, %v12819_v50  ;;  %v2522_v32 = vadd.f32 %v12895_v26, %v12867_v62  ;;  %v8613_v62 = vld [vmem:[%s18393_s4 + $0x1058] sm:$0xff]  ;;  %v8760_v26 = vld [vmem:[%s18393_s4 + $0x14f0] sm:$0xff] }
 0x3db   :  { %3012 = vmatmul.f32.gmra.mxu1 %v18639_v45  ;;  %v2606_v19 = vpop.f32.mrf.mxu2  ;;  %3311 = vmatpush.msrb.mxu0 %v8673_v11  ;;  %v18643_v11 = vld [vmem:[#allocation83_spill] sm:$0xff] }
 0x3dc   :  { %v2607_v8 = vadd.f32 %v2606_v19, %v2560_v41  ;;  %v2516_v19 = vadd.f32 %v12799_v20, %v12781_v23  ;;  %v18642_v41 = vld [vmem:[#allocation58_spill] sm:$0xff]  ;;  %3345 = vmatpush.msrb.mxu1 %v8760_v26 }
 0x3dd   :  { %3312 = vmatpush.msrb.mxu0 %v8670_v29 }
 0x3de   :  { %v13396_v53 = vadd.f32 %v13105_v25, %v2607_v8  ;;  %v8667_v25 = vld [vmem:[%s18393_s4 + $0x1208] sm:$0xff]  ;;  %v2563_v46 = vadd.f32 %v13064_v28, %v2516_v19  ;;  %v18647_v19 = vld [vmem:[#allocation60_spill] sm:$0xff] }
 0x3df   :  { %3100 = vmatmul.f32.gmra.mxu3 %v18641_v7  ;;  %v13399_v60 = vpop.f32.mrf.mxu0  ;;  %3313 = vmatpush.msrb.mxu0 %v8667_v25  ;;  %v18648_v25 = vld [vmem:[#allocation87_spill] sm:$0xff] }
 0x3e0   :  { %18640 = vst [vmem:[#allocation73_spill] sm:$0xff] %v13396_v53  ;;  %v13406_v22 = vpop.f32.mrf.mxu1  ;;  %3032 = vmatmul.f32.vlgmr.msra.gmra.mxu2 %v18642_v41  ;;  %v18644_v53 = vld [vmem:[#allocation104_spill] sm:$0xff] }
 0x3e2   :  { %v13413_v8 = vpop.f32.mrf.mxu3  ;;  %3144 = vmatmul.f32.gmra.mxu0 %v18643_v11  ;;  %v2566_v11 = vadd.f32 %v13083_v48, %v2519_v42  ;;  %v18652_v48 = vld [vmem:[#allocation63_spill] sm:$0xff]  ;;  %v8616_v42 = vld [vmem:[%s18393_s4 + $0x1070] sm:$0xff] }
 0x3e3   :  { %3173 = vmatmul.f32.vlgmr.msra.gmra.mxu1 %v18644_v53  ;;  %v2609_v45 = vpop.f32.mrf.mxu2  ;;  %3204 = vmatpush.msrb.mxu2 %v8616_v42 }
 0x3e4   :  { %v2610_v23 = vadd.f32 %v2609_v45, %v2563_v46  ;;  %v18649_v45 = vld [vmem:[#allocation105_spill] sm:$0xff] }
 0x3e5   :  { %3205 = vmatpush.msrb.mxu2 %v8613_v62  ;;  %v2525_v62 = vadd.f32 %v12940_v5, %v12920_v40  ;;  %v18658_v40 = vld [vmem:[#allocation107_spill] sm:$0xff] }
 0x3e6   :  { %v13418_v20 = vadd.f32 %v13142_v57, %v2610_v23 }
 0x3e7   :  { %3103 = vmatmul.f32.gmra.mxu3 %v18646_v9  ;;  %v13421_v29 = vpop.f32.mrf.mxu0 }
 0x3e8   :  { %18645 = vst [vmem:[#allocation77_spill] sm:$0xff] %v13418_v20  ;;  %v13425_v28 = vpop.f32.mrf.mxu1  ;;  %3035 = vmatmul.f32.gmra.mxu2 %v18647_v19  ;;  %v18651_v20 = vld [vmem:[#allocation101_spill] sm:$0xff] }
 0x3ea   :  { %v13429_v53 = vpop.f32.mrf.mxu3  ;;  %3147 = vmatmul.f32.gmra.mxu0 %v18648_v25 }
 0x3eb   :  { %3176 = vmatmul.f32.gmra.mxu1 %v18649_v45  ;;  %v2612_v57 = vpop.f32.mrf.mxu2 }
 0x3ec   :  { %v2613_v46 = vadd.f32 %v2612_v57, %v2566_v11  ;;  %v2569_v11 = vadd.f32 %v13099_v6, %v2522_v32  ;;  %v8610_v6 = vld [vmem:[%s18393_s4 + $0x1040] sm:$0xff]  ;;  %v8757_v32 = vld [vmem:[%s18393_s4 + $0x14d8] sm:$0xff] }
 0x3ed   :  { %3206 = vmatpush.msrb.mxu2 %v8610_v6  ;;  %3346 = vmatpush.msrb.mxu1 %v8757_v32  ;;  %v8751_v6 = vld [vmem:[%s18393_s4 + $0x14a8] sm:$0xff]  ;;  %v2572_v32 = vadd.f32 %v13133_v21, %v2525_v62  ;;  %v8598_v21 = vld [vmem:[%s18393_s4 + $0xfe0] sm:$0xff]  ;;  %v8745_v62 = vld [vmem:[%s18393_s4 + $0x1478] sm:$0xff] }
 0x3ee   :  { %v13434_v23 = vadd.f32 %v13179_v47, %v2613_v46  ;;  %v18653_v47 = vld [vmem:[#allocation91_spill] sm:$0xff]  ;;  %v18654_v46 = vld [vmem:[#allocation106_spill] sm:$0xff] }
 0x3ef   :  { %3106 = vmatmul.f32.gmra.mxu3 %v18651_v20  ;;  %v13437_v50 = vpop.f32.mrf.mxu0 }
 0x3f0   :  { %18650 = vst [vmem:[#allocation81_spill] sm:$0xff] %v13434_v23  ;;  %v13441_v10 = vpop.f32.mrf.mxu1  ;;  %3038 = vmatmul.f32.gmra.mxu2 %v18652_v48 }
 0x3f2   :  { %v13448_v57 = vpop.f32.mrf.mxu3  ;;  %3150 = vmatmul.f32.gmra.mxu0 %v18653_v47  ;;  %v18657_v47 = vld [vmem:[#allocation95_spill] sm:$0xff] }
 0x3f3   :  { %3179 = vmatmul.f32.gmra.mxu1 %v18654_v46  ;;  %v2615_v23 = vpop.f32.mrf.mxu2 }
 0x3f4   :  { %v2616_v45 = vadd.f32 %v2615_v23, %v2569_v11  ;;  %v8607_v23 = vld [vmem:[%s18393_s4 + $0x1028] sm:$0xff]  ;;  %v8754_v11 = vld [vmem:[%s18393_s4 + $0x14c0] sm:$0xff] }
 0x3f5   :  { %3347 = vmatpush.msrb.mxu1 %v8754_v11  ;;  %3207 = vmatpush.msrb.mxu2 %v8607_v23  ;;  %v8601_v23 = vld [vmem:[%s18393_s4 + $0xff8] sm:$0xff]  ;;  %v8748_v11 = vld [vmem:[%s18393_s4 + $0x1490] sm:$0xff] }
 0x3f6   :  { %v13465_v42 = vadd.f32 %v13222_v61, %v2616_v45  ;;  %v18656_v61 = vld [vmem:[#allocation66_spill] sm:$0xff]  ;;  %v8604_v45 = vld [vmem:[%s18393_s4 + $0x1010] sm:$0xff] }
 0x3f7   :  { %3267 = vmatmul.f32.vlgmr.msra.gmra.mxu3 %v18642_v41  ;;  %v13468_v46 = vpop.f32.mrf.mxu0  ;;  %3348 = vmatpush.msrb.mxu1 %v8751_v6 }
 0x3f8   :  { %18655 = vst [vmem:[#allocation85_spill] sm:$0xff] %v13465_v42  ;;  %v13478_v26 = vpop.f32.mrf.mxu1  ;;  %3041 = vmatmul.f32.gmra.mxu2 %v18656_v61 }
 0x3f9   :  { %3208 = vmatpush.msrb.mxu2 %v8604_v45  ;;  %3349 = vmatpush.msrb.mxu1 %v8748_v11 }
 0x3fa   :  { %v13488_v42 = vpop.f32.mrf.mxu3  ;;  %3153 = vmatmul.f32.gmra.mxu0 %v18657_v47 }
 0x3fb   :  { %3182 = vmatmul.f32.gmra.mxu1 %v18658_v40  ;;  %v2618_v5 = vpop.f32.mrf.mxu2  ;;  %3209 = vmatpush.msrb.mxu2 %v8601_v23  ;;  %v2528_v23 = vadd.f32 %v12984_v39, %v12959_v18  ;;  %v18661_v18 = vld [vmem:[#allocation108_spill] sm:$0xff] }
 0x3fc   :  { %v2619_v25 = vadd.f32 %v2618_v5, %v2572_v32  ;;  %3350 = vmatpush.msrb.mxu1 %v8745_v62  ;;  %v8595_v32 = vld [vmem:[%s18393_s4 + $0xfc8] sm:$0xff]  ;;  %v8742_v5 = vld [vmem:[%s18393_s4 + $0x1460] sm:$0xff] }
 0x3fd   :  { %3210 = vmatpush.msrb.mxu2 %v8598_v21  ;;  %v8739_v21 = vld [vmem:[%s18393_s4 + $0x1448] sm:$0xff]  ;;  %v2575_v62 = vadd.f32 %v13170_v31, %v2528_v23  ;;  %v8586_v31 = vld [vmem:[%s18393_s4 + $0xf80] sm:$0xff]  ;;  %v8733_v23 = vld [vmem:[%s18393_s4 + $0x1418] sm:$0xff] }
 0x3fe   :  { %v13505_v45 = vadd.f32 %v13271_v55, %v2619_v25  ;;  %v18660_v55 = vld [vmem:[#allocation69_spill] sm:$0xff]  ;;  %3351 = vmatpush.msrb.mxu1 %v8742_v5  ;;  %v8592_v25 = vld [vmem:[%s18393_s4 + $0xfb0] sm:$0xff] }
 0x3ff   :  { %3270 = vmatmul.f32.gmra.mxu3 %v18647_v19  ;;  %v13508_v6 = vpop.f32.mrf.mxu0  ;;  %3211 = vmatpush.msrb.mxu2 %v8595_v32  ;;  %v8589_v32 = vld [vmem:[%s18393_s4 + $0xf98] sm:$0xff]  ;;  %v8736_v5 = vld [vmem:[%s18393_s4 + $0x1430] sm:$0xff] }
 0x400   :  { %18659 = vst [vmem:[#allocation89_spill] sm:$0xff] %v13505_v45  ;;  %v13518_v11 = vpop.f32.mrf.mxu1  ;;  %3044 = vmatmul.f32.gmra.mxu2 %v18660_v55  ;;  %3352 = vmatpush.msrb.mxu1 %v8739_v21 }
 0x401   :  { %3212 = vmatpush.msrb.mxu2 %v8592_v25 }
 0x402   :  { %v13528_v45 = vpop.f32.mrf.mxu3  ;;  %3314 = vmatmul.f32.vlgmr.msrb.gmra.mxu0 %v18612_v34  ;;  %3353 = vmatpush.msrb.mxu1 %v8736_v5  ;;  %v18663_v5 = vld [vmem:[#allocation72_spill] sm:$0xff]  ;;  %v8665_v34 = vld [vmem:[%s18393_s4 + $0x11f8] sm:$0xff] }
 0x403   :  { %3185 = vmatmul.f32.gmra.mxu1 %v18661_v18  ;;  %v2621_v39 = vpop.f32.mrf.mxu2  ;;  %3213 = vmatpush.msrb.mxu2 %v8589_v32  ;;  %v8617_v32 = vld [vmem:[%s18393_s4 + $0x1078] sm:$0xff]  ;;  %v8724_v18 = vld [vmem:[%s18393_s4 + $0x13d0] sm:$0xff] }
 0x404   :  { %v2622_v40 = vadd.f32 %v2621_v39, %v2575_v62  ;;  %3354 = vmatpush.msrb.mxu1 %v8733_v23  ;;  %v8583_v62 = vld [vmem:[%s18393_s4 + $0xf68] sm:$0xff]  ;;  %v8730_v39 = vld [vmem:[%s18393_s4 + $0x1400] sm:$0xff]  ;;  %3439 = vmatpush.msrb.mxu3 %v8617_v32  ;;  %v8577_v32 = vld [vmem:[%s18393_s4 + $0xf38] sm:$0xff] }
 0x405   :  { %3214 = vmatpush.msrb.mxu2 %v8586_v31  ;;  %v8580_v31 = vld [vmem:[%s18393_s4 + $0xf50] sm:$0xff]  ;;  %v8727_v23 = vld [vmem:[%s18393_s4 + $0x13e8] sm:$0xff]  ;;  %3486 = vmatpush.msra.mxu0 %v8665_v34 }
 0x406   :  { %v13545_v25 = vadd.f32 %v13311_v0, %v2622_v40  ;;  %v2531_v0 = vadd.f32 %v13025_v4, %v13003_v30  ;;  %3355 = vmatpush.msrb.mxu1 %v8730_v39  ;;  %v8659_v34 = vld [vmem:[%s18393_s4 + $0x11c8] sm:$0xff] }
 0x407   :  { %3273 = vmatmul.f32.gmra.mxu3 %v18652_v48  ;;  %v13548_v21 = vpop.f32.mrf.mxu0  ;;  %3215 = vmatpush.msrb.mxu2 %v8583_v62  ;;  %v18664_v62 = vld [vmem:[#allocation109_spill] sm:$0xff] }
 0x408   :  { %18662 = vst [vmem:[#allocation92_spill] sm:$0xff] %v13545_v25  ;;  %v13561_v40 = vpop.f32.mrf.mxu1  ;;  %3047 = vmatmul.f32.gmra.mxu2 %v18663_v5  ;;  %v8614_v25 = vld [vmem:[%s18393_s4 + $0x1060] sm:$0xff]  ;;  %v2578_v30 = vadd.f32 %v13210_v12, %v2531_v0  ;;  %3356 = vmatpush.msrb.mxu1 %v8727_v23  ;;  %v8611_v12 = vld [vmem:[%s18393_s4 + $0x1048] sm:$0xff] }
 0x409   :  { %3216 = vmatpush.msrb.mxu2 %v8580_v31  ;;  %3440 = vmatpush.msrb.mxu3 %v8614_v25  ;;  %v5049_v31 = vld [vmem:[%s18665_s13 + $0x38] sm:$0xff]  ;;  %v8574_v23 = vld [vmem:[%s18393_s4 + $0xf20] sm:$0xff] }
 0x40a   :  { %v13574_v4 = vpop.f32.mrf.mxu3  ;;  %3317 = vmatmul.f32.gmra.mxu0 %v18615_v44  ;;  %3357 = vmatpush.msrb.mxu1 %v8724_v18  ;;  %v8608_v18 = vld [vmem:[%s18393_s4 + $0x1030] sm:$0xff] }
 0x40b   :  { %3188 = vmatmul.f32.gmra.mxu1 %v18664_v62  ;;  %v2624_v39 = vpop.f32.mrf.mxu2  ;;  %3217 = vmatpush.msrb.mxu2 %v8577_v32  ;;  %v8721_v62 = vld [vmem:[%s18393_s4 + $0x13b8] sm:$0xff] }
 0x40c   :  { %v2625_v0 = vadd.f32 %v2624_v39, %v2578_v30  ;;  %3441 = vmatpush.msrb.mxu3 %v8611_v12  ;;  %5089 = vperm.xlu0 %9585, %v5049_v31   ;;  %v8571_v30 = vld [vmem:[%s18393_s4 + $0xf08] sm:$0xff]  ;;  %v8605_v31 = vld [vmem:[%s18393_s4 + $0x1018] sm:$0xff] }
 0x40d   :  { %3218 = vmatpush.msrb.mxu2 %v8574_v23  ;;  %v18667_v39 = vld [vmem:[#allocation39_spill] sm:$0xff]  ;;  %3358 = vmatpush.msrb.mxu1 %v8721_v62  ;;  %v8602_v62 = vld [vmem:[%s18393_s4 + $0x1000] sm:$0xff] }
 0x40e   :  { %v13597_v44 = vadd.f32 %v13351_v56, %v2625_v0  ;;  %v8718_v56 = vld [vmem:[%s18393_s4 + $0x13a0] sm:$0xff]  ;;  %v2692_v32 = vadd.f32 %v13059_v15, %v18667_v39  ;;  %v18668_v0 = vld [vmem:[#allocation75_spill] sm:$0xff]  ;;  %3442 = vmatpush.msrb.mxu3 %v8608_v18 }
 0x40f   :  { %3276 = vmatmul.f32.gmra.mxu3 %v18656_v61  ;;  %v13603_v25 = vpop.f32.mrf.mxu0  ;;  %3219 = vmatpush.msrb.mxu2 %v8571_v30  ;;  %v5051_v23 = vld [vmem:[%s18665_s13 + $0x48] sm:$0xff]  ;;  %v18669_v18 = vld [vmem:[#allocation110_spill] sm:$0xff] }
 0x410   :  { %18666 = vst [vmem:[#allocation94_spill] sm:$0xff] %v13597_v44  ;;  %v13613_v12 = vpop.f32.mrf.mxu1  ;;  %3050 = vmatmul.f32.gmra.mxu2 %v18668_v0  ;;  %v8715_v44 = vld [vmem:[%s18393_s4 + $0x1388] sm:$0xff]  ;;  %v2739_v15 = vadd.f32 %v13261_v33, %v2692_v32  ;;  %3359 = vmatpush.msrb.mxu1 %v8718_v56  ;;  %v5046_v56 = vld [vmem:[%s18665_s13 + $0x20] sm:$0xff] }
 0x411   :  { %3443 = vmatpush.msrb.mxu3 %v8605_v31  ;;  %5099 = vperm.xlu1 %9586, %v5051_v23   ;;  %v8599_v33 = vld [vmem:[%s18393_s4 + $0xfe8] sm:$0xff]  ;;  %v8662_v32 = vld [vmem:[%s18393_s4 + $0x11e0] sm:$0xff]  ;;  %v8596_v23 = vld [vmem:[%s18393_s4 + $0xfd0] sm:$0xff] }
 0x412   :  { %v13626_v39 = vpop.f32.mrf.mxu3  ;;  %3320 = vmatmul.f32.gmra.mxu0 %v18619_v35  ;;  %3360 = vmatpush.msrb.mxu1 %v8715_v44 }
 0x413   :  { %3191 = vmatmul.f32.gmra.mxu1 %v18669_v18  ;;  %v2785_v30 = vpop.f32.mrf.mxu2  ;;  %3444 = vmatpush.msrb.mxu3 %v8602_v62 }
 0x414   :  { %v2786_v47 = vadd.f32 %v2785_v30, %v2739_v15  ;;  %5074 = vperm.xlu0 %9585, %v5046_v56   ;;  %3487 = vmatpush.msra.mxu0 %v8662_v32  ;;  %v18670_v15 = vld [vmem:[#allocation22_spill] sm:$0xff]  ;;  %v8593_v56 = vld [vmem:[%s18393_s4 + $0xfb8] sm:$0xff]  ;;  %v5048_v32 = vld [vmem:[%s18665_s13 + $0x30] sm:$0xff] }
 0x415   :  { %v2695_v62 = vadd.f32 %v13081_v2, %v18670_v15  ;;  %3445 = vmatpush.msrb.mxu3 %v8599_v33  ;;  %v8656_v2 = vld [vmem:[%s18393_s4 + $0x11b0] sm:$0xff]  ;;  %v18673_v33 = vld [vmem:[#allocation111_spill] sm:$0xff] }
 0x416   :  { %v2833_v31 = vadd.f32 %v13385_v52, %v2786_v47  ;;  %v18672_v47 = vld [vmem:[#allocation78_spill] sm:$0xff]  ;;  %3488 = vmatpush.msra.mxu0 %v8659_v34 }
 0x417   :  { %3279 = vmatmul.f32.gmra.mxu3 %v18660_v55  ;;  %v13647_v44 = vpop.f32.mrf.mxu0  ;;  %v8590_v34 = vld [vmem:[%s18393_s4 + $0xfa0] sm:$0xff] }
 0x418   :  { %v13658_v30 = vadd.f32 %v13399_v60, %v2833_v31  ;;  %v13660_v52 = vpop.f32.mrf.mxu1  ;;  %3053 = vmatmul.f32.gmra.mxu2 %v18672_v47  ;;  %v2742_v60 = vadd.f32 %v13301_v38, %v2695_v62  ;;  %3446 = vmatpush.msrb.mxu3 %v8596_v23  ;;  %v8587_v38 = vld [vmem:[%s18393_s4 + $0xf88] sm:$0xff]  ;;  %v8650_v62 = vld [vmem:[%s18393_s4 + $0x1180] sm:$0xff] }
 0x419   :  { %3489 = vmatpush.msra.mxu0 %v8656_v2  ;;  %5084 = vperm.xlu1 %9586, %v5048_v32   ;;  %v5043_v23 = vld [vmem:[%s18665_s13 + $0x8] sm:$0xff] }
 0x41a   :  { %18671 = vst [vmem:[#allocation97_spill] sm:$0xff] %v13658_v30  ;;  %v13673_v31 = vpop.f32.mrf.mxu3  ;;  %3323 = vmatmul.f32.gmra.mxu0 %v18623_v51  ;;  %v8653_v30 = vld [vmem:[%s18393_s4 + $0x1198] sm:$0xff]  ;;  %3447 = vmatpush.msrb.mxu3 %v8593_v56  ;;  %v8647_v32 = vld [vmem:[%s18393_s4 + $0x1168] sm:$0xff] }
 0x41b   :  { %3194 = vmatmul.f32.gmra.mxu1 %v18673_v33  ;;  %v2788_v15 = vpop.f32.mrf.mxu2  ;;  %3490 = vmatpush.msra.mxu0 %v8653_v30  ;;  %v8584_v30 = vld [vmem:[%s18393_s4 + $0xf70] sm:$0xff] }
 0x41c   :  { %v2789_v18 = vadd.f32 %v2788_v15, %v2742_v60  ;;  %3448 = vmatpush.msrb.mxu3 %v8590_v34  ;;  %5059 = vperm.xlu0 %9585, %v5043_v23   ;;  %v18674_v60 = vld [vmem:[#allocation55_spill] sm:$0xff]  ;;  %v18676_v34 = vld [vmem:[#allocation82_spill] sm:$0xff]  ;;  %v8581_v23 = vld [vmem:[%s18393_s4 + $0xf58] sm:$0xff] }
 0x41d   :  { %3491 = vmatpush.msra.mxu0 %v8650_v62  ;;  %v2698_v15 = vadd.f32 %v13097_v37, %v18674_v60  ;;  %v5045_v62 = vld [vmem:[%s18665_s13 + $0x18] sm:$0xff]  ;;  %v8644_v37 = vld [vmem:[%s18393_s4 + $0x1150] sm:$0xff] }
 0x41e   :  { %v2836_v2 = vadd.f32 %v13413_v8, %v2789_v18  ;;  %3449 = vmatpush.msrb.mxu3 %v8587_v38  ;;  %v18677_v38 = vld [vmem:[#allocation112_spill] sm:$0xff] }
 0x41f   :  { %3282 = vmatmul.f32.gmra.mxu3 %v18663_v5  ;;  %v13694_v56 = vpop.f32.mrf.mxu0  ;;  %3492 = vmatpush.msra.mxu0 %v8647_v32  ;;  %v8578_v32 = vld [vmem:[%s18393_s4 + $0xf40] sm:$0xff] }
 0x420   :  { %v13705_v8 = vadd.f32 %v13421_v29, %v2836_v2  ;;  %v13707_v18 = vpop.f32.mrf.mxu1  ;;  %3056 = vmatmul.f32.gmra.mxu2 %v18676_v34  ;;  %v2745_v29 = vadd.f32 %v13341_v1, %v2698_v15  ;;  %3450 = vmatpush.msrb.mxu3 %v8584_v30  ;;  %v8575_v1 = vld [vmem:[%s18393_s4 + $0xf28] sm:$0xff]  ;;  %v6107_v30 = vld [vmem:[%s18678_s24 + $0x40] sm:$0xff] }
 0x421   :  { %3493 = vmatpush.msra.mxu0 %v8644_v37  ;;  %5069 = vperm.xlu1 %9586, %v5045_v62   ;;  %v8638_v15 = vld [vmem:[%s18393_s4 + $0x1120] sm:$0xff]  ;;  %v8635_v62 = vld [vmem:[%s18393_s4 + $0x1108] sm:$0xff] }
 0x422   :  { %18675 = vst [vmem:[#allocation49_spill] sm:$0xff] %v13705_v8  ;;  %v13720_v2 = vpop.f32.mrf.mxu3  ;;  %3326 = vmatmul.f32.gmra.mxu0 %v18628_v27  ;;  %v8641_v8 = vld [vmem:[%s18393_s4 + $0x1138] sm:$0xff]  ;;  %3451 = vmatpush.msrb.mxu3 %v8581_v23 }
 0x423   :  { %3197 = vmatmul.f32.gmra.mxu1 %v18677_v38  ;;  %v2791_v60 = vpop.f32.mrf.mxu2  ;;  %3494 = vmatpush.msra.mxu0 %v8641_v8  ;;  %v8572_v8 = vld [vmem:[%s18393_s4 + $0xf10] sm:$0xff] }
 0x424   :  { %v2792_v33 = vadd.f32 %v2791_v60, %v2745_v29  ;;  %3452 = vmatpush.msrb.mxu3 %v8578_v32  ;;  %6151 = vperm.xlu0 %9585, %v6107_v30   ;;  %v18679_v29 = vld [vmem:[#allocation41_spill] sm:$0xff]  ;;  %v18681_v32 = vld [vmem:[#allocation86_spill] sm:$0xff] }
 0x425   :  { %3495 = vmatpush.msra.mxu0 %v8638_v15  ;;  %v2701_v60 = vadd.f32 %v13125_v13, %v18679_v29  ;;  %v5042_v30 = vld [vmem:[%s18665_s13] sm:$0xff]  ;;  %v8632_v15 = vld [vmem:[%s18393_s4 + $0x10f0] sm:$0xff] }
 0x426   :  { %v2839_v37 = vadd.f32 %v13429_v53, %v2792_v33  ;;  %3453 = vmatpush.msrb.mxu3 %v8575_v1  ;;  %v5050_v1 = vld [vmem:[%s18665_s13 + $0x40] sm:$0xff] }
 0x427   :  { %3285 = vmatmul.f32.gmra.mxu3 %v18668_v0  ;;  %v13741_v23 = vpop.f32.mrf.mxu0  ;;  %3496 = vmatpush.msra.mxu0 %v8635_v62  ;;  %v2748_v38 = vadd.f32 %v13378_v16, %v2701_v60  ;;  %v8629_v62 = vld [vmem:[%s18393_s4 + $0x10d8] sm:$0xff]  ;;  %v6104_v16 = vld [vmem:[%s18678_s24 + $0x28] sm:$0xff] }
 0x428   :  { %v13752_v53 = vadd.f32 %v13437_v50, %v2839_v37  ;;  %v13754_v33 = vpop.f32.mrf.mxu1  ;;  %3059 = vmatmul.f32.gmra.mxu2 %v18681_v32  ;;  %3454 = vmatpush.msrb.mxu3 %v8572_v8  ;;  %v18682_v50 = vld [vmem:[#allocation113_spill] sm:$0xff]  ;;  %v8626_v8 = vld [vmem:[%s18393_s4 + $0x10c0] sm:$0xff] }
 0x429   :  { %3497 = vmatpush.msra.mxu0 %v8632_v15  ;;  %5054 = vperm.xlu1 %9586, %v5042_v30   ;;  %v18683_v30 = vld [vmem:[#allocation56_spill] sm:$0xff] }
 0x42a   :  { %18680 = vst [vmem:[#allocation114_spill] sm:$0xff] %v13752_v53  ;;  %v13764_v13 = vpop.f32.mrf.mxu3  ;;  %3329 = vmatmul.f32.gmra.mxu0 %v18632_v59  ;;  %5094 = vperm.xlu2 %9587, %v5050_v1  }
 0x42b   :  { %3200 = vmatmul.f32.gmra.mxu1 %v18682_v50  ;;  %v2794_v37 = vpop.f32.mrf.mxu2  ;;  %3498 = vmatpush.msra.mxu0 %v8629_v62 }
 0x42c   :  { %v2795_v29 = vadd.f32 %v2794_v37, %v2748_v38  ;;  %6136 = vperm.xlu0 %9585, %v6104_v16   ;;  %v8623_v38 = vld [vmem:[%s18393_s4 + $0x10a8] sm:$0xff]  ;;  %v2704_v37 = vadd.f32 %v13162_v17, %v18683_v30 }
 0x42d   :  { %3499 = vmatpush.msra.mxu0 %v8626_v8 }
 0x42e   :  { %v2842_v60 = vadd.f32 %v13448_v57, %v2795_v29  ;;  %v6106_v57 = vld [vmem:[%s18678_s24 + $0x38] sm:$0xff]  ;;  %v8620_v29 = vld [vmem:[%s18393_s4 + $0x1090] sm:$0xff]  ;;  %v2751_v16 = vadd.f32 %v13406_v22, %v2704_v37 }
 0x42f   :  { %3288 = vmatmul.f32.gmra.mxu3 %v18672_v47  ;;  %v13782_v15 = vpop.f32.mrf.mxu0  ;;  %3500 = vmatpush.msra.mxu0 %v8623_v38  ;;  %v6101_v38 = vld [vmem:[%s18678_s24 + $0x10] sm:$0xff] }
 0x430   :  { %v13790_v1 = vadd.f32 %v13468_v46, %v2842_v60  ;;  %v13792_v62 = vpop.f32.mrf.mxu1  ;;  %3220 = vmatmul.f32.vlgmr.msrb.gmra.mxu2 %v18606_v58  ;;  %v5047_v46 = vld [vmem:[%s18665_s13 + $0x28] sm:$0xff]  ;;  %v18685_v37 = vld [vmem:[#allocation44_spill] sm:$0xff] }
 0x431   :  { %3501 = vmatpush.msra.mxu0 %v8620_v29  ;;  %6146 = vperm.xlu1 %9586, %v6106_v57   ;;  %v2707_v29 = vadd.f32 %v13199_v43, %v18685_v37  ;;  %v6103_v57 = vld [vmem:[%s18678_s24 + $0x20] sm:$0xff] }
 0x432   :  { %18684 = vst [vmem:[#allocation9_spill] sm:$0xff] %v13790_v1  ;;  %v13802_v8 = vpop.f32.mrf.mxu3  ;;  %3332 = vmatmul.f32.gmra.mxu0 %v18636_v63  ;;  %5079 = vperm.xlu2 %9587, %v5047_v46   ;;  %v18687_v46 = vld [vmem:[#allocation65_spill] sm:$0xff]  ;;  %v18689_v37 = vld [vmem:[#allocation30_spill] sm:$0xff] }
 0x433   :  { %3361 = vmatmul.f32.vlgmr.msrb.gmra.mxu1 %v18616_v24  ;;  %v2797_v17 = vpop.f32.mrf.mxu2 }
 0x434   :  { %v2798_v60 = vadd.f32 %v2797_v17, %v2751_v16  ;;  %6121 = vperm.xlu0 %9585, %v6101_v38   ;;  %v6716_v38 = vld [vmem:[%s18688_s2] sm:$0xff] }
 0x436   :  { %v2845_v22 = vadd.f32 %v13488_v42, %v2798_v60  ;;  %v2754_v42 = vadd.f32 %v13425_v28, %v2707_v29  ;;  %v18690_v29 = vld [vmem:[#allocation28_spill] sm:$0xff] }
 0x437   :  { %3291 = vmatmul.f32.gmra.mxu3 %v18676_v34  ;;  %v13814_v30 = vpop.f32.mrf.mxu0  ;;  %v2710_v1 = vadd.f32 %v18690_v29, %v18689_v37  ;;  %v6108_v37 = vld [vmem:[%s18678_s24 + $0x48] sm:$0xff]  ;;  %v8805_v29 = vld [vmem:[%s18393_s4 + $0x1658] sm:$0xff] }
 0x438   :  { %v13819_v53 = vadd.f32 %v13508_v6, %v2845_v22  ;;  %v13821_v16 = vpop.f32.mrf.mxu1  ;;  %3223 = vmatmul.f32.gmra.mxu2 %v18608_v54  ;;  %v5044_v6 = vld [vmem:[%s18665_s13 + $0x10] sm:$0xff] }
 0x439   :  { %6131 = vperm.xlu1 %9586, %v6103_v57   ;;  %v18692_v57 = vld [vmem:[#allocation61_spill] sm:$0xff] }
 0x43a   :  { %18686 = vst [vmem:[#allocation27_spill] sm:$0xff] %v13819_v53  ;;  %v13828_v17 = vpop.f32.mrf.mxu3  ;;  %3335 = vmatmul.f32.gmra.mxu0 %v18641_v7  ;;  %5064 = vperm.xlu2 %9587, %v5044_v6   ;;  %v8808_v6 = vld [vmem:[%s18393_s4 + $0x1670] sm:$0xff] }
 0x43b   :  { %3364 = vmatmul.f32.gmra.mxu1 %v18687_v46  ;;  %v2800_v43 = vpop.f32.mrf.mxu2  ;;  %3392 = vmatpush.msra.mxu2 %v8808_v6  ;;  %v6719_v6 = vld [vmem:[%s18688_s2 + $0x18] sm:$0xff] }
 0x43c   :  { %v2801_v60 = vadd.f32 %v2800_v43, %v2754_v42  ;;  %6728 = vperm.xlu0 %9585, %v6716_v38   ;;  %v13850_v43 = vpop.permute.xlu0 %2966 }
 0x43d   :  { %3393 = vmatpush.msra.mxu2 %v8805_v29 }
 0x43e   :  { %v2848_v28 = vadd.f32 %v13528_v45, %v2801_v60  ;;  %v6100_v45 = vld [vmem:[%s18678_s24 + $0x8] sm:$0xff]  ;;  %v2757_v60 = vadd.f32 %v13441_v10, %v2710_v1  ;;  %v8713_v10 = vld [vmem:[%s18393_s4 + $0x1378] sm:$0xff] }
 0x43f   :  { %3294 = vmatmul.f32.gmra.mxu3 %v18681_v32  ;;  %v13840_v22 = vpop.f32.mrf.mxu0  ;;  %3533 = vmatpush.msra.mxu1 %v8713_v10 }
 0x440   :  { %v13845_v53 = vadd.f32 %v13548_v21, %v2848_v28  ;;  %v13847_v42 = vpop.f32.mrf.mxu1  ;;  %3226 = vmatmul.f32.gmra.mxu2 %v18692_v57  ;;  %v18693_v21 = vld [vmem:[#allocation68_spill] sm:$0xff] }
 0x441   :  { %6116 = vperm.xlu1 %9586, %v6100_v45  }
 0x442   :  { %18691 = vst [vmem:[#allocation3_spill] sm:$0xff] %v13845_v53  ;;  %v13859_v38 = vpop.f32.mrf.mxu3  ;;  %3338 = vmatmul.f32.gmra.mxu0 %v18646_v9  ;;  %6156 = vperm.xlu2 %9587, %v6108_v37   ;;  %v8802_v53 = vld [vmem:[%s18393_s4 + $0x1640] sm:$0xff] }
 0x443   :  { %3367 = vmatmul.f32.gmra.mxu1 %v18693_v21  ;;  %v2803_v28 = vpop.f32.mrf.mxu2  ;;  %v8710_v21 = vld [vmem:[%s18393_s4 + $0x1360] sm:$0xff]  ;;  %3394 = vmatpush.msra.mxu2 %v8802_v53  ;;  %v6717_v53 = vld [vmem:[%s18688_s2 + $0x8] sm:$0xff] }
 0x444   :  { %v2804_v1 = vadd.f32 %v2803_v28, %v2757_v60  ;;  %6743 = vperm.xlu0 %9585, %v6719_v6   ;;  %v8799_v60 = vld [vmem:[%s18393_s4 + $0x1628] sm:$0xff]  ;;  %v18694_v37 = vld [vmem:[#allocation2_spill] sm:$0xff]  ;;  %3534 = vmatpush.msra.mxu1 %v8710_v21  ;;  %v13912_v21 = vpop.permute.xlu0 %2961 }
 0x445   :  { %v8707_v28 = vld [vmem:[%s18393_s4 + $0x1348] sm:$0xff]  ;;  %v2713_v29 = vadd.f32 %v13291_v3, %v18694_v37  ;;  %3395 = vmatpush.msra.mxu2 %v8799_v60  ;;  %v8704_v3 = vld [vmem:[%s18393_s4 + $0x1330] sm:$0xff]  ;;  %18697 = vst [vmem:[#allocation13_spill] sm:$0xff] %v13912_v21  ;;  %v8793_v37 = vld [vmem:[%s18393_s4 + $0x15f8] sm:$0xff] }
 0x446   :  { %v2851_v46 = vadd.f32 %v13574_v4, %v2804_v1  ;;  %v8796_v1 = vld [vmem:[%s18393_s4 + $0x1610] sm:$0xff]  ;;  %3535 = vmatpush.msra.mxu1 %v8707_v28 }
 0x447   :  { %3455 = vmatmul.f32.vlgmr.msrb.gmra.mxu3 %v18606_v58  ;;  %v13883_v45 = vpop.f32.mrf.mxu0  ;;  %v18696_v58 = vld [vmem:[#allocation64_spill] sm:$0xff]  ;;  %3396 = vmatpush.msra.mxu2 %v8796_v1  ;;  %v8790_v1 = vld [vmem:[%s18393_s4 + $0x15e0] sm:$0xff] }
 0x448   :  { %v13894_v10 = vadd.f32 %v13603_v25, %v2851_v46  ;;  %v13896_v4 = vpop.f32.mrf.mxu1  ;;  %3229 = vmatmul.f32.gmra.mxu2 %v18696_v58  ;;  %v2760_v25 = vadd.f32 %v13478_v26, %v2713_v29  ;;  %v6105_v60 = vld [vmem:[%s18678_s24 + $0x30] sm:$0xff]  ;;  %v8701_v26 = vld [vmem:[%s18393_s4 + $0x1318] sm:$0xff]  ;;  %3536 = vmatpush.msra.mxu1 %v8704_v3  ;;  %v8787_v3 = vld [vmem:[%s18393_s4 + $0x15c8] sm:$0xff] }
 0x449   :  { %6733 = vperm.xlu1 %9586, %v6717_v53   ;;  %3397 = vmatpush.msra.mxu2 %v8793_v37  ;;  %v6722_v28 = vld [vmem:[%s18688_s2 + $0x30] sm:$0xff] }
 0x44a   :  { %18695 = vst [vmem:[#allocation115_spill] sm:$0xff] %v13894_v10  ;;  %v13909_v46 = vpop.f32.mrf.mxu3  ;;  %3341 = vmatmul.f32.gmra.mxu0 %v18651_v20  ;;  %6141 = vperm.xlu2 %9587, %v6105_v60   ;;  %v8698_v10 = vld [vmem:[%s18393_s4 + $0x1300] sm:$0xff] }
 0x44b   :  { %3370 = vmatmul.f32.gmra.mxu1 %v18629_v14  ;;  %v2806_v6 = vpop.f32.mrf.mxu2  ;;  %3398 = vmatpush.msra.mxu2 %v8790_v1  ;;  %v6102_v1 = vld [vmem:[%s18678_s24 + $0x18] sm:$0xff] }
 0x44c   :  { %v2807_v29 = vadd.f32 %v2806_v6, %v2760_v25  ;;  %3537 = vmatpush.msra.mxu1 %v8701_v26  ;;  %6758 = vperm.xlu0 %9585, %v6722_v28   ;;  %v8695_v25 = vld [vmem:[%s18393_s4 + $0x12e8] sm:$0xff]  ;;  %v18698_v6 = vld [vmem:[#allocation46_spill] sm:$0xff] }
 0x44d   :  { %v2716_v60 = vadd.f32 %v13331_v36, %v18698_v6  ;;  %3399 = vmatpush.msra.mxu2 %v8787_v3  ;;  %v6720_v26 = vld [vmem:[%s18688_s2 + $0x20] sm:$0xff]  ;;  %v8692_v36 = vld [vmem:[%s18393_s4 + $0x12d0] sm:$0xff]  ;;  %v8781_v3 = vld [vmem:[%s18393_s4 + $0x1598] sm:$0xff] }
 0x44e   :  { %v2854_v14 = vadd.f32 %v13626_v39, %v2807_v29  ;;  %3538 = vmatpush.msra.mxu1 %v8698_v10  ;;  %v8784_v29 = vld [vmem:[%s18393_s4 + $0x15b0] sm:$0xff]  ;;  %v13964_v10 = vpop.permute.xlu2 %2946  ;;  %v6725_v6 = vld [vmem:[%s18688_s2 + $0x48] sm:$0xff] }
 0x44f   :  { %3458 = vmatmul.f32.gmra.mxu3 %v18608_v54  ;;  %v13935_v53 = vpop.f32.mrf.mxu0  ;;  %v18700_v54 = vld [vmem:[#allocation4_spill] sm:$0xff]  ;;  %3400 = vmatpush.msra.mxu2 %v8784_v29  ;;  %v8686_v29 = vld [vmem:[%s18393_s4 + $0x12a0] sm:$0xff] }
 0x450   :  { %v13946_v39 = vadd.f32 %v13647_v44, %v2854_v14  ;;  %v13948_v37 = vpop.f32.mrf.mxu1  ;;  %3232 = vmatmul.f32.gmra.mxu2 %v18700_v54  ;;  %v2763_v14 = vadd.f32 %v13518_v11, %v2716_v60  ;;  %3539 = vmatpush.msra.mxu1 %v8695_v25  ;;  %v8689_v11 = vld [vmem:[%s18393_s4 + $0x12b8] sm:$0xff]  ;;  %v13976_v25 = vpop.permute.xlu0 %2936  ;;  %v8778_v60 = vld [vmem:[%s18393_s4 + $0x1580] sm:$0xff] }
 0x451   :  { %6748 = vperm.xlu1 %9586, %v6720_v26   ;;  %3401 = vmatpush.msra.mxu2 %v8781_v3  ;;  %v18702_v3 = vld [vmem:[#allocation70_spill] sm:$0xff] }
 0x452   :  { %18699 = vst [vmem:[#allocation103_spill] sm:$0xff] %v13946_v39  ;;  %v13961_v44 = vpop.f32.mrf.mxu3  ;;  %3502 = vmatmul.f32.vlgmr.msra.gmra.mxu0 %v18642_v41  ;;  %3540 = vmatpush.msra.mxu1 %v8692_v36  ;;  %v8775_v36 = vld [vmem:[%s18393_s4 + $0x1568] sm:$0xff]  ;;  %v8772_v39 = vld [vmem:[%s18393_s4 + $0x1550] sm:$0xff] }
 0x453   :  { %3373 = vmatmul.f32.gmra.mxu1 %v18633_v49  ;;  %v2809_v28 = vpop.f32.mrf.mxu2  ;;  %6126 = vperm.xlu2 %9587, %v6102_v1   ;;  %v8809_v1 = vld [vmem:[%s18393_s4 + $0x1678] sm:$0xff] }
 0x454   :  { %v2810_v41 = vadd.f32 %v2809_v28, %v2763_v14  ;;  %3541 = vmatpush.msra.mxu1 %v8689_v11  ;;  %6773 = vperm.xlu0 %9585, %v6725_v6   ;;  %v8683_v28 = vld [vmem:[%s18393_s4 + $0x1288] sm:$0xff] }
 0x455   :  { %3402 = vmatpush.msra.mxu2 %v8778_v60  ;;  %v18704_v6 = vld [vmem:[#allocation7_spill] sm:$0xff]  ;;  %3627 = vmatpush.msra.mxu3 %v8809_v1  ;;  %v6723_v60 = vld [vmem:[%s18688_s2 + $0x38] sm:$0xff] }
 0x456   :  { %v2857_v14 = vadd.f32 %v13673_v31, %v2810_v41  ;;  %v18701_v31 = vld [vmem:[#allocation34_spill] sm:$0xff]  ;;  %3542 = vmatpush.msra.mxu1 %v8686_v29  ;;  %v18705_v1 = vld [vmem:[#allocation79_spill] sm:$0xff] }
 0x457   :  { %3461 = vmatmul.f32.gmra.mxu3 %v18692_v57  ;;  %v13989_v26 = vpop.f32.mrf.mxu0  ;;  %v2719_v11 = vadd.f32 %v18702_v3, %v18701_v31  ;;  %3403 = vmatpush.msra.mxu2 %v8775_v36  ;;  %v8806_v29 = vld [vmem:[%s18393_s4 + $0x1660] sm:$0xff]  ;;  %v14024_v36 = vpop.permute.xlu1 %2956 }
 0x458   :  { %v14003_v57 = vadd.f32 %v13694_v56, %v2857_v14  ;;  %v14005_v41 = vpop.f32.mrf.mxu1  ;;  %3235 = vmatmul.f32.gmra.mxu2 %v18704_v6  ;;  %v8680_v56 = vld [vmem:[%s18393_s4 + $0x1270] sm:$0xff]  ;;  %3543 = vmatpush.msra.mxu1 %v8683_v28 }
 0x459   :  { %v2766_v14 = vadd.f32 %v13561_v40, %v2719_v11  ;;  %3404 = vmatpush.msra.mxu2 %v8772_v39  ;;  %v8769_v40 = vld [vmem:[%s18393_s4 + $0x1538] sm:$0xff]  ;;  %6763 = vperm.xlu1 %9586, %v6723_v60   ;;  %v14036_v11 = vpop.permute.xlu2 %2941  ;;  %v8803_v39 = vld [vmem:[%s18393_s4 + $0x1648] sm:$0xff]  ;;  %v8766_v60 = vld [vmem:[%s18393_s4 + $0x1520] sm:$0xff] }
 0x45a   :  { %18703 = vst [vmem:[#allocation6_spill] sm:$0xff] %v14003_v57  ;;  %v14018_v31 = vpop.f32.mrf.mxu3  ;;  %3505 = vmatmul.f32.gmra.mxu0 %v18647_v19  ;;  %v6099_v57 = vld [vmem:[%s18678_s24] sm:$0xff]  ;;  %v8677_v19 = vld [vmem:[%s18393_s4 + $0x1258] sm:$0xff]  ;;  %3544 = vmatpush.msra.mxu1 %v8680_v56  ;;  %v14051_v56 = vpop.permute.xlu0 %2921 }
 0x45b   :  { %3376 = vmatmul.f32.gmra.mxu1 %v18705_v1  ;;  %v2812_v3 = vpop.f32.mrf.mxu2  ;;  %3628 = vmatpush.msra.mxu3 %v8806_v29  ;;  %v6893_v1 = vld [vmem:[%s18157_s17 + $0x10] sm:$0xff]  ;;  %18706 = vst [vmem:[#allocation43_spill] sm:$0xff] %v14051_v56 }
 0x45c   :  { %v2813_v28 = vadd.f32 %v2812_v3, %v2766_v14  ;;  %6111 = vperm.xlu2 %9587, %v6099_v57   ;;  %3405 = vmatpush.msra.mxu2 %v8769_v40  ;;  %v8674_v57 = vld [vmem:[%s18393_s4 + $0x1240] sm:$0xff]  ;;  %v18708_v40 = vld [vmem:[#allocation11_spill] sm:$0xff] }
 0x45d   :  { %3545 = vmatpush.msra.mxu1 %v8677_v19  ;;  %6918 = vperm.xlu0 %9585, %v6893_v1   ;;  %v8763_v19 = vld [vmem:[%s18393_s4 + $0x1508] sm:$0xff]  ;;  %v8797_v1 = vld [vmem:[%s18393_s4 + $0x1618] sm:$0xff] }
 0x45e   :  { %v2860_v49 = vadd.f32 %v13720_v2, %v2813_v28  ;;  %v8800_v2 = vld [vmem:[%s18393_s4 + $0x1630] sm:$0xff]  ;;  %3629 = vmatpush.msra.mxu3 %v8803_v39  ;;  %3406 = vmatpush.msra.mxu2 %v8766_v60  ;;  %v6891_v28 = vld [vmem:[%s18157_s17] sm:$0xff]  ;;  %v18709_v39 = vld [vmem:[#allocation83_spill] sm:$0xff] }
 0x45f   :  { %3464 = vmatmul.f32.gmra.mxu3 %v18696_v58  ;;  %v14054_v14 = vpop.f32.mrf.mxu0  ;;  %3546 = vmatpush.msra.mxu1 %v8674_v57  ;;  %v8671_v58 = vld [vmem:[%s18393_s4 + $0x1228] sm:$0xff]  ;;  %v8668_v57 = vld [vmem:[%s18393_s4 + $0x1210] sm:$0xff] }
 0x460   :  { %v14060_v29 = vadd.f32 %v13741_v23, %v2860_v49  ;;  %v3174_v3 = vpop.f32.mrf.mxu1  ;;  %3238 = vmatmul.f32.gmra.mxu2 %v18708_v40  ;;  %v2987_v49 = vadd.f32 %v13613_v12, %v14051_v56  ;;  %3630 = vmatpush.msra.mxu3 %v8800_v2  ;;  %v8794_v12 = vld [vmem:[%s18393_s4 + $0x1600] sm:$0xff] }
 0x461   :  { %3407 = vmatpush.msra.mxu2 %v8763_v19  ;;  %3547 = vmatpush.msra.mxu1 %v8671_v58  ;;  %v8791_v19 = vld [vmem:[%s18393_s4 + $0x15e8] sm:$0xff]  ;;  %v14099_v20 = vpop.permute.xlu2 %2926 }
 0x462   :  { %18707 = vst [vmem:[#allocation17_spill] sm:$0xff] %v14060_v29  ;;  %v14074_v23 = vpop.f32.mrf.mxu3  ;;  %3508 = vmatmul.f32.gmra.mxu0 %v18652_v48  ;;  %v6718_v48 = vld [vmem:[%s18688_s2 + $0x10] sm:$0xff]  ;;  %3631 = vmatpush.msra.mxu3 %v8797_v1  ;;  %v14090_v29 = vpop.permute.xlu1 %2951 }
 0x463   :  { %3379 = vmatmul.f32.gmra.mxu1 %v18709_v39  ;;  %v3033_v60 = vpop.f32.mrf.mxu2  ;;  %6908 = vperm.xlu1 %9586, %v6891_v28   ;;  %v6896_v39 = vld [vmem:[%s18157_s17 + $0x28] sm:$0xff]  ;;  %18710 = vst [vmem:[#allocation51_spill] sm:$0xff] %v14099_v20  ;;  %v8788_v1 = vld [vmem:[%s18393_s4 + $0x15d0] sm:$0xff] }
 0x464   :  { %v3034_v2 = vadd.f32 %v3033_v60, %v2987_v49  ;;  %6738 = vperm.xlu2 %9587, %v6718_v48   ;;  %3548 = vmatpush.msra.mxu1 %v8668_v57  ;;  %v18711_v60 = vld [vmem:[#allocation15_spill] sm:$0xff]  ;;  %v8782_v48 = vld [vmem:[%s18393_s4 + $0x15a0] sm:$0xff] }
 0x465   :  { %3632 = vmatpush.msra.mxu3 %v8794_v12  ;;  %6933 = vperm.xlu0 %9585, %v6896_v39   ;;  %v18712_v39 = vld [vmem:[#allocation87_spill] sm:$0xff] }
 0x466   :  { %v3081_v24 = vadd.f32 %v13764_v13, %v3034_v2  ;;  %v8785_v13 = vld [vmem:[%s18393_s4 + $0x15b8] sm:$0xff] }
 0x467   :  { %3467 = vmatmul.f32.gmra.mxu3 %v18700_v54  ;;  %v14102_v58 = vpop.f32.mrf.mxu0  ;;  %v2990_v54 = vadd.f32 %v13660_v52, %v14099_v20  ;;  %v6721_v52 = vld [vmem:[%s18688_s2 + $0x28] sm:$0xff] }
 0x468   :  { %v3128_v49 = vadd.f32 %v13782_v15, %v3081_v24  ;;  %v3177_v28 = vpop.f32.mrf.mxu1  ;;  %3241 = vmatmul.f32.gmra.mxu2 %v18711_v60  ;;  %3633 = vmatpush.msra.mxu3 %v8791_v19  ;;  %v6894_v24 = vld [vmem:[%s18157_s17 + $0x18] sm:$0xff] }
 0x46a   :  { %v14114_v57 = vpop.f32.mrf.mxu3  ;;  %3511 = vmatmul.f32.gmra.mxu0 %v18656_v61  ;;  %3634 = vmatpush.msra.mxu3 %v8788_v1  ;;  %v3175_v15 = vadd.f32 %v3174_v3, %v3128_v49  ;;  %v18713_v61 = vld [vmem:[#allocation5_spill] sm:$0xff]  ;;  %v8779_v3 = vld [vmem:[%s18393_s4 + $0x1588] sm:$0xff]  ;;  %v6899_v1 = vld [vmem:[%s18157_s17 + $0x40] sm:$0xff] }
 0x46b   :  { %3382 = vmatmul.f32.gmra.mxu1 %v18712_v39  ;;  %v3036_v12 = vpop.f32.mrf.mxu2  ;;  %6923 = vperm.xlu1 %9586, %v6894_v24   ;;  %v14137_v39 = vpop.permute.xlu1 %2931 }
 0x46c   :  { %v3037_v2 = vadd.f32 %v3036_v12, %v2990_v54  ;;  %3635 = vmatpush.msra.mxu3 %v8785_v13  ;;  %v14128_v19 = vadd.f32 %v3175_v15, %v18713_v61  ;;  %6753 = vperm.xlu2 %9587, %v6721_v52   ;;  %v8776_v54 = vld [vmem:[%s18393_s4 + $0x1570] sm:$0xff]  ;;  %v18714_v12 = vld [vmem:[#allocation19_spill] sm:$0xff] }
 0x46d   :  { %6948 = vperm.xlu0 %9585, %v6899_v1  }
 0x46e   :  { %v3084_v49 = vadd.f32 %v13802_v8, %v3037_v2  ;;  %3636 = vmatpush.msra.mxu3 %v8782_v48  ;;  %v8773_v8 = vld [vmem:[%s18393_s4 + $0x1558] sm:$0xff]  ;;  %v18715_v2 = vld [vmem:[#allocation91_spill] sm:$0xff] }
 0x46f   :  { %3470 = vmatmul.f32.gmra.mxu3 %v18704_v6  ;;  %v14140_v13 = vpop.f32.mrf.mxu0  ;;  %v2993_v6 = vadd.f32 %v13707_v18, %v14137_v39  ;;  %v6724_v18 = vld [vmem:[%s18688_s2 + $0x40] sm:$0xff] }
 0x470   :  { %v3131_v24 = vadd.f32 %v13814_v30, %v3084_v49  ;;  %v3180_v15 = vpop.f32.mrf.mxu1  ;;  %3244 = vmatmul.f32.gmra.mxu2 %v18714_v12  ;;  %3637 = vmatpush.msra.mxu3 %v8779_v3  ;;  %v6897_v30 = vld [vmem:[%s18157_s17 + $0x30] sm:$0xff]  ;;  %v8770_v3 = vld [vmem:[%s18393_s4 + $0x1540] sm:$0xff] }
 0x472   :  { %v14152_v48 = vpop.f32.mrf.mxu3  ;;  %3514 = vmatmul.f32.gmra.mxu0 %v18660_v55  ;;  %3638 = vmatpush.msra.mxu3 %v8776_v54  ;;  %v3178_v52 = vadd.f32 %v3177_v28, %v3131_v24  ;;  %v18716_v55 = vld [vmem:[#allocation48_spill] sm:$0xff]  ;;  %v8767_v28 = vld [vmem:[%s18393_s4 + $0x1528] sm:$0xff]  ;;  %v6902_v54 = vld [vmem:[%s18157_s17 + $0x58] sm:$0xff] }
 0x473   :  { %3385 = vmatmul.f32.gmra.mxu1 %v18715_v2  ;;  %v3039_v61 = vpop.f32.mrf.mxu2  ;;  %6938 = vperm.xlu1 %9586, %v6897_v30   ;;  %v18728_v2 = vld [vmem:[#allocation107_spill] sm:$0xff] }
 0x474   :  { %v3040_v1 = vadd.f32 %v3039_v61, %v2993_v6  ;;  %3639 = vmatpush.msra.mxu3 %v8773_v8  ;;  %v14166_v49 = vadd.f32 %v3178_v52, %v18716_v55  ;;  %6768 = vperm.xlu2 %9587, %v6724_v18   ;;  %v8764_v8 = vld [vmem:[%s18393_s4 + $0x1510] sm:$0xff]  ;;  %v18717_v61 = vld [vmem:[#allocation23_spill] sm:$0xff]  ;;  %v18719_v55 = vld [vmem:[#allocation38_spill] sm:$0xff] }
 0x475   :  { %6963 = vperm.xlu0 %9585, %v6902_v54   ;;  %v18718_v18 = vld [vmem:[#allocation95_spill] sm:$0xff]  ;;  %v18720_v54 = vld [vmem:[#allocation104_spill] sm:$0xff] }
 0x476   :  { %v3087_v24 = vadd.f32 %v13828_v17, %v3040_v1  ;;  %3640 = vmatpush.msra.mxu3 %v8770_v3  ;;  %v6900_v17 = vld [vmem:[%s18157_s17 + $0x48] sm:$0xff] }
 0x477   :  { %3473 = vmatmul.f32.gmra.mxu3 %v18708_v40  ;;  %v14180_v30 = vpop.f32.mrf.mxu0  ;;  %v6892_v1 = vld [vmem:[%s18157_s17 + $0x8] sm:$0xff] }
 0x478   :  { %v3134_v6 = vadd.f32 %v13840_v22, %v3087_v24  ;;  %v14182_v52 = vpop.f32.mrf.mxu1  ;;  %3247 = vmatmul.f32.gmra.mxu2 %v18717_v61  ;;  %3641 = vmatpush.msra.mxu3 %v8767_v28 }
 0x47a   :  { %3517 = vmatmul.f32.gmra.mxu0 %v18663_v5  ;;  %3642 = vmatpush.msra.mxu3 %v8764_v8  ;;  %v3181_v40 = vadd.f32 %v3180_v15, %v3134_v6  ;;  %v14189_v3 = vpop.f32.mrf.mxu3  ;;  %v6905_v5 = vld [vmem:[%s18157_s17 + $0x70] sm:$0xff]  ;;  %v6903_v8 = vld [vmem:[%s18157_s17 + $0x60] sm:$0xff] }
 0x47b   :  { %3388 = vmatmul.f32.gmra.mxu1 %v18718_v18  ;;  %v14192_v22 = vpop.f32.mrf.mxu2  ;;  %6953 = vperm.xlu1 %9586, %v6900_v17   ;;  %v18722_v6 = vld [vmem:[#allocation76_spill] sm:$0xff] }
 0x47c   :  { %v14198_v28 = vadd.f32 %v3181_v40, %v18719_v55  ;;  %6913 = vperm.xlu2 %9587, %v6892_v1   ;;  %v18723_v1 = vld [vmem:[#allocation105_spill] sm:$0xff]  ;;  %v18724_v55 = vld [vmem:[#allocation80_spill] sm:$0xff] }
 0x47d   :  { %6978 = vperm.xlu0 %9585, %v6905_v5  }
 0x47f   :  { %3476 = vmatmul.f32.gmra.mxu3 %v18711_v60  ;;  %v14207_v24 = vpop.f32.mrf.mxu0  ;;  %v6895_v60 = vld [vmem:[%s18157_s17 + $0x20] sm:$0xff] }
 0x480   :  { %v14204_v15 = vpop.f32.mrf.mxu1  ;;  %3408 = vmatmul.f32.vlgmr.msra.gmra.mxu2 %v18720_v54  ;;  %18721 = vst [vmem:[#allocation10_spill] sm:$0xff] %v14207_v24 }
 0x482   :  { %3520 = vmatmul.f32.gmra.mxu0 %v18668_v0  ;;  %v14219_v40 = vpop.f32.mrf.mxu3 }
 0x483   :  { %3549 = vmatmul.f32.vlgmr.msra.gmra.mxu1 %v18722_v6  ;;  %v14214_v17 = vpop.f32.mrf.mxu2  ;;  %6968 = vperm.xlu1 %9586, %v6903_v8   ;;  %v6898_v6 = vld [vmem:[%s18157_s17 + $0x38] sm:$0xff] }
 0x484   :  { %6928 = vperm.xlu2 %9587, %v6895_v60  }
 0x487   :  { %3479 = vmatmul.f32.gmra.mxu3 %v18714_v12  ;;  %v14232_v18 = vpop.f32.mrf.mxu0  ;;  %v18726_v12 = vld [vmem:[#allocation106_spill] sm:$0xff] }
 0x488   :  { %3411 = vmatmul.f32.gmra.mxu2 %v18723_v1  ;;  %v14223_v0 = vpop.f32.mrf.mxu1  ;;  %18725 = vst [vmem:[#allocation100_spill] sm:$0xff] %v14232_v18 }
 0x48a   :  { %3523 = vmatmul.f32.gmra.mxu0 %v18672_v47  ;;  %v14234_v8 = vpop.f32.mrf.mxu3  ;;  %v8761_v47 = vld [vmem:[%s18393_s4 + $0x14f8] sm:$0xff] }
 0x48b   :  { %3552 = vmatmul.f32.gmra.mxu1 %v18724_v55  ;;  %v14227_v5 = vpop.f32.mrf.mxu2  ;;  %3580 = vmatpush.msrb.mxu2 %v8761_v47 }
 0x48c   :  { %6943 = vperm.xlu2 %9587, %v6898_v6   ;;  %v6901_v6 = vld [vmem:[%s18157_s17 + $0x50] sm:$0xff] }
 0x48f   :  { %3482 = vmatmul.f32.gmra.mxu3 %v18717_v61  ;;  %v8758_v61 = vld [vmem:[%s18393_s4 + $0x14e0] sm:$0xff]  ;;  %v14254_v47 = vpop.f32.mrf.mxu0 }
 0x490   :  { %3414 = vmatmul.f32.gmra.mxu2 %v18726_v12  ;;  %v14242_v60 = vpop.f32.mrf.mxu1  ;;  %18727 = vst [vmem:[#allocation21_spill] sm:$0xff] %v14254_v47 }
 0x491   :  { %3581 = vmatpush.msrb.mxu2 %v8758_v61 }
 0x492   :  { %3526 = vmatmul.f32.gmra.mxu0 %v18676_v34  ;;  %v8755_v34 = vld [vmem:[%s18393_s4 + $0x14c8] sm:$0xff]  ;;  %v14261_v18 = vpop.f32.mrf.mxu3 }
 0x493   :  { %3555 = vmatmul.f32.gmra.mxu1 %v18619_v35  ;;  %v3051_v55 = vpop.f32.mrf.mxu2  ;;  %3582 = vmatpush.msrb.mxu2 %v8755_v34  ;;  %v8752_v35 = vld [vmem:[%s18393_s4 + $0x14b0] sm:$0xff]  ;;  %18729 = vst [vmem:[#allocation31_spill] sm:$0xff] %v14261_v18  ;;  %v8746_v34 = vld [vmem:[%s18393_s4 + $0x1480] sm:$0xff]  ;;  %v8731_v18 = vld [vmem:[%s18393_s4 + $0x1408] sm:$0xff] }
 0x494   :  { %6958 = vperm.xlu2 %9587, %v6901_v6   ;;  %v8749_v6 = vld [vmem:[%s18393_s4 + $0x1498] sm:$0xff] }
 0x495   :  { %3583 = vmatpush.msrb.mxu2 %v8752_v35 }
 0x497   :  { %3643 = vmatmul.f32.vlgmr.msra.gmra.mxu3 %v18720_v54  ;;  %3584 = vmatpush.msrb.mxu2 %v8749_v6  ;;  %v6904_v54 = vld [vmem:[%s18157_s17 + $0x68] sm:$0xff]  ;;  %v14283_v35 = vpop.f32.mrf.mxu0  ;;  %v18731_v6 = vld [vmem:[#allocation108_spill] sm:$0xff] }
 0x498   :  { %3417 = vmatmul.f32.gmra.mxu2 %v18728_v2  ;;  %v14274_v47 = vpop.f32.mrf.mxu1  ;;  %18730 = vst [vmem:[#allocation45_spill] sm:$0xff] %v14283_v35 }
 0x499   :  { %3585 = vmatpush.msrb.mxu2 %v8746_v34  ;;  %v3011_v34 = vadd.f32 %v13948_v37, %v13912_v21  ;;  %v3005_v37 = vadd.f32 %v13847_v42, %v14090_v29  ;;  %v2999_v42 = vadd.f32 %v13792_v62, %v14036_v11 }
 0x49a   :  { %3529 = vmatmul.f32.gmra.mxu0 %v18681_v32  ;;  %v8743_v32 = vld [vmem:[%s18393_s4 + $0x1468] sm:$0xff]  ;;  %v14291_v24 = vpop.f32.mrf.mxu3 }
 0x49b   :  { %3558 = vmatmul.f32.gmra.mxu1 %v18623_v51  ;;  %v3054_v61 = vpop.f32.mrf.mxu2  ;;  %3586 = vmatpush.msrb.mxu2 %v8743_v32  ;;  %v8740_v51 = vld [vmem:[%s18393_s4 + $0x1450] sm:$0xff]  ;;  %v8734_v32 = vld [vmem:[%s18393_s4 + $0x1420] sm:$0xff] }
 0x49c   :  { %6973 = vperm.xlu2 %9587, %v6904_v54   ;;  %v8737_v54 = vld [vmem:[%s18393_s4 + $0x1438] sm:$0xff] }
 0x49d   :  { %3587 = vmatpush.msrb.mxu2 %v8740_v51  ;;  %v3008_v51 = vadd.f32 %v13896_v4, %v14024_v36  ;;  %v3002_v4 = vadd.f32 %v13821_v16, %v13964_v10 }
 0x49f   :  { %3646 = vmatmul.f32.gmra.mxu3 %v18723_v1  ;;  %3588 = vmatpush.msrb.mxu2 %v8737_v54  ;;  %v3055_v21 = vadd.f32 %v3054_v61, %v3008_v51  ;;  %v8728_v54 = vld [vmem:[%s18393_s4 + $0x13f0] sm:$0xff]  ;;  %v3049_v61 = vadd.f32 %v14227_v5, %v3002_v4  ;;  %v8722_v51 = vld [vmem:[%s18393_s4 + $0x13c0] sm:$0xff] }
 0x4a0   :  { %3420 = vmatmul.f32.gmra.mxu2 %v18731_v6 }
 0x4a1   :  { %3589 = vmatpush.msrb.mxu2 %v8734_v32  ;;  %v18732_v32 = vld [vmem:[#allocation109_spill] sm:$0xff]  ;;  %v3102_v16 = vadd.f32 %v14074_v23, %v3055_v21 }
 0x4a3   :  { %3561 = vmatmul.f32.gmra.mxu1 %v18628_v27  ;;  %v3057_v1 = vpop.f32.mrf.mxu2  ;;  %v3198_v27 = vpop.f32.mrf.mxu1  ;;  %3590 = vmatpush.msrb.mxu2 %v8731_v18  ;;  %v8725_v18 = vld [vmem:[%s18393_s4 + $0x13d8] sm:$0xff] }
 0x4a4   :  { %v3058_v35 = vadd.f32 %v3057_v1, %v3011_v34  ;;  %v3052_v34 = vadd.f32 %v3051_v55, %v3005_v37  ;;  %v14321_v55 = vpop.f32.mrf.mxu0  ;;  %v14333_v37 = vpop.f32.mrf.mxu3 }
 0x4a5   :  { %3591 = vmatpush.msrb.mxu2 %v8728_v54 }
 0x4a6   :  { %v3105_v1 = vadd.f32 %v14114_v57, %v3058_v35  ;;  %v2996_v57 = vadd.f32 %v13754_v33, %v13976_v25  ;;  %v3046_v35 = vadd.f32 %v14214_v17, %v2999_v42  ;;  %v3096_v33 = vadd.f32 %v13961_v44, %v3049_v61  ;;  %v18735_v61 = vld [vmem:[#allocation20_spill] sm:$0xff] }
 0x4a7   :  { %3649 = vmatmul.f32.gmra.mxu3 %v18726_v12  ;;  %v3014_v12 = vadd.f32 %v14005_v41, %v13850_v43  ;;  %3592 = vmatpush.msrb.mxu2 %v8725_v18  ;;  %v3099_v41 = vadd.f32 %v14018_v31, %v3052_v34  ;;  %v3149_v17 = vadd.f32 %v14102_v58, %v3102_v16  ;;  %v18733_v34 = vld [vmem:[#allocation110_spill] sm:$0xff] }
 0x4a8   :  { %3423 = vmatmul.f32.gmra.mxu2 %v18732_v32  ;;  %v3152_v5 = vadd.f32 %v14140_v13, %v3105_v1  ;;  %v3043_v23 = vadd.f32 %v14192_v22, %v2996_v57  ;;  %v3093_v31 = vadd.f32 %v13909_v46, %v3046_v35  ;;  %v8716_v13 = vld [vmem:[%s18393_s4 + $0x1390] sm:$0xff]  ;;  %v3143_v46 = vadd.f32 %v13989_v26, %v3096_v33 }
 0x4a9   :  { %3593 = vmatpush.msrb.mxu2 %v8722_v51  ;;  %v3146_v22 = vadd.f32 %v14054_v14, %v3099_v41  ;;  %v18737_v51 = vld [vmem:[#allocation111_spill] sm:$0xff] }
 0x4aa   :  { %v3199_v44 = vadd.f32 %v3198_v27, %v3152_v5  ;;  %v3090_v58 = vadd.f32 %v13859_v38, %v3043_v23  ;;  %v3140_v42 = vadd.f32 %v13935_v53, %v3093_v31  ;;  %v18736_v53 = vld [vmem:[#allocation16_spill] sm:$0xff] }
 0x4ab   :  { %3564 = vmatmul.f32.gmra.mxu1 %v18632_v59  ;;  %v3060_v62 = vpop.f32.mrf.mxu2  ;;  %v8719_v59 = vld [vmem:[%s18393_s4 + $0x13a8] sm:$0xff]  ;;  %v3201_v1 = vpop.f32.mrf.mxu1  ;;  %v3193_v16 = vadd.f32 %v14242_v60, %v3146_v22  ;;  %v18738_v5 = vld [vmem:[#allocation52_spill] sm:$0xff] }
 0x4ac   :  { %v3061_v21 = vadd.f32 %v3060_v62, %v3014_v12  ;;  %3594 = vmatpush.msrb.mxu2 %v8719_v59  ;;  %v14354_v14 = vpop.f32.mrf.mxu0  ;;  %v18734_v12 = vld [vmem:[#allocation24_spill] sm:$0xff]  ;;  %v3698_v38 = vadd.f32 %v3199_v44, %v18735_v61  ;;  %v3137_v26 = vadd.f32 %v13883_v45, %v3090_v58  ;;  %v14366_v62 = vpop.f32.mrf.mxu3  ;;  %v3187_v45 = vadd.f32 %v14204_v15, %v3140_v42  ;;  %v14402_v42 = vld [vmem:[%s18158_s5] sm:$0xff] }
 0x4ad   :  { %v3692_v60 = vadd.f32 %v3193_v16, %v18738_v5  ;;  %v18741_v22 = vld [vmem:[#allocation8_spill] sm:$0xff] }
 0x4ae   :  { %v3108_v54 = vadd.f32 %v14152_v48, %v3061_v21  ;;  %3595 = vmatpush.msrb.mxu2 %v8716_v13  ;;  %v3728_v41 = vmax.f32 %v3698_v38, 0.0  ;;  %v18739_v21 = vld [vmem:[#allocation12_spill] sm:$0xff]  ;;  %v3184_v59 = vadd.f32 %v14182_v52, %v3137_v26 }
 0x4af   :  { %3652 = vmatmul.f32.gmra.mxu3 %v18728_v2  ;;  %v3196_v2 = vadd.f32 %v14274_v47, %v3149_v17  ;;  %v18740_v17 = vld [vmem:[#allocation50_spill] sm:$0xff]  ;;  %v18742_v52 = vld [vmem:[#allocation112_spill] sm:$0xff] }
 0x4b0   :  { %v3155_v4 = vadd.f32 %v14180_v30, %v3108_v54  ;;  %3426 = vmatmul.f32.gmra.mxu2 %v18733_v34  ;;  %v3686_v54 = vadd.f32 %v3187_v45, %v18740_v17  ;;  %v14452_v45 = vld [vmem:[%s18158_s5 + $0x18] sm:$0xff]  ;;  %v18753_v17 = vld [vmem:[#allocation74_spill] sm:$0xff] }
 0x4b1   :  { %v3695_v35 = vadd.f32 %v3196_v2, %v18736_v53  ;;  %v14435_v53 = vld [vmem:[%s18158_s5 + $0x10] sm:$0xff] }
 0x4b2   :  { %v3202_v48 = vadd.f32 %v3201_v1, %v3155_v4  ;;  %v3683_v4 = vadd.f32 %v3184_v59, %v18741_v22 }
 0x4b3   :  { %3567 = vmatmul.f32.gmra.mxu1 %v18636_v63  ;;  %v3221_v18 = vpop.f32.mrf.mxu2  ;;  %v3190_v63 = vadd.f32 %v14223_v0, %v3143_v46  ;;  %v3710_v46 = vmax.f32 %v14198_v28, 0.0 }
 0x4b4   :  { %v3222_v30 = vadd.f32 %v3221_v18, %v14051_v56  ;;  %v3701_v27 = vadd.f32 %v3202_v48, %v18734_v12  ;;  %v14377_v31 = vpop.f32.mrf.mxu0  ;;  %v14385_v44 = vpop.f32.mrf.mxu3  ;;  %v3713_v58 = vmax.f32 %v3683_v4, 0.0  ;;  %v18744_v18 = vld [vmem:[#allocation31_spill] sm:$0xff] }
 0x4b5   :  { %v3689_v23 = vadd.f32 %v3190_v63, %v18739_v21  ;;  %v14418_v12 = vld [vmem:[%s18158_s5 + $0x8] sm:$0xff] }
 0x4b6   :  { %v14362_v57 = vadd.f32 %v14189_v3, %v3222_v30  ;;  %v3731_v47 = vmax.f32 %v3701_v27, 0.0  ;;  %v3725_v3 = vmax.f32 %v3695_v35, 0.0  ;;  %v3362_v35 = vpop.f32.mrf.mxu1 }
 0x4b7   :  { %3655 = vmatmul.f32.gmra.mxu3 %v18731_v6  ;;  %v3722_v6 = vmax.f32 %v3692_v60, 0.0  ;;  %v3719_v15 = vmax.f32 %v3689_v23, 0.0  ;;  %v18748_v60 = vld [vmem:[#allocation68_spill] sm:$0xff] }
 0x4b8   :  { %3429 = vmatmul.f32.gmra.mxu2 %v18737_v51  ;;  %3860 = vmatpush.msrb.mxu0 %v3731_v47  ;;  %v18746_v47 = vld [vmem:[#allocation65_spill] sm:$0xff] }
 0x4ba   :  { %3861 = vmatpush.msrb.mxu0 %v3728_v41 }
 0x4bb   :  { %3570 = vmatmul.f32.gmra.mxu1 %v18641_v7  ;;  %v3224_v0 = vpop.f32.mrf.mxu2  ;;  %v3716_v7 = vmax.f32 %v3686_v54, 0.0  ;;  %v14478_v54 = vld [vmem:[%s18158_s5 + $0x28] sm:$0xff] }
 0x4bc   :  { %v3225_v33 = vadd.f32 %v3224_v0, %v14099_v20  ;;  %3862 = vmatpush.msrb.mxu0 %v3725_v3  ;;  %v14395_v2 = vpop.f32.mrf.mxu0  ;;  %v14404_v28 = vpop.f32.mrf.mxu3 }
 0x4be   :  { %v14380_v13 = vadd.f32 %v14219_v40, %v3225_v33  ;;  %3863 = vmatpush.msrb.mxu0 %v3722_v6  ;;  %v3365_v3 = vpop.f32.mrf.mxu1 }
 0x4bf   :  { %3658 = vmatmul.f32.gmra.mxu3 %v18732_v32  ;;  %v3707_v32 = vmax.f32 %v14166_v49, 0.0 }
 0x4c0   :  { %3432 = vmatmul.f32.gmra.mxu2 %v18742_v52  ;;  %3864 = vmatpush.msrb.mxu0 %v3719_v15 }
 0x4c2   :  { %3865 = vmatpush.msrb.mxu0 %v3716_v7  ;;  %v14490_v7 = vld [vmem:[%s18158_s5 + $0x30] sm:$0xff] }
 0x4c3   :  { %3573 = vmatmul.f32.gmra.mxu1 %v18646_v9  ;;  %v3227_v1 = vpop.f32.mrf.mxu2  ;;  %v3704_v9 = vmax.f32 %v14128_v19, 0.0  ;;  %v18745_v19 = vld [vmem:[#allocation62_spill] sm:$0xff] }
 0x4c4   :  { %v3228_v40 = vadd.f32 %v3227_v1, %v14137_v39  ;;  %3866 = vmatpush.msrb.mxu0 %v3713_v58  ;;  %v14420_v27 = vpop.f32.mrf.mxu0  ;;  %v14425_v16 = vpop.f32.mrf.mxu3 }
 0x4c6   :  { %v14391_v48 = vadd.f32 %v14234_v8, %v3228_v40  ;;  %3867 = vmatpush.msrb.mxu0 %v3710_v46  ;;  %v18743_v8 = vld [vmem:[#allocation101_spill] sm:$0xff]  ;;  %v3368_v33 = vpop.f32.mrf.mxu1  ;;  %v18756_v46 = vld [vmem:[#allocation10_spill] sm:$0xff] }
 0x4c7   :  { %3661 = vmatmul.f32.gmra.mxu3 %v18733_v34 }
 0x4c8   :  { %3435 = vmatmul.f32.gmra.mxu2 %v18682_v50  ;;  %3868 = vmatpush.msrb.mxu0 %v3707_v32  ;;  %v3316_v32 = vadd.f32 %v18756_v46, %v14362_v57  ;;  %v18759_v57 = vld [vmem:[#allocation100_spill] sm:$0xff] }
 0x4ca   :  { %3869 = vmatpush.msrb.mxu0 %v3704_v9  ;;  %v18757_v9 = vld [vmem:[#allocation83_spill] sm:$0xff] }
 0x4cb   :  { %3576 = vmatmul.f32.gmra.mxu1 %v18743_v8  ;;  %v3230_v49 = vpop.f32.mrf.mxu2  ;;  %8810 = vmatmul.msk.f32.vlgmr.msrb.gmra.mxu0 %vm151_vm0, %v14402_v42  ;;  %v14506_v8 = vld [vmem:[%s18158_s5 + $0x38] sm:$0xff] }
 0x4cc   :  { %v3231_v34 = vadd.f32 %v3230_v49, %v13976_v25  ;;  %v14445_v5 = vpop.f32.mrf.mxu3 }
 0x4cd   :  { %18747 = vst [vmem:[#allocation25_spill] sm:$0xff] %v14445_v5 }
 0x4ce   :  { %v14411_v30 = vadd.f32 %v18744_v18, %v3231_v34  ;;  %v3371_v4 = vpop.f32.mrf.mxu1  ;;  %v3363_v34 = vadd.f32 %v3362_v35, %v3316_v32  ;;  %v14523_v35 = vld [vmem:[%s18158_s5 + $0x40] sm:$0xff] }
 0x4cf   :  { %3664 = vmatmul.f32.gmra.mxu3 %v18737_v51  ;;  %v14439_v51 = vpop.f32.mrf.mxu0  ;;  %18761 = vst [vmem:[#allocation102_spill] sm:$0xff] %v14523_v35 }
 0x4d0   :  { %3596 = vmatmul.f32.vlgmr.msrb.gmra.mxu2 %v18745_v19 }
 0x4d3   :  { %v3233_v61 = vpop.f32.mrf.mxu2  ;;  %8811 = vmatmul.msk.f32.gmra.mxu0 %vm151_vm0, %v14418_v12 }
 0x4d4   :  { %v3234_v38 = vadd.f32 %v3233_v61, %v14036_v11  ;;  %v14466_v59 = vpop.f32.mrf.mxu3 }
 0x4d5   :  { %18751 = vst [vmem:[#allocation47_spill] sm:$0xff] %v14466_v59 }
 0x4d6   :  { %v14428_v26 = vadd.f32 %v14291_v24, %v3234_v38  ;;  %v3374_v49 = vpop.f32.mrf.mxu1  ;;  %v18758_v38 = vld [vmem:[#allocation32_spill] sm:$0xff] }
 0x4d7   :  { %3667 = vmatmul.f32.gmra.mxu3 %v18742_v52  ;;  %v14458_v23 = vpop.f32.mrf.mxu0  ;;  %v18754_v52 = vld [vmem:[#allocation79_spill] sm:$0xff] }
 0x4d8   :  { %3599 = vmatmul.f32.gmra.mxu2 %v18746_v47  ;;  %18749 = vst [vmem:[#allocation14_spill] sm:$0xff] %v14458_v23 }
 0x4db   :  { %v3236_v63 = vpop.f32.mrf.mxu2  ;;  %8812 = vmatmul.msk.f32.gmra.mxu0 %vm151_vm0, %v14435_v53 }
 0x4dc   :  { %v3237_v41 = vadd.f32 %v3236_v63, %v13964_v10  ;;  %v14480_v15 = vpop.f32.mrf.mxu3  ;;  %v3319_v63 = vadd.f32 %v18759_v57, %v14380_v13 }
 0x4de   :  { %v14443_v24 = vadd.f32 %v14333_v37, %v3237_v41  ;;  %v18750_v37 = vld [vmem:[#allocation71_spill] sm:$0xff] }
 0x4df   :  { %3670 = vmatmul.f32.gmra.mxu3 %v18682_v50  ;;  %v14464_v50 = vld [vmem:[%s18158_s5 + $0x20] sm:$0xff]  ;;  %v14472_v6 = vpop.f32.mrf.mxu0 }
 0x4e0   :  { %3602 = vmatmul.f32.gmra.mxu2 %v18748_v60  ;;  %18752 = vst [vmem:[#allocation29_spill] sm:$0xff] %v14472_v6  ;;  %v18760_v60 = vld [vmem:[#allocation87_spill] sm:$0xff] }
 0x4e3   :  { %v14454_v21 = vpop.f32.mrf.mxu2  ;;  %8813 = vmatmul.msk.f32.gmra.mxu0 %vm151_vm0, %v14452_v45 }
 0x4e4   :  { %v14498_v40 = vpop.f32.mrf.mxu3  ;;  %v3240_v5 = vadd.f32 %v14454_v21, %v14090_v29 }
 0x4e6   :  { %v3287_v21 = vadd.f32 %v14366_v62, %v3240_v5 }
 0x4e7   :  { %v14492_v58 = vpop.f32.mrf.mxu0 }
 0x4e8   :  { %3605 = vmatmul.f32.gmra.mxu2 %v18750_v37  ;;  %18755 = vst [vmem:[#allocation53_spill] sm:$0xff] %v14492_v58  ;;  %v3366_v37 = vadd.f32 %v3365_v3, %v3319_v63  ;;  %v14538_v3 = vld [vmem:[%s18158_s5 + $0x48] sm:$0xff] }
 0x4e9   :  { %18765 = vst [vmem:[#allocation33_spill] sm:$0xff] %v14538_v3 }
 0x4eb   :  { %v14468_v0 = vpop.f32.mrf.mxu2  ;;  %8814 = vmatmul.msk.f32.gmra.mxu0 %vm151_vm0, %v14464_v50 }
 0x4ec   :  { %v14517_v41 = vpop.f32.mrf.mxu3 }
 0x4ef   :  { %v14510_v19 = vpop.f32.mrf.mxu0 }
 0x4f0   :  { %3608 = vmatmul.f32.gmra.mxu2 %v18753_v17  ;;  %v3377_v17 = vpop.f32.mrf.mxu1 }
 0x4f3   :  { %v14482_v22 = vpop.f32.mrf.mxu2  ;;  %8815 = vmatmul.msk.f32.gmra.mxu0 %vm151_vm0, %v14478_v54 }
 0x4f7   :  { %v14527_v32 = vpop.f32.mrf.mxu0 }
 0x4f8   :  { %3611 = vmatmul.f32.gmra.mxu2 %v18754_v52 }
 0x4fb   :  { %v14494_v1 = vpop.f32.mrf.mxu2  ;;  %8816 = vmatmul.msk.f32.gmra.mxu0 %vm151_vm0, %v14490_v7 }
 0x4fc   :  { %v3249_v6 = vadd.f32 %v14494_v1, %v13850_v43 }
 0x500   :  { %3614 = vmatmul.f32.gmra.mxu2 %v18757_v9  ;;  %v18762_v9 = vld [vmem:[#allocation36_spill] sm:$0xff] }
 0x503   :  { %v3409_v18 = vpop.f32.mrf.mxu2  ;;  %8817 = vmatmul.msk.f32.gmra.mxu0 %vm151_vm0, %v14506_v8 }
 0x504   :  { %v3410_v61 = vadd.f32 %v3409_v18, %v3363_v34  ;;  %v18763_v34 = vld [vmem:[#allocation21_spill] sm:$0xff] }
 0x505   :  { %v3322_v18 = vadd.f32 %v18763_v34, %v14391_v48  ;;  %v18767_v48 = vld [vmem:[#allocation45_spill] sm:$0xff]  ;;  %v14551_v34 = vpop.f32.mrf.mxu0 }
 0x506   :  { %v14513_v47 = vadd.f32 %v3410_v61, %v18758_v38  ;;  %v18764_v61 = vld [vmem:[#allocation91_spill] sm:$0xff]  ;;  %v14540_v38 = vpop.f32.mrf.mxu3 }
 0x507   :  { %v3369_v57 = vadd.f32 %v3368_v33, %v3322_v18  ;;  %v14557_v33 = vld [vmem:[%s18158_s5 + $0x50] sm:$0xff] }
 0x508   :  { %3617 = vmatmul.f32.gmra.mxu2 %v18760_v60  ;;  %18769 = vst [vmem:[#allocation35_spill] sm:$0xff] %v14557_v33 }
 0x50b   :  { %v3412_v52 = vpop.f32.mrf.mxu2  ;;  %8818 = vmatmul.msk.f32.gmra.mxu0 %vm151_vm0, %v14523_v35 }
 0x50c   :  { %v3413_v46 = vadd.f32 %v3412_v52, %v3366_v37  ;;  %v14544_v37 = vpop.f32.mrf.mxu1  ;;  %v18766_v52 = vld [vmem:[#allocation67_spill] sm:$0xff] }
 0x50e   :  { %v14530_v13 = vadd.f32 %v3413_v46, %v18762_v9  ;;  %v3325_v9 = vadd.f32 %v18767_v48, %v14411_v30  ;;  %v3328_v30 = vadd.f32 %v14321_v55, %v14428_v26  ;;  %v3331_v55 = vadd.f32 %v14354_v14, %v14443_v24  ;;  %v14587_v26 = vld [vmem:[%s18158_s5 + $0x60] sm:$0xff]  ;;  %v14601_v14 = vld [vmem:[%s18158_s5 + $0x68] sm:$0xff] }
 0x50f   :  { %18773 = vst [vmem:[#allocation37_spill] sm:$0xff] %v14587_v26 }
 0x510   :  { %3620 = vmatmul.f32.gmra.mxu2 %v18764_v61  ;;  %v18768_v61 = vld [vmem:[#allocation95_spill] sm:$0xff]  ;;  %v3372_v18 = vadd.f32 %v3371_v4, %v3325_v9  ;;  %v14573_v4 = vpop.f32.mrf.mxu0  ;;  %v3375_v9 = vadd.f32 %v3374_v49, %v3328_v30  ;;  %v3378_v49 = vadd.f32 %v3377_v17, %v3331_v55  ;;  %18775 = vst [vmem:[#allocation18_spill] sm:$0xff] %v14601_v14  ;;  %v14610_v55 = vld [vmem:[%s18158_s5 + $0x70] sm:$0xff] }
 0x511   :  { %18776 = vst [vmem:[#allocation40_spill] sm:$0xff] %v14610_v55 }
 0x513   :  { %v3415_v63 = vpop.f32.mrf.mxu2  ;;  %8819 = vmatmul.msk.f32.gmra.mxu0 %vm151_vm0, %v14538_v3  ;;  %v14559_v3 = vpop.f32.mrf.mxu3 }
 0x514   :  { %v3416_v60 = vadd.f32 %v3415_v63, %v3369_v57  ;;  %v3383_v48 = vpop.f32.mrf.mxu1 }
 0x516   :  { %v14547_v46 = vadd.f32 %v3416_v60, %v18766_v52  ;;  %v18770_v60 = vld [vmem:[#allocation73_spill] sm:$0xff] }
 0x518   :  { %3623 = vmatmul.f32.gmra.mxu2 %v18768_v61  ;;  %v14571_v61 = vld [vmem:[%s18158_s5 + $0x58] sm:$0xff] }
 0x519   :  { %18771 = vst [vmem:[#allocation26_spill] sm:$0xff] %v14571_v61 }
 0x51b   :  { %v3418_v57 = vpop.f32.mrf.mxu2  ;;  %8820 = vmatmul.msk.f32.gmra.mxu0 %vm151_vm0, %v14557_v33 }
 0x51c   :  { %v3419_v63 = vadd.f32 %v3418_v57, %v3372_v18  ;;  %v14577_v57 = vpop.f32.mrf.mxu3  ;;  %v3386_v33 = vpop.f32.mrf.mxu1 }
 0x51e   :  { %v14564_v52 = vadd.f32 %v3419_v63, %v18770_v60  ;;  %v18772_v63 = vld [vmem:[#allocation77_spill] sm:$0xff] }
 0x523   :  { %v3421_v35 = vpop.f32.mrf.mxu2  ;;  %8821 = vmatmul.msk.f32.gmra.mxu0 %vm151_vm0, %v14571_v61  ;;  %v18774_v61 = vld [vmem:[#allocation81_spill] sm:$0xff] }
 0x524   :  { %v3422_v18 = vadd.f32 %v3421_v35, %v3375_v9  ;;  %v14591_v35 = vpop.f32.mrf.mxu0  ;;  %v3389_v24 = vpop.f32.mrf.mxu1 }
 0x526   :  { %v14580_v60 = vadd.f32 %v3422_v18, %v18772_v63  ;;  %v14596_v63 = vpop.f32.mrf.mxu3 }
 0x52b   :  { %v3424_v30 = vpop.f32.mrf.mxu2  ;;  %8822 = vmatmul.msk.f32.gmra.mxu0 %vm151_vm0, %v14587_v26 }
 0x52c   :  { %v3425_v9 = vadd.f32 %v3424_v30, %v3378_v49  ;;  %v14605_v17 = vpop.f32.mrf.mxu0  ;;  %v18777_v30 = vld [vmem:[#allocation13_spill] sm:$0xff]  ;;  %v14618_v26 = vpop.f32.mrf.mxu1 }
 0x52d   :  { %18778 = vst [vmem:[#allocation54_spill] sm:$0xff] %v14618_v26  ;;  %v3296_v26 = vadd.f32 %v14425_v16, %v3249_v6  ;;  %v14652_v6 = vld [vmem:[%s18158_s5 + $0x80] sm:$0xff] }
 0x52e   :  { %v14594_v18 = vadd.f32 %v3425_v9, %v18774_v61  ;;  %v14612_v61 = vpop.f32.mrf.mxu3  ;;  %v3246_v9 = vadd.f32 %v14482_v22, %v18777_v30 }
 0x530   :  { %v3293_v56 = vadd.f32 %v14404_v28, %v3246_v9  ;;  %v3343_v9 = vadd.f32 %v14439_v51, %v3296_v26  ;;  %v18782_v26 = vld [vmem:[#allocation92_spill] sm:$0xff] }
 0x532   :  { %v3340_v28 = vadd.f32 %v14420_v27, %v3293_v56  ;;  %v3390_v5 = vadd.f32 %v3389_v24, %v3343_v9  ;;  %v14667_v24 = vld [vmem:[%s18158_s5 + $0x88] sm:$0xff] }
 0x533   :  { %v3427_v23 = vpop.f32.mrf.mxu2  ;;  %8823 = vmatmul.msk.f32.gmra.mxu0 %vm151_vm0, %v14601_v14  ;;  %v3243_v14 = vadd.f32 %v14468_v0, %v14024_v36  ;;  %18786 = vst [vmem:[#allocation88_spill] sm:$0xff] %v14667_v24 }
 0x534   :  { %v14627_v58 = vpop.f32.mrf.mxu0  ;;  %v14644_v20 = vpop.f32.mrf.mxu1 }
 0x535   :  { %v3290_v22 = vadd.f32 %v14385_v44, %v3243_v14  ;;  %v3334_v44 = vadd.f32 %v14377_v31, %v3287_v21  ;;  %v3387_v14 = vadd.f32 %v3386_v33, %v3340_v28  ;;  %v18783_v21 = vld [vmem:[#allocation94_spill] sm:$0xff] }
 0x536   :  { %v14636_v0 = vpop.f32.mrf.mxu3 }
 0x537   :  { %18780 = vst [vmem:[#allocation57_spill] sm:$0xff] %v14636_v0  ;;  %v3337_v1 = vadd.f32 %v14395_v2, %v3290_v22  ;;  %v3381_v2 = vadd.f32 %v14544_v37, %v3334_v44 }
 0x539   :  { %v3428_v33 = vadd.f32 %v3427_v23, %v3381_v2 }
 0x53b   :  { %v3430_v49 = vpop.f32.mrf.mxu2  ;;  %8824 = vmatmul.msk.f32.gmra.mxu0 %vm151_vm0, %v14610_v55  ;;  %v14632_v55 = vld [vmem:[%s18158_s5 + $0x78] sm:$0xff] }
 0x53c   :  { %18779 = vst [vmem:[#allocation42_spill] sm:$0xff] %v14632_v55  ;;  %v14669_v37 = vpop.f32.mrf.mxu1 }
 0x53e   :  { %v14657_v31 = vpop.f32.mrf.mxu3 }
 0x543   :  { %v3433_v59 = vpop.f32.mrf.mxu2  ;;  %8825 = vmatmul.msk.f32.gmra.mxu0 %vm151_vm0, %v14632_v55  ;;  %v3384_v55 = vadd.f32 %v3383_v48, %v3337_v1 }
 0x544   :  { %v3434_v62 = vadd.f32 %v3433_v59, %v3387_v14  ;;  %v14687_v2 = vpop.f32.mrf.mxu1 }
 0x545   :  { %v3431_v27 = vadd.f32 %v3430_v49, %v3384_v55  ;;  %v18787_v55 = vld [vmem:[#allocation85_spill] sm:$0xff] }
 0x546   :  { %v3699_v22 = vadd.f32 %v3434_v62, %v18782_v26  ;;  %v3693_v49 = vadd.f32 %v3428_v33, %v18787_v55  ;;  %v14676_v14 = vpop.f32.mrf.mxu3  ;;  %v3720_v62 = vmax.f32 %v14594_v18, 0.0  ;;  %v3711_v18 = vmax.f32 %v14547_v46, 0.0 }
 0x547   :  { %v3708_v33 = vmax.f32 %v14530_v13, 0.0 }
 0x548   :  { %v14647_v16 = vpop.f32.mrf.mxu0  ;;  %v3729_v23 = vmax.f32 %v3699_v22, 0.0  ;;  %v3723_v44 = vmax.f32 %v3693_v49, 0.0  ;;  %v3705_v22 = vmax.f32 %v14513_v47, 0.0  ;;  %v14736_v49 = vld [vmem:[%s18158_s5 + $0xa8] sm:$0xff] }
 0x549   :  { %18781 = vst [vmem:[#allocation59_spill] sm:$0xff] %v14647_v16  ;;  %v18784_v16 = vld [vmem:[#allocation89_spill] sm:$0xff] }
 0x54a   :  { %v3696_v0 = vadd.f32 %v3431_v27, %v18784_v16  ;;  %v3714_v27 = vmax.f32 %v14564_v52, 0.0  ;;  %v14719_v52 = vld [vmem:[%s18158_s5 + $0xa0] sm:$0xff]  ;;  %18795 = vst [vmem:[#allocation63_spill] sm:$0xff] %v14736_v49 }
 0x54b   :  { %v3436_v56 = vpop.f32.mrf.mxu2  ;;  %8826 = vmatmul.msk.f32.gmra.mxu0 %vm151_vm0, %v14652_v6  ;;  %18793 = vst [vmem:[#allocation99_spill] sm:$0xff] %v14719_v52 }
 0x54c   :  { %v3437_v51 = vadd.f32 %v3436_v56, %v3390_v5  ;;  %v3726_v9 = vmax.f32 %v3696_v0, 0.0  ;;  %v14684_v5 = vld [vmem:[%s18158_s5 + $0x90] sm:$0xff]  ;;  %v3717_v56 = vmax.f32 %v14580_v60, 0.0  ;;  %v14701_v60 = vld [vmem:[%s18158_s5 + $0x98] sm:$0xff]  ;;  %v14710_v46 = vpop.f32.mrf.mxu1 }
 0x54d   :  { %18789 = vst [vmem:[#allocation93_spill] sm:$0xff] %v14684_v5 }
 0x54e   :  { %v3702_v28 = vadd.f32 %v3437_v51, %v18783_v21  ;;  %18791 = vst [vmem:[#allocation98_spill] sm:$0xff] %v14701_v60  ;;  %v14703_v26 = vpop.f32.mrf.mxu3 }
 0x550   :  { %v3732_v48 = vmax.f32 %v3702_v28, 0.0  ;;  %v14662_v59 = vpop.f32.mrf.mxu0 }
 0x551   :  { %18785 = vst [vmem:[#allocation84_spill] sm:$0xff] %v14662_v59  ;;  %v14799_v59 = vld [vmem:[%s18158_s5 + $0xc0] sm:$0xff] }
 0x552   :  { %3967 = vmatpush.msrb.mxu1 %v3732_v48  ;;  %18801 = vst [vmem:[#allocation22_spill] sm:$0xff] %v14799_v59 }
 0x553   :  { %v14672_v1 = vpop.f32.mrf.mxu2  ;;  %8827 = vmatmul.msk.f32.gmra.mxu0 %vm151_vm0, %v14667_v24 }
 0x554   :  { %3968 = vmatpush.msrb.mxu1 %v3729_v23  ;;  %v14729_v48 = vpop.f32.mrf.mxu1 }
 0x556   :  { %3969 = vmatpush.msrb.mxu1 %v3726_v9  ;;  %v14721_v28 = vpop.f32.mrf.mxu3 }
 0x558   :  { %v14678_v16 = vpop.f32.mrf.mxu0  ;;  %3970 = vmatpush.msrb.mxu1 %v3723_v44 }
 0x559   :  { %18788 = vst [vmem:[#allocation90_spill] sm:$0xff] %v14678_v16 }
 0x55a   :  { %3971 = vmatpush.msrb.mxu1 %v3720_v62  ;;  %v14751_v62 = vld [vmem:[%s18158_s5 + $0xb0] sm:$0xff] }
 0x55b   :  { %v14689_v0 = vpop.f32.mrf.mxu2  ;;  %8828 = vmatmul.msk.f32.gmra.mxu0 %vm151_vm0, %v14684_v5  ;;  %18797 = vst [vmem:[#allocation69_spill] sm:$0xff] %v14751_v62 }
 0x55c   :  { %3972 = vmatpush.msrb.mxu1 %v3717_v56  ;;  %v14753_v56 = vpop.f32.mrf.mxu1 }
 0x55e   :  { %3973 = vmatpush.msrb.mxu1 %v3714_v27  ;;  %v14742_v9 = vpop.f32.mrf.mxu3 }
 0x560   :  { %v14695_v51 = vpop.f32.mrf.mxu0  ;;  %3974 = vmatpush.msrb.mxu1 %v3711_v18  ;;  %v8931_v18 = vld [vmem:[%s18159_s6 + $0x378] sm:$0xff] }
 0x561   :  { %18790 = vst [vmem:[#allocation96_spill] sm:$0xff] %v14695_v51  ;;  %4508 = vmatpush.msra.mxu0 %v8931_v18  ;;  %v8925_v18 = vld [vmem:[%s18159_s6 + $0x348] sm:$0xff] }
 0x562   :  { %3975 = vmatpush.msrb.mxu1 %v3708_v33  ;;  %v8929_v33 = vld [vmem:[%s18159_s6 + $0x368] sm:$0xff] }
 0x563   :  { %v14706_v21 = vpop.f32.mrf.mxu2  ;;  %8829 = vmatmul.msk.f32.gmra.mxu0 %vm151_vm0, %v14701_v60 }
 0x564   :  { %3976 = vmatpush.msrb.mxu1 %v3705_v22  ;;  %4509 = vmatpush.msra.mxu0 %v8929_v33  ;;  %v3571_v51 = vpop.f32.mrf.mxu1  ;;  %v8923_v33 = vld [vmem:[%s18159_s6 + $0x338] sm:$0xff] }
 0x565   :  { %8840 = vmatmul.msk.f32.vlgmr.msrb.gmra.mxu1 %vm151_vm0, %v14402_v42 }
 0x566   :  { %v14767_v22 = vpop.f32.mrf.mxu3 }
 0x568   :  { %v14714_v13 = vpop.f32.mrf.mxu0 }
 0x569   :  { %18792 = vst [vmem:[#allocation58_spill] sm:$0xff] %v14714_v13  ;;  %v8927_v13 = vld [vmem:[%s18159_s6 + $0x358] sm:$0xff] }
 0x56a   :  { %4510 = vmatpush.msra.mxu0 %v8927_v13  ;;  %v8921_v13 = vld [vmem:[%s18159_s6 + $0x328] sm:$0xff] }
 0x56b   :  { %v14723_v47 = vpop.f32.mrf.mxu2  ;;  %8830 = vmatmul.msk.f32.gmra.mxu0 %vm151_vm0, %v14719_v52  ;;  %v3481_v52 = vadd.f32 %v14596_v63, %v18777_v30  ;;  %v8907_v63 = vld [vmem:[%s18159_s6 + $0x2b8] sm:$0xff]  ;;  %v3475_v30 = vadd.f32 %v14559_v3, %v14090_v29 }
 0x56c   :  { %4511 = vmatpush.msra.mxu0 %v8925_v18  ;;  %v8919_v18 = vld [vmem:[%s18159_s6 + $0x318] sm:$0xff] }
 0x56d   :  { %8841 = vmatmul.msk.f32.gmra.mxu1 %vm151_vm0, %v14418_v12  ;;  %v3528_v5 = vadd.f32 %v14605_v17, %v3481_v52  ;;  %v3522_v52 = vadd.f32 %v14573_v4, %v3475_v30  ;;  %v18806_v30 = vld [vmem:[#allocation53_spill] sm:$0xff] }
 0x56e   :  { %4512 = vmatpush.msra.mxu0 %v8923_v33  ;;  %v8917_v33 = vld [vmem:[%s18159_s6 + $0x308] sm:$0xff] }
 0x56f   :  { %v3569_v4 = vadd.f32 %v14753_v56, %v3522_v52  ;;  %v18809_v52 = vld [vmem:[#allocation43_spill] sm:$0xff] }
 0x570   :  { %v14731_v55 = vpop.f32.mrf.mxu0  ;;  %4513 = vmatpush.msra.mxu0 %v8921_v13  ;;  %v8915_v13 = vld [vmem:[%s18159_s6 + $0x2f8] sm:$0xff] }
 0x571   :  { %18794 = vst [vmem:[#allocation60_spill] sm:$0xff] %v14731_v55  ;;  %v14774_v55 = vld [vmem:[%s18158_s5 + $0xb8] sm:$0xff] }
 0x572   :  { %18799 = vst [vmem:[#allocation39_spill] sm:$0xff] %v14774_v55  ;;  %4514 = vmatpush.msra.mxu0 %v8919_v18  ;;  %v8913_v18 = vld [vmem:[%s18159_s6 + $0x2e8] sm:$0xff] }
 0x573   :  { %v14738_v23 = vpop.f32.mrf.mxu2  ;;  %8831 = vmatmul.msk.f32.gmra.mxu0 %vm151_vm0, %v14736_v49 }
 0x574   :  { %4515 = vmatpush.msra.mxu0 %v8917_v33  ;;  %v8911_v33 = vld [vmem:[%s18159_s6 + $0x2d8] sm:$0xff] }
 0x575   :  { %8842 = vmatmul.msk.f32.gmra.mxu1 %vm151_vm0, %v14435_v53 }
 0x576   :  { %4516 = vmatpush.msra.mxu0 %v8915_v13  ;;  %v8909_v13 = vld [vmem:[%s18159_s6 + $0x2c8] sm:$0xff] }
 0x578   :  { %v14746_v44 = vpop.f32.mrf.mxu0  ;;  %4517 = vmatpush.msra.mxu0 %v8913_v18  ;;  %v3478_v18 = vadd.f32 %v14577_v57, %v14024_v36  ;;  %v8905_v36 = vld [vmem:[%s18159_s6 + $0x2a8] sm:$0xff]  ;;  %v3472_v57 = vadd.f32 %v14540_v38, %v13964_v10  ;;  %v3469_v10 = vadd.f32 %v14517_v41, %v14036_v11 }
 0x579   :  { %18796 = vst [vmem:[#allocation66_spill] sm:$0xff] %v14746_v44 }
 0x57a   :  { %4518 = vmatpush.msra.mxu0 %v8911_v33  ;;  %v3525_v33 = vadd.f32 %v14591_v35, %v3478_v18  ;;  %v3519_v38 = vadd.f32 %v14551_v34, %v3472_v57 }
 0x57b   :  { %v14755_v27 = vpop.f32.mrf.mxu2  ;;  %8832 = vmatmul.msk.f32.gmra.mxu0 %vm151_vm0, %v14751_v62 }
 0x57c   :  { %4519 = vmatpush.msra.mxu0 %v8909_v13  ;;  %v3572_v29 = vadd.f32 %v3571_v51, %v3525_v33  ;;  %v3516_v51 = vadd.f32 %v14527_v32, %v3469_v10  ;;  %v3566_v11 = vadd.f32 %v14729_v48, %v3519_v38 }
 0x57d   :  { %8843 = vmatmul.msk.f32.gmra.mxu1 %vm151_vm0, %v14452_v45 }
 0x57e   :  { %4520 = vmatpush.msra.mxu0 %v8907_v63 }
 0x580   :  { %v14769_v44 = vpop.f32.mrf.mxu0  ;;  %4521 = vmatpush.msra.mxu0 %v8905_v36  ;;  %v18807_v36 = vld [vmem:[#allocation17_spill] sm:$0xff] }
 0x581   :  { %18798 = vst [vmem:[#allocation72_spill] sm:$0xff] %v14769_v44 }
 0x583   :  { %v14782_v16 = vpop.f32.mrf.mxu2  ;;  %8833 = vmatmul.msk.f32.gmra.mxu0 %vm151_vm0, %v14774_v55  ;;  %v14804_v55 = vpop.f32.mrf.mxu3 }
 0x584   :  { %v3616_v41 = vadd.f32 %v14782_v16, %v3569_v4  ;;  %v18804_v16 = vld [vmem:[#allocation51_spill] sm:$0xff]  ;;  %v18813_v4 = vld [vmem:[#allocation14_spill] sm:$0xff] }
 0x585   :  { %8844 = vmatmul.msk.f32.gmra.mxu1 %vm151_vm0, %v14464_v50 }
 0x588   :  { %v14794_v44 = vpop.f32.mrf.mxu0 }
 0x589   :  { %18800 = vst [vmem:[#allocation75_spill] sm:$0xff] %v14794_v44  ;;  %v3574_v44 = vpop.f32.mrf.mxu1 }
 0x58a   :  { %v3575_v24 = vadd.f32 %v3574_v44, %v3528_v5  ;;  %v3466_v5 = vadd.f32 %v14498_v40, %v13976_v25  ;;  %v3563_v25 = vadd.f32 %v14710_v46, %v3516_v51  ;;  %v3613_v40 = vadd.f32 %v14755_v27, %v3566_v11  ;;  %v14900_v46 = vld [vmem:[%s18158_s5 + $0xd8] sm:$0xff]  ;;  %v18814_v51 = vld [vmem:[#allocation115_spill] sm:$0xff]  ;;  %v18815_v11 = vld [vmem:[#allocation54_spill] sm:$0xff] }
 0x58b   :  { %v3618_v62 = vpop.f32.mrf.mxu2  ;;  %8834 = vmatmul.msk.f32.gmra.mxu0 %vm151_vm0, %v14799_v59  ;;  %v14824_v59 = vld [vmem:[%s18158_s5 + $0xc8] sm:$0xff]  ;;  %v3668_v60 = vpop.f32.mrf.mxu3 }
 0x58c   :  { %18803 = vst [vmem:[#allocation55_spill] sm:$0xff] %v14824_v59  ;;  %v3513_v56 = vadd.f32 %v14510_v19, %v3466_v5  ;;  %v3663_v19 = vadd.f32 %v14767_v22, %v3616_v41  ;;  %v8930_v5 = vld [vmem:[%s18159_s6 + $0x370] sm:$0xff] }
 0x58d   :  { %8845 = vmatmul.msk.f32.gmra.mxu1 %vm151_vm0, %v14478_v54  ;;  %4367 = vmatpush.msrb.mxu3 %v8930_v5  ;;  %v8910_v5 = vld [vmem:[%s18159_s6 + $0x2d0] sm:$0xff] }
 0x590   :  { %v14819_v49 = vpop.f32.mrf.mxu0 }
 0x591   :  { %18802 = vst [vmem:[#allocation78_spill] sm:$0xff] %v14819_v49  ;;  %v3577_v17 = vpop.f32.mrf.mxu1 }
 0x593   :  { %v3621_v49 = vpop.f32.mrf.mxu2  ;;  %8835 = vmatmul.msk.f32.gmra.mxu0 %vm151_vm0, %v14824_v59  ;;  %v3484_v59 = vadd.f32 %v14612_v61, %v13850_v43  ;;  %v14861_v43 = vld [vmem:[%s18158_s5 + $0xd0] sm:$0xff]  ;;  %v8903_v61 = vld [vmem:[%s18159_s6 + $0x298] sm:$0xff]  ;;  %v3671_v18 = vpop.f32.mrf.mxu3 }
 0x594   :  { %v3622_v3 = vadd.f32 %v3621_v49, %v3575_v24  ;;  %v3619_v24 = vadd.f32 %v3618_v62, %v3572_v29  ;;  %4522 = vmatpush.msra.mxu0 %v8903_v61  ;;  %v3463_v62 = vadd.f32 %v14480_v15, %v14137_v39  ;;  %v3560_v39 = vadd.f32 %v14687_v2, %v3513_v56 }
 0x595   :  { %8846 = vmatmul.msk.f32.gmra.mxu1 %vm151_vm0, %v14490_v7  ;;  %v3531_v13 = vadd.f32 %v14627_v58, %v3484_v59  ;;  %v8901_v58 = vld [vmem:[%s18159_s6 + $0x288] sm:$0xff]  ;;  %v3610_v15 = vadd.f32 %v14738_v23, %v3563_v25  ;;  %v3660_v61 = vadd.f32 %v14742_v9, %v3613_v40 }
 0x596   :  { %v3669_v44 = vadd.f32 %v3668_v60, %v3622_v3  ;;  %4523 = vmatpush.msra.mxu0 %v8901_v58  ;;  %v3666_v32 = vadd.f32 %v14804_v55, %v3619_v24  ;;  %v18805_v60 = vld [vmem:[#allocation47_spill] sm:$0xff]  ;;  %v3510_v33 = vadd.f32 %v18806_v30, %v3463_v62  ;;  %v18808_v55 = vld [vmem:[#allocation6_spill] sm:$0xff]  ;;  %v18811_v3 = vld [vmem:[#allocation29_spill] sm:$0xff]  ;;  %v3607_v22 = vadd.f32 %v14723_v47, %v3560_v39 }
 0x597   :  { %v3578_v59 = vadd.f32 %v3577_v17, %v3531_v13  ;;  %v3460_v63 = vadd.f32 %v18805_v60, %v18804_v16  ;;  %v18810_v13 = vld [vmem:[#allocation25_spill] sm:$0xff]  ;;  %v18812_v58 = vld [vmem:[#allocation103_spill] sm:$0xff]  ;;  %v3657_v47 = vadd.f32 %v14721_v28, %v3610_v15  ;;  %v8924_v16 = vld [vmem:[%s18159_s6 + $0x340] sm:$0xff] }
 0x598   :  { %v14856_v35 = vpop.f32.mrf.mxu0  ;;  %v3700_v27 = vadd.f32 %v3669_v44, %v18808_v55  ;;  %v3457_v29 = vadd.f32 %v18810_v13, %v18809_v52  ;;  %v3557_v23 = vadd.f32 %v14669_v37, %v3510_v33  ;;  %v3697_v38 = vadd.f32 %v3666_v32, %v18812_v58  ;;  %v18816_v44 = vld [vmem:[#allocation102_spill] sm:$0xff]  ;;  %v18817_v62 = vld [vmem:[#allocation3_spill] sm:$0xff]  ;;  %v8922_v33 = vld [vmem:[%s18159_s6 + $0x330] sm:$0xff] }
 0x599   :  { %v3507_v2 = vadd.f32 %v18811_v3, %v3460_v63  ;;  %v3691_v56 = vadd.f32 %v3660_v61, %v18817_v62  ;;  %v14934_v32 = vld [vmem:[%s18158_s5 + $0xe0] sm:$0xff]  ;;  %v18819_v63 = vld [vmem:[#allocation9_spill] sm:$0xff]  ;;  %v14963_v3 = vld [vmem:[%s18158_s5 + $0xe8] sm:$0xff] }
 0x59a   :  { %v3604_v37 = vadd.f32 %v14706_v21, %v3557_v23  ;;  %v3730_v9 = vmax.f32 %v3700_v27, 0.0  ;;  %v3654_v21 = vadd.f32 %v14703_v26, %v3607_v22  ;;  %v3727_v28 = vmax.f32 %v3697_v38, 0.0  ;;  %v8926_v26 = vld [vmem:[%s18159_s6 + $0x350] sm:$0xff]  ;;  %v18820_v39 = vld [vmem:[#allocation57_spill] sm:$0xff]  ;;  %v8916_v61 = vld [vmem:[%s18159_s6 + $0x300] sm:$0xff] }
 0x59b   :  { %v3624_v49 = vpop.f32.mrf.mxu2  ;;  %8836 = vmatmul.msk.f32.gmra.mxu0 %vm151_vm0, %v14861_v43  ;;  %v3554_v24 = vadd.f32 %v14644_v20, %v3507_v2  ;;  %v8928_v20 = vld [vmem:[%s18159_s6 + $0x360] sm:$0xff]  ;;  %v3721_v60 = vmax.f32 %v3691_v56, 0.0  ;;  %v18822_v55 = vld [vmem:[#allocation33_spill] sm:$0xff]  ;;  %v8918_v22 = vld [vmem:[%s18159_s6 + $0x310] sm:$0xff] }
 0x59c   :  { %v3625_v34 = vadd.f32 %v3624_v49, %v3578_v59  ;;  %v3504_v59 = vadd.f32 %v18813_v4, %v3457_v29  ;;  %v3694_v49 = vadd.f32 %v3663_v19, %v18814_v51  ;;  %4368 = vmatpush.msrb.mxu3 %v8928_v20  ;;  %v3651_v25 = vadd.f32 %v14676_v14, %v3604_v37  ;;  %v18823_v52 = vld [vmem:[#allocation49_spill] sm:$0xff]  ;;  %v8914_v38 = vld [vmem:[%s18159_s6 + $0x2f0] sm:$0xff]  ;;  %v8908_v37 = vld [vmem:[%s18159_s6 + $0x2c0] sm:$0xff] }
 0x59d   :  { %8847 = vmatmul.msk.f32.gmra.mxu1 %vm151_vm0, %v14506_v8  ;;  %v3685_v30 = vadd.f32 %v3654_v21, %v18819_v63  ;;  %v18824_v2 = vld [vmem:[#allocation97_spill] sm:$0xff]  ;;  %v18826_v51 = vld [vmem:[#allocation26_spill] sm:$0xff]  ;;  %v18829_v62 = vld [vmem:[#allocation40_spill] sm:$0xff] }
 0x59e   :  { %v3672_v48 = vadd.f32 %v3671_v18, %v3625_v34  ;;  %v3551_v41 = vadd.f32 %v18815_v11, %v3504_v59  ;;  %v3601_v34 = vadd.f32 %v14689_v0, %v3554_v24  ;;  %v3724_v40 = vmax.f32 %v3694_v49, 0.0  ;;  %4369 = vmatpush.msrb.mxu3 %v8926_v26  ;;  %v18825_v59 = vld [vmem:[#allocation35_spill] sm:$0xff]  ;;  %v8912_v24 = vld [vmem:[%s18159_s6 + $0x2e0] sm:$0xff]  ;;  %v8902_v49 = vld [vmem:[%s18159_s6 + $0x290] sm:$0xff] }
 0x59f   :  { %v3715_v27 = vmax.f32 %v3685_v30, 0.0  ;;  %v8900_v11 = vld [vmem:[%s18159_s6 + $0x280] sm:$0xff]  ;;  %v4225_v56 = vld [vmem:[%s18159_s6 + $0x190] sm:$0xff] }
 0x5a0   :  { %v3703_v57 = vadd.f32 %v3672_v48, %v18807_v36  ;;  %v14895_v17 = vpop.f32.mrf.mxu0  ;;  %v3598_v18 = vadd.f32 %v14672_v1, %v3551_v41  ;;  %v18818_v48 = vld [vmem:[#allocation27_spill] sm:$0xff]  ;;  %v3648_v14 = vadd.f32 %v14657_v31, %v3601_v34  ;;  %4370 = vmatpush.msrb.mxu3 %v8924_v16  ;;  %v18821_v36 = vld [vmem:[#allocation114_spill] sm:$0xff]  ;;  %v18827_v41 = vld [vmem:[#allocation37_spill] sm:$0xff] }
 0x5a1   :  { %v3688_v0 = vadd.f32 %v3657_v47, %v18818_v48  ;;  %v8920_v31 = vld [vmem:[%s18159_s6 + $0x320] sm:$0xff]  ;;  %v8906_v47 = vld [vmem:[%s18159_s6 + $0x2b0] sm:$0xff] }
 0x5a2   :  { %v3733_v10 = vmax.f32 %v3703_v57, 0.0  ;;  %v3645_v15 = vadd.f32 %v18820_v39, %v3598_v18  ;;  %v3682_v57 = vadd.f32 %v3651_v25, %v18821_v36  ;;  %4371 = vmatpush.msrb.mxu3 %v8922_v33  ;;  %v3679_v13 = vadd.f32 %v3648_v14, %v18823_v52  ;;  %v18828_v34 = vld [vmem:[#allocation18_spill] sm:$0xff]  ;;  %v18831_v33 = vld [vmem:[#allocation88_spill] sm:$0xff] }
 0x5a3   :  { %8837 = vmatmul.msk.f32.gmra.mxu0 %vm151_vm0, %v14900_v46  ;;  %v3718_v19 = vmax.f32 %v3688_v0, 0.0  ;;  %v4223_v18 = vld [vmem:[%s18159_s6 + $0x180] sm:$0xff]  ;;  %v4217_v0 = vld [vmem:[%s18159_s6 + $0x150] sm:$0xff] }
 0x5a4   :  { %4074 = vmatpush.msra.mxu2 %v3733_v10  ;;  %4372 = vmatpush.msrb.mxu3 %v8920_v31  ;;  %v3712_v29 = vmax.f32 %v3682_v57, 0.0  ;;  %v3676_v23 = vadd.f32 %v3645_v15, %v18824_v2  ;;  %v3709_v10 = vmax.f32 %v3679_v13, 0.0  ;;  %v18830_v48 = vld [vmem:[#allocation42_spill] sm:$0xff]  ;;  %v8962_v15 = vld [vmem:[%s18159_s6 + $0x470] sm:$0xff] }
 0x5a5   :  { %8848 = vmatmul.msk.f32.gmra.mxu1 %vm151_vm0, %v18816_v44  ;;  %v4215_v16 = vld [vmem:[%s18159_s6 + $0x140] sm:$0xff] }
 0x5a6   :  { %4075 = vmatpush.msra.mxu2 %v3730_v9  ;;  %4373 = vmatpush.msrb.mxu3 %v8918_v22  ;;  %v3706_v4 = vmax.f32 %v3676_v23, 0.0  ;;  %v4211_v14 = vld [vmem:[%s18159_s6 + $0x120] sm:$0xff] }
 0x5a7   :  { %v4207_v30 = vld [vmem:[%s18159_s6 + $0x100] sm:$0xff] }
 0x5a8   :  { %4076 = vmatpush.msra.mxu2 %v3727_v28  ;;  %v14943_v1 = vpop.f32.mrf.mxu0  ;;  %4374 = vmatpush.msrb.mxu3 %v8916_v61  ;;  %v4229_v28 = vld [vmem:[%s18159_s6 + $0x1b0] sm:$0xff]  ;;  %v8960_v36 = vld [vmem:[%s18159_s6 + $0x460] sm:$0xff]  ;;  %v18834_v61 = vld [vmem:[#allocation99_spill] sm:$0xff] }
 0x5a9   :  { %v18833_v52 = vld [vmem:[#allocation98_spill] sm:$0xff] }
 0x5aa   :  { %4077 = vmatpush.msra.mxu2 %v3724_v40  ;;  %4375 = vmatpush.msrb.mxu3 %v8914_v38  ;;  %v4221_v40 = vld [vmem:[%s18159_s6 + $0x170] sm:$0xff]  ;;  %v8952_v13 = vld [vmem:[%s18159_s6 + $0x420] sm:$0xff] }
 0x5ab   :  { %8838 = vmatmul.msk.f32.gmra.mxu0 %vm151_vm0, %v14934_v32  ;;  %v8948_v23 = vld [vmem:[%s18159_s6 + $0x400] sm:$0xff] }
 0x5ac   :  { %4078 = vmatpush.msra.mxu2 %v3721_v60  ;;  %4376 = vmatpush.msrb.mxu3 %v8912_v24  ;;  %v4209_v60 = vld [vmem:[%s18159_s6 + $0x110] sm:$0xff] }
 0x5ad   :  { %8849 = vmatmul.msk.f32.gmra.mxu1 %vm151_vm0, %v18822_v55  ;;  %v8938_v24 = vld [vmem:[%s18159_s6 + $0x3b0] sm:$0xff] }
 0x5ae   :  { %4079 = vmatpush.msra.mxu2 %v3718_v19  ;;  %4377 = vmatpush.msrb.mxu3 %v8910_v5  ;;  %v18832_v19 = vld [vmem:[#allocation93_spill] sm:$0xff]  ;;  %v18835_v5 = vld [vmem:[#allocation63_spill] sm:$0xff] }
 0x5b0   :  { %4080 = vmatpush.msra.mxu2 %v3715_v27  ;;  %v3910_v58 = vpop.f32.mrf.mxu0  ;;  %4378 = vmatpush.msrb.mxu3 %v8908_v37  ;;  %v8956_v27 = vld [vmem:[%s18159_s6 + $0x440] sm:$0xff] }
 0x5b1   :  { %v8936_v37 = vld [vmem:[%s18159_s6 + $0x3a0] sm:$0xff] }
 0x5b2   :  { %4081 = vmatpush.msra.mxu2 %v3712_v29  ;;  %4379 = vmatpush.msrb.mxu3 %v8906_v47  ;;  %v8950_v29 = vld [vmem:[%s18159_s6 + $0x410] sm:$0xff] }
 0x5b3   :  { %8839 = vmatmul.msk.f32.gmra.mxu0 %vm151_vm0, %v14963_v3  ;;  %v8934_v47 = vld [vmem:[%s18159_s6 + $0x390] sm:$0xff] }
 0x5b4   :  { %4082 = vmatpush.msra.mxu2 %v3709_v10  ;;  %v8944_v10 = vld [vmem:[%s18159_s6 + $0x3e0] sm:$0xff] }
 0x5b5   :  { %8850 = vmatmul.msk.f32.gmra.mxu1 %vm151_vm0, %v18825_v59 }
 0x5b6   :  { %4083 = vmatpush.msra.mxu2 %v3706_v4  ;;  %v8940_v4 = vld [vmem:[%s18159_s6 + $0x3c0] sm:$0xff] }
 0x5b7   :  { %8870 = vmatmul.msk.f32.vlgmr.msra.gmra.mxu2 %vm151_vm0, %v14402_v42  ;;  %v8904_v42 = vld [vmem:[%s18159_s6 + $0x2a0] sm:$0xff] }
 0x5b8   :  { %v3913_v9 = vpop.f32.mrf.mxu0  ;;  %4380 = vmatpush.msrb.mxu3 %v8904_v42  ;;  %v8932_v42 = vld [vmem:[%s18159_s6 + $0x380] sm:$0xff] }
 0x5ba   :  { %4381 = vmatpush.msrb.mxu3 %v8902_v49  ;;  %v18836_v49 = vld [vmem:[#allocation69_spill] sm:$0xff] }
 0x5bb   :  { %4524 = vmatmul.f32.vlgmr.msra.gmra.mxu0 %v14856_v35 }
 0x5bc   :  { %4382 = vmatpush.msrb.mxu3 %v8900_v11 }
 0x5bd   :  { %8851 = vmatmul.msk.f32.gmra.mxu1 %vm151_vm0, %v18826_v51  ;;  %4383 = vmatmul.f32.vlgmr.msrb.gmra.mxu3 %v14856_v35  ;;  %v4235_v35 = vld [vmem:[%s18159_s6 + $0x1e0] sm:$0xff] }
 0x5be   :  { %4414 = vmatpush.msra.mxu3 %v8962_v15 }
 0x5bf   :  { %8871 = vmatmul.msk.f32.gmra.mxu2 %vm151_vm0, %v14418_v12  ;;  %v4237_v12 = vld [vmem:[%s18159_s6 + $0x1f0] sm:$0xff] }
 0x5c0   :  { %v3916_v20 = vpop.f32.mrf.mxu0  ;;  %4807 = vmatpush.msrb.mxu0 %v4237_v12  ;;  %4415 = vmatpush.msra.mxu3 %v8960_v36  ;;  %v8935_v36 = vld [vmem:[%s18159_s6 + $0x398] sm:$0xff] }
 0x5c2   :  { %4808 = vmatpush.msrb.mxu0 %v4235_v35  ;;  %v8959_v35 = vld [vmem:[%s18159_s6 + $0x458] sm:$0xff] }
 0x5c3   :  { %4527 = vmatmul.f32.gmra.mxu0 %v14895_v17 }
 0x5c5   :  { %8852 = vmatmul.msk.f32.gmra.mxu1 %vm151_vm0, %v18827_v41  ;;  %4386 = vmatmul.f32.gmra.mxu3 %v14895_v17  ;;  %v4231_v17 = vld [vmem:[%s18159_s6 + $0x1c0] sm:$0xff] }
 0x5c7   :  { %8872 = vmatmul.msk.f32.gmra.mxu2 %vm151_vm0, %v14435_v53  ;;  %v4233_v53 = vld [vmem:[%s18159_s6 + $0x1d0] sm:$0xff] }
 0x5c8   :  { %v3919_v21 = vpop.f32.mrf.mxu0  ;;  %4809 = vmatpush.msrb.mxu0 %v4233_v53  ;;  %v8957_v53 = vld [vmem:[%s18159_s6 + $0x448] sm:$0xff] }
 0x5ca   :  { %4810 = vmatpush.msrb.mxu0 %v4231_v17  ;;  %v8953_v17 = vld [vmem:[%s18159_s6 + $0x428] sm:$0xff] }
 0x5cb   :  { %4530 = vmatmul.f32.gmra.mxu0 %v14943_v1 }
 0x5cc   :  { %4811 = vmatpush.msrb.mxu0 %v4229_v28 }
 0x5cd   :  { %8853 = vmatmul.msk.f32.gmra.mxu1 %vm151_vm0, %v18828_v34  ;;  %4389 = vmatmul.f32.gmra.mxu3 %v14943_v1  ;;  %v4213_v1 = vld [vmem:[%s18159_s6 + $0x130] sm:$0xff] }
 0x5cf   :  { %8873 = vmatmul.msk.f32.gmra.mxu2 %vm151_vm0, %v14452_v45  ;;  %v4227_v45 = vld [vmem:[%s18159_s6 + $0x1a0] sm:$0xff] }
 0x5d0   :  { %4812 = vmatpush.msrb.mxu0 %v4227_v45  ;;  %v3922_v25 = vpop.f32.mrf.mxu0 }
 0x5d2   :  { %4813 = vmatpush.msrb.mxu0 %v4225_v56  ;;  %v8951_v56 = vld [vmem:[%s18159_s6 + $0x418] sm:$0xff] }
 0x5d3   :  { %4533 = vmatmul.f32.gmra.mxu0 %v3910_v58 }
 0x5d4   :  { %4814 = vmatpush.msrb.mxu0 %v4223_v18  ;;  %v18838_v18 = vld [vmem:[#allocation22_spill] sm:$0xff] }
 0x5d5   :  { %8854 = vmatmul.msk.f32.gmra.mxu1 %vm151_vm0, %v18829_v62  ;;  %4392 = vmatmul.f32.gmra.mxu3 %v3910_v58  ;;  %v8942_v58 = vld [vmem:[%s18159_s6 + $0x3d0] sm:$0xff] }
 0x5d6   :  { %4815 = vmatpush.msrb.mxu0 %v4221_v40  ;;  %v8945_v40 = vld [vmem:[%s18159_s6 + $0x3e8] sm:$0xff] }
 0x5d7   :  { %8874 = vmatmul.msk.f32.gmra.mxu2 %vm151_vm0, %v14464_v50  ;;  %v4219_v50 = vld [vmem:[%s18159_s6 + $0x160] sm:$0xff] }
 0x5d8   :  { %4816 = vmatpush.msrb.mxu0 %v4219_v50 }
 0x5da   :  { %4817 = vmatpush.msrb.mxu0 %v4217_v0  ;;  %v8943_v0 = vld [vmem:[%s18159_s6 + $0x3d8] sm:$0xff] }
 0x5db   :  { %4536 = vmatmul.f32.gmra.mxu0 %v3913_v9 }
 0x5dc   :  { %4818 = vmatpush.msrb.mxu0 %v4215_v16 }
 0x5dd   :  { %8855 = vmatmul.msk.f32.gmra.mxu1 %vm151_vm0, %v18830_v48  ;;  %4395 = vmatmul.f32.gmra.mxu3 %v3913_v9 }
 0x5de   :  { %4819 = vmatpush.msrb.mxu0 %v4213_v1  ;;  %v4254_v1 = vld [vmem:[%s18159_s6 + $0x278] sm:$0xff] }
 0x5df   :  { %8875 = vmatmul.msk.f32.gmra.mxu2 %vm151_vm0, %v14478_v54  ;;  %v3925_v54 = vpop.f32.mrf.mxu0 }
 0x5e0   :  { %4820 = vmatpush.msrb.mxu0 %v4211_v14  ;;  %v8939_v14 = vld [vmem:[%s18159_s6 + $0x3b8] sm:$0xff] }
 0x5e2   :  { %v15061_v26 = vpop.f32.mrf.mxu1  ;;  %4821 = vmatpush.msrb.mxu0 %v4209_v60  ;;  %v4252_v60 = vld [vmem:[%s18159_s6 + $0x268] sm:$0xff] }
 0x5e3   :  { %4539 = vmatmul.f32.gmra.mxu0 %v3916_v20 }
 0x5e4   :  { %4822 = vmatpush.msrb.mxu0 %v4207_v30  ;;  %v8937_v30 = vld [vmem:[%s18159_s6 + $0x3a8] sm:$0xff] }
 0x5e5   :  { %8856 = vmatmul.msk.f32.gmra.mxu1 %vm151_vm0, %v14652_v6  ;;  %4398 = vmatmul.f32.gmra.mxu3 %v3916_v20  ;;  %v8961_v20 = vld [vmem:[%s18159_s6 + $0x468] sm:$0xff] }
 0x5e6   :  { %5003 = vmatpush.msra.mxu0 %v4254_v1  ;;  %v8966_v1 = vld [vmem:[%s18159_s6 + $0x490] sm:$0xff] }
 0x5e7   :  { %8876 = vmatmul.msk.f32.gmra.mxu2 %vm151_vm0, %v14490_v7  ;;  %v3928_v39 = vpop.f32.mrf.mxu0 }
 0x5e8   :  { %5004 = vmatpush.msra.mxu0 %v4252_v60 }
 0x5ea   :  { %v15079_v63 = vpop.f32.mrf.mxu1 }
 0x5eb   :  { %4542 = vmatmul.f32.gmra.mxu0 %v3919_v21 }
 0x5ed   :  { %8857 = vmatmul.msk.f32.gmra.mxu1 %vm151_vm0, %v18831_v33  ;;  %4401 = vmatmul.f32.gmra.mxu3 %v3919_v21  ;;  %v18837_v21 = vld [vmem:[#allocation39_spill] sm:$0xff] }
 0x5ef   :  { %8877 = vmatmul.msk.f32.gmra.mxu2 %vm151_vm0, %v14506_v8  ;;  %v8958_v8 = vld [vmem:[%s18159_s6 + $0x450] sm:$0xff]  ;;  %v15103_v57 = vpop.f32.mrf.mxu0 }
 0x5f0   :  { %4416 = vmatpush.msra.mxu3 %v8958_v8  ;;  %v8933_v8 = vld [vmem:[%s18159_s6 + $0x388] sm:$0xff] }
 0x5f2   :  { %v15088_v7 = vpop.f32.mrf.mxu1  ;;  %4417 = vmatpush.msra.mxu3 %v8956_v27  ;;  %v4246_v27 = vld [vmem:[%s18159_s6 + $0x238] sm:$0xff] }
 0x5f3   :  { %4545 = vmatmul.f32.gmra.mxu0 %v3922_v25 }
 0x5f5   :  { %8858 = vmatmul.msk.f32.gmra.mxu1 %vm151_vm0, %v18832_v19  ;;  %4404 = vmatmul.f32.gmra.mxu3 %v3922_v25  ;;  %v8947_v25 = vld [vmem:[%s18159_s6 + $0x3f8] sm:$0xff] }
 0x5f7   :  { %8878 = vmatmul.msk.f32.gmra.mxu2 %vm151_vm0, %v18816_v44  ;;  %v8954_v44 = vld [vmem:[%s18159_s6 + $0x430] sm:$0xff]  ;;  %v15128_v22 = vpop.f32.mrf.mxu0 }
 0x5f8   :  { %4418 = vmatpush.msra.mxu3 %v8954_v44 }
 0x5fa   :  { %v15105_v31 = vpop.f32.mrf.mxu1  ;;  %4419 = vmatpush.msra.mxu3 %v8952_v13  ;;  %v4244_v13 = vld [vmem:[%s18159_s6 + $0x228] sm:$0xff] }
 0x5fb   :  { %4548 = vmatmul.f32.gmra.mxu0 %v3925_v54 }
 0x5fc   :  { %4420 = vmatpush.msra.mxu3 %v8950_v29  ;;  %v4242_v29 = vld [vmem:[%s18159_s6 + $0x218] sm:$0xff] }
 0x5fd   :  { %8859 = vmatmul.msk.f32.gmra.mxu1 %vm151_vm0, %v18833_v52  ;;  %4407 = vmatmul.f32.gmra.mxu3 %v3925_v54  ;;  %v18839_v54 = vld [vmem:[#allocation55_spill] sm:$0xff] }
 0x5fe   :  { %4421 = vmatpush.msra.mxu3 %v8948_v23 }
 0x5ff   :  { %8879 = vmatmul.msk.f32.gmra.mxu2 %vm151_vm0, %v18822_v55  ;;  %v8946_v55 = vld [vmem:[%s18159_s6 + $0x3f0] sm:$0xff] }
 0x600   :  { %4422 = vmatpush.msra.mxu3 %v8946_v55 }
 0x602   :  { %v15123_v2 = vpop.f32.mrf.mxu1  ;;  %4423 = vmatpush.msra.mxu3 %v8944_v10  ;;  %v4240_v10 = vld [vmem:[%s18159_s6 + $0x208] sm:$0xff] }
 0x603   :  { %4551 = vmatmul.f32.gmra.mxu0 %v3928_v39 }
 0x604   :  { %4424 = vmatpush.msra.mxu3 %v8942_v58 }
 0x605   :  { %8860 = vmatmul.msk.f32.gmra.mxu1 %vm151_vm0, %v18834_v61  ;;  %4410 = vmatmul.f32.gmra.mxu3 %v3928_v39  ;;  %v4250_v39 = vld [vmem:[%s18159_s6 + $0x258] sm:$0xff] }
 0x606   :  { %4425 = vmatpush.msra.mxu3 %v8940_v4  ;;  %5005 = vmatpush.msra.mxu0 %v4250_v39  ;;  %v9029_v39 = vld [vmem:[%s18159_s6 + $0x5e8] sm:$0xff] }
 0x607   :  { %8880 = vmatmul.msk.f32.gmra.mxu2 %vm151_vm0, %v18825_v59  ;;  %v15152_v59 = vpop.f32.mrf.mxu0 }
 0x608   :  { %4426 = vmatpush.msra.mxu3 %v8938_v24 }
 0x60a   :  { %v15143_v38 = vpop.f32.mrf.mxu1  ;;  %4427 = vmatpush.msra.mxu3 %v8936_v37 }
 0x60b   :  { %4823 = vmatmul.f32.vlgmr.msrb.gmra.mxu0 %v15061_v26 }
 0x60c   :  { %4428 = vmatpush.msra.mxu3 %v8934_v47 }
 0x60d   :  { %8861 = vmatmul.msk.f32.gmra.mxu1 %vm151_vm0, %v18835_v5 }
 0x60e   :  { %4429 = vmatpush.msra.mxu3 %v8932_v42 }
 0x60f   :  { %8881 = vmatmul.msk.f32.gmra.mxu2 %vm151_vm0, %v18826_v51  ;;  %v8963_v51 = vld [vmem:[%s18159_s6 + $0x478] sm:$0xff]  ;;  %v15175_v11 = vpop.f32.mrf.mxu0 }
 0x610   :  { %4555 = vmatpush.msra.mxu1 %v8963_v51 }
 0x612   :  { %v15164_v9 = vpop.f32.mrf.mxu1  ;;  %4556 = vmatpush.msra.mxu1 %v8961_v20 }
 0x613   :  { %4826 = vmatmul.f32.gmra.mxu0 %v15079_v63 }
 0x614   :  { %4557 = vmatpush.msra.mxu1 %v8959_v35 }
 0x615   :  { %8862 = vmatmul.msk.f32.gmra.mxu1 %vm151_vm0, %v18836_v49 }
 0x616   :  { %4558 = vmatpush.msra.mxu1 %v8957_v53  ;;  %v8978_v53 = vld [vmem:[%s18159_s6 + $0x4f0] sm:$0xff] }
 0x617   :  { %8882 = vmatmul.msk.f32.gmra.mxu2 %vm151_vm0, %v18827_v41  ;;  %v8955_v41 = vld [vmem:[%s18159_s6 + $0x438] sm:$0xff]  ;;  %v15201_v28 = vpop.f32.mrf.mxu0  ;;  %4469 = vmatpush.msrb.mxu3 %v8978_v53 }
 0x618   :  { %4559 = vmatpush.msra.mxu1 %v8955_v41 }
 0x61a   :  { %v15182_v12 = vpop.f32.mrf.mxu1  ;;  %4560 = vmatpush.msra.mxu1 %v8953_v17  ;;  %v8974_v17 = vld [vmem:[%s18159_s6 + $0x4d0] sm:$0xff] }
 0x61b   :  { %4829 = vmatmul.f32.gmra.mxu0 %v15088_v7 }
 0x61c   :  { %4561 = vmatpush.msra.mxu1 %v8951_v56 }
 0x61d   :  { %8863 = vmatmul.msk.f32.gmra.mxu1 %vm151_vm0, %v18837_v21 }
 0x61f   :  { %8883 = vmatmul.msk.f32.gmra.mxu2 %vm151_vm0, %v18828_v34  ;;  %v8949_v34 = vld [vmem:[%s18159_s6 + $0x408] sm:$0xff]  ;;  %v15227_v16 = vpop.f32.mrf.mxu0 }
 0x620   :  { %4562 = vmatpush.msra.mxu1 %v8949_v34 }
 0x622   :  { %v15203_v45 = vpop.f32.mrf.mxu1  ;;  %4563 = vmatpush.msra.mxu1 %v8947_v25  ;;  %v8972_v25 = vld [vmem:[%s18159_s6 + $0x4c0] sm:$0xff] }
 0x623   :  { %4832 = vmatmul.f32.gmra.mxu0 %v15105_v31 }
 0x624   :  { %4564 = vmatpush.msra.mxu1 %v8945_v40 }
 0x625   :  { %8864 = vmatmul.msk.f32.gmra.mxu1 %vm151_vm0, %v18838_v18 }
 0x626   :  { %4565 = vmatpush.msra.mxu1 %v8943_v0  ;;  %v8968_v0 = vld [vmem:[%s18159_s6 + $0x4a0] sm:$0xff] }
 0x627   :  { %8884 = vmatmul.msk.f32.gmra.mxu2 %vm151_vm0, %v18829_v62  ;;  %v8941_v62 = vld [vmem:[%s18159_s6 + $0x3c8] sm:$0xff]  ;;  %v15265_v44 = vpop.f32.mrf.mxu0 }
 0x628   :  { %4566 = vmatpush.msra.mxu1 %v8941_v62 }
 0x62a   :  { %v15222_v50 = vpop.f32.mrf.mxu1  ;;  %4567 = vmatpush.msra.mxu1 %v8939_v14 }
 0x62b   :  { %4835 = vmatmul.f32.gmra.mxu0 %v15123_v2 }
 0x62c   :  { %4568 = vmatpush.msra.mxu1 %v8937_v30  ;;  %v8964_v30 = vld [vmem:[%s18159_s6 + $0x480] sm:$0xff] }
 0x62d   :  { %8865 = vmatmul.msk.f32.gmra.mxu1 %vm151_vm0, %v18839_v54 }
 0x62e   :  { %4569 = vmatpush.msra.mxu1 %v8935_v36  ;;  %v9027_v36 = vld [vmem:[%s18159_s6 + $0x5d8] sm:$0xff] }
 0x62f   :  { %8885 = vmatmul.msk.f32.gmra.mxu2 %vm151_vm0, %v18830_v48  ;;  %v4248_v48 = vld [vmem:[%s18159_s6 + $0x248] sm:$0xff] }
 0x630   :  { %5006 = vmatpush.msra.mxu0 %v4248_v48  ;;  %4570 = vmatpush.msra.mxu1 %v8933_v8 }
 0x632   :  { %v4008_v15 = vpop.f32.mrf.mxu1  ;;  %5007 = vmatpush.msra.mxu0 %v4246_v27 }
 0x633   :  { %4430 = vmatmul.f32.vlgmr.msra.gmra.mxu3 %v4008_v15  ;;  %4838 = vmatmul.f32.gmra.mxu0 %v15143_v38 }
 0x634   :  { %5008 = vmatpush.msra.mxu0 %v4244_v13  ;;  %v9025_v13 = vld [vmem:[%s18159_s6 + $0x5c8] sm:$0xff] }
 0x635   :  { %8866 = vmatmul.msk.f32.gmra.mxu1 %vm151_vm0, %v14861_v43 }
 0x636   :  { %5009 = vmatpush.msra.mxu0 %v4242_v29  ;;  %v9023_v29 = vld [vmem:[%s18159_s6 + $0x5b8] sm:$0xff] }
 0x637   :  { %8886 = vmatmul.msk.f32.gmra.mxu2 %vm151_vm0, %v14652_v6  ;;  %v15285_v6 = vpop.f32.mrf.mxu0 }
 0x638   :  { %5010 = vmatpush.msra.mxu0 %v4240_v10  ;;  %v9021_v10 = vld [vmem:[%s18159_s6 + $0x5a8] sm:$0xff] }
 0x63a   :  { %v4011_v23 = vpop.f32.mrf.mxu1  ;;  %v15277_v55 = vpop.f32.mrf.mxu2 }
 0x63b   :  { %4433 = vmatmul.f32.gmra.mxu3 %v4011_v23  ;;  %4841 = vmatmul.f32.gmra.mxu0 %v15164_v9 }
 0x63d   :  { %8867 = vmatmul.msk.f32.gmra.mxu1 %vm151_vm0, %v14900_v46 }
 0x63f   :  { %8887 = vmatmul.msk.f32.gmra.mxu2 %vm151_vm0, %v18831_v33  ;;  %v15296_v24 = vpop.f32.mrf.mxu0 }
 0x640   :  { %v15305_v33 = vpop.f32.mrf.mxu3 }
 0x642   :  { %v4014_v58 = vpop.f32.mrf.mxu1  ;;  %v15289_v4 = vpop.f32.mrf.mxu2 }
 0x643   :  { %4436 = vmatmul.f32.gmra.mxu3 %v4014_v58  ;;  %4844 = vmatmul.f32.gmra.mxu0 %v15182_v12 }
 0x645   :  { %8868 = vmatmul.msk.f32.gmra.mxu1 %vm151_vm0, %v14934_v32 }
 0x647   :  { %8888 = vmatmul.msk.f32.gmra.mxu2 %vm151_vm0, %v18832_v19  ;;  %v15309_v19 = vpop.f32.mrf.mxu0 }
 0x64a   :  { %v4017_v37 = vpop.f32.mrf.mxu1  ;;  %v15298_v47 = vpop.f32.mrf.mxu2 }
 0x64b   :  { %4439 = vmatmul.f32.gmra.mxu3 %v4017_v37  ;;  %4847 = vmatmul.f32.gmra.mxu0 %v15203_v45 }
 0x64d   :  { %8869 = vmatmul.msk.f32.gmra.mxu1 %vm151_vm0, %v14963_v3 }
 0x64f   :  { %8889 = vmatmul.msk.f32.gmra.mxu2 %vm151_vm0, %v18833_v52  ;;  %v15321_v52 = vpop.f32.mrf.mxu3  ;;  %v15326_v41 = vpop.f32.mrf.mxu0 }
 0x652   :  { %v4020_v42 = vpop.f32.mrf.mxu1  ;;  %v15307_v51 = vpop.f32.mrf.mxu2 }
 0x653   :  { %4442 = vmatmul.f32.gmra.mxu3 %v4020_v42  ;;  %4850 = vmatmul.f32.gmra.mxu0 %v15222_v50 }
 0x655   :  { %4571 = vmatmul.f32.vlgmr.msra.gmra.mxu1 %v4008_v15 }
 0x657   :  { %8890 = vmatmul.msk.f32.gmra.mxu2 %vm151_vm0, %v18834_v61  ;;  %v8976_v61 = vld [vmem:[%s18159_s6 + $0x4e0] sm:$0xff]  ;;  %v15349_v40 = vpop.f32.mrf.mxu3  ;;  %v15354_v62 = vpop.f32.mrf.mxu0 }
 0x658   :  { %4470 = vmatpush.msrb.mxu3 %v8976_v61 }
 0x65a   :  { %v15314_v20 = vpop.f32.mrf.mxu1  ;;  %v15316_v35 = vpop.f32.mrf.mxu2  ;;  %4471 = vmatpush.msrb.mxu3 %v8974_v17  ;;  %v4249_v17 = vld [vmem:[%s18159_s6 + $0x250] sm:$0xff] }
 0x65b   :  { %4445 = vmatmul.f32.gmra.mxu3 %v15314_v20  ;;  %9090 = vmatmul.msk.f32.vlgmr.msra.gmra.mxu0 %vm4336_vm1, %v15277_v55 }
 0x65c   :  { %4472 = vmatpush.msrb.mxu3 %v8972_v25  ;;  %v9017_v25 = vld [vmem:[%s18159_s6 + $0x588] sm:$0xff] }
 0x65d   :  { %4574 = vmatmul.f32.gmra.mxu1 %v4011_v23  ;;  %v4253_v23 = vld [vmem:[%s18159_s6 + $0x270] sm:$0xff] }
 0x65e   :  { %4862 = vmatpush.msrb.mxu1 %v4253_v23 }
 0x65f   :  { %8891 = vmatmul.msk.f32.gmra.mxu2 %vm151_vm0, %v18835_v5  ;;  %v8970_v5 = vld [vmem:[%s18159_s6 + $0x4b0] sm:$0xff]  ;;  %v15379_v15 = vpop.f32.mrf.mxu3  ;;  %v15384_v48 = vpop.f32.mrf.mxu0 }
 0x660   :  { %4473 = vmatpush.msrb.mxu3 %v8970_v5 }
 0x662   :  { %v15336_v56 = vpop.f32.mrf.mxu1  ;;  %v15338_v34 = vpop.f32.mrf.mxu2  ;;  %4474 = vmatpush.msrb.mxu3 %v8968_v0  ;;  %v8975_v0 = vld [vmem:[%s18159_s6 + $0x4d8] sm:$0xff] }
 0x663   :  { %4448 = vmatmul.f32.gmra.mxu3 %v15336_v56  ;;  %9091 = vmatmul.msk.f32.gmra.mxu0 %vm4336_vm1, %v15289_v4 }
 0x664   :  { %4475 = vmatpush.msrb.mxu3 %v8966_v1  ;;  %v4247_v1 = vld [vmem:[%s18159_s6 + $0x240] sm:$0xff] }
 0x665   :  { %4577 = vmatmul.f32.gmra.mxu1 %v4014_v58  ;;  %v4251_v58 = vld [vmem:[%s18159_s6 + $0x260] sm:$0xff] }
 0x666   :  { %4476 = vmatpush.msrb.mxu3 %v8964_v30  ;;  %4863 = vmatpush.msrb.mxu1 %v4251_v58  ;;  %v9015_v30 = vld [vmem:[%s18159_s6 + $0x578] sm:$0xff]  ;;  %v4241_v58 = vld [vmem:[%s18159_s6 + $0x210] sm:$0xff] }
 0x667   :  { %8892 = vmatmul.msk.f32.gmra.mxu2 %vm151_vm0, %v18836_v49  ;;  %v9031_v49 = vld [vmem:[%s18159_s6 + $0x5f8] sm:$0xff]  ;;  %v15431_v5 = vpop.f32.mrf.mxu0 }
 0x668   :  { %5273 = vmatpush.msrb.mxu0 %v9031_v49  ;;  %18840 = vst [vmem:[#allocation82_spill] sm:$0xff] %v15431_v5  ;;  %4864 = vmatpush.msrb.mxu1 %v4249_v17  ;;  %v8973_v49 = vld [vmem:[%s18159_s6 + $0x4c8] sm:$0xff]  ;;  %v8967_v17 = vld [vmem:[%s18159_s6 + $0x498] sm:$0xff] }
 0x669   :  { %v4238_v5 = vld [vmem:[%s18159_s6 + $0x1f8] sm:$0xff] }
 0x66a   :  { %v15361_v14 = vpop.f32.mrf.mxu1  ;;  %v15363_v60 = vpop.f32.mrf.mxu2  ;;  %5274 = vmatpush.msrb.mxu0 %v9029_v39  ;;  %v4245_v39 = vld [vmem:[%s18159_s6 + $0x230] sm:$0xff]  ;;  %4865 = vmatpush.msrb.mxu1 %v4247_v1  ;;  %v9005_v1 = vld [vmem:[%s18159_s6 + $0x528] sm:$0xff] }
 0x66b   :  { %4451 = vmatmul.f32.gmra.mxu3 %v15361_v14  ;;  %9092 = vmatmul.msk.f32.gmra.mxu0 %vm4336_vm1, %v15298_v47 }
 0x66c   :  { %5275 = vmatpush.msrb.mxu0 %v9027_v36  ;;  %v9013_v36 = vld [vmem:[%s18159_s6 + $0x568] sm:$0xff]  ;;  %4866 = vmatpush.msrb.mxu1 %v4245_v39 }
 0x66d   :  { %4580 = vmatmul.f32.gmra.mxu1 %v4017_v37  ;;  %v9019_v37 = vld [vmem:[%s18159_s6 + $0x598] sm:$0xff] }
 0x66e   :  { %5276 = vmatpush.msrb.mxu0 %v9025_v13  ;;  %v4243_v13 = vld [vmem:[%s18159_s6 + $0x220] sm:$0xff] }
 0x66f   :  { %8893 = vmatmul.msk.f32.gmra.mxu2 %vm151_vm0, %v18837_v21  ;;  %v8979_v21 = vld [vmem:[%s18159_s6 + $0x4f8] sm:$0xff]  ;;  %4867 = vmatpush.msrb.mxu1 %v4243_v13 }
 0x670   :  { %4610 = vmatpush.msrb.mxu2 %v8979_v21  ;;  %5277 = vmatpush.msrb.mxu0 %v9023_v29  ;;  %v9011_v21 = vld [vmem:[%s18159_s6 + $0x558] sm:$0xff] }
 0x671   :  { %4868 = vmatpush.msrb.mxu1 %v4241_v58 }
 0x672   :  { %v15386_v8 = vpop.f32.mrf.mxu1  ;;  %v15388_v27 = vpop.f32.mrf.mxu2  ;;  %5278 = vmatpush.msrb.mxu0 %v9021_v10 }
 0x673   :  { %4454 = vmatmul.f32.gmra.mxu3 %v15386_v8  ;;  %9093 = vmatmul.msk.f32.gmra.mxu0 %vm4336_vm1, %v15307_v51 }
 0x674   :  { %5279 = vmatpush.msrb.mxu0 %v9019_v37  ;;  %v9009_v37 = vld [vmem:[%s18159_s6 + $0x548] sm:$0xff] }
 0x675   :  { %4583 = vmatmul.f32.gmra.mxu1 %v4020_v42  ;;  %v15416_v42 = vpop.f32.mrf.mxu3 }
 0x676   :  { %5280 = vmatpush.msrb.mxu0 %v9017_v25  ;;  %v4239_v25 = vld [vmem:[%s18159_s6 + $0x200] sm:$0xff] }
 0x677   :  { %8894 = vmatmul.msk.f32.gmra.mxu2 %vm151_vm0, %v18838_v18  ;;  %v8977_v18 = vld [vmem:[%s18159_s6 + $0x4e8] sm:$0xff]  ;;  %4869 = vmatpush.msrb.mxu1 %v4239_v25 }
 0x678   :  { %4611 = vmatpush.msrb.mxu2 %v8977_v18  ;;  %5281 = vmatpush.msrb.mxu0 %v9015_v30  ;;  %v15483_v18 = vpop.f32.mrf.mxu0 }
 0x679   :  { %18841 = vst [vmem:[#allocation41_spill] sm:$0xff] %v15483_v18 }
 0x67a   :  { %v15418_v53 = vpop.f32.mrf.mxu1  ;;  %v15420_v61 = vpop.f32.mrf.mxu2  ;;  %4612 = vmatpush.msrb.mxu2 %v8975_v0  ;;  %5282 = vmatpush.msrb.mxu0 %v9013_v36  ;;  %v9007_v0 = vld [vmem:[%s18159_s6 + $0x538] sm:$0xff]  ;;  %v9001_v36 = vld [vmem:[%s18159_s6 + $0x508] sm:$0xff] }
 0x67b   :  { %4457 = vmatmul.f32.gmra.mxu3 %v15418_v53  ;;  %9094 = vmatmul.msk.f32.gmra.mxu0 %vm4336_vm1, %v15316_v35 }
 0x67c   :  { %4613 = vmatpush.msrb.mxu2 %v8973_v49  ;;  %5283 = vmatpush.msrb.mxu0 %v9011_v21 }
 0x67d   :  { %4586 = vmatmul.f32.gmra.mxu1 %v15314_v20  ;;  %v8971_v20 = vld [vmem:[%s18159_s6 + $0x4b8] sm:$0xff]  ;;  %v15475_v10 = vpop.f32.mrf.mxu3 }
 0x67e   :  { %4614 = vmatpush.msrb.mxu2 %v8971_v20  ;;  %5284 = vmatpush.msrb.mxu0 %v9009_v37  ;;  %v4205_v37 = vld [vmem:[%s18159_s6 + $0xf0] sm:$0xff] }
 0x67f   :  { %8895 = vmatmul.msk.f32.gmra.mxu2 %vm151_vm0, %v18839_v54  ;;  %v8969_v54 = vld [vmem:[%s18159_s6 + $0x4a8] sm:$0xff]  ;;  %4760 = vmatpush.msra.mxu3 %v4205_v37 }
 0x680   :  { %4615 = vmatpush.msrb.mxu2 %v8969_v54  ;;  %5285 = vmatpush.msrb.mxu0 %v9007_v0  ;;  %v15517_v20 = vpop.f32.mrf.mxu0 }
 0x681   :  { %18843 = vst [vmem:[#allocation113_spill] sm:$0xff] %v15517_v20 }
 0x682   :  { %v15466_v29 = vpop.f32.mrf.mxu1  ;;  %v15468_v23 = vpop.f32.mrf.mxu2  ;;  %4616 = vmatpush.msrb.mxu2 %v8967_v17  ;;  %5286 = vmatpush.msrb.mxu0 %v9005_v1  ;;  %v4195_v1 = vld [vmem:[%s18159_s6 + $0xa0] sm:$0xff] }
 0x683   :  { %9095 = vmatmul.msk.f32.gmra.mxu0 %vm4336_vm1, %v15338_v34 }
 0x685   :  { %4589 = vmatmul.f32.gmra.mxu1 %v15336_v56  ;;  %v8965_v56 = vld [vmem:[%s18159_s6 + $0x488] sm:$0xff]  ;;  %v15512_v39 = vpop.f32.mrf.mxu3 }
 0x686   :  { %4617 = vmatpush.msrb.mxu2 %v8965_v56  ;;  %18842 = vst [vmem:[#allocation86_spill] sm:$0xff] %v15512_v39  ;;  %v4192_v39 = vld [vmem:[%s18159_s6 + $0x88] sm:$0xff] }
 0x687   :  { %8896 = vmatmul.msk.f32.gmra.mxu2 %vm151_vm0, %v14861_v43  ;;  %v9003_v43 = vld [vmem:[%s18159_s6 + $0x518] sm:$0xff] }
 0x688   :  { %5287 = vmatpush.msrb.mxu0 %v9003_v43  ;;  %v15531_v54 = vpop.f32.mrf.mxu0  ;;  %v4193_v43 = vld [vmem:[%s18159_s6 + $0x90] sm:$0xff] }
 0x689   :  { %18845 = vst [vmem:[#allocation44_spill] sm:$0xff] %v15531_v54 }
 0x68a   :  { %v15503_v30 = vpop.f32.mrf.mxu1  ;;  %v4115_v49 = vpop.f32.mrf.mxu2  ;;  %5288 = vmatpush.msrb.mxu0 %v9001_v36 }
 0x68b   :  { %8980 = vmatmul.msk.f32.vlgmr.msrb.gmra.mxu3 %vm4336_vm1, %v4115_v49  ;;  %9096 = vmatmul.msk.f32.gmra.mxu0 %vm4336_vm1, %v15363_v60 }
 0x68d   :  { %4592 = vmatmul.f32.gmra.mxu1 %v15361_v14  ;;  %v15529_v14 = vpop.f32.mrf.mxu3 }
 0x68e   :  { %18844 = vst [vmem:[#allocation56_spill] sm:$0xff] %v15529_v14 }
 0x68f   :  { %8897 = vmatmul.msk.f32.gmra.mxu2 %vm151_vm0, %v14900_v46 }
 0x690   :  { %v15559_v56 = vpop.f32.mrf.mxu0 }
 0x691   :  { %18847 = vst [vmem:[#allocation28_spill] sm:$0xff] %v15559_v56 }
 0x692   :  { %v15521_v13 = vpop.f32.mrf.mxu1  ;;  %v4118_v21 = vpop.f32.mrf.mxu2 }
 0x693   :  { %8981 = vmatmul.msk.f32.gmra.mxu3 %vm4336_vm1, %v4118_v21  ;;  %9097 = vmatmul.msk.f32.gmra.mxu0 %vm4336_vm1, %v15388_v27 }
 0x695   :  { %4595 = vmatmul.f32.gmra.mxu1 %v15386_v8  ;;  %v4201_v8 = vld [vmem:[%s18159_s6 + $0xd0] sm:$0xff]  ;;  %v15550_v17 = vpop.f32.mrf.mxu3 }
 0x696   :  { %18846 = vst [vmem:[#allocation30_spill] sm:$0xff] %v15550_v17  ;;  %v4176_v17 = vld [vmem:[%s18159_s6 + $0x8] sm:$0xff] }
 0x697   :  { %8898 = vmatmul.msk.f32.gmra.mxu2 %vm151_vm0, %v14934_v32  ;;  %v4203_v32 = vld [vmem:[%s18159_s6 + $0xe0] sm:$0xff] }
 0x698   :  { %4761 = vmatpush.msra.mxu3 %v4203_v32 }
 0x69a   :  { %v15533_v58 = vpop.f32.mrf.mxu1  ;;  %v4121_v46 = vpop.f32.mrf.mxu2  ;;  %4762 = vmatpush.msra.mxu3 %v4201_v8 }
 0x69b   :  { %8982 = vmatmul.msk.f32.gmra.mxu3 %vm4336_vm1, %v4121_v46  ;;  %9098 = vmatmul.msk.f32.gmra.mxu0 %vm4336_vm1, %v15420_v61  ;;  %v15592_v8 = vpop.f32.mrf.mxu0 }
 0x69c   :  { %18849 = vst [vmem:[#allocation2_spill] sm:$0xff] %v15592_v8 }
 0x69d   :  { %4598 = vmatmul.f32.gmra.mxu1 %v15418_v53  ;;  %v4199_v53 = vld [vmem:[%s18159_s6 + $0xc0] sm:$0xff]  ;;  %v15590_v32 = vpop.f32.mrf.mxu3 }
 0x69e   :  { %4763 = vmatpush.msra.mxu3 %v4199_v53  ;;  %18848 = vst [vmem:[#allocation61_spill] sm:$0xff] %v15590_v32  ;;  %v4187_v53 = vld [vmem:[%s18159_s6 + $0x60] sm:$0xff]  ;;  %v4184_v32 = vld [vmem:[%s18159_s6 + $0x48] sm:$0xff] }
 0x69f   :  { %8899 = vmatmul.msk.f32.gmra.mxu2 %vm151_vm0, %v14963_v3  ;;  %v4197_v3 = vld [vmem:[%s18159_s6 + $0xb0] sm:$0xff] }
 0x6a0   :  { %4764 = vmatpush.msra.mxu3 %v4197_v3  ;;  %v4185_v3 = vld [vmem:[%s18159_s6 + $0x50] sm:$0xff] }
 0x6a2   :  { %v15552_v25 = vpop.f32.mrf.mxu1  ;;  %v15554_v0 = vpop.f32.mrf.mxu2  ;;  %4765 = vmatpush.msra.mxu3 %v4195_v1 }
 0x6a3   :  { %8983 = vmatmul.msk.f32.gmra.mxu3 %vm4336_vm1, %v15554_v0  ;;  %9099 = vmatmul.msk.f32.gmra.mxu0 %vm4336_vm1, %v15468_v23 }
 0x6a4   :  { %4766 = vmatpush.msra.mxu3 %v4193_v43 }
 0x6a5   :  { %9080 = vmatmul.msk.f32.vlgmr.msrb.gmra.mxu1 %vm4336_vm1, %v15277_v55  ;;  %v4191_v55 = vld [vmem:[%s18159_s6 + $0x80] sm:$0xff] }
 0x6a6   :  { %4767 = vmatpush.msra.mxu3 %v4191_v55 }
 0x6a7   :  { %8990 = vmatmul.msk.f32.vlgmr.msrb.gmra.mxu2 %vm4336_vm1, %v4115_v49  ;;  %v4189_v49 = vld [vmem:[%s18159_s6 + $0x70] sm:$0xff] }
 0x6a8   :  { %4768 = vmatpush.msra.mxu3 %v4189_v49  ;;  %v4179_v49 = vld [vmem:[%s18159_s6 + $0x20] sm:$0xff] }
 0x6aa   :  { %v15577_v36 = vpop.f32.mrf.mxu1  ;;  %v15579_v37 = vpop.f32.mrf.mxu2  ;;  %4769 = vmatpush.msra.mxu3 %v4187_v53  ;;  %v9030_v53 = vld [vmem:[%s18159_s6 + $0x5f0] sm:$0xff] }
 0x6ab   :  { %8984 = vmatmul.msk.f32.gmra.mxu3 %vm4336_vm1, %v15579_v37  ;;  %5289 = vmatmul.f32.vlgmr.msrb.gmra.mxu0 %v15103_v57 }
 0x6ac   :  { %4770 = vmatpush.msra.mxu3 %v4185_v3  ;;  %v15626_v3 = vpop.f32.mrf.mxu0  ;;  %5132 = vmatpush.msra.mxu1 %v9030_v53  ;;  %v4204_v53 = vld [vmem:[%s18159_s6 + $0xe8] sm:$0xff] }
 0x6ad   :  { %9081 = vmatmul.msk.f32.gmra.mxu1 %vm4336_vm1, %v15289_v4  ;;  %v4183_v4 = vld [vmem:[%s18159_s6 + $0x40] sm:$0xff]  ;;  %18850 = vst [vmem:[#allocation64_spill] sm:$0xff] %v15626_v3  ;;  %v4200_v3 = vld [vmem:[%s18159_s6 + $0xc8] sm:$0xff] }
 0x6ae   :  { %4771 = vmatpush.msra.mxu3 %v4183_v4  ;;  %v4206_v4 = vld [vmem:[%s18159_s6 + $0xf8] sm:$0xff] }
 0x6af   :  { %8991 = vmatmul.msk.f32.gmra.mxu2 %vm4336_vm1, %v4118_v21  ;;  %v4181_v21 = vld [vmem:[%s18159_s6 + $0x30] sm:$0xff] }
 0x6b0   :  { %4772 = vmatpush.msra.mxu3 %v4181_v21  ;;  %4901 = vmatpush.msra.mxu2 %v4206_v4  ;;  %v9028_v21 = vld [vmem:[%s18159_s6 + $0x5e0] sm:$0xff] }
 0x6b1   :  { %5133 = vmatpush.msra.mxu1 %v9028_v21  ;;  %v9024_v4 = vld [vmem:[%s18159_s6 + $0x5c0] sm:$0xff] }
 0x6b2   :  { %v15603_v1 = vpop.f32.mrf.mxu1  ;;  %v15605_v43 = vpop.f32.mrf.mxu2  ;;  %4773 = vmatpush.msra.mxu3 %v4179_v49  ;;  %v9026_v49 = vld [vmem:[%s18159_s6 + $0x5d0] sm:$0xff]  ;;  %4902 = vmatpush.msra.mxu2 %v4204_v53 }
 0x6b3   :  { %8985 = vmatmul.msk.f32.gmra.mxu3 %vm4336_vm1, %v15605_v43  ;;  %5292 = vmatmul.f32.gmra.mxu0 %v15128_v22 }
 0x6b4   :  { %5134 = vmatpush.msra.mxu1 %v9026_v49  ;;  %v15675_v53 = vpop.f32.mrf.mxu0  ;;  %v9020_v49 = vld [vmem:[%s18159_s6 + $0x5a0] sm:$0xff] }
 0x6b5   :  { %9082 = vmatmul.msk.f32.gmra.mxu1 %vm4336_vm1, %v15298_v47  ;;  %v4177_v47 = vld [vmem:[%s18159_s6 + $0x10] sm:$0xff] }
 0x6b6   :  { %v15618_v55 = vpop.f32.mrf.mxu3  ;;  %4774 = vmatpush.msra.mxu3 %v4177_v47  ;;  %v4202_v47 = vld [vmem:[%s18159_s6 + $0xd8] sm:$0xff]  ;;  %5135 = vmatpush.msra.mxu1 %v9024_v4 }
 0x6b7   :  { %8992 = vmatmul.msk.f32.gmra.mxu2 %vm4336_vm1, %v4121_v46  ;;  %v4175_v46 = vld [vmem:[%s18159_s6] sm:$0xff]  ;;  %v4194_v4 = vld [vmem:[%s18159_s6 + $0x98] sm:$0xff] }
 0x6b8   :  { %4775 = vmatpush.msra.mxu3 %v4175_v46  ;;  %4903 = vmatpush.msra.mxu2 %v4202_v47  ;;  %v9022_v46 = vld [vmem:[%s18159_s6 + $0x5b0] sm:$0xff] }
 0x6b9   :  { %5136 = vmatpush.msra.mxu1 %v9022_v46  ;;  %v9016_v46 = vld [vmem:[%s18159_s6 + $0x580] sm:$0xff] }
 0x6ba   :  { %v15638_v54 = vpop.f32.mrf.mxu1  ;;  %v15640_v56 = vpop.f32.mrf.mxu2  ;;  %4904 = vmatpush.msra.mxu2 %v4200_v3  ;;  %v9018_v3 = vld [vmem:[%s18159_s6 + $0x590] sm:$0xff]  ;;  %4948 = vmatpush.msrb.mxu3 %v4238_v5  ;;  %v4232_v5 = vld [vmem:[%s18159_s6 + $0x1c8] sm:$0xff] }
 0x6bb   :  { %8986 = vmatmul.msk.f32.gmra.mxu3 %vm4336_vm1, %v15640_v56  ;;  %5295 = vmatmul.f32.gmra.mxu0 %v15152_v59 }
 0x6bc   :  { %5137 = vmatpush.msra.mxu1 %v9020_v49  ;;  %v9014_v49 = vld [vmem:[%s18159_s6 + $0x570] sm:$0xff] }
 0x6bd   :  { %9083 = vmatmul.msk.f32.gmra.mxu1 %vm4336_vm1, %v15307_v51  ;;  %v4198_v51 = vld [vmem:[%s18159_s6 + $0xb8] sm:$0xff] }
 0x6be   :  { %v15662_v21 = vpop.f32.mrf.mxu3  ;;  %4905 = vmatpush.msra.mxu2 %v4198_v51  ;;  %5138 = vmatpush.msra.mxu1 %v9018_v3 }
 0x6bf   :  { %8993 = vmatmul.msk.f32.gmra.mxu2 %vm4336_vm1, %v15554_v0  ;;  %v4196_v0 = vld [vmem:[%s18159_s6 + $0xa8] sm:$0xff] }
 0x6c0   :  { %4906 = vmatpush.msra.mxu2 %v4196_v0  ;;  %5139 = vmatpush.msra.mxu1 %v9016_v46  ;;  %v9012_v0 = vld [vmem:[%s18159_s6 + $0x560] sm:$0xff]  ;;  %v4186_v46 = vld [vmem:[%s18159_s6 + $0x58] sm:$0xff] }
 0x6c2   :  { %v15680_v47 = vpop.f32.mrf.mxu2  ;;  %v15694_v8 = vpop.f32.mrf.mxu1  ;;  %4907 = vmatpush.msra.mxu2 %v4194_v4  ;;  %5140 = vmatpush.msra.mxu1 %v9014_v49  ;;  %v9008_v49 = vld [vmem:[%s18159_s6 + $0x540] sm:$0xff] }
 0x6c3   :  { %8987 = vmatmul.msk.f32.gmra.mxu3 %vm4336_vm1, %v15680_v47  ;;  %5298 = vmatmul.f32.gmra.mxu0 %v15175_v11  ;;  %v15720_v4 = vpop.f32.mrf.mxu0 }
 0x6c4   :  { %4908 = vmatpush.msra.mxu2 %v4192_v39  ;;  %v9010_v39 = vld [vmem:[%s18159_s6 + $0x550] sm:$0xff]  ;;  %5141 = vmatpush.msra.mxu1 %v9012_v0  ;;  %v4182_v0 = vld [vmem:[%s18159_s6 + $0x38] sm:$0xff] }
 0x6c5   :  { %9084 = vmatmul.msk.f32.gmra.mxu1 %vm4336_vm1, %v15316_v35  ;;  %v4190_v35 = vld [vmem:[%s18159_s6 + $0x78] sm:$0xff] }
 0x6c6   :  { %v15701_v51 = vpop.f32.mrf.mxu3  ;;  %4909 = vmatpush.msra.mxu2 %v4190_v35  ;;  %5142 = vmatpush.msra.mxu1 %v9010_v39 }
 0x6c7   :  { %8994 = vmatmul.msk.f32.gmra.mxu2 %vm4336_vm1, %v15579_v37  ;;  %v4188_v37 = vld [vmem:[%s18159_s6 + $0x68] sm:$0xff] }
 0x6c8   :  { %4910 = vmatpush.msra.mxu2 %v4188_v37  ;;  %5143 = vmatpush.msra.mxu1 %v9008_v49  ;;  %v9004_v37 = vld [vmem:[%s18159_s6 + $0x520] sm:$0xff] }
 0x6ca   :  { %v4139_v3 = vpop.f32.mrf.mxu2  ;;  %v15735_v35 = vpop.f32.mrf.mxu1  ;;  %4911 = vmatpush.msra.mxu2 %v4186_v46  ;;  %v9002_v46 = vld [vmem:[%s18159_s6 + $0x510] sm:$0xff] }
 0x6cb   :  { %8988 = vmatmul.msk.f32.gmra.mxu3 %vm4336_vm1, %v4139_v3  ;;  %5301 = vmatmul.f32.gmra.mxu0 %v15201_v28  ;;  %18851 = vst [vmem:[#allocation46_spill] sm:$0xff] %v15735_v35  ;;  %v15764_v49 = vpop.f32.mrf.mxu0 }
 0x6cc   :  { %4912 = vmatpush.msra.mxu2 %v4184_v32  ;;  %v4178_v32 = vld [vmem:[%s18159_s6 + $0x18] sm:$0xff] }
 0x6cd   :  { %9085 = vmatmul.msk.f32.gmra.mxu1 %vm4336_vm1, %v15338_v34  ;;  %v9006_v34 = vld [vmem:[%s18159_s6 + $0x530] sm:$0xff] }
 0x6ce   :  { %v15737_v14 = vpop.f32.mrf.mxu3  ;;  %5144 = vmatpush.msra.mxu1 %v9006_v34  ;;  %4913 = vmatpush.msra.mxu2 %v4182_v0  ;;  %v9000_v34 = vld [vmem:[%s18159_s6 + $0x500] sm:$0xff] }
 0x6cf   :  { %8995 = vmatmul.msk.f32.gmra.mxu2 %vm4336_vm1, %v15605_v43  ;;  %v4180_v43 = vld [vmem:[%s18159_s6 + $0x28] sm:$0xff] }
 0x6d0   :  { %5145 = vmatpush.msra.mxu1 %v9004_v37  ;;  %4914 = vmatpush.msra.mxu2 %v4180_v43  ;;  %v18852_v43 = vld [vmem:[#allocation59_spill] sm:$0xff] }
 0x6d2   :  { %v4142_v39 = vpop.f32.mrf.mxu2  ;;  %5146 = vmatpush.msra.mxu1 %v9002_v46  ;;  %4915 = vmatpush.msra.mxu2 %v4178_v32  ;;  %v15778_v37 = vpop.f32.mrf.mxu1 }
 0x6d3   :  { %8989 = vmatmul.msk.f32.gmra.mxu3 %vm4336_vm1, %v4142_v39  ;;  %5304 = vmatmul.f32.gmra.mxu0 %v15227_v16  ;;  %v15788_v32 = vpop.f32.mrf.mxu0 }
 0x6d4   :  { %5147 = vmatpush.msra.mxu1 %v9000_v34  ;;  %4916 = vmatpush.msra.mxu2 %v4176_v17  ;;  %v18853_v17 = vld [vmem:[#allocation84_spill] sm:$0xff] }
 0x6d5   :  { %9086 = vmatmul.msk.f32.gmra.mxu1 %vm4336_vm1, %v15363_v60 }
 0x6d6   :  { %v15771_v0 = vpop.f32.mrf.mxu3 }
 0x6d7   :  { %8996 = vmatmul.msk.f32.gmra.mxu2 %vm4336_vm1, %v15640_v56 }
 0x6da   :  { %v15780_v60 = vpop.f32.mrf.mxu2  ;;  %v15792_v56 = vpop.f32.mrf.mxu1 }
 0x6db   :  { %4776 = vmatmul.f32.vlgmr.msra.gmra.mxu3 %v18852_v43  ;;  %5307 = vmatmul.f32.gmra.mxu0 %v15265_v44  ;;  %v15803_v20 = vpop.f32.mrf.mxu0 }
 0x6dd   :  { %9087 = vmatmul.msk.f32.gmra.mxu1 %vm4336_vm1, %v15388_v27 }
 0x6de   :  { %v15786_v46 = vpop.f32.mrf.mxu3 }
 0x6df   :  { %8997 = vmatmul.msk.f32.gmra.mxu2 %vm4336_vm1, %v15680_v47  ;;  %v18856_v47 = vld [vmem:[#allocation90_spill] sm:$0xff] }
 0x6e2   :  { %v15794_v34 = vpop.f32.mrf.mxu2  ;;  %v15812_v35 = vpop.f32.mrf.mxu1 }
 0x6e3   :  { %4779 = vmatmul.f32.gmra.mxu3 %v18853_v17  ;;  %5310 = vmatmul.f32.gmra.mxu0 %v15285_v6  ;;  %18857 = vst [vmem:[#allocation70_spill] sm:$0xff] %v15812_v35  ;;  %v18860_v35 = vld [vmem:[#allocation96_spill] sm:$0xff] }
 0x6e5   :  { %9088 = vmatmul.msk.f32.gmra.mxu1 %vm4336_vm1, %v15420_v61  ;;  %v4236_v61 = vld [vmem:[%s18159_s6 + $0x1e8] sm:$0xff] }
 0x6e6   :  { %v15801_v27 = vpop.f32.mrf.mxu3  ;;  %4949 = vmatpush.msrb.mxu3 %v4236_v61 }
 0x6e7   :  { %8998 = vmatmul.msk.f32.gmra.mxu2 %vm4336_vm1, %v4139_v3  ;;  %18854 = vst [vmem:[#allocation4_spill] sm:$0xff] %v15801_v27  ;;  %v4234_v3 = vld [vmem:[%s18159_s6 + $0x1d8] sm:$0xff] }
 0x6e8   :  { %4950 = vmatpush.msrb.mxu3 %v4234_v3  ;;  %v4228_v3 = vld [vmem:[%s18159_s6 + $0x1a8] sm:$0xff] }
 0x6ea   :  { %v15805_v18 = vpop.f32.mrf.mxu2  ;;  %4951 = vmatpush.msrb.mxu3 %v4232_v5  ;;  %v15838_v61 = vpop.f32.mrf.mxu1  ;;  %v18863_v5 = vld [vmem:[#allocation58_spill] sm:$0xff] }
 0x6eb   :  { %18855 = vst [vmem:[#allocation34_spill] sm:$0xff] %v15805_v18  ;;  %4782 = vmatmul.f32.gmra.mxu3 %v18856_v47  ;;  %5313 = vmatmul.f32.gmra.mxu0 %v15296_v24 }
 0x6ec   :  { %18861 = vst [vmem:[#allocation15_spill] sm:$0xff] %v15838_v61 }
 0x6ed   :  { %9089 = vmatmul.msk.f32.gmra.mxu1 %vm4336_vm1, %v15468_v23  ;;  %v15830_v23 = vpop.f32.mrf.mxu0 }
 0x6ee   :  { %v15823_v27 = vpop.f32.mrf.mxu3 }
 0x6ef   :  { %8999 = vmatmul.msk.f32.gmra.mxu2 %vm4336_vm1, %v4142_v39  ;;  %18858 = vst [vmem:[#allocation7_spill] sm:$0xff] %v15823_v27  ;;  %v4230_v39 = vld [vmem:[%s18159_s6 + $0x1b8] sm:$0xff] }
 0x6f0   :  { %4952 = vmatpush.msrb.mxu3 %v4230_v39  ;;  %v4226_v27 = vld [vmem:[%s18159_s6 + $0x198] sm:$0xff] }
 0x6f1   :  { %v4222_v39 = vld [vmem:[%s18159_s6 + $0x178] sm:$0xff] }
 0x6f2   :  { %v15825_v18 = vpop.f32.mrf.mxu2  ;;  %4953 = vmatpush.msrb.mxu3 %v4228_v3  ;;  %v15866_v3 = vpop.f32.mrf.mxu1 }
 0x6f3   :  { %18859 = vst [vmem:[#allocation11_spill] sm:$0xff] %v15825_v18  ;;  %4785 = vmatmul.f32.gmra.mxu3 %v18860_v35  ;;  %5316 = vmatmul.f32.gmra.mxu0 %v15309_v19 }
 0x6f4   :  { %4954 = vmatpush.msrb.mxu3 %v4226_v27  ;;  %v4218_v27 = vld [vmem:[%s18159_s6 + $0x158] sm:$0xff] }
 0x6f5   :  { %5148 = vmatmul.f32.vlgmr.msra.gmra.mxu1 %v15103_v57  ;;  %v4224_v57 = vld [vmem:[%s18159_s6 + $0x188] sm:$0xff] }
 0x6f6   :  { %v15856_v61 = vpop.f32.mrf.mxu3  ;;  %4955 = vmatpush.msrb.mxu3 %v4224_v57  ;;  %v18866_v57 = vld [vmem:[#allocation60_spill] sm:$0xff] }
 0x6f7   :  { %4917 = vmatmul.f32.vlgmr.msra.gmra.mxu2 %v18852_v43  ;;  %18864 = vst [vmem:[#allocation19_spill] sm:$0xff] %v15856_v61  ;;  %v4220_v43 = vld [vmem:[%s18159_s6 + $0x168] sm:$0xff] }
 0x6f8   :  { %4956 = vmatpush.msrb.mxu3 %v4222_v39 }
 0x6fa   :  { %v15847_v18 = vpop.f32.mrf.mxu2  ;;  %4957 = vmatpush.msrb.mxu3 %v4220_v43  ;;  %v4212_v43 = vld [vmem:[%s18159_s6 + $0x128] sm:$0xff] }
 0x6fb   :  { %18862 = vst [vmem:[#allocation5_spill] sm:$0xff] %v15847_v18  ;;  %4788 = vmatmul.f32.gmra.mxu3 %v18863_v5 }
 0x6fc   :  { %4958 = vmatpush.msrb.mxu3 %v4218_v27  ;;  %v9063_v27 = vld [vmem:[%s18159_s6 + $0x6f8] sm:$0xff] }
 0x6fd   :  { %5151 = vmatmul.f32.gmra.mxu1 %v15128_v22  ;;  %v4216_v22 = vld [vmem:[%s18159_s6 + $0x148] sm:$0xff] }
 0x6fe   :  { %4959 = vmatpush.msrb.mxu3 %v4216_v22  ;;  %v15878_v39 = vpop.f32.mrf.mxu3  ;;  %5320 = vmatpush.msrb.mxu1 %v9063_v27  ;;  %v4210_v22 = vld [vmem:[%s18159_s6 + $0x118] sm:$0xff]  ;;  %v9060_v27 = vld [vmem:[%s18159_s6 + $0x6e0] sm:$0xff] }
 0x6ff   :  { %4920 = vmatmul.f32.gmra.mxu2 %v18853_v17  ;;  %v4214_v17 = vld [vmem:[%s18159_s6 + $0x138] sm:$0xff]  ;;  %18867 = vst [vmem:[#allocation23_spill] sm:$0xff] %v15878_v39  ;;  %v15896_v39 = vpop.f32.mrf.mxu1 }
 0x700   :  { %4960 = vmatpush.msrb.mxu3 %v4214_v17  ;;  %v9061_v17 = vld [vmem:[%s18159_s6 + $0x6e8] sm:$0xff]  ;;  %18868 = vst [vmem:[#allocation38_spill] sm:$0xff] %v15896_v39  ;;  %v9047_v39 = vld [vmem:[%s18159_s6 + $0x678] sm:$0xff] }
 0x701   :  { %5321 = vmatpush.msrb.mxu1 %v9061_v17  ;;  %v9058_v17 = vld [vmem:[%s18159_s6 + $0x6d0] sm:$0xff] }
 0x702   :  { %v15868_v18 = vpop.f32.mrf.mxu2  ;;  %4961 = vmatpush.msrb.mxu3 %v4212_v43  ;;  %v9059_v43 = vld [vmem:[%s18159_s6 + $0x6d8] sm:$0xff] }
 0x703   :  { %18865 = vst [vmem:[#allocation48_spill] sm:$0xff] %v15868_v18  ;;  %4791 = vmatmul.f32.gmra.mxu3 %v18866_v57  ;;  %5322 = vmatpush.msrb.mxu1 %v9059_v43  ;;  %v9055_v18 = vld [vmem:[%s18159_s6 + $0x6b8] sm:$0xff] }
 0x704   :  { %4962 = vmatpush.msrb.mxu3 %v4210_v22  ;;  %v9057_v22 = vld [vmem:[%s18159_s6 + $0x6c8] sm:$0xff] }
 0x705   :  { %5154 = vmatmul.f32.gmra.mxu1 %v15152_v59  ;;  %v9062_v59 = vld [vmem:[%s18159_s6 + $0x6f0] sm:$0xff] }
 0x706   :  { %5179 = vmatpush.msrb.mxu2 %v9062_v59  ;;  %v18870_v59 = vld [vmem:[#allocation66_spill] sm:$0xff]  ;;  %5323 = vmatpush.msrb.mxu1 %v9057_v22  ;;  %v18872_v22 = vld [vmem:[#allocation72_spill] sm:$0xff] }
 0x707   :  { %4923 = vmatmul.f32.gmra.mxu2 %v18856_v47  ;;  %v4208_v47 = vld [vmem:[%s18159_s6 + $0x108] sm:$0xff] }
 0x708   :  { %5180 = vmatpush.msrb.mxu2 %v9060_v27  ;;  %4963 = vmatpush.msrb.mxu3 %v4208_v47  ;;  %v9056_v27 = vld [vmem:[%s18159_s6 + $0x6c0] sm:$0xff]  ;;  %v9054_v47 = vld [vmem:[%s18159_s6 + $0x6b0] sm:$0xff] }
 0x709   :  { %5324 = vmatpush.msrb.mxu1 %v9055_v18  ;;  %v9050_v18 = vld [vmem:[%s18159_s6 + $0x690] sm:$0xff] }
 0x70a   :  { %v15898_v61 = vpop.f32.mrf.mxu2  ;;  %5181 = vmatpush.msrb.mxu2 %v9058_v17  ;;  %v9052_v17 = vld [vmem:[%s18159_s6 + $0x6a0] sm:$0xff] }
 0x70b   :  { %18869 = vst [vmem:[#allocation104_spill] sm:$0xff] %v15898_v61  ;;  %4794 = vmatmul.f32.gmra.mxu3 %v18870_v59 }
 0x70c   :  { %5182 = vmatpush.msrb.mxu2 %v9056_v27  ;;  %v9049_v27 = vld [vmem:[%s18159_s6 + $0x688] sm:$0xff] }
 0x70d   :  { %5157 = vmatmul.f32.gmra.mxu1 %v15175_v11  ;;  %v9053_v11 = vld [vmem:[%s18159_s6 + $0x6a8] sm:$0xff] }
 0x70e   :  { %v15917_v61 = vpop.f32.mrf.mxu3  ;;  %5183 = vmatpush.msrb.mxu2 %v9054_v47  ;;  %5325 = vmatpush.msrb.mxu1 %v9053_v11  ;;  %v15947_v47 = vpop.f32.mrf.mxu1 }
 0x70f   :  { %4926 = vmatmul.f32.gmra.mxu2 %v18860_v35  ;;  %v9051_v35 = vld [vmem:[%s18159_s6 + $0x698] sm:$0xff]  ;;  %18873 = vst [vmem:[#allocation105_spill] sm:$0xff] %v15947_v47  ;;  %v9040_v47 = vld [vmem:[%s18159_s6 + $0x640] sm:$0xff] }
 0x710   :  { %5184 = vmatpush.msrb.mxu2 %v9052_v17  ;;  %5326 = vmatpush.msrb.mxu1 %v9051_v35  ;;  %v9046_v17 = vld [vmem:[%s18159_s6 + $0x670] sm:$0xff] }
 0x712   :  { %v15932_v43 = vpop.f32.mrf.mxu2  ;;  %5185 = vmatpush.msrb.mxu2 %v9050_v18  ;;  %5327 = vmatpush.msrb.mxu1 %v9049_v27  ;;  %v9044_v18 = vld [vmem:[%s18159_s6 + $0x660] sm:$0xff]  ;;  %v18875_v27 = vld [vmem:[#allocation75_spill] sm:$0xff] }
 0x713   :  { %18871 = vst [vmem:[#allocation76_spill] sm:$0xff] %v15932_v43  ;;  %4797 = vmatmul.f32.gmra.mxu3 %v18872_v22  ;;  %v9048_v43 = vld [vmem:[%s18159_s6 + $0x680] sm:$0xff] }
 0x714   :  { %5186 = vmatpush.msrb.mxu2 %v9048_v43  ;;  %5328 = vmatpush.msrb.mxu1 %v9047_v39  ;;  %v9042_v39 = vld [vmem:[%s18159_s6 + $0x650] sm:$0xff]  ;;  %v9041_v43 = vld [vmem:[%s18159_s6 + $0x648] sm:$0xff] }
 0x715   :  { %5160 = vmatmul.f32.gmra.mxu1 %v15201_v28  ;;  %v9045_v28 = vld [vmem:[%s18159_s6 + $0x668] sm:$0xff] }
 0x716   :  { %v15950_v11 = vpop.f32.mrf.mxu3  ;;  %5187 = vmatpush.msrb.mxu2 %v9046_v17  ;;  %5329 = vmatpush.msrb.mxu1 %v9045_v28  ;;  %v15981_v17 = vpop.f32.mrf.mxu1 }
 0x717   :  { %4929 = vmatmul.f32.gmra.mxu2 %v18863_v5  ;;  %v9043_v5 = vld [vmem:[%s18159_s6 + $0x658] sm:$0xff]  ;;  %18876 = vst [vmem:[#allocation106_spill] sm:$0xff] %v15981_v17 }
 0x718   :  { %5188 = vmatpush.msrb.mxu2 %v9044_v18  ;;  %5330 = vmatpush.msrb.mxu1 %v9043_v5  ;;  %v9037_v18 = vld [vmem:[%s18159_s6 + $0x628] sm:$0xff] }
 0x71a   :  { %v15965_v35 = vpop.f32.mrf.mxu2  ;;  %5189 = vmatpush.msrb.mxu2 %v9042_v39  ;;  %5331 = vmatpush.msrb.mxu1 %v9041_v43  ;;  %v9036_v39 = vld [vmem:[%s18159_s6 + $0x620] sm:$0xff] }
 0x71b   :  { %18874 = vst [vmem:[#allocation80_spill] sm:$0xff] %v15965_v35  ;;  %4800 = vmatmul.f32.gmra.mxu3 %v18875_v27  ;;  %v9039_v35 = vld [vmem:[%s18159_s6 + $0x638] sm:$0xff]  ;;  %v18878_v43 = vld [vmem:[#allocation78_spill] sm:$0xff] }
 0x71c   :  { %5190 = vmatpush.msrb.mxu2 %v9040_v47  ;;  %5332 = vmatpush.msrb.mxu1 %v9039_v35  ;;  %v9034_v47 = vld [vmem:[%s18159_s6 + $0x610] sm:$0xff]  ;;  %v9033_v35 = vld [vmem:[%s18159_s6 + $0x608] sm:$0xff] }
 0x71d   :  { %5163 = vmatmul.f32.gmra.mxu1 %v15227_v16  ;;  %v9038_v16 = vld [vmem:[%s18159_s6 + $0x630] sm:$0xff] }
 0x71e   :  { %v15983_v28 = vpop.f32.mrf.mxu3  ;;  %5191 = vmatpush.msrb.mxu2 %v9038_v16  ;;  %5333 = vmatpush.msrb.mxu1 %v9037_v18  ;;  %v9032_v18 = vld [vmem:[%s18159_s6 + $0x600] sm:$0xff]  ;;  %v16020_v17 = vpop.f32.mrf.mxu1 }
 0x71f   :  { %4932 = vmatmul.f32.gmra.mxu2 %v18866_v57  ;;  %v9035_v57 = vld [vmem:[%s18159_s6 + $0x618] sm:$0xff]  ;;  %18879 = vst [vmem:[#allocation108_spill] sm:$0xff] %v16020_v17  ;;  %v4435_v17 = vadd.f32 %v15662_v21, %v15321_v52  ;;  %v9077_v21 = vld [vmem:[%s18159_s6 + $0x768] sm:$0xff] }
 0x720   :  { %5192 = vmatpush.msrb.mxu2 %v9036_v39  ;;  %5334 = vmatpush.msrb.mxu1 %v9035_v57 }
 0x722   :  { %v15998_v5 = vpop.f32.mrf.mxu2  ;;  %5193 = vmatpush.msrb.mxu2 %v9034_v47  ;;  %5335 = vmatpush.msrb.mxu1 %v9033_v35  ;;  %v9072_v35 = vld [vmem:[%s18159_s6 + $0x740] sm:$0xff] }
 0x723   :  { %18877 = vst [vmem:[#allocation107_spill] sm:$0xff] %v15998_v5  ;;  %4803 = vmatmul.f32.gmra.mxu3 %v18878_v43 }
 0x724   :  { %5194 = vmatpush.msrb.mxu2 %v9032_v18 }
 0x725   :  { %5166 = vmatmul.f32.gmra.mxu1 %v15265_v44 }
 0x726   :  { %v16014_v16 = vpop.f32.mrf.mxu3  ;;  %v16029_v39 = vpop.f32.mrf.mxu1 }
 0x727   :  { %4935 = vmatmul.f32.gmra.mxu2 %v18870_v59  ;;  %18880 = vst [vmem:[#allocation109_spill] sm:$0xff] %v16029_v39 }
 0x72a   :  { %v16022_v5 = vpop.f32.mrf.mxu2 }
 0x72b   :  { %4964 = vmatmul.f32.vlgmr.msrb.gmra.mxu3 %v15061_v26 }
 0x72d   :  { %5169 = vmatmul.f32.gmra.mxu1 %v15285_v6 }
 0x72e   :  { %v16026_v44 = vpop.f32.mrf.mxu3  ;;  %v4871_v26 = vpop.f32.mrf.mxu1 }
 0x72f   :  { %4938 = vmatmul.f32.gmra.mxu2 %v18872_v22 }
 0x732   :  { %v16031_v57 = vpop.f32.mrf.mxu2 }
 0x733   :  { %4967 = vmatmul.f32.gmra.mxu3 %v15079_v63 }
 0x735   :  { %5172 = vmatmul.f32.gmra.mxu1 %v15296_v24 }
 0x736   :  { %v16035_v59 = vpop.f32.mrf.mxu3  ;;  %v4874_v63 = vpop.f32.mrf.mxu1 }
 0x737   :  { %4941 = vmatmul.f32.gmra.mxu2 %v18875_v27 }
 0x73a   :  { %v16038_v47 = vpop.f32.mrf.mxu2 }
 0x73b   :  { %4970 = vmatmul.f32.gmra.mxu3 %v15088_v7  ;;  %v9078_v7 = vld [vmem:[%s18159_s6 + $0x770] sm:$0xff] }
 0x73c   :  { %5234 = vmatpush.msra.mxu3 %v9078_v7  ;;  %v9068_v7 = vld [vmem:[%s18159_s6 + $0x720] sm:$0xff] }
 0x73d   :  { %5175 = vmatmul.f32.gmra.mxu1 %v15309_v19 }
 0x73e   :  { %v16042_v6 = vpop.f32.mrf.mxu3 }
 0x73f   :  { %4944 = vmatmul.f32.gmra.mxu2 %v18878_v43 }
 0x742   :  { %v16045_v22 = vpop.f32.mrf.mxu2 }
 0x743   :  { %4973 = vmatmul.f32.gmra.mxu3 %v15105_v31  ;;  %v9076_v31 = vld [vmem:[%s18159_s6 + $0x760] sm:$0xff] }
 0x744   :  { %5235 = vmatpush.msra.mxu3 %v9076_v31 }
 0x745   :  { %5336 = vmatmul.f32.vlgmr.msrb.gmra.mxu1 %v15466_v29 }
 0x746   :  { %v16049_v24 = vpop.f32.mrf.mxu3 }
 0x747   :  { %5195 = vmatmul.f32.vlgmr.msrb.gmra.mxu2 %v15466_v29  ;;  %v16065_v29 = vpop.f32.mrf.mxu1 }
 0x74a   :  { %v16052_v27 = vpop.f32.mrf.mxu2 }
 0x74b   :  { %4976 = vmatmul.f32.gmra.mxu3 %v15123_v2  ;;  %v9074_v2 = vld [vmem:[%s18159_s6 + $0x750] sm:$0xff] }
 0x74c   :  { %5236 = vmatpush.msra.mxu3 %v9074_v2 }
 0x74d   :  { %5339 = vmatmul.f32.gmra.mxu1 %v15503_v30 }
 0x74e   :  { %v16059_v19 = vpop.f32.mrf.mxu3  ;;  %5237 = vmatpush.msra.mxu3 %v9072_v35  ;;  %v9064_v35 = vld [vmem:[%s18159_s6 + $0x700] sm:$0xff] }
 0x74f   :  { %5198 = vmatmul.f32.gmra.mxu2 %v15503_v30  ;;  %v9070_v30 = vld [vmem:[%s18159_s6 + $0x730] sm:$0xff]  ;;  %v16089_v31 = vpop.f32.mrf.mxu1 }
 0x750   :  { %5238 = vmatpush.msra.mxu3 %v9070_v30  ;;  %v4432_v30 = vadd.f32 %v15618_v55, %v15305_v33  ;;  %v4482_v55 = vadd.f32 %v15950_v11, %v4435_v17 }
 0x752   :  { %v16070_v43 = vpop.f32.mrf.mxu2  ;;  %5239 = vmatpush.msra.mxu3 %v9068_v7 }
 0x753   :  { %4979 = vmatmul.f32.gmra.mxu3 %v15143_v38  ;;  %v9066_v38 = vld [vmem:[%s18159_s6 + $0x710] sm:$0xff] }
 0x754   :  { %5240 = vmatpush.msra.mxu3 %v9066_v38 }
 0x755   :  { %5342 = vmatmul.f32.gmra.mxu1 %v15521_v13 }
 0x756   :  { %v16080_v18 = vpop.f32.mrf.mxu3  ;;  %5241 = vmatpush.msra.mxu3 %v9064_v35 }
 0x757   :  { %5201 = vmatmul.f32.gmra.mxu2 %v15521_v13  ;;  %v4479_v13 = vadd.f32 %v15917_v61, %v4432_v30  ;;  %v4441_v30 = vadd.f32 %v15737_v14, %v15379_v15  ;;  %v4573_v15 = vadd.f32 %v15778_v37, %v15326_v41 }
 0x75a   :  { %v16091_v2 = vpop.f32.mrf.mxu2 }
 0x75b   :  { %18881 = vst [vmem:[#allocation110_spill] sm:$0xff] %v16091_v2  ;;  %4982 = vmatmul.f32.gmra.mxu3 %v15164_v9  ;;  %v16110_v9 = vpop.f32.mrf.mxu1 }
 0x75d   :  { %5345 = vmatmul.f32.gmra.mxu1 %v15533_v58 }
 0x75e   :  { %v4777_v7 = vpop.f32.mrf.mxu3 }
 0x75f   :  { %v4778_v39 = vadd.f32 %v4777_v7, %v4479_v13  ;;  %5204 = vmatmul.f32.gmra.mxu2 %v15533_v58  ;;  %v9079_v58 = vld [vmem:[%s18159_s6 + $0x778] sm:$0xff]  ;;  %v16158_v7 = vpop.f32.mrf.mxu0 }
 0x760   :  { %5375 = vmatpush.msra.mxu2 %v9079_v58 }
 0x761   :  { %v4825_v38 = vadd.f32 %v15675_v53, %v4778_v39  ;;  %v4438_v53 = vadd.f32 %v15701_v51, %v15349_v40  ;;  %v9073_v40 = vld [vmem:[%s18159_s6 + $0x748] sm:$0xff] }
 0x762   :  { %v16103_v2 = vpop.f32.mrf.mxu2  ;;  %5376 = vmatpush.msra.mxu2 %v9077_v21 }
 0x763   :  { %18882 = vst [vmem:[#allocation24_spill] sm:$0xff] %v16103_v2  ;;  %4985 = vmatmul.f32.gmra.mxu3 %v15182_v12  ;;  %v16108_v33 = vadd.f32 %v4871_v26, %v4825_v38  ;;  %v4886_v17 = vpop.f32.mrf.mxu1  ;;  %v18956_v2 = vld [vmem:[#allocation61_spill] sm:$0xff] }
 0x765   :  { %18883 = vst [vmem:[#allocation20_spill] sm:$0xff] %v16108_v33  ;;  %5348 = vmatmul.f32.gmra.mxu1 %v15552_v25  ;;  %v18959_v33 = vld [vmem:[#allocation7_spill] sm:$0xff] }
 0x766   :  { %v4780_v61 = vpop.f32.mrf.mxu3 }
 0x767   :  { %v4781_v35 = vadd.f32 %v4780_v61, %v4482_v55  ;;  %5207 = vmatmul.f32.gmra.mxu2 %v15552_v25  ;;  %v9075_v25 = vld [vmem:[%s18159_s6 + $0x758] sm:$0xff] }
 0x768   :  { %5377 = vmatpush.msra.mxu2 %v9075_v25 }
 0x769   :  { %v4828_v52 = vadd.f32 %v15720_v4, %v4781_v35  ;;  %v4485_v4 = vadd.f32 %v15983_v28, %v4438_v53  ;;  %v4444_v35 = vadd.f32 %v15771_v0, %v15416_v42  ;;  %v16184_v42 = vpop.f32.mrf.mxu0 }
 0x76a   :  { %v16119_v12 = vpop.f32.mrf.mxu2  ;;  %5378 = vmatpush.msra.mxu2 %v9073_v40  ;;  %v18893_v40 = vld [vmem:[#allocation34_spill] sm:$0xff] }
 0x76b   :  { %18884 = vst [vmem:[#allocation16_spill] sm:$0xff] %v16119_v12  ;;  %4988 = vmatmul.f32.gmra.mxu3 %v15203_v45  ;;  %v16130_v11 = vadd.f32 %v4874_v63, %v4828_v52  ;;  %v9071_v45 = vld [vmem:[%s18159_s6 + $0x738] sm:$0xff]  ;;  %v9069_v63 = vld [vmem:[%s18159_s6 + $0x728] sm:$0xff] }
 0x76c   :  { %5379 = vmatpush.msra.mxu2 %v9071_v45 }
 0x76d   :  { %18885 = vst [vmem:[#allocation111_spill] sm:$0xff] %v16130_v11  ;;  %5351 = vmatmul.f32.gmra.mxu1 %v15577_v36 }
 0x76e   :  { %v4783_v39 = vpop.f32.mrf.mxu3  ;;  %5380 = vmatpush.msra.mxu2 %v9069_v63 }
 0x76f   :  { %v4784_v51 = vadd.f32 %v4783_v39, %v4485_v4  ;;  %5210 = vmatmul.f32.gmra.mxu2 %v15577_v36  ;;  %v9067_v36 = vld [vmem:[%s18159_s6 + $0x718] sm:$0xff] }
 0x770   :  { %5381 = vmatpush.msra.mxu2 %v9067_v36  ;;  %v18898_v36 = vld [vmem:[#allocation11_spill] sm:$0xff] }
 0x771   :  { %v4831_v26 = vadd.f32 %v15764_v49, %v4784_v51  ;;  %v4488_v49 = vadd.f32 %v16014_v16, %v4441_v30  ;;  %v4620_v16 = vadd.f32 %v16022_v5, %v4573_v15  ;;  %v16206_v4 = vpop.f32.mrf.mxu0 }
 0x772   :  { %v16142_v28 = vpop.f32.mrf.mxu2 }
 0x773   :  { %18886 = vst [vmem:[#allocation52_spill] sm:$0xff] %v16142_v28  ;;  %4991 = vmatmul.f32.gmra.mxu3 %v15222_v50  ;;  %v16154_v13 = vadd.f32 %v16065_v29, %v4831_v26  ;;  %v9065_v50 = vld [vmem:[%s18159_s6 + $0x708] sm:$0xff]  ;;  %v16166_v29 = vpop.f32.mrf.mxu1 }
 0x774   :  { %5382 = vmatpush.msra.mxu2 %v9065_v50  ;;  %v18899_v50 = vld [vmem:[#allocation41_spill] sm:$0xff]  ;;  %v18957_v28 = vld [vmem:[#allocation23_spill] sm:$0xff] }
 0x775   :  { %18887 = vst [vmem:[#allocation12_spill] sm:$0xff] %v16154_v13  ;;  %5354 = vmatmul.f32.gmra.mxu1 %v15603_v1  ;;  %v4585_v15 = vadd.f32 %v15866_v3, %v18899_v50  ;;  %v4459_v12 = vadd.f32 %v18957_v28, %v18956_v2  ;;  %v18960_v13 = vld [vmem:[#allocation86_spill] sm:$0xff] }
 0x776   :  { %v4786_v38 = vpop.f32.mrf.mxu3 }
 0x777   :  { %v4787_v14 = vadd.f32 %v4786_v38, %v4488_v49  ;;  %5213 = vmatmul.f32.gmra.mxu2 %v15603_v1  ;;  %v4491_v1 = vadd.f32 %v16026_v44, %v4444_v35  ;;  %v4447_v44 = vadd.f32 %v15786_v46, %v15475_v10  ;;  %v4506_v11 = vadd.f32 %v16080_v18, %v4459_v12 }
 0x779   :  { %v4834_v55 = vadd.f32 %v15788_v32, %v4787_v14  ;;  %v4576_v32 = vadd.f32 %v15792_v56, %v15354_v62 }
 0x77a   :  { %v4918_v61 = vpop.f32.mrf.mxu2 }
 0x77b   :  { %v16172_v58 = vadd.f32 %v4918_v61, %v4620_v16  ;;  %9100 = vmatmul.msk.f32.vlgmr.msra.gmra.mxu3 %vm4336_vm1, %v15780_v60  ;;  %v16177_v41 = vadd.f32 %v16089_v31, %v4834_v55  ;;  %v4623_v0 = vadd.f32 %v16031_v57, %v4576_v32  ;;  %v16188_v21 = vpop.f32.mrf.mxu1  ;;  %v18901_v55 = vld [vmem:[#allocation5_spill] sm:$0xff] }
 0x77d   :  { %18888 = vst [vmem:[#allocation50_spill] sm:$0xff] %v16172_v58  ;;  %5357 = vmatmul.f32.gmra.mxu1 %v15638_v54 }
 0x77e   :  { %18889 = vst [vmem:[#allocation8_spill] sm:$0xff] %v16177_v41  ;;  %v4789_v37 = vpop.f32.mrf.mxu3 }
 0x77f   :  { %v4790_v5 = vadd.f32 %v4789_v37, %v4491_v1  ;;  %5216 = vmatmul.f32.gmra.mxu2 %v15638_v54  ;;  %v4494_v54 = vadd.f32 %v16035_v59, %v4447_v44  ;;  %v18903_v1 = vld [vmem:[#allocation113_spill] sm:$0xff]  ;;  %v18904_v37 = vld [vmem:[#allocation38_spill] sm:$0xff] }
 0x780   :  { %v4588_v32 = vadd.f32 %v18904_v37, %v18903_v1 }
 0x781   :  { %v4837_v52 = vadd.f32 %v15803_v20, %v4790_v5  ;;  %v18891_v20 = vld [vmem:[#allocation70_spill] sm:$0xff] }
 0x782   :  { %v4921_v31 = vpop.f32.mrf.mxu2  ;;  %v4579_v57 = vadd.f32 %v18891_v20, %v15384_v48  ;;  %v18894_v48 = vld [vmem:[#allocation46_spill] sm:$0xff] }
 0x783   :  { %v16192_v53 = vadd.f32 %v4921_v31, %v4623_v0  ;;  %9101 = vmatmul.msk.f32.gmra.mxu3 %vm4336_vm1, %v15794_v34  ;;  %v16197_v62 = vadd.f32 %v16110_v9, %v4837_v52  ;;  %v16214_v51 = vpop.f32.mrf.mxu1  ;;  %v18906_v0 = vld [vmem:[#allocation48_spill] sm:$0xff] }
 0x784   :  { %v4626_v10 = vadd.f32 %v16038_v47, %v4579_v57  ;;  %v18896_v47 = vld [vmem:[#allocation15_spill] sm:$0xff]  ;;  %v18913_v57 = vld [vmem:[#allocation76_spill] sm:$0xff] }
 0x785   :  { %18890 = vst [vmem:[#allocation112_spill] sm:$0xff] %v16192_v53  ;;  %5360 = vmatmul.f32.gmra.mxu1 %v15694_v8 }
 0x786   :  { %v4792_v56 = vpop.f32.mrf.mxu3 }
 0x787   :  { %v4793_v25 = vadd.f32 %v4792_v56, %v4494_v54  ;;  %5219 = vmatmul.f32.gmra.mxu2 %v15694_v8  ;;  %v18895_v8 = vld [vmem:[#allocation82_spill] sm:$0xff]  ;;  %v18909_v54 = vld [vmem:[#allocation104_spill] sm:$0xff] }
 0x788   :  { %v4582_v26 = vadd.f32 %v18896_v47, %v18895_v8 }
 0x789   :  { %v4840_v46 = vadd.f32 %v15830_v23, %v4793_v25 }
 0x78a   :  { %v4924_v39 = vpop.f32.mrf.mxu2  ;;  %v4629_v23 = vadd.f32 %v16045_v22, %v4582_v26  ;;  %v4632_v22 = vadd.f32 %v16052_v27, %v4585_v15  ;;  %v18920_v26 = vld [vmem:[#allocation107_spill] sm:$0xff] }
 0x78b   :  { %v16208_v9 = vadd.f32 %v4924_v39, %v4626_v10  ;;  %9102 = vmatmul.msk.f32.gmra.mxu3 %vm4336_vm1, %v18893_v40  ;;  %v16212_v59 = vadd.f32 %v4886_v17, %v4840_v46  ;;  %v16227_v17 = vpop.f32.mrf.mxu0  ;;  %v16229_v49 = vpop.f32.mrf.mxu1  ;;  %v18916_v39 = vld [vmem:[#allocation80_spill] sm:$0xff] }
 0x78d   :  { %18892 = vst [vmem:[#allocation101_spill] sm:$0xff] %v16208_v9  ;;  %5363 = vmatmul.f32.gmra.mxu1 %v18894_v48 }
 0x78e   :  { %v16217_v45 = vpop.f32.mrf.mxu3 }
 0x78f   :  { %5222 = vmatmul.f32.gmra.mxu2 %v18894_v48 }
 0x792   :  { %v4927_v63 = vpop.f32.mrf.mxu2 }
 0x793   :  { %v16223_v30 = vadd.f32 %v4927_v63, %v4629_v23  ;;  %9103 = vmatmul.msk.f32.gmra.mxu3 %vm4336_vm1, %v18898_v36  ;;  %v16242_v61 = vpop.f32.mrf.mxu0  ;;  %v16250_v3 = vpop.f32.mrf.mxu1 }
 0x794   :  { %18902 = vst [vmem:[#allocation65_spill] sm:$0xff] %v16242_v61 }
 0x795   :  { %18897 = vst [vmem:[#allocation31_spill] sm:$0xff] %v16223_v30 }
 0x796   :  { %v16231_v38 = vpop.f32.mrf.mxu3 }
 0x797   :  { %9110 = vmatmul.msk.f32.vlgmr.msra.gmra.mxu2 %vm4336_vm1, %v15780_v60  ;;  %v4635_v60 = vadd.f32 %v16070_v43, %v4588_v32 }
 0x79a   :  { %v4930_v14 = vpop.f32.mrf.mxu2 }
 0x79b   :  { %v16238_v16 = vadd.f32 %v4930_v14, %v4632_v22  ;;  %9104 = vmatmul.msk.f32.gmra.mxu3 %vm4336_vm1, %v18901_v55  ;;  %v16261_v31 = vpop.f32.mrf.mxu0  ;;  %v16263_v44 = vpop.f32.mrf.mxu1 }
 0x79c   :  { %18907 = vst [vmem:[#allocation71_spill] sm:$0xff] %v16261_v31 }
 0x79d   :  { %18900 = vst [vmem:[#allocation62_spill] sm:$0xff] %v16238_v16 }
 0x79e   :  { %v16244_v35 = vpop.f32.mrf.mxu3 }
 0x79f   :  { %9111 = vmatmul.msk.f32.gmra.mxu2 %vm4336_vm1, %v15794_v34 }
 0x7a2   :  { %v4933_v27 = vpop.f32.mrf.mxu2 }
 0x7a3   :  { %v16253_v5 = vadd.f32 %v4933_v27, %v4635_v60  ;;  %9105 = vmatmul.msk.f32.gmra.mxu3 %vm4336_vm1, %v18906_v0  ;;  %v16273_v56 = vpop.f32.mrf.mxu0  ;;  %v16279_v25 = vpop.f32.mrf.mxu1 }
 0x7a4   :  { %18911 = vst [vmem:[#allocation10_spill] sm:$0xff] %v16273_v56 }
 0x7a5   :  { %18905 = vst [vmem:[#allocation68_spill] sm:$0xff] %v16253_v5 }
 0x7a6   :  { %v16257_v52 = vpop.f32.mrf.mxu3 }
 0x7a7   :  { %9112 = vmatmul.msk.f32.gmra.mxu2 %vm4336_vm1, %v18893_v40 }
 0x7aa   :  { %v16265_v34 = vpop.f32.mrf.mxu2 }
 0x7ab   :  { %18908 = vst [vmem:[#allocation74_spill] sm:$0xff] %v16265_v34  ;;  %9106 = vmatmul.msk.f32.gmra.mxu3 %vm4336_vm1, %v18909_v54  ;;  %v16289_v40 = vpop.f32.mrf.mxu0  ;;  %v16291_v48 = vpop.f32.mrf.mxu1 }
 0x7ac   :  { %18917 = vst [vmem:[#allocation87_spill] sm:$0xff] %v16289_v40 }
 0x7ae   :  { %v16269_v43 = vpop.f32.mrf.mxu3 }
 0x7af   :  { %18910 = vst [vmem:[#allocation79_spill] sm:$0xff] %v16269_v43  ;;  %9113 = vmatmul.msk.f32.gmra.mxu2 %vm4336_vm1, %v18898_v36 }
 0x7b2   :  { %v16275_v20 = vpop.f32.mrf.mxu2 }
 0x7b3   :  { %18912 = vst [vmem:[#allocation83_spill] sm:$0xff] %v16275_v20  ;;  %9107 = vmatmul.msk.f32.gmra.mxu3 %vm4336_vm1, %v18913_v57  ;;  %v16301_v23 = vpop.f32.mrf.mxu0  ;;  %v16307_v36 = vpop.f32.mrf.mxu1 }
 0x7b4   :  { %18921 = vst [vmem:[#allocation91_spill] sm:$0xff] %v16301_v23  ;;  %v16403_v20 = vpop.permute.xlu2 %5094 }
 0x7b6   :  { %v16281_v10 = vpop.f32.mrf.mxu3 }
 0x7b7   :  { %18914 = vst [vmem:[#allocation32_spill] sm:$0xff] %v16281_v10  ;;  %9114 = vmatmul.msk.f32.gmra.mxu2 %vm4336_vm1, %v18901_v55 }
 0x7ba   :  { %v16285_v46 = vpop.f32.mrf.mxu2 }
 0x7bb   :  { %18915 = vst [vmem:[#allocation100_spill] sm:$0xff] %v16285_v46  ;;  %9108 = vmatmul.msk.f32.gmra.mxu3 %vm4336_vm1, %v18916_v39  ;;  %v16315_v22 = vpop.f32.mrf.mxu0  ;;  %v16317_v14 = vpop.f32.mrf.mxu1 }
 0x7bc   :  { %18925 = vst [vmem:[#allocation73_spill] sm:$0xff] %v16315_v22 }
 0x7be   :  { %v16293_v8 = vpop.f32.mrf.mxu3 }
 0x7bf   :  { %18918 = vst [vmem:[#allocation36_spill] sm:$0xff] %v16293_v8  ;;  %9115 = vmatmul.msk.f32.gmra.mxu2 %vm4336_vm1, %v18906_v0 }
 0x7c2   :  { %v16297_v47 = vpop.f32.mrf.mxu2 }
 0x7c3   :  { %18919 = vst [vmem:[#allocation21_spill] sm:$0xff] %v16297_v47  ;;  %9109 = vmatmul.msk.f32.gmra.mxu3 %vm4336_vm1, %v18920_v26  ;;  %v16325_v37 = vpop.f32.mrf.mxu0  ;;  %v16329_v60 = vpop.f32.mrf.mxu1  ;;  %v18953_v47 = vld [vmem:[#allocation30_spill] sm:$0xff] }
 0x7c4   :  { %18927 = vst [vmem:[#allocation81_spill] sm:$0xff] %v16325_v37 }
 0x7c6   :  { %v16303_v63 = vpop.f32.mrf.mxu3 }
 0x7c7   :  { %18922 = vst [vmem:[#allocation67_spill] sm:$0xff] %v16303_v63  ;;  %9116 = vmatmul.msk.f32.gmra.mxu2 %vm4336_vm1, %v18909_v54 }
 0x7ca   :  { %v16309_v50 = vpop.f32.mrf.mxu2 }
 0x7cb   :  { %18923 = vst [vmem:[#allocation45_spill] sm:$0xff] %v16309_v50  ;;  %v16337_v54 = vpop.f32.mrf.mxu0  ;;  %v4805_v50 = vadd.f32 %v16257_v52, %v4506_v11 }
 0x7cc   :  { %18929 = vst [vmem:[#allocation92_spill] sm:$0xff] %v16337_v54 }
 0x7cd   :  { %v4852_v11 = vadd.f32 %v16227_v17, %v4805_v50 }
 0x7ce   :  { %v16311_v15 = vpop.f32.mrf.mxu3 }
 0x7cf   :  { %18924 = vst [vmem:[#allocation95_spill] sm:$0xff] %v16311_v15  ;;  %9117 = vmatmul.msk.f32.gmra.mxu2 %vm4336_vm1, %v18913_v57  ;;  %v16339_v57 = vpop.f32.mrf.mxu1 }
 0x7d2   :  { %v16319_v55 = vpop.f32.mrf.mxu2 }
 0x7d3   :  { %v16345_v31 = vpop.f32.mrf.mxu0 }
 0x7d4   :  { %18931 = vst [vmem:[#allocation89_spill] sm:$0xff] %v16345_v31 }
 0x7d6   :  { %v16321_v1 = vpop.f32.mrf.mxu3 }
 0x7d7   :  { %18926 = vst [vmem:[#allocation77_spill] sm:$0xff] %v16321_v1  ;;  %9118 = vmatmul.msk.f32.gmra.mxu2 %vm4336_vm1, %v18916_v39  ;;  %v5173_v43 = vpop.f32.mrf.mxu1 }
 0x7d8   :  { %v5174_v18 = vadd.f32 %v5173_v43, %v16403_v20 }
 0x7da   :  { %v16327_v32 = vpop.f32.mrf.mxu2 }
 0x7de   :  { %v16331_v27 = vpop.f32.mrf.mxu3 }
 0x7df   :  { %18928 = vst [vmem:[#allocation13_spill] sm:$0xff] %v16331_v27  ;;  %9119 = vmatmul.msk.f32.gmra.mxu2 %vm4336_vm1, %v18920_v26  ;;  %v16353_v26 = vpop.f32.mrf.mxu0  ;;  %v5176_v10 = vpop.f32.mrf.mxu1 }
 0x7e0   :  { %18934 = vst [vmem:[#allocation47_spill] sm:$0xff] %v16353_v26 }
 0x7e2   :  { %v16335_v0 = vpop.f32.mrf.mxu2 }
 0x7e6   :  { %v16341_v61 = vpop.f32.mrf.mxu3 }
 0x7e7   :  { %18930 = vst [vmem:[#allocation94_spill] sm:$0xff] %v16341_v61  ;;  %v16359_v8 = vpop.f32.mrf.mxu0  ;;  %v16361_v22 = vpop.f32.mrf.mxu1 }
 0x7e8   :  { %18936 = vst [vmem:[#allocation17_spill] sm:$0xff] %v16359_v8 }
 0x7e9   :  { %18937 = vst [vmem:[#allocation6_spill] sm:$0xff] %v16361_v22 }
 0x7ea   :  { %v16343_v39 = vpop.f32.mrf.mxu2 }
 0x7ee   :  { %v16347_v56 = vpop.f32.mrf.mxu3 }
 0x7ef   :  { %18932 = vst [vmem:[#allocation85_spill] sm:$0xff] %v16347_v56  ;;  %v16365_v37 = vpop.f32.mrf.mxu0  ;;  %v16367_v15 = vpop.f32.mrf.mxu1 }
 0x7f0   :  { %18939 = vst [vmem:[#allocation25_spill] sm:$0xff] %v16365_v37 }
 0x7f1   :  { %18940 = vst [vmem:[#allocation29_spill] sm:$0xff] %v16367_v15 }
 0x7f2   :  { %v16349_v58 = vpop.f32.mrf.mxu2 }
 0x7f6   :  { %v16351_v40 = vpop.f32.mrf.mxu3 }
 0x7f7   :  { %18933 = vst [vmem:[#allocation51_spill] sm:$0xff] %v16351_v40  ;;  %v16371_v1 = vpop.f32.mrf.mxu0  ;;  %v16375_v26 = vpop.f32.mrf.mxu1 }
 0x7f8   :  { %18941 = vst [vmem:[#allocation103_spill] sm:$0xff] %v16371_v1 }
 0x7f9   :  { %18942 = vst [vmem:[#allocation14_spill] sm:$0xff] %v16375_v26  ;;  %v16395_v26 = vpop.permute.xlu1 %5099 }
 0x7fa   :  { %v16355_v53 = vpop.f32.mrf.mxu2 }
 0x7fe   :  { %v16357_v23 = vpop.f32.mrf.mxu3 }
 0x7ff   :  { %18935 = vst [vmem:[#allocation53_spill] sm:$0xff] %v16357_v23  ;;  %v16381_v22 = vpop.f32.mrf.mxu0  ;;  %v16383_v27 = vpop.f32.mrf.mxu1  ;;  %v18961_v23 = vld [vmem:[#allocation4_spill] sm:$0xff] }
 0x800   :  { %18944 = vst [vmem:[#allocation54_spill] sm:$0xff] %v16381_v22  ;;  %v4450_v41 = vadd.f32 %v18961_v23, %v18960_v13 }
 0x801   :  { %18945 = vst [vmem:[#allocation102_spill] sm:$0xff] %v16383_v27 }
 0x802   :  { %v5217_v9 = vpop.f32.mrf.mxu2  ;;  %v4497_v2 = vadd.f32 %v16042_v6, %v4450_v41  ;;  %v5177_v41 = vadd.f32 %v5176_v10, %v16395_v26 }
 0x804   :  { %v4796_v12 = vadd.f32 %v16217_v45, %v4497_v2 }
 0x806   :  { %v16363_v63 = vpop.f32.mrf.mxu3 }
 0x807   :  { %18938 = vst [vmem:[#allocation43_spill] sm:$0xff] %v16363_v63  ;;  %v16389_v61 = vpop.f32.mrf.mxu0  ;;  %v16393_v1 = vpop.f32.mrf.mxu1 }
 0x808   :  { %18947 = vst [vmem:[#allocation27_spill] sm:$0xff] %v16389_v61  ;;  %v18954_v61 = vld [vmem:[#allocation19_spill] sm:$0xff] }
 0x809   :  { %18949 = vst [vmem:[#allocation57_spill] sm:$0xff] %v16393_v1  ;;  %v4456_v46 = vadd.f32 %v18954_v61, %v18953_v47  ;;  %v16411_v1 = vpop.permute.xlu1 %5084 }
 0x80a   :  { %v5220_v30 = vpop.f32.mrf.mxu2  ;;  %v5168_v45 = vadd.f32 %v16329_v60, %v16411_v1 }
 0x80e   :  { %v16369_v16 = vpop.f32.mrf.mxu3 }
 0x80f   :  { %v16399_v56 = vpop.f32.mrf.mxu0  ;;  %v16401_v22 = vpop.f32.mrf.mxu1 }
 0x810   :  { %18951 = vst [vmem:[#allocation33_spill] sm:$0xff] %v16399_v56 }
 0x811   :  { %18952 = vst [vmem:[#allocation49_spill] sm:$0xff] %v16401_v22  ;;  %v4503_v22 = vadd.f32 %v16059_v19, %v4456_v46  ;;  %v16430_v19 = vpop.permute.xlu2 %5079 }
 0x812   :  { %v5223_v54 = vpop.f32.mrf.mxu2  ;;  %v5165_v17 = vadd.f32 %v16317_v14, %v16430_v19 }
 0x813   :  { %v4802_v47 = vadd.f32 %v16244_v35, %v4503_v22  ;;  %v5224_v43 = vadd.f32 %v5223_v54, %v5177_v41 }
 0x816   :  { %v16373_v5 = vpop.f32.mrf.mxu3 }
 0x817   :  { %v16422_v61 = vpop.f32.mrf.mxu0  ;;  %v16428_v28 = vpop.f32.mrf.mxu1 }
 0x81a   :  { %v16377_v8 = vpop.f32.mrf.mxu2 }
 0x81b   :  { %18943 = vst [vmem:[#allocation115_spill] sm:$0xff] %v16377_v8 }
 0x81e   :  { %v16379_v31 = vpop.f32.mrf.mxu3 }
 0x81f   :  { %v16454_v22 = vpop.f32.mrf.mxu0 }
 0x822   :  { %v16385_v37 = vpop.f32.mrf.mxu2 }
 0x823   :  { %18946 = vst [vmem:[#allocation3_spill] sm:$0xff] %v16385_v37  ;;  %v16405_v37 = vpop.permute.xlu0 %5089 }
 0x824   :  { %v5171_v6 = vadd.f32 %v16339_v57, %v16405_v37  ;;  %v16467_v57 = vpop.permute.xlu2 %5064 }
 0x826   :  { %v16387_v15 = vpop.f32.mrf.mxu3 }
 0x82a   :  { %v16391_v34 = vpop.f32.mrf.mxu2 }
 0x82b   :  { %18948 = vst [vmem:[#allocation9_spill] sm:$0xff] %v16391_v34  ;;  %v16437_v35 = vpop.permute.xlu0 %5074 }
 0x82e   :  { %v5261_v40 = vpop.f32.mrf.mxu3 }
 0x832   :  { %v16397_v8 = vpop.f32.mrf.mxu2 }
 0x833   :  { %18950 = vst [vmem:[#allocation114_spill] sm:$0xff] %v16397_v8  ;;  %v18958_v8 = vld [vmem:[#allocation56_spill] sm:$0xff]  ;;  %v16473_v2 = vpop.permute.xlu0 %5059 }
 0x834   :  { %v4453_v56 = vadd.f32 %v18959_v33, %v18958_v8  ;;  %v4843_v8 = vadd.f32 %v16158_v7, %v4796_v12  ;;  %v5212_v7 = vadd.f32 %v16349_v58, %v5165_v17  ;;  %v5153_v12 = vadd.f32 %v16263_v44, %v16473_v2 }
 0x836   :  { %v5264_v27 = vpop.f32.mrf.mxu3  ;;  %v4500_v63 = vadd.f32 %v16049_v24, %v4453_v56  ;;  %v4849_v24 = vadd.f32 %v16206_v4, %v4802_v47  ;;  %v16444_v56 = vpop.permute.xlu1 %5069  ;;  %v5218_v4 = vadd.f32 %v5217_v9, %v5171_v6  ;;  %v5162_v9 = vadd.f32 %v16307_v36, %v16437_v35 }
 0x838   :  { %v4799_v33 = vadd.f32 %v16231_v38, %v4500_v63  ;;  %v5221_v38 = vadd.f32 %v5220_v30, %v5174_v18  ;;  %v4896_v23 = vadd.f32 %v16214_v51, %v4849_v24  ;;  %v5215_v30 = vadd.f32 %v16355_v53, %v5168_v45  ;;  %v16462_v53 = vpop.f32.mrf.mxu1 }
 0x839   :  { %v5265_v10 = vadd.f32 %v5264_v27, %v5218_v4  ;;  %v5159_v51 = vadd.f32 %v16291_v48, %v16444_v56  ;;  %v5209_v36 = vadd.f32 %v16343_v39, %v5162_v9  ;;  %v18970_v9 = vld [vmem:[#allocation64_spill] sm:$0xff] }
 0x83a   :  { %v16409_v34 = vpop.f32.mrf.mxu2  ;;  %v4846_v52 = vadd.f32 %v16184_v42, %v4799_v33  ;;  %v4899_v42 = vadd.f32 %v16229_v49, %v4852_v11  ;;  %v5262_v60 = vadd.f32 %v5261_v40, %v5215_v30  ;;  %v4890_v49 = vadd.f32 %v16166_v29, %v4843_v8 }
 0x83b   :  { %18955 = vst [vmem:[#allocation97_spill] sm:$0xff] %v16409_v34  ;;  %v5156_v40 = vadd.f32 %v16279_v25, %v16467_v57  ;;  %v5206_v48 = vadd.f32 %v16335_v0, %v5159_v51  ;;  %v5256_v33 = vadd.f32 %v16379_v31, %v5209_v36  ;;  %v5200_v31 = vadd.f32 %v16319_v55, %v5153_v12  ;;  %v18966_v55 = vld [vmem:[#allocation12_spill] sm:$0xff] }
 0x83c   :  { %v5426_v29 = vadd.f32 %v5262_v60, %v4890_v49  ;;  %v18972_v60 = vld [vmem:[#allocation20_spill] sm:$0xff]  ;;  %v18974_v49 = vld [vmem:[#allocation106_spill] sm:$0xff] }
 0x83d   :  { %v5253_v24 = vadd.f32 %v16373_v5, %v5206_v48  ;;  %v5422_v41 = vadd.f32 %v5256_v33, %v16197_v62  ;;  %v18963_v5 = vld [vmem:[#allocation43_spill] sm:$0xff]  ;;  %v18973_v51 = vld [vmem:[#allocation28_spill] sm:$0xff] }
 0x83e   :  { %v5267_v34 = vpop.f32.mrf.mxu3  ;;  %v16479_v39 = vpop.permute.xlu1 %5054  ;;  %v5446_v44 = vmax.f32 %v5426_v29, 0.0  ;;  %v5247_v4 = vadd.f32 %v18963_v5, %v5200_v31  ;;  %v18967_v62 = vld [vmem:[#allocation111_spill] sm:$0xff]  ;;  %v4594_v36 = vadd.f32 %v18974_v49, %v18973_v51  ;;  %v18977_v29 = vld [vmem:[#allocation44_spill] sm:$0xff] }
 0x83f   :  { %v5268_v46 = vadd.f32 %v5267_v34, %v5221_v38  ;;  %v4893_v34 = vadd.f32 %v16188_v21, %v4846_v52  ;;  %v5259_v21 = vadd.f32 %v16387_v15, %v5212_v7  ;;  %v5203_v15 = vadd.f32 %v16327_v32, %v5156_v40  ;;  %v5314_v38 = vpop.f32.mrf.mxu0  ;;  %v18962_v32 = vld [vmem:[#allocation45_spill] sm:$0xff]  ;;  %v18976_v40 = vld [vmem:[#allocation52_spill] sm:$0xff] }
 0x840   :  { %v5150_v0 = vadd.f32 %v16250_v3, %v16479_v39  ;;  %v5361_v8 = vpop.f32.mrf.mxu1  ;;  %v18965_v3 = vld [vmem:[#allocation53_spill] sm:$0xff]  ;;  %v5315_v31 = vadd.f32 %v5314_v38, %v16403_v20  ;;  %v18985_v38 = vld [vmem:[#allocation51_spill] sm:$0xff] }
 0x841   :  { %v5430_v14 = vadd.f32 %v5268_v46, %v4896_v23  ;;  %v5428_v47 = vadd.f32 %v5265_v10, %v4893_v34  ;;  %v5424_v25 = vadd.f32 %v5259_v21, %v16212_v59  ;;  %v5250_v6 = vadd.f32 %v16369_v16, %v5203_v15  ;;  %v18964_v59 = vld [vmem:[#allocation8_spill] sm:$0xff]  ;;  %v18968_v10 = vld [vmem:[#allocation2_spill] sm:$0xff]  ;;  %v18971_v34 = vld [vmem:[#allocation109_spill] sm:$0xff] }
 0x842   :  { %v16435_v13 = vpop.f32.mrf.mxu2  ;;  %v5197_v45 = vadd.f32 %v18962_v32, %v5150_v0  ;;  %v5442_v16 = vmax.f32 %v5422_v41, 0.0  ;;  %v4600_v7 = vadd.f32 %v18971_v34, %v18970_v9  ;;  %v18975_v21 = vld [vmem:[#allocation16_spill] sm:$0xff]  ;;  %v16513_v32 = vld [vmem:[%s18160_s8] sm:$0xff]  ;;  %v18989_v9 = vld [vmem:[#allocation13_spill] sm:$0xff] }
 0x843   :  { %v5450_v18 = vmax.f32 %v5430_v14, 0.0  ;;  %v5448_v11 = vmax.f32 %v5428_v47, 0.0  ;;  %v5444_v46 = vmax.f32 %v5424_v25, 0.0  ;;  %v5418_v23 = vadd.f32 %v5250_v6, %v18966_v55  ;;  %v18979_v15 = vld [vmem:[#allocation24_spill] sm:$0xff]  ;;  %v18981_v6 = vld [vmem:[#allocation21_spill] sm:$0xff] }
 0x844   :  { %v5244_v17 = vadd.f32 %v18965_v3, %v5197_v45  ;;  %v4647_v48 = vadd.f32 %v18976_v40, %v4600_v7  ;;  %v18982_v45 = vld [vmem:[#allocation110_spill] sm:$0xff]  ;;  %v18990_v34 = vld [vmem:[#allocation89_spill] sm:$0xff] }
 0x846   :  { %v5270_v63 = vpop.f32.mrf.mxu3  ;;  %v5414_v14 = vadd.f32 %v5244_v17, %v18972_v60  ;;  %v4946_v41 = vadd.f32 %v18981_v6, %v4647_v48  ;;  %v5312_v17 = vadd.f32 %v16454_v22, %v16405_v37 }
 0x847   :  { %v5271_v50 = vadd.f32 %v5270_v63, %v5224_v43  ;;  %v5420_v43 = vadd.f32 %v5253_v24, %v18964_v59  ;;  %v5416_v63 = vadd.f32 %v5247_v4, %v18967_v62  ;;  %v4641_v24 = vadd.f32 %v18979_v15, %v4594_v36  ;;  %v5317_v25 = vpop.f32.mrf.mxu0  ;;  %v18983_v4 = vld [vmem:[#allocation83_spill] sm:$0xff] }
 0x848   :  { %v5364_v3 = vpop.f32.mrf.mxu1  ;;  %v5318_v20 = vadd.f32 %v5317_v25, %v16395_v26  ;;  %v4993_v55 = vadd.f32 %v18985_v38, %v4946_v41  ;;  %v18988_v26 = vld [vmem:[#allocation33_spill] sm:$0xff]  ;;  %v18999_v15 = vld [vmem:[#allocation95_spill] sm:$0xff] }
 0x849   :  { %v5432_v54 = vadd.f32 %v5271_v50, %v4899_v42  ;;  %v5440_v30 = vmax.f32 %v5420_v43, 0.0  ;;  %v18969_v42 = vld [vmem:[#allocation108_spill] sm:$0xff]  ;;  %v5436_v33 = vmax.f32 %v5416_v63, 0.0  ;;  %v4940_v59 = vadd.f32 %v18983_v4, %v4641_v24  ;;  %v18984_v43 = vld [vmem:[#allocation85_spill] sm:$0xff]  ;;  %v18987_v63 = vld [vmem:[#allocation94_spill] sm:$0xff] }
 0x84a   :  { %v16465_v27 = vpop.f32.mrf.mxu2  ;;  %v4597_v50 = vadd.f32 %v18969_v42, %v18968_v10  ;;  %v5309_v10 = vadd.f32 %v16422_v61, %v16411_v1  ;;  %v5359_v42 = vadd.f32 %v16462_v53, %v5312_v17  ;;  %v5306_v22 = vadd.f32 %v18988_v26, %v16430_v19  ;;  %v18992_v1 = vld [vmem:[#allocation27_spill] sm:$0xff]  ;;  %v18993_v53 = vld [vmem:[#allocation68_spill] sm:$0xff]  ;;  %v18996_v19 = vld [vmem:[#allocation49_spill] sm:$0xff] }
 0x84b   :  { %v5452_v58 = vmax.f32 %v5432_v54, 0.0  ;;  %v5438_v54 = vmax.f32 %v5418_v23, 0.0  ;;  %v5362_v23 = vadd.f32 %v5361_v8, %v5315_v31  ;;  %v5303_v61 = vadd.f32 %v18992_v1, %v16437_v35  ;;  %v18998_v35 = vld [vmem:[#allocation62_spill] sm:$0xff]  ;;  %v19000_v25 = vld [vmem:[#allocation81_spill] sm:$0xff]  ;;  %v19004_v4 = vld [vmem:[#allocation67_spill] sm:$0xff] }
 0x84c   :  { %v4644_v47 = vadd.f32 %v18975_v21, %v4597_v50  ;;  %v5365_v50 = vadd.f32 %v5364_v3, %v5318_v20  ;;  %v18994_v21 = vld [vmem:[#allocation77_spill] sm:$0xff]  ;;  %v5353_v48 = vadd.f32 %v18996_v19, %v5306_v22  ;;  %v4978_v24 = vadd.f32 %v18999_v15, %v18998_v35  ;;  %v19023_v19 = vld [vmem:[#allocation6_spill] sm:$0xff]  ;;  %v19026_v15 = vld [vmem:[#allocation115_spill] sm:$0xff] }
 0x84d   :  { %5580 = vmatpush.msrb.mxu3 %v5452_v58  ;;  %v19007_v17 = vld [vmem:[#allocation97_spill] sm:$0xff] }
 0x84e   :  { %v5400_v6 = vadd.f32 %v16435_v13, %v5353_v48 }
 0x84f   :  { %5581 = vmatpush.msrb.mxu3 %v5450_v18  ;;  %v18978_v18 = vld [vmem:[#allocation105_spill] sm:$0xff] }
 0x850   :  { %v4591_v12 = vadd.f32 %v18978_v18, %v18977_v29 }
 0x851   :  { %5582 = vmatpush.msrb.mxu3 %v5448_v11  ;;  %v18980_v11 = vld [vmem:[#allocation100_spill] sm:$0xff] }
 0x852   :  { %v5405_v52 = vpop.f32.mrf.mxu2  ;;  %v4943_v0 = vadd.f32 %v18980_v11, %v4644_v47  ;;  %v4638_v5 = vadd.f32 %v18982_v45, %v4591_v12  ;;  %v4981_v47 = vadd.f32 %v18994_v21, %v18993_v53  ;;  %v5456_v53 = vld [vmem:[%s18160_s8 + $0x10] sm:$0xff]  ;;  %v19020_v21 = vld [vmem:[#allocation50_spill] sm:$0xff] }
 0x853   :  { %5583 = vmatpush.msrb.mxu3 %v5446_v44  ;;  %v5434_v44 = vmax.f32 %v5414_v14, 0.0  ;;  %v5356_v14 = vadd.f32 %v16428_v28, %v5309_v10  ;;  %v5406_v49 = vadd.f32 %v5405_v52, %v5359_v42  ;;  %v16545_v28 = vld [vmem:[%s18160_s8 + $0x8] sm:$0xff]  ;;  %v18997_v52 = vld [vmem:[#allocation54_spill] sm:$0xff] }
 0x854   :  { %v5300_v12 = vadd.f32 %v18997_v52, %v16444_v56  ;;  %v19006_v56 = vld [vmem:[#allocation102_spill] sm:$0xff] }
 0x855   :  { %5584 = vmatpush.msrb.mxu3 %v5444_v46  ;;  %v4990_v46 = vadd.f32 %v18984_v43, %v4943_v0  ;;  %v19001_v0 = vld [vmem:[#allocation57_spill] sm:$0xff]  ;;  %v19012_v10 = vld [vmem:[#allocation14_spill] sm:$0xff] }
 0x856   :  { %v5350_v31 = vadd.f32 %v19001_v0, %v5303_v61  ;;  %v19005_v43 = vld [vmem:[#allocation73_spill] sm:$0xff]  ;;  %v5347_v3 = vadd.f32 %v19006_v56, %v5300_v12  ;;  %v19025_v12 = vld [vmem:[#allocation71_spill] sm:$0xff] }
 0x857   :  { %5585 = vmatpush.msrb.mxu3 %v5442_v16  ;;  %v18986_v16 = vld [vmem:[#allocation74_spill] sm:$0xff]  ;;  %v5037_v7 = vadd.f32 %v18990_v34, %v4990_v46  ;;  %v5028_v46 = vadd.f32 %v19005_v43, %v4981_v47  ;;  %v19015_v34 = vld [vmem:[#allocation112_spill] sm:$0xff]  ;;  %v19021_v47 = vld [vmem:[#allocation79_spill] sm:$0xff] }
 0x858   :  { %v4937_v62 = vadd.f32 %v18986_v16, %v4638_v5  ;;  %v19003_v5 = vld [vmem:[#allocation31_spill] sm:$0xff]  ;;  %v5397_v20 = vadd.f32 %v19007_v17, %v5350_v31  ;;  %v19010_v16 = vld [vmem:[#allocation36_spill] sm:$0xff]  ;;  %v19027_v0 = vld [vmem:[#allocation65_spill] sm:$0xff] }
 0x859   :  { %5586 = vmatpush.msrb.mxu3 %v5440_v30  ;;  %v4987_v30 = vadd.f32 %v18987_v63, %v4940_v59  ;;  %v4975_v59 = vadd.f32 %v19004_v4, %v19003_v5  ;;  %v19011_v63 = vld [vmem:[#allocation91_spill] sm:$0xff]  ;;  %v5425_v26 = vadd.f32 %v5400_v6, %v5028_v46  ;;  %v5462_v46 = vld [vmem:[%s18160_s8 + $0x40] sm:$0xff]  ;;  %v5465_v17 = vld [vmem:[%s18160_s8 + $0x58] sm:$0xff] }
 0x85a   :  { %v5408_v58 = vpop.f32.mrf.mxu2  ;;  %v4984_v8 = vadd.f32 %v18989_v9, %v4937_v62  ;;  %v19014_v9 = vld [vmem:[#allocation17_spill] sm:$0xff]  ;;  %v5459_v43 = vld [vmem:[%s18160_s8 + $0x28] sm:$0xff] }
 0x85b   :  { %5587 = vmatpush.msrb.mxu3 %v5438_v54  ;;  %v5409_v37 = vadd.f32 %v5408_v58, %v5362_v23  ;;  %v18991_v54 = vld [vmem:[#allocation47_spill] sm:$0xff]  ;;  %v18995_v58 = vld [vmem:[#allocation92_spill] sm:$0xff]  ;;  %v5445_v52 = vmax.f32 %v5425_v26, 0.0 }
 0x85c   :  { %v5040_v51 = vadd.f32 %v18991_v54, %v4993_v55  ;;  %v5034_v40 = vadd.f32 %v18995_v58, %v4987_v30  ;;  %v5031_v11 = vadd.f32 %v19000_v25, %v4984_v8  ;;  %v19008_v55 = vld [vmem:[#allocation25_spill] sm:$0xff]  ;;  %v5025_v30 = vadd.f32 %v19011_v63, %v4978_v24  ;;  %v19022_v58 = vld [vmem:[#allocation10_spill] sm:$0xff]  ;;  %v5463_v56 = vld [vmem:[%s18160_s8 + $0x48] sm:$0xff] }
 0x85d   :  { %5588 = vmatpush.msrb.mxu3 %v5436_v33  ;;  %v5403_v33 = vadd.f32 %v16465_v27, %v5356_v14  ;;  %v5431_v29 = vadd.f32 %v5409_v37, %v5037_v7  ;;  %v5294_v23 = vadd.f32 %v19008_v55, %v16473_v2  ;;  %v5291_v8 = vadd.f32 %v19014_v9, %v16479_v39  ;;  %v19016_v7 = vld [vmem:[#allocation32_spill] sm:$0xff]  ;;  %v19017_v2 = vld [vmem:[#allocation87_spill] sm:$0xff]  ;;  %v19018_v54 = vld [vmem:[#allocation29_spill] sm:$0xff] }
 0x85e   :  { %v5429_v27 = vadd.f32 %v5406_v49, %v5034_v40  ;;  %v5022_v14 = vadd.f32 %v19017_v2, %v4975_v59  ;;  %v19019_v49 = vld [vmem:[#allocation9_spill] sm:$0xff]  ;;  %v5423_v1 = vadd.f32 %v5397_v20, %v5025_v30  ;;  %v4966_v39 = vadd.f32 %v19021_v47, %v19020_v21  ;;  %v5458_v59 = vld [vmem:[%s18160_s8 + $0x20] sm:$0xff]  ;;  %v5472_v63 = vld [vmem:[%s18160_s8 + $0x90] sm:$0xff] }
 0x85f   :  { %5589 = vmatpush.msrb.mxu3 %v5434_v44  ;;  %v19002_v44 = vld [vmem:[#allocation103_spill] sm:$0xff]  ;;  %v5427_v38 = vadd.f32 %v5403_v33, %v5031_v11  ;;  %v5451_v13 = vmax.f32 %v5431_v29, 0.0  ;;  %v5338_v48 = vadd.f32 %v19023_v19, %v5291_v8  ;;  %v5466_v20 = vld [vmem:[%s18160_s8 + $0x60] sm:$0xff]  ;;  %v5469_v55 = vld [vmem:[%s18160_s8 + $0x78] sm:$0xff] }
 0x860   :  { %9120 = vmatmul.msk.f32.vlgmr.msrb.gmra.mxu3 %vm151_vm0, %v16513_v32  ;;  %v5297_v45 = vadd.f32 %v19002_v44, %v16467_v57  ;;  %v19009_v57 = vld [vmem:[#allocation101_spill] sm:$0xff]  ;;  %v5449_v22 = vmax.f32 %v5429_v27, 0.0  ;;  %v19024_v33 = vld [vmem:[#allocation3_spill] sm:$0xff]  ;;  %v5443_v11 = vmax.f32 %v5423_v1, 0.0  ;;  %v5013_v31 = vadd.f32 %v19027_v0, %v4966_v39  ;;  %v9192_v9 = vld [vmem:[%s18161_s9 + $0x100] sm:$0xff] }
 0x861   :  { %v4972_v62 = vadd.f32 %v19010_v16, %v19009_v57  ;;  %v5447_v61 = vmax.f32 %v5427_v38, 0.0  ;;  %v5385_v24 = vadd.f32 %v19026_v15, %v5338_v48  ;;  %v5467_v38 = vld [vmem:[%s18160_s8 + $0x68] sm:$0xff]  ;;  %v9191_v8 = vld [vmem:[%s18161_s9 + $0xf8] sm:$0xff]  ;;  %v9182_v21 = vld [vmem:[%s18161_s9 + $0xb0] sm:$0xff] }
 0x862   :  { %v5411_v60 = vpop.f32.mrf.mxu2  ;;  %v5344_v42 = vadd.f32 %v19012_v10, %v5297_v45  ;;  %v5457_v45 = vld [vmem:[%s18160_s8 + $0x18] sm:$0xff]  ;;  %v5471_v16 = vld [vmem:[%s18160_s8 + $0x88] sm:$0xff] }
 0x863   :  { %v5412_v36 = vadd.f32 %v5411_v60, %v5365_v50  ;;  %v19013_v50 = vld [vmem:[#allocation114_spill] sm:$0xff]  ;;  %v4969_v60 = vadd.f32 %v19016_v7, %v19015_v34  ;;  %v5019_v40 = vadd.f32 %v19022_v58, %v4972_v62  ;;  %v9195_v10 = vld [vmem:[%s18161_s9 + $0x118] sm:$0xff]  ;;  %v9193_v26 = vld [vmem:[%s18161_s9 + $0x108] sm:$0xff] }
 0x864   :  { %v5394_v37 = vadd.f32 %v19013_v50, %v5347_v3  ;;  %v5464_v3 = vld [vmem:[%s18160_s8 + $0x50] sm:$0xff]  ;;  %v5473_v50 = vld [vmem:[%s18160_s8 + $0x98] sm:$0xff]  ;;  %5860 = vmatpush.msra.mxu1 %v9195_v10  ;;  %v9181_v39 = vld [vmem:[%s18161_s9 + $0xa8] sm:$0xff] }
 0x865   :  { %v5433_v18 = vadd.f32 %v5412_v36, %v5040_v51  ;;  %v5341_v51 = vadd.f32 %v19018_v54, %v5294_v23  ;;  %v5391_v36 = vadd.f32 %v19019_v49, %v5344_v42  ;;  %v5016_v35 = vadd.f32 %v19025_v12, %v4969_v60  ;;  %v5470_v23 = vld [vmem:[%s18160_s8 + $0x80] sm:$0xff]  ;;  %v9194_v42 = vld [vmem:[%s18161_s9 + $0x110] sm:$0xff]  ;;  %v9189_v60 = vld [vmem:[%s18161_s9 + $0xe8] sm:$0xff] }
 0x866   :  { %5861 = vmatpush.msra.mxu1 %v9194_v42  ;;  %v9190_v34 = vld [vmem:[%s18161_s9 + $0xf0] sm:$0xff]  ;;  %v9187_v54 = vld [vmem:[%s18161_s9 + $0xd8] sm:$0xff] }
 0x867   :  { %v5453_v41 = vmax.f32 %v5433_v18, 0.0  ;;  %v5388_v29 = vadd.f32 %v19024_v33, %v5341_v51  ;;  %v5421_v18 = vadd.f32 %v5394_v37, %v5022_v14  ;;  %v5419_v25 = vadd.f32 %v5391_v36, %v5019_v40  ;;  %v9188_v14 = vld [vmem:[%s18161_s9 + $0xe0] sm:$0xff]  ;;  %v9186_v51 = vld [vmem:[%s18161_s9 + $0xd0] sm:$0xff]  ;;  %v9185_v36 = vld [vmem:[%s18161_s9 + $0xc8] sm:$0xff] }
 0x868   :  { %9121 = vmatmul.msk.f32.gmra.mxu3 %vm151_vm0, %v16545_v28  ;;  %5862 = vmatpush.msra.mxu1 %v9193_v26  ;;  %v9180_v40 = vld [vmem:[%s18161_s9 + $0xa0] sm:$0xff]  ;;  %v9198_v12 = vld [vmem:[%s18161_s9 + $0x130] sm:$0xff] }
 0x869   :  { %5687 = vmatpush.msra.mxu0 %v5453_v41  ;;  %9563 = vmatpush.msrb.mxu2 %v5453_v41  ;;  %v5417_v6 = vadd.f32 %v5388_v29, %v5016_v35  ;;  %v5441_v27 = vmax.f32 %v5421_v18, 0.0  ;;  %v5415_v41 = vadd.f32 %v5385_v24, %v5013_v31  ;;  %v5439_v44 = vmax.f32 %v5419_v25, 0.0  ;;  %v16758_v29 = vld [vmem:[%s18160_s8 + $0xe8] sm:$0xff]  ;;  %v9196_v24 = vld [vmem:[%s18161_s9 + $0x120] sm:$0xff]  ;;  %v5794_v10 = vld [vmem:[%s18161_s9 + $0x30] sm:$0xff] }
 0x86a   :  { %5863 = vmatpush.msra.mxu1 %v9192_v9  ;;  %v9197_v35 = vld [vmem:[%s18161_s9 + $0x128] sm:$0xff]  ;;  %v5792_v9 = vld [vmem:[%s18161_s9 + $0x20] sm:$0xff] }
 0x86b   :  { %5688 = vmatpush.msra.mxu0 %v5451_v13  ;;  %9564 = vmatpush.msrb.mxu2 %v5451_v13  ;;  %v5437_v5 = vmax.f32 %v5417_v6, 0.0  ;;  %v5435_v4 = vmax.f32 %v5415_v41, 0.0  ;;  %v5468_v13 = vld [vmem:[%s18160_s8 + $0x70] sm:$0xff]  ;;  %v5475_v6 = vld [vmem:[%s18160_s8 + $0xa8] sm:$0xff] }
 0x86c   :  { %5864 = vmatpush.msra.mxu1 %v9191_v8  ;;  %v5791_v8 = vld [vmem:[%s18161_s9 + $0x18] sm:$0xff] }
 0x86d   :  { %5689 = vmatpush.msra.mxu0 %v5449_v22  ;;  %9565 = vmatpush.msrb.mxu2 %v5449_v22 }
 0x86e   :  { %5865 = vmatpush.msra.mxu1 %v9190_v34  ;;  %v5480_v34 = vld [vmem:[%s18160_s8 + $0xd0] sm:$0xff] }
 0x86f   :  { %5690 = vmatpush.msra.mxu0 %v5447_v61  ;;  %9566 = vmatpush.msrb.mxu2 %v5447_v61  ;;  %v9184_v61 = vld [vmem:[%s18161_s9 + $0xc0] sm:$0xff] }
 0x870   :  { %9122 = vmatmul.msk.f32.gmra.mxu3 %vm151_vm0, %v5456_v53  ;;  %5866 = vmatpush.msra.mxu1 %v9189_v60  ;;  %v5790_v60 = vld [vmem:[%s18161_s9 + $0x10] sm:$0xff] }
 0x871   :  { %5691 = vmatpush.msra.mxu0 %v5445_v52  ;;  %9567 = vmatpush.msrb.mxu2 %v5445_v52  ;;  %v9199_v52 = vld [vmem:[%s18161_s9 + $0x138] sm:$0xff] }
 0x872   :  { %5867 = vmatpush.msra.mxu1 %v9188_v14 }
 0x873   :  { %5692 = vmatpush.msra.mxu0 %v5443_v11  ;;  %9568 = vmatpush.msrb.mxu2 %v5443_v11  ;;  %v5474_v11 = vld [vmem:[%s18160_s8 + $0xa0] sm:$0xff] }
 0x874   :  { %5868 = vmatpush.msra.mxu1 %v9187_v54  ;;  %v5789_v54 = vld [vmem:[%s18161_s9 + $0x8] sm:$0xff] }
 0x875   :  { %5693 = vmatpush.msra.mxu0 %v5441_v27  ;;  %9569 = vmatpush.msrb.mxu2 %v5441_v27 }
 0x876   :  { %5869 = vmatpush.msra.mxu1 %v9186_v51  ;;  %v5788_v51 = vld [vmem:[%s18161_s9] sm:$0xff] }
 0x877   :  { %5694 = vmatpush.msra.mxu0 %v5439_v44  ;;  %9570 = vmatpush.msrb.mxu2 %v5439_v44  ;;  %v5476_v44 = vld [vmem:[%s18160_s8 + $0xb0] sm:$0xff] }
 0x878   :  { %9123 = vmatmul.msk.f32.gmra.mxu3 %vm151_vm0, %v5457_v45  ;;  %5870 = vmatpush.msra.mxu1 %v9185_v36 }
 0x879   :  { %5695 = vmatpush.msra.mxu0 %v5437_v5  ;;  %9571 = vmatpush.msrb.mxu2 %v5437_v5 }
 0x87a   :  { %5871 = vmatpush.msra.mxu1 %v9184_v61  ;;  %v5481_v61 = vld [vmem:[%s18160_s8 + $0xd8] sm:$0xff] }
 0x87b   :  { %5696 = vmatpush.msra.mxu0 %v5435_v4  ;;  %9572 = vmatpush.msrb.mxu2 %v5435_v4  ;;  %v5803_v4 = vld [vmem:[%s18161_s9 + $0x78] sm:$0xff] }
 0x87c   :  { %9150 = vmatmul.msk.f32.vlgmr.msra.gmra.mxu0 %vm151_vm0, %v16513_v32  ;;  %v5460_v32 = vld [vmem:[%s18160_s8 + $0x30] sm:$0xff]  ;;  %9179 = vmatmul.msk.f32.vlgmr.msrb.gmra.mxu2 %vm151_vm0, %v16758_v29 }
 0x87d   :  { %5919 = vmatpush.msra.mxu2 %v9199_v52  ;;  %v5807_v52 = vld [vmem:[%s18161_s9 + $0x98] sm:$0xff] }
 0x87f   :  { %5920 = vmatpush.msra.mxu2 %v9198_v12 }
 0x880   :  { %9124 = vmatmul.msk.f32.gmra.mxu3 %vm151_vm0, %v5458_v59 }
 0x881   :  { %5921 = vmatpush.msra.mxu2 %v9197_v35  ;;  %v5806_v35 = vld [vmem:[%s18161_s9 + $0x90] sm:$0xff] }
 0x883   :  { %5922 = vmatpush.msra.mxu2 %v9196_v24  ;;  %v5805_v24 = vld [vmem:[%s18161_s9 + $0x88] sm:$0xff] }
 0x884   :  { %9151 = vmatmul.msk.f32.gmra.mxu0 %vm151_vm0, %v16545_v28  ;;  %v5461_v28 = vld [vmem:[%s18160_s8 + $0x38] sm:$0xff] }
 0x885   :  { %6064 = vmatpush.msrb.mxu2 %v5807_v52 }
 0x887   :  { %6065 = vmatpush.msrb.mxu2 %v5806_v35 }
 0x888   :  { %9125 = vmatmul.msk.f32.gmra.mxu3 %vm151_vm0, %v5459_v43 }
 0x889   :  { %6066 = vmatpush.msrb.mxu2 %v5805_v24 }
 0x88c   :  { %9152 = vmatmul.msk.f32.gmra.mxu0 %vm151_vm0, %v5456_v53  ;;  %v9183_v53 = vld [vmem:[%s18161_s9 + $0xb8] sm:$0xff] }
 0x88d   :  { %5872 = vmatpush.msra.mxu1 %v9183_v53 }
 0x88f   :  { %5873 = vmatpush.msra.mxu1 %v9182_v21 }
 0x890   :  { %9126 = vmatmul.msk.f32.gmra.mxu3 %vm151_vm0, %v5460_v32 }
 0x891   :  { %5874 = vmatpush.msra.mxu1 %v9181_v39  ;;  %v5482_v39 = vld [vmem:[%s18160_s8 + $0xe0] sm:$0xff] }
 0x893   :  { %5875 = vmatpush.msra.mxu1 %v9180_v40 }
 0x894   :  { %9153 = vmatmul.msk.f32.gmra.mxu0 %vm151_vm0, %v5457_v45 }
 0x895   :  { %6005 = vmatpush.msrb.mxu1 %v5803_v4  ;;  %v9224_v4 = vld [vmem:[%s18161_s9 + $0x1b0] sm:$0xff] }
 0x898   :  { %9127 = vmatmul.msk.f32.gmra.mxu3 %vm151_vm0, %v5461_v28 }
 0x89c   :  { %9154 = vmatmul.msk.f32.gmra.mxu0 %vm151_vm0, %v5458_v59  ;;  %v5802_v59 = vld [vmem:[%s18161_s9 + $0x70] sm:$0xff] }
 0x89d   :  { %6006 = vmatpush.msrb.mxu1 %v5802_v59  ;;  %v9220_v59 = vld [vmem:[%s18161_s9 + $0x190] sm:$0xff] }
 0x8a0   :  { %9128 = vmatmul.msk.f32.gmra.mxu3 %vm151_vm0, %v5462_v46 }
 0x8a4   :  { %9155 = vmatmul.msk.f32.gmra.mxu0 %vm151_vm0, %v5459_v43  ;;  %v5477_v43 = vld [vmem:[%s18160_s8 + $0xb8] sm:$0xff] }
 0x8a8   :  { %9129 = vmatmul.msk.f32.gmra.mxu3 %vm151_vm0, %v5463_v56 }
 0x8ac   :  { %9156 = vmatmul.msk.f32.gmra.mxu0 %vm151_vm0, %v5460_v32 }
 0x8b0   :  { %9130 = vmatmul.msk.f32.gmra.mxu3 %vm151_vm0, %v5464_v3 }
 0x8b4   :  { %9157 = vmatmul.msk.f32.gmra.mxu0 %vm151_vm0, %v5461_v28  ;;  %v5801_v28 = vld [vmem:[%s18161_s9 + $0x68] sm:$0xff] }
 0x8b5   :  { %6007 = vmatpush.msrb.mxu1 %v5801_v28  ;;  %v9213_v28 = vld [vmem:[%s18161_s9 + $0x158] sm:$0xff] }
 0x8b8   :  { %9131 = vmatmul.msk.f32.gmra.mxu3 %vm151_vm0, %v5465_v17 }
 0x8bc   :  { %9158 = vmatmul.msk.f32.gmra.mxu0 %vm151_vm0, %v5462_v46 }
 0x8c0   :  { %9132 = vmatmul.msk.f32.gmra.mxu3 %vm151_vm0, %v5466_v20 }
 0x8c4   :  { %9159 = vmatmul.msk.f32.gmra.mxu0 %vm151_vm0, %v5463_v56  ;;  %v5800_v56 = vld [vmem:[%s18161_s9 + $0x60] sm:$0xff] }
 0x8c5   :  { %6008 = vmatpush.msrb.mxu1 %v5800_v56 }
 0x8c8   :  { %9133 = vmatmul.msk.f32.gmra.mxu3 %vm151_vm0, %v5467_v38 }
 0x8cc   :  { %9160 = vmatmul.msk.f32.gmra.mxu0 %vm151_vm0, %v5464_v3  ;;  %v5799_v3 = vld [vmem:[%s18161_s9 + $0x58] sm:$0xff] }
 0x8cd   :  { %6009 = vmatpush.msrb.mxu1 %v5799_v3 }
 0x8d0   :  { %9134 = vmatmul.msk.f32.gmra.mxu3 %vm151_vm0, %v5468_v13 }
 0x8d4   :  { %9161 = vmatmul.msk.f32.gmra.mxu0 %vm151_vm0, %v5465_v17  ;;  %v5478_v17 = vld [vmem:[%s18160_s8 + $0xc0] sm:$0xff] }
 0x8d8   :  { %9135 = vmatmul.msk.f32.gmra.mxu3 %vm151_vm0, %v5469_v55 }
 0x8dc   :  { %9162 = vmatmul.msk.f32.gmra.mxu0 %vm151_vm0, %v5466_v20  ;;  %v5798_v20 = vld [vmem:[%s18161_s9 + $0x50] sm:$0xff] }
 0x8dd   :  { %6010 = vmatpush.msrb.mxu1 %v5798_v20 }
 0x8e0   :  { %9136 = vmatmul.msk.f32.gmra.mxu3 %vm151_vm0, %v5470_v23 }
 0x8e3   :  { %v16660_v57 = vpop.f32.mrf.mxu3 }
 0x8e4   :  { %9163 = vmatmul.msk.f32.gmra.mxu0 %vm151_vm0, %v5467_v38 }
 0x8e8   :  { %9137 = vmatmul.msk.f32.gmra.mxu3 %vm151_vm0, %v5471_v16 }
 0x8eb   :  { %v16667_v62 = vpop.f32.mrf.mxu3 }
 0x8ec   :  { %9164 = vmatmul.msk.f32.gmra.mxu0 %vm151_vm0, %v5468_v13  ;;  %v5797_v13 = vld [vmem:[%s18161_s9 + $0x48] sm:$0xff] }
 0x8ed   :  { %6011 = vmatpush.msrb.mxu1 %v5797_v13  ;;  %v9226_v13 = vld [vmem:[%s18161_s9 + $0x1c0] sm:$0xff] }
 0x8f0   :  { %9138 = vmatmul.msk.f32.gmra.mxu3 %vm151_vm0, %v5472_v63 }
 0x8f3   :  { %v16674_v30 = vpop.f32.mrf.mxu3 }
 0x8f4   :  { %9165 = vmatmul.msk.f32.gmra.mxu0 %vm151_vm0, %v5469_v55 }
 0x8f8   :  { %9139 = vmatmul.msk.f32.gmra.mxu3 %vm151_vm0, %v5473_v50 }
 0x8f9   :  { %v16687_v37 = vpop.f32.mrf.mxu0 }
 0x8fb   :  { %v16692_v22 = vpop.f32.mrf.mxu3 }
 0x8fc   :  { %9166 = vmatmul.msk.f32.gmra.mxu0 %vm151_vm0, %v5470_v23  ;;  %v5796_v23 = vld [vmem:[%s18161_s9 + $0x40] sm:$0xff] }
 0x8fd   :  { %6012 = vmatpush.msrb.mxu1 %v5796_v23 }
 0x900   :  { %9140 = vmatmul.msk.f32.gmra.mxu3 %vm151_vm0, %v5474_v11 }
 0x901   :  { %v16704_v7 = vpop.f32.mrf.mxu0 }
 0x903   :  { %v16709_v2 = vpop.f32.mrf.mxu3 }
 0x904   :  { %9167 = vmatmul.msk.f32.gmra.mxu0 %vm151_vm0, %v5471_v16  ;;  %v5795_v16 = vld [vmem:[%s18161_s9 + $0x38] sm:$0xff] }
 0x905   :  { %6013 = vmatpush.msrb.mxu1 %v5795_v16 }
 0x907   :  { %6014 = vmatpush.msrb.mxu1 %v5794_v10 }
 0x908   :  { %9141 = vmatmul.msk.f32.gmra.mxu3 %vm151_vm0, %v5475_v6 }
 0x909   :  { %v16721_v49 = vpop.f32.mrf.mxu0 }
 0x90b   :  { %v16726_v1 = vpop.f32.mrf.mxu3 }
 0x90c   :  { %9168 = vmatmul.msk.f32.gmra.mxu0 %vm151_vm0, %v5472_v63  ;;  %v5479_v63 = vld [vmem:[%s18160_s8 + $0xc8] sm:$0xff] }
 0x910   :  { %9142 = vmatmul.msk.f32.gmra.mxu3 %vm151_vm0, %v5476_v44 }
 0x911   :  { %v16738_v47 = vpop.f32.mrf.mxu0 }
 0x913   :  { %v16743_v58 = vpop.f32.mrf.mxu3 }
 0x914   :  { %9169 = vmatmul.msk.f32.gmra.mxu0 %vm151_vm0, %v5473_v50  ;;  %v5793_v50 = vld [vmem:[%s18161_s9 + $0x28] sm:$0xff] }
 0x915   :  { %6015 = vmatpush.msrb.mxu1 %v5793_v50 }
 0x917   :  { %6016 = vmatpush.msrb.mxu1 %v5792_v9 }
 0x918   :  { %9143 = vmatmul.msk.f32.gmra.mxu3 %vm151_vm0, %v5477_v43 }
 0x919   :  { %v16749_v19 = vpop.f32.mrf.mxu0  ;;  %6017 = vmatpush.msrb.mxu1 %v5791_v8 }
 0x91b   :  { %v16751_v48 = vpop.f32.mrf.mxu3  ;;  %6018 = vmatpush.msrb.mxu1 %v5790_v60 }
 0x91c   :  { %9170 = vmatmul.msk.f32.gmra.mxu0 %vm151_vm0, %v5474_v11  ;;  %v5804_v11 = vld [vmem:[%s18161_s9 + $0x80] sm:$0xff] }
 0x91d   :  { %6019 = vmatpush.msrb.mxu1 %v5789_v54  ;;  %6067 = vmatpush.msrb.mxu2 %v5804_v11 }
 0x91f   :  { %6020 = vmatpush.msrb.mxu1 %v5788_v51 }
 0x920   :  { %9144 = vmatmul.msk.f32.gmra.mxu3 %vm151_vm0, %v5478_v17 }
 0x921   :  { %v16753_v33 = vpop.f32.mrf.mxu0 }
 0x923   :  { %v16762_v18 = vpop.f32.mrf.mxu3 }
 0x924   :  { %9171 = vmatmul.msk.f32.gmra.mxu0 %vm151_vm0, %v5475_v6 }
 0x928   :  { %9145 = vmatmul.msk.f32.gmra.mxu3 %vm151_vm0, %v5479_v63 }
 0x929   :  { %v16773_v15 = vpop.f32.mrf.mxu0 }
 0x92b   :  { %v16778_v25 = vpop.f32.mrf.mxu3 }
 0x92c   :  { %9172 = vmatmul.msk.f32.gmra.mxu0 %vm151_vm0, %v5476_v44 }
 0x930   :  { %9146 = vmatmul.msk.f32.gmra.mxu3 %vm151_vm0, %v5480_v34 }
 0x931   :  { %v16785_v0 = vpop.f32.mrf.mxu0 }
 0x933   :  { %v5621_v31 = vpop.f32.mrf.mxu3 }
 0x934   :  { %5876 = vmatmul.f32.vlgmr.msra.gmra.mxu1 %v5621_v31  ;;  %9173 = vmatmul.msk.f32.gmra.mxu0 %vm151_vm0, %v5477_v43  ;;  %v9217_v43 = vld [vmem:[%s18161_s9 + $0x178] sm:$0xff] }
 0x938   :  { %9147 = vmatmul.msk.f32.gmra.mxu3 %vm151_vm0, %v5481_v61 }
 0x939   :  { %v16792_v27 = vpop.f32.mrf.mxu0 }
 0x93b   :  { %v5624_v41 = vpop.f32.mrf.mxu3 }
 0x93c   :  { %5879 = vmatmul.f32.gmra.mxu1 %v5624_v41  ;;  %9174 = vmatmul.msk.f32.gmra.mxu0 %vm151_vm0, %v5478_v17 }
 0x940   :  { %9148 = vmatmul.msk.f32.gmra.mxu3 %vm151_vm0, %v5482_v39 }
 0x941   :  { %v16799_v45 = vpop.f32.mrf.mxu0 }
 0x943   :  { %v5627_v5 = vpop.f32.mrf.mxu3 }
 0x944   :  { %5882 = vmatmul.f32.gmra.mxu1 %v5627_v5  ;;  %9175 = vmatmul.msk.f32.gmra.mxu0 %vm151_vm0, %v5479_v63  ;;  %v9225_v5 = vld [vmem:[%s18161_s9 + $0x1b8] sm:$0xff] }
 0x945   :  { %6189 = vmatpush.msra.mxu1 %v9225_v5 }
 0x947   :  { %6190 = vmatpush.msra.mxu1 %v9224_v4 }
 0x948   :  { %9149 = vmatmul.msk.f32.gmra.mxu3 %vm151_vm0, %v16758_v29 }
 0x949   :  { %v5728_v32 = vpop.f32.mrf.mxu0 }
 0x94a   :  { %9200 = vmatmul.msk.f32.vlgmr.msra.gmra.mxu2 %vm5829_vm2, %v5728_v32  ;;  %v9216_v32 = vld [vmem:[%s18161_s9 + $0x170] sm:$0xff] }
 0x94b   :  { %v5630_v46 = vpop.f32.mrf.mxu3 }
 0x94c   :  { %5885 = vmatmul.f32.gmra.mxu1 %v5630_v46  ;;  %9176 = vmatmul.msk.f32.gmra.mxu0 %vm151_vm0, %v5480_v34  ;;  %v9212_v46 = vld [vmem:[%s18161_s9 + $0x150] sm:$0xff] }
 0x951   :  { %v5731_v38 = vpop.f32.mrf.mxu0 }
 0x952   :  { %9201 = vmatmul.msk.f32.gmra.mxu2 %vm5829_vm2, %v5731_v38  ;;  %v16974_v38 = vpop.f32.mrf.mxu2 }
 0x953   :  { %v5633_v55 = vpop.f32.mrf.mxu3 }
 0x954   :  { %5888 = vmatmul.f32.gmra.mxu1 %v5633_v55  ;;  %9177 = vmatmul.msk.f32.gmra.mxu0 %vm151_vm0, %v5481_v61 }
 0x959   :  { %v5734_v42 = vpop.f32.mrf.mxu0 }
 0x95a   :  { %9202 = vmatmul.msk.f32.gmra.mxu2 %vm5829_vm2, %v5734_v42 }
 0x95b   :  { %v5636_v26 = vpop.f32.mrf.mxu3 }
 0x95c   :  { %5891 = vmatmul.f32.gmra.mxu1 %v5636_v26  ;;  %9178 = vmatmul.msk.f32.gmra.mxu0 %vm151_vm0, %v5482_v39 }
 0x961   :  { %v5737_v14 = vpop.f32.mrf.mxu0 }
 0x962   :  { %9203 = vmatmul.msk.f32.gmra.mxu2 %vm5829_vm2, %v5737_v14 }
 0x963   :  { %v5639_v36 = vpop.f32.mrf.mxu3 }
 0x964   :  { %5894 = vmatmul.f32.gmra.mxu1 %v5639_v36 }
 0x969   :  { %v5740_v53 = vpop.f32.mrf.mxu0 }
 0x96a   :  { %9204 = vmatmul.msk.f32.gmra.mxu2 %vm5829_vm2, %v5740_v53 }
 0x96b   :  { %v5642_v21 = vpop.f32.mrf.mxu3 }
 0x96c   :  { %5897 = vmatmul.f32.gmra.mxu1 %v5642_v21 }
 0x971   :  { %v5743_v40 = vpop.f32.mrf.mxu0 }
 0x972   :  { %9205 = vmatmul.msk.f32.gmra.mxu2 %vm5829_vm2, %v5743_v40 }
 0x973   :  { %v5645_v12 = vpop.f32.mrf.mxu3 }
 0x974   :  { %5900 = vmatmul.f32.gmra.mxu1 %v5645_v12 }
 0x979   :  { %v5746_v31 = vpop.f32.mrf.mxu0 }
 0x97a   :  { %9206 = vmatmul.msk.f32.gmra.mxu2 %vm5829_vm2, %v5746_v31 }
 0x97b   :  { %v5648_v6 = vpop.f32.mrf.mxu3 }
 0x97c   :  { %5903 = vmatmul.f32.gmra.mxu1 %v5648_v6 }
 0x981   :  { %v5749_v41 = vpop.f32.mrf.mxu0 }
 0x982   :  { %9207 = vmatmul.msk.f32.gmra.mxu2 %vm5829_vm2, %v5749_v41 }
 0x983   :  { %v5651_v17 = vpop.f32.mrf.mxu3 }
 0x984   :  { %6021 = vmatmul.f32.vlgmr.msrb.gmra.mxu1 %v16660_v57  ;;  %v9223_v57 = vld [vmem:[%s18161_s9 + $0x1a8] sm:$0xff] }
 0x985   :  { %6191 = vmatpush.msra.mxu1 %v9223_v57 }
 0x989   :  { %v5752_v44 = vpop.f32.mrf.mxu0 }
 0x98a   :  { %9208 = vmatmul.msk.f32.gmra.mxu2 %vm5829_vm2, %v5752_v44 }
 0x98c   :  { %6024 = vmatmul.f32.gmra.mxu1 %v16667_v62  ;;  %v9222_v62 = vld [vmem:[%s18161_s9 + $0x1a0] sm:$0xff] }
 0x98d   :  { %6192 = vmatpush.msra.mxu1 %v9222_v62 }
 0x991   :  { %v5755_v29 = vpop.f32.mrf.mxu0 }
 0x992   :  { %9209 = vmatmul.msk.f32.gmra.mxu2 %vm5829_vm2, %v5755_v29 }
 0x994   :  { %6027 = vmatmul.f32.gmra.mxu1 %v16674_v30  ;;  %v9221_v30 = vld [vmem:[%s18161_s9 + $0x198] sm:$0xff] }
 0x995   :  { %6193 = vmatpush.msra.mxu1 %v9221_v30 }
 0x997   :  { %6194 = vmatpush.msra.mxu1 %v9220_v59 }
 0x999   :  { %v5758_v42 = vpop.f32.mrf.mxu0 }
 0x99a   :  { %9230 = vmatmul.msk.f32.vlgmr.msrb.gmra.mxu2 %vm5829_vm2, %v16687_v37  ;;  %v9219_v37 = vld [vmem:[%s18161_s9 + $0x188] sm:$0xff] }
 0x99b   :  { %6195 = vmatpush.msra.mxu1 %v9219_v37 }
 0x99c   :  { %6030 = vmatmul.f32.gmra.mxu1 %v16692_v22  ;;  %v9218_v22 = vld [vmem:[%s18161_s9 + $0x180] sm:$0xff] }
 0x99d   :  { %6196 = vmatpush.msra.mxu1 %v9218_v22 }
 0x99f   :  { %6197 = vmatpush.msra.mxu1 %v9217_v43 }
 0x9a1   :  { %6198 = vmatpush.msra.mxu1 %v9216_v32  ;;  %v5761_v8 = vpop.f32.mrf.mxu0 }
 0x9a2   :  { %9231 = vmatmul.msk.f32.gmra.mxu2 %vm5829_vm2, %v16704_v7  ;;  %v9215_v7 = vld [vmem:[%s18161_s9 + $0x168] sm:$0xff] }
 0x9a3   :  { %6199 = vmatpush.msra.mxu1 %v9215_v7 }
 0x9a4   :  { %6033 = vmatmul.f32.gmra.mxu1 %v16709_v2  ;;  %v9214_v2 = vld [vmem:[%s18161_s9 + $0x160] sm:$0xff] }
 0x9a5   :  { %6200 = vmatpush.msra.mxu1 %v9214_v2 }
 0x9a7   :  { %6201 = vmatpush.msra.mxu1 %v9213_v28 }
 0x9a9   :  { %6202 = vmatpush.msra.mxu1 %v9212_v46 }
 0x9aa   :  { %9232 = vmatmul.msk.f32.gmra.mxu2 %vm5829_vm2, %v16721_v49  ;;  %v9211_v49 = vld [vmem:[%s18161_s9 + $0x148] sm:$0xff] }
 0x9ab   :  { %6203 = vmatpush.msra.mxu1 %v9211_v49 }
 0x9ac   :  { %6036 = vmatmul.f32.gmra.mxu1 %v16726_v1  ;;  %v9210_v1 = vld [vmem:[%s18161_s9 + $0x140] sm:$0xff] }
 0x9ad   :  { %6204 = vmatpush.msra.mxu1 %v9210_v1 }
 0x9b1   :  { %v5877_v56 = vpop.f32.mrf.mxu1 }
 0x9b2   :  { %9233 = vmatmul.msk.f32.gmra.mxu2 %vm5829_vm2, %v16738_v47  ;;  %v9229_v47 = vld [vmem:[%s18161_s9 + $0x1d8] sm:$0xff] }
 0x9b3   :  { %6248 = vmatpush.msra.mxu2 %v9229_v47 }
 0x9b4   :  { %6039 = vmatmul.f32.gmra.mxu1 %v16743_v58  ;;  %v9228_v58 = vld [vmem:[%s18161_s9 + $0x1d0] sm:$0xff] }
 0x9b5   :  { %6249 = vmatpush.msra.mxu2 %v9228_v58 }
 0x9b9   :  { %v5880_v3 = vpop.f32.mrf.mxu1 }
 0x9ba   :  { %9234 = vmatmul.msk.f32.gmra.mxu2 %vm5829_vm2, %v16749_v19  ;;  %v9227_v19 = vld [vmem:[%s18161_s9 + $0x1c8] sm:$0xff] }
 0x9bb   :  { %6250 = vmatpush.msra.mxu2 %v9227_v19 }
 0x9bc   :  { %6042 = vmatmul.f32.gmra.mxu1 %v16751_v48 }
 0x9bd   :  { %6251 = vmatpush.msra.mxu2 %v9226_v13 }
 0x9c1   :  { %v5883_v20 = vpop.f32.mrf.mxu1 }
 0x9c2   :  { %9235 = vmatmul.msk.f32.gmra.mxu2 %vm5829_vm2, %v16753_v33  ;;  %v5654_v33 = vpop.f32.mrf.mxu3 }
 0x9c4   :  { %6045 = vmatmul.f32.gmra.mxu1 %v16762_v18 }
 0x9c9   :  { %v5886_v48 = vpop.f32.mrf.mxu1 }
 0x9ca   :  { %9236 = vmatmul.msk.f32.gmra.mxu2 %vm5829_vm2, %v16773_v15  ;;  %v5657_v16 = vpop.f32.mrf.mxu3 }
 0x9cc   :  { %6048 = vmatmul.f32.gmra.mxu1 %v16778_v25 }
 0x9cd   :  { %v5924_v18 = vpop.f32.mrf.mxu2 }
 0x9ce   :  { %v16989_v55 = vadd.f32 %v5924_v18, %v5877_v56 }
 0x9d0   :  { %19028 = vst [vmem:[#allocation35_spill] sm:$0xff] %v16989_v55 }
 0x9d1   :  { %v5889_v23 = vpop.f32.mrf.mxu1 }
 0x9d2   :  { %9237 = vmatmul.msk.f32.gmra.mxu2 %vm5829_vm2, %v16785_v0  ;;  %v5660_v25 = vpop.f32.mrf.mxu3 }
 0x9d4   :  { %6205 = vmatmul.f32.vlgmr.msra.gmra.mxu1 %v5651_v17 }
 0x9d5   :  { %v5927_v63 = vpop.f32.mrf.mxu2 }
 0x9d6   :  { %v16993_v10 = vadd.f32 %v5927_v63, %v5880_v3 }
 0x9d9   :  { %v5892_v50 = vpop.f32.mrf.mxu1 }
 0x9da   :  { %9238 = vmatmul.msk.f32.gmra.mxu2 %vm5829_vm2, %v16792_v27  ;;  %v5663_v60 = vpop.f32.mrf.mxu3  ;;  %v5764_v27 = vpop.f32.mrf.mxu0 }
 0x9dc   :  { %6208 = vmatmul.f32.gmra.mxu1 %v5654_v33 }
 0x9dd   :  { %v5930_v15 = vpop.f32.mrf.mxu2 }
 0x9de   :  { %v16997_v26 = vadd.f32 %v5930_v15, %v5883_v20 }
 0x9e1   :  { %v16999_v9 = vpop.f32.mrf.mxu1 }
 0x9e2   :  { %9239 = vmatmul.msk.f32.gmra.mxu2 %vm5829_vm2, %v16799_v45  ;;  %v5666_v61 = vpop.f32.mrf.mxu3  ;;  %v5767_v53 = vpop.f32.mrf.mxu0 }
 0x9e4   :  { %6211 = vmatmul.f32.gmra.mxu1 %v5657_v16 }
 0x9e5   :  { %v5933_v0 = vpop.f32.mrf.mxu2 }
 0x9e6   :  { %v17003_v34 = vadd.f32 %v5933_v0, %v5886_v48 }
 0x9e9   :  { %v17005_v14 = vpop.f32.mrf.mxu1 }
 0x9ea   :  { %9240 = vmatmul.msk.f32.vlgmr.msra.gmra.mxu2 %vm5829_vm2, %v5758_v42  ;;  %v5669_v40 = vpop.f32.mrf.mxu3  ;;  %v5770_v12 = vpop.f32.mrf.mxu0 }
 0x9ec   :  { %6214 = vmatmul.f32.gmra.mxu1 %v5660_v25 }
 0x9ed   :  { %v5936_v54 = vpop.f32.mrf.mxu2 }
 0x9ee   :  { %v17008_v51 = vadd.f32 %v5936_v54, %v5889_v23 }
 0x9f1   :  { %v17010_v36 = vpop.f32.mrf.mxu1 }
 0x9f2   :  { %9241 = vmatmul.msk.f32.gmra.mxu2 %vm5829_vm2, %v5761_v8  ;;  %v5672_v11 = vpop.f32.mrf.mxu3  ;;  %v5773_v6 = vpop.f32.mrf.mxu0 }
 0x9f4   :  { %6217 = vmatmul.f32.gmra.mxu1 %v5663_v60  ;;  %v6157_v60 = vpop.permute.xlu2 %6156 }
 0x9f5   :  { %v5939_v45 = vpop.f32.mrf.mxu2 }
 0x9f6   :  { %v17013_v21 = vadd.f32 %v5939_v45, %v5892_v50  ;;  %v6147_v45 = vpop.permute.xlu1 %6146 }
 0x9f9   :  { %v17015_v39 = vpop.f32.mrf.mxu1 }
 0x9fa   :  { %9242 = vmatmul.msk.f32.gmra.mxu2 %vm5829_vm2, %v5764_v27  ;;  %v5675_v44 = vpop.f32.mrf.mxu3  ;;  %v5776_v5 = vpop.f32.mrf.mxu0 }
 0x9fc   :  { %6220 = vmatmul.f32.gmra.mxu1 %v5666_v61  ;;  %v6152_v61 = vpop.permute.xlu0 %6151 }
 0x9fd   :  { %v17018_v52 = vpop.f32.mrf.mxu2 }
 0x9fe   :  { %v5943_v55 = vadd.f32 %v17018_v52, %v16999_v9 }
 0xa01   :  { %v17020_v35 = vpop.f32.mrf.mxu1 }
 0xa02   :  { %19029 = vst [vmem:[#allocation26_spill] sm:$0xff] %v17020_v35  ;;  %9243 = vmatmul.msk.f32.gmra.mxu2 %vm5829_vm2, %v5767_v53  ;;  %v5678_v62 = vpop.f32.mrf.mxu3  ;;  %v5779_v59 = vpop.f32.mrf.mxu0 }
 0xa03   :  { %v6142_v53 = vpop.permute.xlu2 %6141  ;;  %v6132_v35 = vpop.permute.xlu1 %6131 }
 0xa04   :  { %6223 = vmatmul.f32.gmra.mxu1 %v5669_v40 }
 0xa05   :  { %v17023_v24 = vpop.f32.mrf.mxu2 }
 0xa09   :  { %v17025_v31 = vpop.f32.mrf.mxu1 }
 0xa0a   :  { %19030 = vst [vmem:[#allocation37_spill] sm:$0xff] %v17025_v31  ;;  %9244 = vmatmul.msk.f32.gmra.mxu2 %vm5829_vm2, %v5770_v12  ;;  %v5782_v43 = vpop.f32.mrf.mxu0 }
 0xa0c   :  { %6226 = vmatmul.f32.gmra.mxu1 %v5672_v11 }
 0xa0d   :  { %v5948_v41 = vpop.f32.mrf.mxu2 }
 0xa0e   :  { %v5949_v12 = vadd.f32 %v5948_v41, %v17010_v36 }
 0xa11   :  { %v17028_v29 = vpop.f32.mrf.mxu1 }
 0xa12   :  { %9245 = vmatmul.msk.f32.gmra.mxu2 %vm5829_vm2, %v5773_v6 }
 0xa14   :  { %6229 = vmatmul.f32.gmra.mxu1 %v5675_v44 }
 0xa15   :  { %v5951_v4 = vpop.f32.mrf.mxu2 }
 0xa16   :  { %v5952_v6 = vadd.f32 %v5951_v4, %v17015_v39 }
 0xa19   :  { %v17031_v57 = vpop.f32.mrf.mxu1 }
 0xa1a   :  { %9246 = vmatmul.msk.f32.gmra.mxu2 %vm5829_vm2, %v5776_v5  ;;  %v6137_v5 = vpop.permute.xlu0 %6136 }
 0xa1c   :  { %6232 = vmatmul.f32.gmra.mxu1 %v5678_v62  ;;  %v5946_v62 = vadd.f32 %v17023_v24, %v17005_v14 }
 0xa1d   :  { %v17034_v30 = vpop.f32.mrf.mxu2 }
 0xa1e   :  { %19031 = vst [vmem:[#allocation18_spill] sm:$0xff] %v17034_v30 }
 0xa21   :  { %v17036_v37 = vpop.f32.mrf.mxu1 }
 0xa22   :  { %9247 = vmatmul.msk.f32.gmra.mxu2 %vm5829_vm2, %v5779_v59 }
 0xa25   :  { %v17039_v22 = vpop.f32.mrf.mxu2 }
 0xa26   :  { %19032 = vst [vmem:[#allocation40_spill] sm:$0xff] %v17039_v22 }
 0xa29   :  { %v17041_v32 = vpop.f32.mrf.mxu1 }
 0xa2a   :  { %9248 = vmatmul.msk.f32.gmra.mxu2 %vm5829_vm2, %v5782_v43 }
 0xa2d   :  { %v17044_v7 = vpop.f32.mrf.mxu2 }
 0xa2e   :  { %19033 = vst [vmem:[#allocation42_spill] sm:$0xff] %v17044_v7 }
 0xa31   :  { %v6040_v2 = vpop.f32.mrf.mxu1 }
 0xa32   :  { %9249 = vmatmul.msk.f32.gmra.mxu2 %vm5829_vm2, %v16974_v38 }
 0xa35   :  { %v17048_v28 = vpop.f32.mrf.mxu2 }
 0xa39   :  { %v6043_v46 = vpop.f32.mrf.mxu1 }
 0xa3d   :  { %v17050_v56 = vpop.f32.mrf.mxu2 }
 0xa41   :  { %v6046_v49 = vpop.f32.mrf.mxu1 }
 0xa42   :  { %v6047_v59 = vadd.f32 %v6046_v49, %v5949_v12 }
 0xa45   :  { %v6084_v1 = vpop.f32.mrf.mxu2 }
 0xa49   :  { %v6049_v3 = vpop.f32.mrf.mxu1 }
 0xa4a   :  { %v6050_v43 = vadd.f32 %v6049_v3, %v5952_v6 }
 0xa4d   :  { %v6087_v17 = vpop.f32.mrf.mxu2 }
 0xa51   :  { %v17052_v47 = vpop.f32.mrf.mxu1 }
 0xa52   :  { %19034 = vst [vmem:[#allocation88_spill] sm:$0xff] %v17052_v47 }
 0xa55   :  { %v6090_v20 = vpop.f32.mrf.mxu2 }
 0xa59   :  { %v17054_v19 = vpop.f32.mrf.mxu1 }
 0xa5d   :  { %v6093_v58 = vpop.f32.mrf.mxu2 }
 0xa5e   :  { %v6094_v47 = vadd.f32 %v6093_v58, %v6047_v59  ;;  %v6035_v58 = vadd.f32 %v17036_v37, %v17008_v51  ;;  %v6029_v51 = vadd.f32 %v17028_v29, %v16997_v26 }
 0xa61   :  { %v17056_v33 = vpop.f32.mrf.mxu1 }
 0xa65   :  { %v6096_v48 = vpop.f32.mrf.mxu2 }
 0xa66   :  { %v6097_v41 = vadd.f32 %v6096_v48, %v6050_v43 }
 0xa69   :  { %v6215_v38 = vpop.f32.mrf.mxu1 }
 0xa6d   :  { %v17058_v13 = vpop.f32.mrf.mxu2 }
 0xa6e   :  { %19035 = vst [vmem:[#allocation93_spill] sm:$0xff] %v17058_v13 }
 0xa71   :  { %v6218_v16 = vpop.f32.mrf.mxu1 }
 0xa75   :  { %v17060_v18 = vpop.f32.mrf.mxu2 }
 0xa76   :  { %19036 = vst [vmem:[#allocation98_spill] sm:$0xff] %v17060_v18  ;;  %v6044_v18 = vadd.f32 %v6043_v46, %v5946_v62 }
 0xa78   :  { %v6091_v31 = vadd.f32 %v6090_v20, %v6044_v18  ;;  %v6117_v20 = vpop.permute.xlu1 %6116  ;;  %v19038_v18 = vld [vmem:[#allocation42_spill] sm:$0xff] }
 0xa79   :  { %v6221_v42 = vpop.f32.mrf.mxu1 }
 0xa7a   :  { %v6222_v14 = vadd.f32 %v6221_v42, %v6137_v5 }
 0xa7d   :  { %v17062_v23 = vpop.f32.mrf.mxu2 }
 0xa81   :  { %v6224_v15 = vpop.f32.mrf.mxu1 }
 0xa82   :  { %v6225_v7 = vadd.f32 %v6224_v15, %v6142_v53 }
 0xa85   :  { %v6262_v63 = vpop.f32.mrf.mxu2 }
 0xa89   :  { %v6227_v8 = vpop.f32.mrf.mxu1 }
 0xa8a   :  { %v6228_v30 = vadd.f32 %v6227_v8, %v6147_v45  ;;  %v6038_v8 = vadd.f32 %v17041_v32, %v17013_v21  ;;  %v6219_v45 = vadd.f32 %v6218_v16, %v6132_v35  ;;  %v6082_v21 = vadd.f32 %v17050_v56, %v6035_v58  ;;  %v19037_v56 = vld [vmem:[#allocation37_spill] sm:$0xff]  ;;  %v6535_v58 = vld [vmem:[%s18163_s12 + $0x28] sm:$0xff] }
 0xa8b   :  { %v6076_v16 = vadd.f32 %v19038_v18, %v6029_v51  ;;  %v6321_v51 = vld [vmem:[%s18162_s11 + $0x90] sm:$0xff]  ;;  %v6324_v18 = vld [vmem:[%s18162_s11 + $0xa8] sm:$0xff] }
 0xa8d   :  { %v6265_v50 = vpop.f32.mrf.mxu2 }
 0xa91   :  { %v6230_v54 = vpop.f32.mrf.mxu1 }
 0xa92   :  { %v6231_v44 = vadd.f32 %v6230_v54, %v6152_v61  ;;  %v6127_v54 = vpop.permute.xlu2 %6126  ;;  %v6041_v61 = vadd.f32 %v6040_v2, %v5943_v55 }
 0xa93   :  { %v6216_v48 = vadd.f32 %v6215_v38, %v6127_v54  ;;  %v6307_v54 = vld [vmem:[%s18162_s11 + $0x20] sm:$0xff] }
 0xa95   :  { %v6268_v25 = vpop.f32.mrf.mxu2  ;;  %v6263_v32 = vadd.f32 %v6262_v63, %v6216_v48  ;;  %v19039_v63 = vld [vmem:[#allocation88_spill] sm:$0xff]  ;;  %v6315_v48 = vld [vmem:[%s18162_s11 + $0x60] sm:$0xff] }
 0xa96   :  { %v6269_v9 = vadd.f32 %v6268_v25, %v6222_v14  ;;  %v6309_v14 = vld [vmem:[%s18162_s11 + $0x30] sm:$0xff] }
 0xa99   :  { %v6233_v11 = vpop.f32.mrf.mxu1 }
 0xa9a   :  { %v6234_v13 = vadd.f32 %v6233_v11, %v6157_v60  ;;  %v6088_v60 = vadd.f32 %v6087_v17, %v6041_v61  ;;  %v6308_v61 = vld [vmem:[%s18162_s11 + $0x28] sm:$0xff] }
 0xa9d   :  { %v6271_v0 = vpop.f32.mrf.mxu2 }
 0xa9e   :  { %v6272_v24 = vadd.f32 %v6271_v0, %v6225_v7  ;;  %v6122_v7 = vpop.permute.xlu0 %6121 }
 0xa9f   :  { %v6213_v35 = vadd.f32 %v17056_v33, %v6122_v7  ;;  %v6026_v33 = vadd.f32 %v19037_v56, %v16993_v10  ;;  %v19045_v10 = vld [vmem:[#allocation18_spill] sm:$0xff]  ;;  %v9288_v56 = vld [vmem:[%s18163_s12 + $0x90] sm:$0xff] }
 0xaa0   :  { %v6289_v55 = vadd.f32 %v6272_v24, %v6088_v60  ;;  %v6310_v24 = vld [vmem:[%s18162_s11 + $0x38] sm:$0xff]  ;;  %v6539_v60 = vld [vmem:[%s18163_s12 + $0x48] sm:$0xff]  ;;  %v6530_v7 = vld [vmem:[%s18163_s12] sm:$0xff] }
 0xaa1   :  { %6675 = vmatpush.msrb.mxu1 %v6539_v60 }
 0xaa5   :  { %v6274_v27 = vpop.f32.mrf.mxu2 }
 0xaa6   :  { %v6275_v39 = vadd.f32 %v6274_v27, %v6228_v30  ;;  %v6085_v30 = vadd.f32 %v6084_v1, %v6038_v8  ;;  %v6210_v1 = vadd.f32 %v17054_v19, %v6117_v20  ;;  %v19042_v19 = vld [vmem:[#allocation26_spill] sm:$0xff]  ;;  %v19044_v27 = vld [vmem:[#allocation93_spill] sm:$0xff]  ;;  %v6313_v8 = vld [vmem:[%s18162_s11 + $0x50] sm:$0xff] }
 0xaa8   :  { %v6290_v52 = vadd.f32 %v6275_v39, %v6091_v31  ;;  %v6288_v31 = vadd.f32 %v6269_v9, %v6085_v30  ;;  %v6305_v39 = vld [vmem:[%s18162_s11 + $0x10] sm:$0xff]  ;;  %v6314_v9 = vld [vmem:[%s18162_s11 + $0x58] sm:$0xff]  ;;  %v6534_v30 = vld [vmem:[%s18163_s12 + $0x20] sm:$0xff] }
 0xaaa   :  { %v6300_v17 = vmax.f32 %v6290_v52, 0.0  ;;  %v6298_v29 = vmax.f32 %v6288_v31, 0.0  ;;  %v6537_v52 = vld [vmem:[%s18163_s12 + $0x38] sm:$0xff] }
 0xaad   :  { %v6277_v40 = vpop.f32.mrf.mxu2 }
 0xaae   :  { %v6278_v22 = vadd.f32 %v6277_v40, %v6231_v44 }
 0xab0   :  { %v6291_v49 = vadd.f32 %v6278_v22, %v6094_v47  ;;  %v6032_v22 = vadd.f32 %v17031_v57, %v17003_v34  ;;  %v6260_v47 = vadd.f32 %v17062_v23, %v6213_v35  ;;  %v6299_v34 = vmax.f32 %v6289_v55, 0.0  ;;  %v6112_v57 = vpop.permute.xlu2 %6111  ;;  %v19043_v23 = vld [vmem:[#allocation40_spill] sm:$0xff]  ;;  %v6318_v35 = vld [vmem:[%s18162_s11 + $0x78] sm:$0xff] }
 0xab1   :  { %v6207_v42 = vadd.f32 %v19039_v63, %v6112_v57  ;;  %v6073_v0 = vadd.f32 %v19043_v23, %v6026_v33  ;;  %v6532_v55 = vld [vmem:[%s18163_s12 + $0x10] sm:$0xff]  ;;  %v9287_v33 = vld [vmem:[%s18163_s12 + $0x88] sm:$0xff]  ;;  %v9285_v63 = vld [vmem:[%s18163_s12 + $0x78] sm:$0xff] }
 0xab2   :  { %v6301_v2 = vmax.f32 %v6291_v49, 0.0  ;;  %v6079_v37 = vadd.f32 %v17048_v28, %v6032_v22  ;;  %v19041_v28 = vld [vmem:[#allocation35_spill] sm:$0xff]  ;;  %v6285_v40 = vadd.f32 %v6260_v47, %v6076_v16  ;;  %v6311_v49 = vld [vmem:[%s18162_s11 + $0x40] sm:$0xff]  ;;  %v6326_v23 = vld [vmem:[%s18162_s11 + $0xb8] sm:$0xff] }
 0xab3   :  { %v6023_v25 = vadd.f32 %v19042_v19, %v19041_v28  ;;  %v6254_v53 = vadd.f32 %v19044_v27, %v6207_v42  ;;  %v6316_v22 = vld [vmem:[%s18162_s11 + $0x68] sm:$0xff]  ;;  %v9286_v16 = vld [vmem:[%s18163_s12 + $0x80] sm:$0xff]  ;;  %v9281_v28 = vld [vmem:[%s18163_s12 + $0x58] sm:$0xff] }
 0xab4   :  { %v6286_v26 = vadd.f32 %v6263_v32, %v6079_v37  ;;  %v6295_v62 = vmax.f32 %v6285_v40, 0.0  ;;  %v6319_v32 = vld [vmem:[%s18162_s11 + $0x80] sm:$0xff]  ;;  %v6328_v40 = vld [vmem:[%s18162_s11 + $0xc8] sm:$0xff] }
 0xab5   :  { %v6280_v36 = vpop.f32.mrf.mxu2  ;;  %v6070_v11 = vadd.f32 %v19045_v10, %v6023_v25  ;;  %v9280_v25 = vld [vmem:[%s18163_s12 + $0x50] sm:$0xff]  ;;  %v6327_v27 = vld [vmem:[%s18162_s11 + $0xc0] sm:$0xff] }
 0xab6   :  { %v6281_v4 = vadd.f32 %v6280_v36, %v6234_v13  ;;  %v6266_v13 = vadd.f32 %v6265_v50, %v6219_v45  ;;  %v19040_v50 = vld [vmem:[#allocation98_spill] sm:$0xff]  ;;  %v6296_v44 = vmax.f32 %v6286_v26, 0.0  ;;  %v6325_v26 = vld [vmem:[%s18162_s11 + $0xb0] sm:$0xff] }
 0xab7   :  { %v6257_v15 = vadd.f32 %v19040_v50, %v6210_v1  ;;  %v6283_v5 = vadd.f32 %v6254_v53, %v6070_v11  ;;  %v6303_v36 = vld [vmem:[%s18162_s11] sm:$0xff]  ;;  %v6322_v1 = vld [vmem:[%s18162_s11 + $0x98] sm:$0xff]  ;;  %v9284_v50 = vld [vmem:[%s18163_s12 + $0x70] sm:$0xff] }
 0xab8   :  { %v6292_v3 = vadd.f32 %v6281_v4, %v6097_v41  ;;  %v6287_v38 = vadd.f32 %v6266_v13, %v6082_v21  ;;  %v6304_v41 = vld [vmem:[%s18162_s11 + $0x8] sm:$0xff]  ;;  %v6306_v4 = vld [vmem:[%s18162_s11 + $0x18] sm:$0xff]  ;;  %v6538_v45 = vld [vmem:[%s18163_s12 + $0x40] sm:$0xff] }
 0xab9   :  { %v6284_v6 = vadd.f32 %v6257_v15, %v6073_v0  ;;  %v6293_v43 = vmax.f32 %v6283_v5, 0.0  ;;  %6676 = vmatpush.msrb.mxu1 %v6538_v45  ;;  %v6533_v13 = vld [vmem:[%s18163_s12 + $0x18] sm:$0xff]  ;;  %v6317_v21 = vld [vmem:[%s18162_s11 + $0x70] sm:$0xff]  ;;  %v9283_v15 = vld [vmem:[%s18163_s12 + $0x68] sm:$0xff] }
 0xaba   :  { %v6302_v46 = vmax.f32 %v6292_v3, 0.0  ;;  %v6297_v12 = vmax.f32 %v6287_v38, 0.0  ;;  %v6312_v3 = vld [vmem:[%s18162_s11 + $0x48] sm:$0xff]  ;;  %v6323_v38 = vld [vmem:[%s18162_s11 + $0xa0] sm:$0xff]  ;;  %v6329_v10 = vld [vmem:[%s18162_s11 + $0xd0] sm:$0xff] }
 0xabb   :  { %v6294_v59 = vmax.f32 %v6284_v6, 0.0  ;;  %6677 = vmatpush.msrb.mxu1 %v6537_v52  ;;  %v6330_v6 = vld [vmem:[%s18162_s11 + $0xd8] sm:$0xff]  ;;  %v6331_v5 = vld [vmem:[%s18162_s11 + $0xe0] sm:$0xff] }
 0xabc   :  { %6429 = vmatpush.msra.mxu3 %v6302_v46  ;;  %v6536_v46 = vld [vmem:[%s18163_s12 + $0x30] sm:$0xff] }
 0xabd   :  { %6678 = vmatpush.msrb.mxu1 %v6536_v46 }
 0xabe   :  { %6430 = vmatpush.msra.mxu3 %v6301_v2  ;;  %v6531_v2 = vld [vmem:[%s18163_s12 + $0x8] sm:$0xff] }
 0xabf   :  { %6679 = vmatpush.msrb.mxu1 %v6535_v58 }
 0xac0   :  { %6431 = vmatpush.msra.mxu3 %v6300_v17  ;;  %v6320_v17 = vld [vmem:[%s18162_s11 + $0x88] sm:$0xff] }
 0xac1   :  { %6680 = vmatpush.msrb.mxu1 %v6534_v30 }
 0xac2   :  { %6432 = vmatpush.msra.mxu3 %v6299_v34  ;;  %v9289_v34 = vld [vmem:[%s18163_s12 + $0x98] sm:$0xff] }
 0xac3   :  { %6681 = vmatpush.msrb.mxu1 %v6533_v13  ;;  %6587 = vmatpush.msrb.mxu0 %v9289_v34  ;;  %v6885_v34 = vld [vmem:[%s18165_s16 + $0x48] sm:$0xff] }
 0xac4   :  { %6433 = vmatpush.msra.mxu3 %v6298_v29  ;;  %v9282_v29 = vld [vmem:[%s18163_s12 + $0x60] sm:$0xff] }
 0xac5   :  { %6682 = vmatpush.msrb.mxu1 %v6532_v55  ;;  %6588 = vmatpush.msrb.mxu0 %v9288_v56  ;;  %v6886_v56 = vld [vmem:[%s18165_s16 + $0x50] sm:$0xff] }
 0xac6   :  { %6434 = vmatpush.msra.mxu3 %v6297_v12 }
 0xac7   :  { %6683 = vmatpush.msrb.mxu1 %v6531_v2  ;;  %6589 = vmatpush.msrb.mxu0 %v9287_v33  ;;  %v6887_v33 = vld [vmem:[%s18165_s16 + $0x58] sm:$0xff] }
 0xac8   :  { %6435 = vmatpush.msra.mxu3 %v6296_v44 }
 0xac9   :  { %6684 = vmatpush.msrb.mxu1 %v6530_v7  ;;  %6590 = vmatpush.msrb.mxu0 %v9286_v16  ;;  %v7097_v16 = vld [vmem:[%s18166_s14 + $0x20] sm:$0xff] }
 0xaca   :  { %6436 = vmatpush.msra.mxu3 %v6295_v62 }
 0xacb   :  { %6591 = vmatpush.msrb.mxu0 %v9285_v63  ;;  %v9360_v63 = vld [vmem:[%s18166_s14 + $0x48] sm:$0xff]  ;;  %7140 = vmatpush.msra.mxu1 %v7097_v16 }
 0xacc   :  { %6437 = vmatpush.msra.mxu3 %v6294_v59  ;;  %v6332_v59 = vld [vmem:[%s18162_s11 + $0xe8] sm:$0xff] }
 0xacd   :  { %6592 = vmatpush.msrb.mxu0 %v9284_v50  ;;  %v7096_v50 = vld [vmem:[%s18166_s14 + $0x18] sm:$0xff] }
 0xace   :  { %6438 = vmatpush.msra.mxu3 %v6293_v43  ;;  %7141 = vmatpush.msra.mxu1 %v7096_v50  ;;  %v9405_v50 = vld [vmem:[%s18166_s14 + $0x70] sm:$0xff] }
 0xacf   :  { %9250 = vmatmul.msk.f32.vlgmr.msra.gmra.mxu3 %vm151_vm0, %v6303_v36  ;;  %6593 = vmatpush.msrb.mxu0 %v9283_v15  ;;  %v9309_v36 = vld [vmem:[%s18163_s12 + $0xe8] sm:$0xff]  ;;  %v9359_v15 = vld [vmem:[%s18166_s14 + $0x40] sm:$0xff] }
 0xad0   :  { %9573 = vmatpush.msrb.mxu3 %v6539_v60  ;;  %6812 = vmatpush.msrb.mxu2 %v9309_v36 }
 0xad1   :  { %6594 = vmatpush.msrb.mxu0 %v9282_v29  ;;  %v6889_v29 = vld [vmem:[%s18165_s16 + $0x68] sm:$0xff] }
 0xad2   :  { %9574 = vmatpush.msrb.mxu3 %v6538_v45  ;;  %v9300_v45 = vld [vmem:[%s18163_s12 + $0xa0] sm:$0xff] }
 0xad3   :  { %6595 = vmatpush.msrb.mxu0 %v9281_v28  ;;  %v7095_v28 = vld [vmem:[%s18166_s14 + $0x10] sm:$0xff] }
 0xad4   :  { %9575 = vmatpush.msrb.mxu3 %v6537_v52  ;;  %7142 = vmatpush.msra.mxu1 %v7095_v28 }
 0xad5   :  { %6596 = vmatpush.msrb.mxu0 %v9280_v25  ;;  %v9433_v25 = vld [vmem:[%s18166_s14 + $0x88] sm:$0xff] }
 0xad6   :  { %9576 = vmatpush.msrb.mxu3 %v6536_v46 }
 0xad7   :  { %9251 = vmatmul.msk.f32.gmra.mxu3 %vm151_vm0, %v6304_v41 }
 0xad8   :  { %9577 = vmatpush.msrb.mxu3 %v6535_v58 }
 0xada   :  { %9578 = vmatpush.msrb.mxu3 %v6534_v30  ;;  %v6876_v30 = vld [vmem:[%s18165_s16] sm:$0xff] }
 0xadc   :  { %9579 = vmatpush.msrb.mxu3 %v6533_v13  ;;  %v6877_v13 = vld [vmem:[%s18165_s16 + $0x8] sm:$0xff] }
 0xade   :  { %9580 = vmatpush.msrb.mxu3 %v6532_v55 }
 0xadf   :  { %9252 = vmatmul.msk.f32.gmra.mxu3 %vm151_vm0, %v6305_v39  ;;  %v9308_v39 = vld [vmem:[%s18163_s12 + $0xe0] sm:$0xff] }
 0xae0   :  { %9581 = vmatpush.msrb.mxu3 %v6531_v2  ;;  %6813 = vmatpush.msrb.mxu2 %v9308_v39  ;;  %v6878_v2 = vld [vmem:[%s18165_s16 + $0x10] sm:$0xff] }
 0xae2   :  { %9582 = vmatpush.msrb.mxu3 %v6530_v7 }
 0xae7   :  { %9253 = vmatmul.msk.f32.gmra.mxu3 %vm151_vm0, %v6306_v4  ;;  %v9307_v4 = vld [vmem:[%s18163_s12 + $0xd8] sm:$0xff] }
 0xae8   :  { %6814 = vmatpush.msrb.mxu2 %v9307_v4 }
 0xaef   :  { %9254 = vmatmul.msk.f32.gmra.mxu3 %vm151_vm0, %v6307_v54  ;;  %v9306_v54 = vld [vmem:[%s18163_s12 + $0xd0] sm:$0xff] }
 0xaf0   :  { %6815 = vmatpush.msrb.mxu2 %v9306_v54 }
 0xaf7   :  { %9255 = vmatmul.msk.f32.gmra.mxu3 %vm151_vm0, %v6308_v61  ;;  %v9305_v61 = vld [vmem:[%s18163_s12 + $0xc8] sm:$0xff] }
 0xaf8   :  { %6816 = vmatpush.msrb.mxu2 %v9305_v61  ;;  %v6734_v61 = vpop.permute.xlu1 %6733 }
 0xaff   :  { %9256 = vmatmul.msk.f32.gmra.mxu3 %vm151_vm0, %v6309_v14 }
 0xb07   :  { %9257 = vmatmul.msk.f32.gmra.mxu3 %vm151_vm0, %v6310_v24  ;;  %v9304_v24 = vld [vmem:[%s18163_s12 + $0xc0] sm:$0xff] }
 0xb08   :  { %6817 = vmatpush.msrb.mxu2 %v9304_v24 }
 0xb0f   :  { %9258 = vmatmul.msk.f32.gmra.mxu3 %vm151_vm0, %v6311_v49  ;;  %v9303_v49 = vld [vmem:[%s18163_s12 + $0xb8] sm:$0xff] }
 0xb10   :  { %6818 = vmatpush.msrb.mxu2 %v9303_v49 }
 0xb17   :  { %9259 = vmatmul.msk.f32.gmra.mxu3 %vm151_vm0, %v6312_v3  ;;  %v9302_v3 = vld [vmem:[%s18163_s12 + $0xb0] sm:$0xff] }
 0xb18   :  { %6819 = vmatpush.msrb.mxu2 %v9302_v3 }
 0xb1f   :  { %9260 = vmatmul.msk.f32.gmra.mxu3 %vm151_vm0, %v6313_v8  ;;  %v9301_v8 = vld [vmem:[%s18163_s12 + $0xa8] sm:$0xff] }
 0xb20   :  { %6820 = vmatpush.msrb.mxu2 %v9301_v8 }
 0xb22   :  { %6821 = vmatpush.msrb.mxu2 %v9300_v45 }
 0xb24   :  { %7208 = vmatpush.msra.mxu2 %v9360_v63 }
 0xb26   :  { %7209 = vmatpush.msra.mxu2 %v9359_v15 }
 0xb27   :  { %9261 = vmatmul.msk.f32.gmra.mxu3 %vm151_vm0, %v6314_v9  ;;  %v6875_v9 = vld [vmem:[%s18164_s1] sm:$0x1f] }
 0xb28   :  { %9330 = vmatpush.msk.msra.mxu0 %vm7027_vm3, %v6875_v9  ;;  %v6739_v9 = vpop.permute.xlu2 %6738 }
 0xb2f   :  { %9262 = vmatmul.msk.f32.gmra.mxu3 %vm151_vm0, %v6315_v48 }
 0xb37   :  { %9263 = vmatmul.msk.f32.gmra.mxu3 %vm151_vm0, %v6316_v22  ;;  %v6879_v22 = vld [vmem:[%s18165_s16 + $0x18] sm:$0xff] }
 0xb3f   :  { %9264 = vmatmul.msk.f32.gmra.mxu3 %vm151_vm0, %v6317_v21 }
 0xb47   :  { %9265 = vmatmul.msk.f32.gmra.mxu3 %vm151_vm0, %v6318_v35  ;;  %v6880_v35 = vld [vmem:[%s18165_s16 + $0x20] sm:$0xff] }
 0xb4f   :  { %9266 = vmatmul.msk.f32.gmra.mxu3 %vm151_vm0, %v6319_v32 }
 0xb52   :  { %v6440_v31 = vpop.f32.mrf.mxu3 }
 0xb53   :  { %9310 = vmatmul.msk.f32.vlgmr.msrb.gmra.mxu1 %vm151_vm0, %v6440_v31  ;;  %v6881_v31 = vld [vmem:[%s18165_s16 + $0x28] sm:$0xff] }
 0xb57   :  { %9267 = vmatmul.msk.f32.gmra.mxu3 %vm151_vm0, %v6320_v17 }
 0xb5a   :  { %v6443_v20 = vpop.f32.mrf.mxu3 }
 0xb5b   :  { %9311 = vmatmul.msk.f32.gmra.mxu1 %vm151_vm0, %v6443_v20  ;;  %v6882_v20 = vld [vmem:[%s18165_s16 + $0x30] sm:$0xff] }
 0xb5f   :  { %9268 = vmatmul.msk.f32.gmra.mxu3 %vm151_vm0, %v6321_v51 }
 0xb62   :  { %v6446_v37 = vpop.f32.mrf.mxu3 }
 0xb63   :  { %9312 = vmatmul.msk.f32.gmra.mxu1 %vm151_vm0, %v6446_v37  ;;  %v6883_v37 = vld [vmem:[%s18165_s16 + $0x38] sm:$0xff] }
 0xb67   :  { %9269 = vmatmul.msk.f32.gmra.mxu3 %vm151_vm0, %v6322_v1 }
 0xb6a   :  { %v6449_v47 = vpop.f32.mrf.mxu3 }
 0xb6b   :  { %9313 = vmatmul.msk.f32.gmra.mxu1 %vm151_vm0, %v6449_v47  ;;  %v6884_v47 = vld [vmem:[%s18165_s16 + $0x40] sm:$0xff] }
 0xb6f   :  { %9270 = vmatmul.msk.f32.gmra.mxu3 %vm151_vm0, %v6323_v38 }
 0xb72   :  { %v6452_v57 = vpop.f32.mrf.mxu3 }
 0xb73   :  { %9314 = vmatmul.msk.f32.gmra.mxu1 %vm151_vm0, %v6452_v57 }
 0xb77   :  { %9271 = vmatmul.msk.f32.gmra.mxu3 %vm151_vm0, %v6324_v18  ;;  %v6888_v18 = vld [vmem:[%s18165_s16 + $0x60] sm:$0xff] }
 0xb7a   :  { %v6455_v42 = vpop.f32.mrf.mxu3 }
 0xb7b   :  { %9315 = vmatmul.msk.f32.gmra.mxu1 %vm151_vm0, %v6455_v42  ;;  %v9435_v42 = vld [vmem:[%s18166_s14 + $0x98] sm:$0xff] }
 0xb7c   :  { %7453 = vmatpush.msra.mxu3 %v9435_v42 }
 0xb7f   :  { %9272 = vmatmul.msk.f32.gmra.mxu3 %vm151_vm0, %v6325_v26  ;;  %v9434_v26 = vld [vmem:[%s18166_s14 + $0x90] sm:$0xff] }
 0xb80   :  { %7454 = vmatpush.msra.mxu3 %v9434_v26 }
 0xb82   :  { %v6458_v19 = vpop.f32.mrf.mxu3  ;;  %7455 = vmatpush.msra.mxu3 %v9433_v25 }
 0xb83   :  { %9316 = vmatmul.msk.f32.gmra.mxu1 %vm151_vm0, %v6458_v19  ;;  %v9358_v19 = vld [vmem:[%s18166_s14 + $0x38] sm:$0xff] }
 0xb84   :  { %7210 = vmatpush.msra.mxu2 %v9358_v19 }
 0xb87   :  { %9273 = vmatmul.msk.f32.gmra.mxu3 %vm151_vm0, %v6326_v23  ;;  %v7094_v23 = vld [vmem:[%s18166_s14 + $0x8] sm:$0xff] }
 0xb88   :  { %7143 = vmatpush.msra.mxu1 %v7094_v23  ;;  %v9403_v23 = vld [vmem:[%s18166_s14 + $0x60] sm:$0xff] }
 0xb8a   :  { %v6461_v0 = vpop.f32.mrf.mxu3 }
 0xb8b   :  { %9317 = vmatmul.msk.f32.gmra.mxu1 %vm151_vm0, %v6461_v0  ;;  %v9357_v0 = vld [vmem:[%s18166_s14 + $0x30] sm:$0xff] }
 0xb8c   :  { %7211 = vmatpush.msra.mxu2 %v9357_v0 }
 0xb8f   :  { %9274 = vmatmul.msk.f32.gmra.mxu3 %vm151_vm0, %v6327_v27  ;;  %v9432_v27 = vld [vmem:[%s18166_s14 + $0x80] sm:$0xff] }
 0xb90   :  { %7456 = vmatpush.msra.mxu3 %v9432_v27  ;;  %v9402_v27 = vld [vmem:[%s18166_s14 + $0x58] sm:$0xff] }
 0xb92   :  { %v6464_v53 = vpop.f32.mrf.mxu3 }
 0xb93   :  { %9318 = vmatmul.msk.f32.gmra.mxu1 %vm151_vm0, %v6464_v53  ;;  %v7093_v53 = vld [vmem:[%s18166_s14] sm:$0xff] }
 0xb94   :  { %7144 = vmatpush.msra.mxu1 %v7093_v53 }
 0xb97   :  { %9275 = vmatmul.msk.f32.gmra.mxu3 %vm151_vm0, %v6328_v40  ;;  %v9356_v40 = vld [vmem:[%s18166_s14 + $0x28] sm:$0xff] }
 0xb98   :  { %7212 = vmatpush.msra.mxu2 %v9356_v40  ;;  %v9401_v40 = vld [vmem:[%s18166_s14 + $0x50] sm:$0xff] }
 0xb9a   :  { %v6467_v12 = vpop.f32.mrf.mxu3 }
 0xb9f   :  { %9276 = vmatmul.msk.f32.gmra.mxu3 %vm151_vm0, %v6329_v10  ;;  %v6890_v10 = vld [vmem:[%s18165_s16 + $0x70] sm:$0xff] }
 0xba2   :  { %v6470_v11 = vpop.f32.mrf.mxu3 }
 0xba3   :  { %9290 = vmatmul.msk.f32.vlgmr.msrb.gmra.mxu0 %vm151_vm0, %v6470_v11 }
 0xba7   :  { %9277 = vmatmul.msk.f32.gmra.mxu3 %vm151_vm0, %v6330_v6 }
 0xbaa   :  { %v6473_v44 = vpop.f32.mrf.mxu3 }
 0xbab   :  { %9291 = vmatmul.msk.f32.gmra.mxu0 %vm151_vm0, %v6473_v44 }
 0xbaf   :  { %9278 = vmatmul.msk.f32.gmra.mxu3 %vm151_vm0, %v6331_v5 }
 0xbb2   :  { %v6476_v62 = vpop.f32.mrf.mxu3 }
 0xbb3   :  { %9292 = vmatmul.msk.f32.gmra.mxu0 %vm151_vm0, %v6476_v62  ;;  %v6729_v62 = vpop.permute.xlu0 %6728 }
 0xbb7   :  { %9279 = vmatmul.msk.f32.gmra.mxu3 %vm151_vm0, %v6332_v59 }
 0xbba   :  { %v6479_v43 = vpop.f32.mrf.mxu3 }
 0xbbb   :  { %9293 = vmatmul.msk.f32.gmra.mxu0 %vm151_vm0, %v6479_v43 }
 0xbbf   :  { %9319 = vmatmul.msk.f32.vlgmr.msrb.gmra.mxu3 %vm151_vm0, %v6467_v12  ;;  %v9431_v12 = vld [vmem:[%s18166_s14 + $0x78] sm:$0xff] }
 0xbc0   :  { %7457 = vmatpush.msra.mxu3 %v9431_v12 }
 0xbc2   :  { %v6482_v41 = vpop.f32.mrf.mxu3 }
 0xbc3   :  { %9294 = vmatmul.msk.f32.gmra.mxu0 %vm151_vm0, %v6482_v41 }
 0xbca   :  { %v6485_v14 = vpop.f32.mrf.mxu3 }
 0xbcb   :  { %9295 = vmatmul.msk.f32.gmra.mxu0 %vm151_vm0, %v6485_v14 }
 0xbd0   :  { %v6686_v6 = vpop.f32.mrf.mxu1 }
 0xbd2   :  { %v6488_v60 = vpop.f32.mrf.mxu3 }
 0xbd3   :  { %9296 = vmatmul.msk.f32.gmra.mxu0 %vm151_vm0, %v6488_v60 }
 0xbd8   :  { %v6689_v5 = vpop.f32.mrf.mxu1 }
 0xbda   :  { %v6491_v52 = vpop.f32.mrf.mxu3 }
 0xbdb   :  { %9297 = vmatmul.msk.f32.gmra.mxu0 %vm151_vm0, %v6491_v52 }
 0xbe0   :  { %v6692_v4 = vpop.f32.mrf.mxu1 }
 0xbe2   :  { %v6494_v46 = vpop.f32.mrf.mxu3 }
 0xbe3   :  { %9298 = vmatmul.msk.f32.gmra.mxu0 %vm151_vm0, %v6494_v46 }
 0xbe8   :  { %v6695_v45 = vpop.f32.mrf.mxu1 }
 0xbea   :  { %v6497_v58 = vpop.f32.mrf.mxu3 }
 0xbeb   :  { %9299 = vmatmul.msk.f32.gmra.mxu0 %vm151_vm0, %v6497_v58 }
 0xbf2   :  { %v6500_v48 = vpop.f32.mrf.mxu3 }
 0xbf3   :  { %9320 = vmatmul.msk.f32.vlgmr.msrb.gmra.mxu2 %vm151_vm0, %v6500_v48  ;;  %9331 = vmatmul.msk.f32.vlgmr.msra.gmra.mxu0 %vm6981_vm4, %v6876_v30 }
 0xbf4   :  { %7384 = vmatpush.msrb.mxu2 %v9405_v50 }
 0xbfa   :  { %v6503_v55 = vpop.f32.mrf.mxu3 }
 0xbfb   :  { %9321 = vmatmul.msk.f32.gmra.mxu2 %vm151_vm0, %v6503_v55  ;;  %9332 = vmatmul.msk.f32.gmra.mxu0 %vm6981_vm4, %v6877_v13  ;;  %v6744_v55 = vpop.permute.xlu0 %6743 }
 0xc02   :  { %v6506_v7 = vpop.f32.mrf.mxu3 }
 0xc03   :  { %9322 = vmatmul.msk.f32.gmra.mxu2 %vm151_vm0, %v6506_v7  ;;  %9333 = vmatmul.msk.f32.gmra.mxu0 %vm6981_vm4, %v6878_v2  ;;  %v6698_v7 = vpop.f32.mrf.mxu1  ;;  %v6759_v15 = vpop.permute.xlu0 %6758 }
 0xc0a   :  { %v6509_v21 = vpop.f32.mrf.mxu3 }
 0xc0b   :  { %9323 = vmatmul.msk.f32.gmra.mxu2 %vm151_vm0, %v6509_v21  ;;  %9334 = vmatmul.msk.f32.gmra.mxu0 %vm6981_vm4, %v6879_v22 }
 0xc12   :  { %v6512_v32 = vpop.f32.mrf.mxu3 }
 0xc13   :  { %9324 = vmatmul.msk.f32.gmra.mxu2 %vm151_vm0, %v6512_v32  ;;  %9335 = vmatmul.msk.f32.gmra.mxu0 %vm6981_vm4, %v6880_v35 }
 0xc1a   :  { %v6515_v17 = vpop.f32.mrf.mxu3 }
 0xc1b   :  { %9325 = vmatmul.msk.f32.gmra.mxu2 %vm151_vm0, %v6515_v17  ;;  %9336 = vmatmul.msk.f32.gmra.mxu0 %vm6981_vm4, %v6881_v31  ;;  %v6749_v17 = vpop.permute.xlu1 %6748 }
 0xc20   :  { %v6598_v11 = vpop.f32.mrf.mxu0 }
 0xc21   :  { %v6687_v36 = vadd.f32 %v6686_v6, %v6598_v11 }
 0xc22   :  { %v6518_v51 = vpop.f32.mrf.mxu3 }
 0xc23   :  { %9326 = vmatmul.msk.f32.gmra.mxu2 %vm151_vm0, %v6518_v51  ;;  %9337 = vmatmul.msk.f32.gmra.mxu0 %vm6981_vm4, %v6882_v20 }
 0xc28   :  { %v6601_v44 = vpop.f32.mrf.mxu0 }
 0xc29   :  { %v6690_v24 = vadd.f32 %v6689_v5, %v6601_v44 }
 0xc2a   :  { %v6521_v1 = vpop.f32.mrf.mxu3 }
 0xc2b   :  { %9327 = vmatmul.msk.f32.gmra.mxu2 %vm151_vm0, %v6521_v1  ;;  %9338 = vmatmul.msk.f32.gmra.mxu0 %vm6981_vm4, %v6883_v37  ;;  %v6701_v1 = vpop.f32.mrf.mxu1 }
 0xc30   :  { %v6604_v59 = vpop.f32.mrf.mxu0 }
 0xc31   :  { %v6693_v46 = vadd.f32 %v6692_v4, %v6604_v59 }
 0xc32   :  { %v6524_v38 = vpop.f32.mrf.mxu3 }
 0xc33   :  { %9328 = vmatmul.msk.f32.gmra.mxu2 %vm151_vm0, %v6524_v38  ;;  %9339 = vmatmul.msk.f32.gmra.mxu0 %vm6981_vm4, %v6884_v47  ;;  %v6704_v63 = vpop.f32.mrf.mxu1 }
 0xc38   :  { %v6607_v3 = vpop.f32.mrf.mxu0 }
 0xc39   :  { %v6696_v22 = vadd.f32 %v6695_v45, %v6607_v3 }
 0xc3a   :  { %v6527_v57 = vpop.f32.mrf.mxu3 }
 0xc3b   :  { %9329 = vmatmul.msk.f32.gmra.mxu2 %vm151_vm0, %v6527_v57  ;;  %9340 = vmatmul.msk.f32.gmra.mxu0 %vm6981_vm4, %v6885_v34  ;;  %v6754_v34 = vpop.permute.xlu2 %6753  ;;  %v6707_v12 = vpop.f32.mrf.mxu1 }
 0xc40   :  { %v6610_v48 = vpop.f32.mrf.mxu0 }
 0xc41   :  { %v6699_v51 = vadd.f32 %v6698_v7, %v6610_v48  ;;  %v9478_v48 = vld [vmem:[%s18166_s14 + $0xb0] sm:$0xff] }
 0xc42   :  { %v6713_v3 = vpop.f32.mrf.mxu3 }
 0xc43   :  { %9341 = vmatmul.msk.f32.gmra.mxu0 %vm6981_vm4, %v6886_v56 }
 0xc48   :  { %v6613_v31 = vpop.f32.mrf.mxu0 }
 0xc4b   :  { %9342 = vmatmul.msk.f32.gmra.mxu0 %vm6981_vm4, %v6887_v33  ;;  %v6702_v33 = vadd.f32 %v6701_v1, %v6613_v31 }
 0xc50   :  { %v6616_v57 = vpop.f32.mrf.mxu0 }
 0xc51   :  { %v6705_v28 = vadd.f32 %v6704_v63, %v6616_v57 }
 0xc53   :  { %9343 = vmatmul.msk.f32.gmra.mxu0 %vm6981_vm4, %v6888_v18 }
 0xc58   :  { %v6619_v25 = vpop.f32.mrf.mxu0 }
 0xc59   :  { %v6708_v6 = vadd.f32 %v6707_v12, %v6619_v25  ;;  %v9446_v12 = vld [vmem:[%s18167_s15 + $0x168] sm:$0xff] }
 0xc5b   :  { %9344 = vmatmul.msk.f32.gmra.mxu0 %vm6981_vm4, %v6889_v29  ;;  %v9404_v29 = vld [vmem:[%s18166_s14 + $0x68] sm:$0xff] }
 0xc5c   :  { %7385 = vmatpush.msrb.mxu2 %v9404_v29 }
 0xc5e   :  { %7386 = vmatpush.msrb.mxu2 %v9403_v23 }
 0xc60   :  { %7387 = vmatpush.msrb.mxu2 %v9402_v27  ;;  %v9371_v27 = vld [vmem:[%s18167_s15 + $0x78] sm:$0xff] }
 0xc62   :  { %7388 = vmatpush.msrb.mxu2 %v9401_v40 }
 0xc63   :  { %9345 = vmatmul.msk.f32.gmra.mxu0 %vm6981_vm4, %v6890_v10  ;;  %v6764_v10 = vpop.permute.xlu1 %6763 }
 0xc76   :  { %v6823_v43 = vpop.f32.mrf.mxu2 }
 0xc77   :  { %v6824_v41 = vadd.f32 %v6823_v43, %v6729_v62  ;;  %v6622_v62 = vpop.f32.mrf.mxu0  ;;  %v6769_v43 = vpop.permute.xlu2 %6768 }
 0xc79   :  { %v6853_v39 = vadd.f32 %v6824_v41, %v6687_v36  ;;  %v6710_v36 = vpop.f32.mrf.mxu1 }
 0xc7b   :  { %v17441_v54 = vmax.f32 %v6853_v39, 0.0  ;;  %v6711_v39 = vadd.f32 %v6710_v36, %v6622_v62  ;;  %v9373_v62 = vld [vmem:[%s18167_s15 + $0x88] sm:$0xff] }
 0xc7d   :  { %9346 = vmatmul.msk.f32.vlgmr.msra.gmra.mxu1 %vm7098_vm5, %v17441_v54  ;;  %9361 = vmatmul.msk.f32.vlgmr.msra.gmra.mxu2 %vm7098_vm5, %v17441_v54 }
 0xc7e   :  { %9436 = vmatmul.msk.f32.vlgmr.msra.gmra.mxu3 %vm7098_vm5, %v17441_v54  ;;  %v6826_v14 = vpop.f32.mrf.mxu2 }
 0xc7f   :  { %v6827_v49 = vadd.f32 %v6826_v14, %v6734_v61 }
 0xc81   :  { %v6854_v8 = vadd.f32 %v6827_v49, %v6690_v24  ;;  %v6625_v24 = vpop.f32.mrf.mxu0  ;;  %v6774_v49 = vpop.permute.xlu0 %6773 }
 0xc82   :  { %v6714_v45 = vadd.f32 %v6713_v3, %v6625_v24  ;;  %v9450_v24 = vld [vmem:[%s18167_s15 + $0x188] sm:$0xff]  ;;  %v9376_v3 = vld [vmem:[%s18167_s15 + $0xa0] sm:$0xff] }
 0xc83   :  { %v17449_v60 = vmax.f32 %v6854_v8, 0.0 }
 0xc85   :  { %9347 = vmatmul.msk.f32.gmra.mxu1 %vm7098_vm5, %v17449_v60  ;;  %9362 = vmatmul.msk.f32.gmra.mxu2 %vm7098_vm5, %v17449_v60 }
 0xc86   :  { %9437 = vmatmul.msk.f32.gmra.mxu3 %vm7098_vm5, %v17449_v60  ;;  %v6829_v52 = vpop.f32.mrf.mxu2 }
 0xc87   :  { %v6830_v58 = vadd.f32 %v6829_v52, %v6739_v9 }
 0xc89   :  { %v6855_v30 = vadd.f32 %v6830_v58, %v6693_v46  ;;  %v9480_v58 = vld [vmem:[%s18166_s14 + $0xc0] sm:$0xff] }
 0xc8a   :  { %7629 = vmatpush.msra.mxu2 %v9480_v58 }
 0xc8b   :  { %v17457_v13 = vmax.f32 %v6855_v30, 0.0  ;;  %v9479_v30 = vld [vmem:[%s18166_s14 + $0xb8] sm:$0xff] }
 0xc8c   :  { %7630 = vmatpush.msra.mxu2 %v9479_v30 }
 0xc8d   :  { %9348 = vmatmul.msk.f32.gmra.mxu1 %vm7098_vm5, %v17457_v13  ;;  %9363 = vmatmul.msk.f32.gmra.mxu2 %vm7098_vm5, %v17457_v13 }
 0xc8e   :  { %9438 = vmatmul.msk.f32.gmra.mxu3 %vm7098_vm5, %v17457_v13  ;;  %v6832_v2 = vpop.f32.mrf.mxu2  ;;  %7631 = vmatpush.msra.mxu2 %v9478_v48  ;;  %v9378_v48 = vld [vmem:[%s18167_s15 + $0xb0] sm:$0xff] }
 0xc8f   :  { %v6833_v21 = vadd.f32 %v6832_v2, %v6744_v55  ;;  %v9477_v55 = vld [vmem:[%s18166_s14 + $0xa8] sm:$0xff]  ;;  %v9476_v2 = vld [vmem:[%s18166_s14 + $0xa0] sm:$0xff] }
 0xc90   :  { %7632 = vmatpush.msra.mxu2 %v9477_v55  ;;  %v9453_v55 = vld [vmem:[%s18167_s15 + $0x1a0] sm:$0xff] }
 0xc91   :  { %v6856_v35 = vadd.f32 %v6833_v21, %v6696_v22 }
 0xc92   :  { %7633 = vmatpush.msra.mxu2 %v9476_v2 }
 0xc93   :  { %v17465_v32 = vmax.f32 %v6856_v35, 0.0 }
 0xc95   :  { %9349 = vmatmul.msk.f32.gmra.mxu1 %vm7098_vm5, %v17465_v32  ;;  %9364 = vmatmul.msk.f32.gmra.mxu2 %vm7098_vm5, %v17465_v32 }
 0xc96   :  { %9439 = vmatmul.msk.f32.gmra.mxu3 %vm7098_vm5, %v17465_v32  ;;  %v6835_v20 = vpop.f32.mrf.mxu2 }
 0xc97   :  { %v6836_v37 = vadd.f32 %v6835_v20, %v6749_v17 }
 0xc99   :  { %v6857_v47 = vadd.f32 %v6836_v37, %v6699_v51 }
 0xc9b   :  { %v17473_v38 = vmax.f32 %v6857_v47, 0.0 }
 0xc9d   :  { %9350 = vmatmul.msk.f32.gmra.mxu1 %vm7098_vm5, %v17473_v38  ;;  %9365 = vmatmul.msk.f32.gmra.mxu2 %vm7098_vm5, %v17473_v38 }
 0xc9e   :  { %9440 = vmatmul.msk.f32.gmra.mxu3 %vm7098_vm5, %v17473_v38  ;;  %v6838_v56 = vpop.f32.mrf.mxu2 }
 0xc9f   :  { %v6839_v18 = vadd.f32 %v6838_v56, %v6754_v34 }
 0xca1   :  { %v6858_v16 = vadd.f32 %v6839_v18, %v6702_v33 }
 0xca3   :  { %v17481_v42 = vmax.f32 %v6858_v16, 0.0 }
 0xca5   :  { %9351 = vmatmul.msk.f32.gmra.mxu1 %vm7098_vm5, %v17481_v42  ;;  %9366 = vmatmul.msk.f32.gmra.mxu2 %vm7098_vm5, %v17481_v42 }
 0xca6   :  { %9441 = vmatmul.msk.f32.gmra.mxu3 %vm7098_vm5, %v17481_v42  ;;  %v6841_v26 = vpop.f32.mrf.mxu2 }
 0xca7   :  { %v6842_v19 = vadd.f32 %v6841_v26, %v6759_v15 }
 0xca9   :  { %v6859_v0 = vadd.f32 %v6842_v19, %v6705_v28  ;;  %v17597_v19 = vpop.f32.mrf.mxu0 }
 0xcab   :  { %v17501_v53 = vmax.f32 %v6859_v0, 0.0 }
 0xcad   :  { %9352 = vmatmul.msk.f32.gmra.mxu1 %vm7098_vm5, %v17501_v53  ;;  %9367 = vmatmul.msk.f32.gmra.mxu2 %vm7098_vm5, %v17501_v53 }
 0xcae   :  { %9442 = vmatmul.msk.f32.gmra.mxu3 %vm7098_vm5, %v17501_v53  ;;  %v6844_v11 = vpop.f32.mrf.mxu2 }
 0xcaf   :  { %v6845_v44 = vadd.f32 %v6844_v11, %v6764_v10  ;;  %v9372_v11 = vld [vmem:[%s18167_s15 + $0x80] sm:$0xff] }
 0xcb1   :  { %v6860_v5 = vadd.f32 %v6845_v44, %v6708_v6  ;;  %v9447_v6 = vld [vmem:[%s18167_s15 + $0x170] sm:$0xff] }
 0xcb3   :  { %v17512_v59 = vmax.f32 %v6860_v5, 0.0 }
 0xcb5   :  { %9353 = vmatmul.msk.f32.gmra.mxu1 %vm7098_vm5, %v17512_v59  ;;  %9368 = vmatmul.msk.f32.gmra.mxu2 %vm7098_vm5, %v17512_v59 }
 0xcb6   :  { %9443 = vmatmul.msk.f32.gmra.mxu3 %vm7098_vm5, %v17512_v59  ;;  %v6847_v41 = vpop.f32.mrf.mxu2 }
 0xcb7   :  { %v6848_v4 = vadd.f32 %v6847_v41, %v6769_v43  ;;  %v9374_v41 = vld [vmem:[%s18167_s15 + $0x90] sm:$0xff] }
 0xcb9   :  { %v6861_v61 = vadd.f32 %v6848_v4, %v6711_v39  ;;  %v9449_v39 = vld [vmem:[%s18167_s15 + $0x180] sm:$0xff] }
 0xcbb   :  { %v17520_v14 = vmax.f32 %v6861_v61, 0.0 }
 0xcbd   :  { %9354 = vmatmul.msk.f32.gmra.mxu1 %vm7098_vm5, %v17520_v14  ;;  %9369 = vmatmul.msk.f32.gmra.mxu2 %vm7098_vm5, %v17520_v14 }
 0xcbe   :  { %9444 = vmatmul.msk.f32.gmra.mxu3 %vm7098_vm5, %v17520_v14  ;;  %v6850_v8 = vpop.f32.mrf.mxu2 }
 0xcbf   :  { %v6851_v9 = vadd.f32 %v6850_v8, %v6774_v49 }
 0xcc1   :  { %v6862_v52 = vadd.f32 %v6851_v9, %v6714_v45  ;;  %v9451_v45 = vld [vmem:[%s18167_s15 + $0x190] sm:$0xff] }
 0xcc3   :  { %v17528_v46 = vmax.f32 %v6862_v52, 0.0  ;;  %v9377_v52 = vld [vmem:[%s18167_s15 + $0xa8] sm:$0xff] }
 0xcc5   :  { %9355 = vmatmul.msk.f32.gmra.mxu1 %vm7098_vm5, %v17528_v46  ;;  %9370 = vmatmul.msk.f32.gmra.mxu2 %vm7098_vm5, %v17528_v46 }
 0xcc6   :  { %9445 = vmatmul.msk.f32.gmra.mxu3 %vm7098_vm5, %v17528_v46 }
 0xccd   :  { %9406 = vmatmul.msk.f32.vlgmr.msrb.gmra.mxu2 %vm7098_vm5, %v17441_v54 }
 0xcd5   :  { %9407 = vmatmul.msk.f32.gmra.mxu2 %vm7098_vm5, %v17449_v60 }
 0xcdd   :  { %9408 = vmatmul.msk.f32.gmra.mxu2 %vm7098_vm5, %v17457_v13 }
 0xce5   :  { %9409 = vmatmul.msk.f32.gmra.mxu2 %vm7098_vm5, %v17465_v32 }
 0xced   :  { %9410 = vmatmul.msk.f32.gmra.mxu2 %vm7098_vm5, %v17473_v38 }
 0xcf5   :  { %9411 = vmatmul.msk.f32.gmra.mxu2 %vm7098_vm5, %v17481_v42 }
 0xcfa   :  { %v17567_v22 = vpop.f32.mrf.mxu1 }
 0xcfd   :  { %9412 = vmatmul.msk.f32.gmra.mxu2 %vm7098_vm5, %v17501_v53 }
 0xd00   :  { %v17565_v7 = vpop.f32.mrf.mxu2 }
 0xd01   :  { %v17569_v21 = vpop.f32.mrf.mxu3 }
 0xd02   :  { %v17573_v17 = vpop.f32.mrf.mxu1 }
 0xd05   :  { %9413 = vmatmul.msk.f32.gmra.mxu2 %vm7098_vm5, %v17512_v59 }
 0xd08   :  { %v7217_v35 = vpop.f32.mrf.mxu2 }
 0xd09   :  { %v7462_v31 = vpop.f32.mrf.mxu3 }
 0xd0a   :  { %v17577_v37 = vpop.f32.mrf.mxu1 }
 0xd0d   :  { %9414 = vmatmul.msk.f32.gmra.mxu2 %vm7098_vm5, %v17520_v14 }
 0xd10   :  { %v7220_v20 = vpop.f32.mrf.mxu2 }
 0xd11   :  { %v7465_v51 = vpop.f32.mrf.mxu3 }
 0xd12   :  { %v17583_v34 = vpop.f32.mrf.mxu1 }
 0xd15   :  { %9415 = vmatmul.msk.f32.gmra.mxu2 %vm7098_vm5, %v17528_v46 }
 0xd18   :  { %v7223_v1 = vpop.f32.mrf.mxu2 }
 0xd19   :  { %v7468_v47 = vpop.f32.mrf.mxu3 }
 0xd1a   :  { %v17587_v18 = vpop.f32.mrf.mxu1 }
 0xd1d   :  { %9481 = vmatmul.msk.f32.vlgmr.msra.gmra.mxu2 %vm7098_vm5, %v17441_v54 }
 0xd20   :  { %v7226_v57 = vpop.f32.mrf.mxu2 }
 0xd21   :  { %v7471_v56 = vpop.f32.mrf.mxu3 }
 0xd22   :  { %v7161_v15 = vpop.f32.mrf.mxu1 }
 0xd25   :  { %9482 = vmatmul.msk.f32.gmra.mxu2 %vm7098_vm5, %v17449_v60 }
 0xd28   :  { %v7229_v33 = vpop.f32.mrf.mxu2 }
 0xd29   :  { %v7474_v16 = vpop.f32.mrf.mxu3 }
 0xd2a   :  { %v7164_v29 = vpop.f32.mrf.mxu1 }
 0xd2d   :  { %9483 = vmatmul.msk.f32.gmra.mxu2 %vm7098_vm5, %v17457_v13 }
 0xd30   :  { %v7232_v63 = vpop.f32.mrf.mxu2 }
 0xd31   :  { %v7477_v50 = vpop.f32.mrf.mxu3 }
 0xd32   :  { %v7167_v13 = vpop.f32.mrf.mxu1 }
 0xd35   :  { %9484 = vmatmul.msk.f32.gmra.mxu2 %vm7098_vm5, %v17465_v32 }
 0xd38   :  { %v7235_v54 = vpop.f32.mrf.mxu2 }
 0xd39   :  { %v7480_v26 = vpop.f32.mrf.mxu3 }
 0xd3d   :  { %9485 = vmatmul.msk.f32.gmra.mxu2 %vm7098_vm5, %v17473_v38  ;;  %v17603_v38 = vpop.f32.mrf.mxu0 }
 0xd40   :  { %v7238_v60 = vpop.f32.mrf.mxu2 }
 0xd41   :  { %v7483_v28 = vpop.f32.mrf.mxu3 }
 0xd45   :  { %9486 = vmatmul.msk.f32.gmra.mxu2 %vm7098_vm5, %v17481_v42  ;;  %v7170_v42 = vpop.f32.mrf.mxu1 }
 0xd48   :  { %v7241_v25 = vpop.f32.mrf.mxu2 }
 0xd49   :  { %v7486_v23 = vpop.f32.mrf.mxu3  ;;  %7311 = vmatpush.msrb.mxu1 %v7241_v25 }
 0xd4a   :  { %7556 = vmatpush.msrb.mxu0 %v7486_v23  ;;  %v7176_v23 = vld [vmem:[%s18167_s15] sm:$0xff] }
 0xd4b   :  { %7312 = vmatpush.msrb.mxu1 %v7238_v60 }
 0xd4c   :  { %7557 = vmatpush.msrb.mxu0 %v7483_v28  ;;  %v9385_v28 = vld [vmem:[%s18167_s15 + $0xe8] sm:$0xff] }
 0xd4d   :  { %7313 = vmatpush.msrb.mxu1 %v7235_v54  ;;  %9487 = vmatmul.msk.f32.gmra.mxu2 %vm7098_vm5, %v17501_v53  ;;  %v17612_v53 = vpop.f32.mrf.mxu0  ;;  %v7173_v40 = vpop.f32.mrf.mxu1  ;;  %v9384_v54 = vld [vmem:[%s18167_s15 + $0xe0] sm:$0xff] }
 0xd4e   :  { %7558 = vmatpush.msrb.mxu0 %v7480_v26  ;;  %v9459_v26 = vld [vmem:[%s18167_s15 + $0x1d0] sm:$0xff] }
 0xd4f   :  { %7314 = vmatpush.msrb.mxu1 %v7232_v63  ;;  %v9458_v63 = vld [vmem:[%s18167_s15 + $0x1c8] sm:$0xff] }
 0xd50   :  { %7559 = vmatpush.msrb.mxu0 %v7477_v50  ;;  %v17601_v32 = vpop.f32.mrf.mxu2 }
 0xd51   :  { %7315 = vmatpush.msrb.mxu1 %v7229_v33 }
 0xd52   :  { %7560 = vmatpush.msrb.mxu0 %v7474_v16  ;;  %v9383_v16 = vld [vmem:[%s18167_s15 + $0xd8] sm:$0xff] }
 0xd53   :  { %7316 = vmatpush.msrb.mxu1 %v7226_v57  ;;  %v9382_v57 = vld [vmem:[%s18167_s15 + $0xd0] sm:$0xff] }
 0xd54   :  { %7561 = vmatpush.msrb.mxu0 %v7471_v56  ;;  %v9457_v56 = vld [vmem:[%s18167_s15 + $0x1c0] sm:$0xff] }
 0xd55   :  { %7317 = vmatpush.msrb.mxu1 %v7223_v1  ;;  %9488 = vmatmul.msk.f32.gmra.mxu2 %vm7098_vm5, %v17512_v59  ;;  %v17631_v44 = vpop.f32.mrf.mxu0  ;;  %v9448_v59 = vld [vmem:[%s18167_s15 + $0x178] sm:$0xff] }
 0xd56   :  { %7562 = vmatpush.msrb.mxu0 %v7468_v47  ;;  %v9456_v47 = vld [vmem:[%s18167_s15 + $0x1b8] sm:$0xff] }
 0xd57   :  { %7318 = vmatpush.msrb.mxu1 %v7220_v20  ;;  %v9455_v20 = vld [vmem:[%s18167_s15 + $0x1b0] sm:$0xff] }
 0xd58   :  { %7563 = vmatpush.msrb.mxu0 %v7465_v51  ;;  %v17607_v0 = vpop.f32.mrf.mxu2 }
 0xd59   :  { %7319 = vmatpush.msrb.mxu1 %v7217_v35 }
 0xd5a   :  { %7564 = vmatpush.msrb.mxu0 %v7462_v31 }
 0xd5b   :  { %7320 = vmatpush.msrb.mxu1 %v17565_v7 }
 0xd5c   :  { %7565 = vmatpush.msrb.mxu0 %v17569_v21  ;;  %9386 = vmatmul.msk.f32.vlgmr.msrb.gmra.mxu1 %vm151_vm0, %v9371_v27  ;;  %v9454_v21 = vld [vmem:[%s18167_s15 + $0x1a8] sm:$0xff] }
 0xd5d   :  { %7839 = vmatpush.msra.mxu1 %v7173_v40  ;;  %9489 = vmatmul.msk.f32.gmra.mxu2 %vm7098_vm5, %v17520_v14  ;;  %v17650_v43 = vpop.f32.mrf.mxu0  ;;  %v9375_v14 = vld [vmem:[%s18167_s15 + $0x98] sm:$0xff]  ;;  %v7177_v40 = vld [vmem:[%s18167_s15 + $0x8] sm:$0xff] }
 0xd5e   :  { %9461 = vmatmul.msk.f32.vlgmr.msrb.gmra.mxu0 %vm151_vm0, %v9446_v12 }
 0xd5f   :  { %7840 = vmatpush.msra.mxu1 %v7170_v42  ;;  %v9416_v42 = vld [vmem:[%s18167_s15 + $0xf0] sm:$0xff] }
 0xd60   :  { %v17623_v10 = vpop.f32.mrf.mxu2 }
 0xd61   :  { %7841 = vmatpush.msra.mxu1 %v7167_v13  ;;  %v9460_v13 = vld [vmem:[%s18167_s15 + $0x1d8] sm:$0xff] }
 0xd63   :  { %7842 = vmatpush.msra.mxu1 %v7164_v29 }
 0xd64   :  { %9387 = vmatmul.msk.f32.gmra.mxu1 %vm151_vm0, %v9372_v11 }
 0xd65   :  { %7843 = vmatpush.msra.mxu1 %v7161_v15  ;;  %9490 = vmatmul.msk.f32.gmra.mxu2 %vm7098_vm5, %v17528_v46  ;;  %v17660_v61 = vpop.f32.mrf.mxu0  ;;  %v9452_v46 = vld [vmem:[%s18167_s15 + $0x198] sm:$0xff] }
 0xd66   :  { %9462 = vmatmul.msk.f32.gmra.mxu0 %vm151_vm0, %v9447_v6 }
 0xd67   :  { %7844 = vmatpush.msra.mxu1 %v17587_v18 }
 0xd68   :  { %v7399_v5 = vpop.f32.mrf.mxu2 }
 0xd69   :  { %7845 = vmatpush.msra.mxu1 %v17583_v34 }
 0xd6b   :  { %7846 = vmatpush.msra.mxu1 %v17577_v37  ;;  %v9381_v37 = vld [vmem:[%s18167_s15 + $0xc8] sm:$0xff] }
 0xd6c   :  { %9388 = vmatmul.msk.f32.gmra.mxu1 %vm151_vm0, %v9373_v62 }
 0xd6d   :  { %7847 = vmatpush.msra.mxu1 %v17573_v17  ;;  %v17673_v8 = vpop.f32.mrf.mxu0  ;;  %v9380_v17 = vld [vmem:[%s18167_s15 + $0xc0] sm:$0xff] }
 0xd6e   :  { %9463 = vmatmul.msk.f32.gmra.mxu0 %vm151_vm0, %v9448_v59  ;;  %v9418_v59 = vld [vmem:[%s18167_s15 + $0x100] sm:$0xff] }
 0xd6f   :  { %7848 = vmatpush.msra.mxu1 %v17567_v22  ;;  %v9379_v22 = vld [vmem:[%s18167_s15 + $0xb8] sm:$0xff] }
 0xd70   :  { %v7402_v36 = vpop.f32.mrf.mxu2 }
 0xd74   :  { %9389 = vmatmul.msk.f32.gmra.mxu1 %vm151_vm0, %v9374_v41 }
 0xd75   :  { %v17686_v58 = vpop.f32.mrf.mxu0 }
 0xd76   :  { %9464 = vmatmul.msk.f32.gmra.mxu0 %vm151_vm0, %v9449_v39  ;;  %v7179_v39 = vld [vmem:[%s18167_s15 + $0x18] sm:$0xff] }
 0xd78   :  { %v7405_v4 = vpop.f32.mrf.mxu2 }
 0xd7c   :  { %9390 = vmatmul.msk.f32.gmra.mxu1 %vm151_vm0, %v9375_v14  ;;  %v9419_v14 = vld [vmem:[%s18167_s15 + $0x108] sm:$0xff] }
 0xd7d   :  { %v17698_v2 = vpop.f32.mrf.mxu0 }
 0xd7e   :  { %9465 = vmatmul.msk.f32.gmra.mxu0 %vm151_vm0, %v9450_v24 }
 0xd80   :  { %v7408_v49 = vpop.f32.mrf.mxu2 }
 0xd84   :  { %9391 = vmatmul.msk.f32.gmra.mxu1 %vm151_vm0, %v9376_v3 }
 0xd85   :  { %v17710_v31 = vpop.f32.mrf.mxu0 }
 0xd86   :  { %9466 = vmatmul.msk.f32.gmra.mxu0 %vm151_vm0, %v9451_v45  ;;  %v9420_v45 = vld [vmem:[%s18167_s15 + $0x110] sm:$0xff] }
 0xd88   :  { %v7411_v9 = vpop.f32.mrf.mxu2 }
 0xd8c   :  { %9392 = vmatmul.msk.f32.gmra.mxu1 %vm151_vm0, %v9377_v52 }
 0xd8d   :  { %v17727_v1 = vpop.f32.mrf.mxu0 }
 0xd8e   :  { %9467 = vmatmul.msk.f32.gmra.mxu0 %vm151_vm0, %v9452_v46  ;;  %v7181_v46 = vld [vmem:[%s18167_s15 + $0x28] sm:$0xff] }
 0xd90   :  { %v7414_v30 = vpop.f32.mrf.mxu2 }
 0xd94   :  { %9393 = vmatmul.msk.f32.gmra.mxu1 %vm151_vm0, %v9378_v48  ;;  %v9421_v48 = vld [vmem:[%s18167_s15 + $0x118] sm:$0xff] }
 0xd95   :  { %v17743_v33 = vpop.f32.mrf.mxu0 }
 0xd96   :  { %9468 = vmatmul.msk.f32.gmra.mxu0 %vm151_vm0, %v9453_v55  ;;  %v9492_v55 = vld [vmem:[%s18167_s15 + $0x1e8] sm:$0xff] }
 0xd98   :  { %v7417_v7 = vpop.f32.mrf.mxu2 }
 0xd99   :  { %7946 = vmatpush.msra.mxu0 %v7417_v7 }
 0xd9b   :  { %7947 = vmatpush.msra.mxu0 %v7414_v30 }
 0xd9c   :  { %9394 = vmatmul.msk.f32.gmra.mxu1 %vm151_vm0, %v9379_v22  ;;  %v7182_v22 = vld [vmem:[%s18167_s15 + $0x30] sm:$0xff] }
 0xd9d   :  { %7948 = vmatpush.msra.mxu0 %v7411_v9  ;;  %v17755_v50 = vpop.f32.mrf.mxu0  ;;  %v9491_v9 = vld [vmem:[%s18167_s15 + $0x1e0] sm:$0xff] }
 0xd9e   :  { %9469 = vmatmul.msk.f32.gmra.mxu0 %vm151_vm0, %v9454_v21 }
 0xd9f   :  { %7949 = vmatpush.msra.mxu0 %v7408_v49  ;;  %v7180_v49 = vld [vmem:[%s18167_s15 + $0x20] sm:$0xff] }
 0xda0   :  { %v17708_v35 = vpop.f32.mrf.mxu2 }
 0xda1   :  { %7950 = vmatpush.msra.mxu0 %v7405_v4 }
 0xda3   :  { %7951 = vmatpush.msra.mxu0 %v7402_v36 }
 0xda4   :  { %9395 = vmatmul.msk.f32.gmra.mxu1 %vm151_vm0, %v9380_v17  ;;  %v9493_v17 = vld [vmem:[%s18167_s15 + $0x1f0] sm:$0xff] }
 0xda5   :  { %7952 = vmatpush.msra.mxu0 %v7399_v5  ;;  %v17765_v60 = vpop.f32.mrf.mxu0  ;;  %v7178_v5 = vld [vmem:[%s18167_s15 + $0x10] sm:$0xff] }
 0xda6   :  { %9470 = vmatmul.msk.f32.gmra.mxu0 %vm151_vm0, %v9455_v20  ;;  %19046 = vst [vmem:[#allocation99_spill] sm:$0xff] %v17765_v60  ;;  %v6914_v60 = vpop.permute.xlu2 %6913 }
 0xda7   :  { %7953 = vmatpush.msra.mxu0 %v17623_v10  ;;  %v9417_v10 = vld [vmem:[%s18167_s15 + $0xf8] sm:$0xff] }
 0xda8   :  { %v17721_v51 = vpop.f32.mrf.mxu2 }
 0xda9   :  { %7954 = vmatpush.msra.mxu0 %v17607_v0 }
 0xdab   :  { %7955 = vmatpush.msra.mxu0 %v17601_v32 }
 0xdac   :  { %9396 = vmatmul.msk.f32.gmra.mxu1 %vm151_vm0, %v9381_v37 }
 0xdad   :  { %v17778_v32 = vpop.f32.mrf.mxu0 }
 0xdae   :  { %9471 = vmatmul.msk.f32.gmra.mxu0 %vm151_vm0, %v9456_v47  ;;  %19047 = vst [vmem:[#allocation63_spill] sm:$0xff] %v17778_v32  ;;  %v9423_v47 = vld [vmem:[%s18167_s15 + $0x128] sm:$0xff] }
 0xdb0   :  { %v17735_v34 = vpop.f32.mrf.mxu2 }
 0xdb4   :  { %9397 = vmatmul.msk.f32.gmra.mxu1 %vm151_vm0, %v9382_v57 }
 0xdb6   :  { %9472 = vmatmul.msk.f32.gmra.mxu0 %vm151_vm0, %v9457_v56  ;;  %v7184_v56 = vld [vmem:[%s18167_s15 + $0x40] sm:$0xff] }
 0xdb8   :  { %v7644_v18 = vpop.f32.mrf.mxu2 }
 0xdbc   :  { %9398 = vmatmul.msk.f32.gmra.mxu1 %vm151_vm0, %v9383_v16  ;;  %v9424_v16 = vld [vmem:[%s18167_s15 + $0x130] sm:$0xff] }
 0xdbe   :  { %9473 = vmatmul.msk.f32.gmra.mxu0 %vm151_vm0, %v9458_v63  ;;  %v9495_v63 = vld [vmem:[%s18167_s15 + $0x200] sm:$0xff] }
 0xdc0   :  { %v7647_v15 = vpop.f32.mrf.mxu2 }
 0xdc4   :  { %9399 = vmatmul.msk.f32.gmra.mxu1 %vm151_vm0, %v9384_v54  ;;  %v7185_v54 = vld [vmem:[%s18167_s15 + $0x48] sm:$0xff] }
 0xdc6   :  { %9474 = vmatmul.msk.f32.gmra.mxu0 %vm151_vm0, %v9459_v26 }
 0xdc8   :  { %v7650_v29 = vpop.f32.mrf.mxu2 }
 0xdcc   :  { %9400 = vmatmul.msk.f32.gmra.mxu1 %vm151_vm0, %v9385_v28  ;;  %v9496_v28 = vld [vmem:[%s18167_s15 + $0x208] sm:$0xff] }
 0xdce   :  { %9475 = vmatmul.msk.f32.gmra.mxu0 %vm151_vm0, %v9460_v13 }
 0xdd0   :  { %v7653_v25 = vpop.f32.mrf.mxu2 }
 0xdd4   :  { %9521 = vmatmul.msk.f32.vlgmr.msra.gmra.mxu1 %vm151_vm0, %v7176_v23 }
 0xdd6   :  { %9536 = vmatmul.msk.f32.vlgmr.msra.gmra.mxu0 %vm151_vm0, %v9416_v42  ;;  %v9426_v42 = vld [vmem:[%s18167_s15 + $0x140] sm:$0xff] }
 0xdd8   :  { %v7656_v0 = vpop.f32.mrf.mxu2 }
 0xdd9   :  { %v17785_v27 = vpop.f32.mrf.mxu1 }
 0xddb   :  { %v17790_v12 = vpop.f32.mrf.mxu0 }
 0xddc   :  { %9522 = vmatmul.msk.f32.gmra.mxu1 %vm151_vm0, %v7177_v40 }
 0xdde   :  { %9537 = vmatmul.msk.f32.gmra.mxu0 %vm151_vm0, %v9417_v10  ;;  %v7187_v10 = vld [vmem:[%s18167_s15 + $0x58] sm:$0xff] }
 0xde0   :  { %v7659_v11 = vpop.f32.mrf.mxu2 }
 0xde1   :  { %v17797_v6 = vpop.f32.mrf.mxu1 }
 0xde3   :  { %v17802_v62 = vpop.f32.mrf.mxu0 }
 0xde4   :  { %9523 = vmatmul.msk.f32.gmra.mxu1 %vm151_vm0, %v7178_v5  ;;  %v9427_v5 = vld [vmem:[%s18167_s15 + $0x148] sm:$0xff] }
 0xde6   :  { %9538 = vmatmul.msk.f32.gmra.mxu0 %vm151_vm0, %v9418_v59  ;;  %v9498_v59 = vld [vmem:[%s18167_s15 + $0x218] sm:$0xff] }
 0xde8   :  { %v7662_v36 = vpop.f32.mrf.mxu2 }
 0xde9   :  { %7732 = vmatpush.msrb.mxu3 %v7662_v36  ;;  %v17809_v41 = vpop.f32.mrf.mxu1 }
 0xdeb   :  { %7733 = vmatpush.msrb.mxu3 %v7659_v11  ;;  %v17814_v4 = vpop.f32.mrf.mxu0 }
 0xdec   :  { %9524 = vmatmul.msk.f32.gmra.mxu1 %vm151_vm0, %v7179_v39  ;;  %v7188_v39 = vld [vmem:[%s18167_s15 + $0x60] sm:$0xff] }
 0xded   :  { %7734 = vmatpush.msrb.mxu3 %v7656_v0  ;;  %v9497_v0 = vld [vmem:[%s18167_s15 + $0x210] sm:$0xff] }
 0xdee   :  { %9539 = vmatmul.msk.f32.gmra.mxu0 %vm151_vm0, %v9419_v14 }
 0xdef   :  { %7735 = vmatpush.msrb.mxu3 %v7653_v25  ;;  %v7186_v25 = vld [vmem:[%s18167_s15 + $0x50] sm:$0xff] }
 0xdf1   :  { %7736 = vmatpush.msrb.mxu3 %v7650_v29  ;;  %v17821_v24 = vpop.f32.mrf.mxu1  ;;  %v9425_v29 = vld [vmem:[%s18167_s15 + $0x138] sm:$0xff] }
 0xdf3   :  { %7737 = vmatpush.msrb.mxu3 %v7647_v15  ;;  %v17826_v3 = vpop.f32.mrf.mxu0 }
 0xdf4   :  { %9525 = vmatmul.msk.f32.gmra.mxu1 %vm151_vm0, %v7180_v49  ;;  %v9428_v49 = vld [vmem:[%s18167_s15 + $0x150] sm:$0xff] }
 0xdf5   :  { %7738 = vmatpush.msrb.mxu3 %v7644_v18 }
 0xdf6   :  { %9540 = vmatmul.msk.f32.gmra.mxu0 %vm151_vm0, %v9420_v45  ;;  %v9499_v45 = vld [vmem:[%s18167_s15 + $0x220] sm:$0xff] }
 0xdf7   :  { %7739 = vmatpush.msrb.mxu3 %v17735_v34  ;;  %v9494_v34 = vld [vmem:[%s18167_s15 + $0x1f8] sm:$0xff] }
 0xdf9   :  { %7740 = vmatpush.msrb.mxu3 %v17721_v51  ;;  %v17838_v52 = vpop.f32.mrf.mxu1  ;;  %v7183_v51 = vld [vmem:[%s18167_s15 + $0x38] sm:$0xff] }
 0xdfb   :  { %7741 = vmatpush.msrb.mxu3 %v17708_v35  ;;  %v17844_v30 = vpop.f32.mrf.mxu0  ;;  %v9422_v35 = vld [vmem:[%s18167_s15 + $0x120] sm:$0xff] }
 0xdfc   :  { %9506 = vmatmul.msk.f32.vlgmr.msrb.gmra.mxu3 %vm151_vm0, %v9491_v9  ;;  %9526 = vmatmul.msk.f32.gmra.mxu1 %vm151_vm0, %v7181_v46  ;;  %v7189_v9 = vld [vmem:[%s18167_s15 + $0x68] sm:$0xff]  ;;  %v9429_v46 = vld [vmem:[%s18167_s15 + $0x158] sm:$0xff] }
 0xdfe   :  { %9541 = vmatmul.msk.f32.gmra.mxu0 %vm151_vm0, %v9421_v48 }
 0xe01   :  { %v17855_v7 = vpop.f32.mrf.mxu1 }
 0xe03   :  { %v17860_v21 = vpop.f32.mrf.mxu0 }
 0xe04   :  { %9507 = vmatmul.msk.f32.gmra.mxu3 %vm151_vm0, %v9492_v55  ;;  %9527 = vmatmul.msk.f32.gmra.mxu1 %vm151_vm0, %v7182_v22  ;;  %v9500_v22 = vld [vmem:[%s18167_s15 + $0x228] sm:$0xff] }
 0xe06   :  { %9542 = vmatmul.msk.f32.gmra.mxu0 %vm151_vm0, %v9422_v35  ;;  %v7190_v35 = vld [vmem:[%s18167_s15 + $0x70] sm:$0xff] }
 0xe09   :  { %v17871_v20 = vpop.f32.mrf.mxu1 }
 0xe0b   :  { %v17876_v37 = vpop.f32.mrf.mxu0 }
 0xe0c   :  { %9508 = vmatmul.msk.f32.gmra.mxu3 %vm151_vm0, %v9493_v17  ;;  %9528 = vmatmul.msk.f32.gmra.mxu1 %vm151_vm0, %v7183_v51  ;;  %v9430_v17 = vld [vmem:[%s18167_s15 + $0x160] sm:$0xff] }
 0xe0e   :  { %9543 = vmatmul.msk.f32.gmra.mxu0 %vm151_vm0, %v9423_v47 }
 0xe11   :  { %v17887_v57 = vpop.f32.mrf.mxu1 }
 0xe13   :  { %v17892_v18 = vpop.f32.mrf.mxu0 }
 0xe14   :  { %9509 = vmatmul.msk.f32.gmra.mxu3 %vm151_vm0, %v9494_v34  ;;  %9529 = vmatmul.msk.f32.gmra.mxu1 %vm151_vm0, %v7184_v56  ;;  %v9501_v34 = vld [vmem:[%s18167_s15 + $0x230] sm:$0xff] }
 0xe16   :  { %9544 = vmatmul.msk.f32.gmra.mxu0 %vm151_vm0, %v9424_v16  ;;  %v9502_v16 = vld [vmem:[%s18167_s15 + $0x238] sm:$0xff] }
 0xe19   :  { %v17903_v15 = vpop.f32.mrf.mxu1 }
 0xe1b   :  { %v17908_v26 = vpop.f32.mrf.mxu0 }
 0xe1c   :  { %9510 = vmatmul.msk.f32.gmra.mxu3 %vm151_vm0, %v9495_v63  ;;  %9530 = vmatmul.msk.f32.gmra.mxu1 %vm151_vm0, %v7185_v54  ;;  %v9503_v54 = vld [vmem:[%s18167_s15 + $0x240] sm:$0xff] }
 0xe1e   :  { %9545 = vmatmul.msk.f32.gmra.mxu0 %vm151_vm0, %v9425_v29 }
 0xe21   :  { %v17919_v13 = vpop.f32.mrf.mxu1 }
 0xe23   :  { %v17924_v23 = vpop.f32.mrf.mxu0 }
 0xe24   :  { %9511 = vmatmul.msk.f32.gmra.mxu3 %vm151_vm0, %v9496_v28  ;;  %9531 = vmatmul.msk.f32.gmra.mxu1 %vm151_vm0, %v7186_v25  ;;  %v9504_v25 = vld [vmem:[%s18167_s15 + $0x248] sm:$0xff] }
 0xe26   :  { %9546 = vmatmul.msk.f32.gmra.mxu0 %vm151_vm0, %v9426_v42 }
 0xe29   :  { %v17935_v40 = vpop.f32.mrf.mxu1 }
 0xe2b   :  { %v17940_v11 = vpop.f32.mrf.mxu0 }
 0xe2c   :  { %9512 = vmatmul.msk.f32.gmra.mxu3 %vm151_vm0, %v9497_v0  ;;  %9532 = vmatmul.msk.f32.gmra.mxu1 %vm151_vm0, %v7187_v10  ;;  %v9505_v10 = vld [vmem:[%s18167_s15 + $0x250] sm:$0xff] }
 0xe2e   :  { %9547 = vmatmul.msk.f32.gmra.mxu0 %vm151_vm0, %v9427_v5 }
 0xe31   :  { %v17951_v36 = vpop.f32.mrf.mxu1 }
 0xe33   :  { %v17956_v14 = vpop.f32.mrf.mxu0 }
 0xe34   :  { %9513 = vmatmul.msk.f32.gmra.mxu3 %vm151_vm0, %v9498_v59  ;;  %9533 = vmatmul.msk.f32.gmra.mxu1 %vm151_vm0, %v7188_v39 }
 0xe36   :  { %9548 = vmatmul.msk.f32.gmra.mxu0 %vm151_vm0, %v9428_v49 }
 0xe39   :  { %v17974_v48 = vpop.f32.mrf.mxu1 }
 0xe3b   :  { %v17976_v55 = vpop.f32.mrf.mxu0 }
 0xe3c   :  { %9514 = vmatmul.msk.f32.gmra.mxu3 %vm151_vm0, %v9499_v45  ;;  %9534 = vmatmul.msk.f32.gmra.mxu1 %vm151_vm0, %v7189_v9 }
 0xe3e   :  { %9549 = vmatmul.msk.f32.gmra.mxu0 %vm151_vm0, %v9429_v46 }
 0xe41   :  { %v17991_v51 = vpop.f32.mrf.mxu1 }
 0xe43   :  { %v17994_v47 = vpop.f32.mrf.mxu0 }
 0xe44   :  { %9515 = vmatmul.msk.f32.gmra.mxu3 %vm151_vm0, %v9500_v22  ;;  %9535 = vmatmul.msk.f32.gmra.mxu1 %vm151_vm0, %v7190_v35  ;;  %v6909_v22 = vpop.permute.xlu1 %6908 }
 0xe46   :  { %9550 = vmatmul.msk.f32.gmra.mxu0 %vm151_vm0, %v9430_v17  ;;  %v7049_v17 = vadd.f32 %v17597_v19, %v6909_v22 }
 0xe49   :  { %v18000_v56 = vpop.f32.mrf.mxu1 }
 0xe4a   :  { %19048 = vst [vmem:[#allocation69_spill] sm:$0xff] %v18000_v56 }
 0xe4b   :  { %v18005_v63 = vpop.f32.mrf.mxu0 }
 0xe4c   :  { %9516 = vmatmul.msk.f32.gmra.mxu3 %vm151_vm0, %v9501_v34  ;;  %19049 = vst [vmem:[#allocation39_spill] sm:$0xff] %v18005_v63 }
 0xe51   :  { %v7850_v29 = vpop.f32.mrf.mxu1 }
 0xe52   :  { %v7851_v45 = vadd.f32 %v7850_v29, %v17785_v27 }
 0xe53   :  { %v7957_v28 = vpop.f32.mrf.mxu0 }
 0xe54   :  { %9517 = vmatmul.msk.f32.gmra.mxu3 %vm151_vm0, %v9502_v16  ;;  %v7958_v9 = vadd.f32 %v7957_v28, %v17790_v12  ;;  %v7052_v12 = vadd.f32 %v17603_v38, %v6914_v60 }
 0xe56   :  { %v8002_v46 = vadd.f32 %v7958_v9, %v7851_v45 }
 0xe59   :  { %v7853_v42 = vpop.f32.mrf.mxu1 }
 0xe5b   :  { %v7960_v0 = vpop.f32.mrf.mxu0 }
 0xe5c   :  { %9518 = vmatmul.msk.f32.gmra.mxu3 %vm151_vm0, %v9503_v54  ;;  %v7854_v54 = vadd.f32 %v7853_v42, %v17797_v6  ;;  %v6919_v42 = vpop.permute.xlu0 %6918 }
 0xe61   :  { %v7856_v5 = vpop.f32.mrf.mxu1 }
 0xe62   :  { %v7857_v45 = vadd.f32 %v7856_v5, %v17809_v41 }
 0xe63   :  { %v7963_v59 = vpop.f32.mrf.mxu0 }
 0xe64   :  { %9519 = vmatmul.msk.f32.gmra.mxu3 %vm151_vm0, %v9504_v25  ;;  %v7961_v25 = vadd.f32 %v7960_v0, %v17802_v62  ;;  %v7964_v19 = vadd.f32 %v7963_v59, %v17814_v4 }
 0xe66   :  { %v8003_v56 = vadd.f32 %v7961_v25, %v7854_v54  ;;  %v8004_v62 = vadd.f32 %v7964_v19, %v7857_v45 }
 0xe69   :  { %v7859_v39 = vpop.f32.mrf.mxu1 }
 0xe6b   :  { %v7966_v49 = vpop.f32.mrf.mxu0 }
 0xe6c   :  { %9520 = vmatmul.msk.f32.gmra.mxu3 %vm151_vm0, %v9505_v10  ;;  %v7967_v38 = vadd.f32 %v7966_v49, %v17826_v3 }
 0xe71   :  { %v7862_v10 = vpop.f32.mrf.mxu1 }
 0xe72   :  { %v7863_v25 = vadd.f32 %v7862_v10, %v17838_v52  ;;  %v6934_v10 = vpop.permute.xlu0 %6933 }
 0xe73   :  { %v7969_v32 = vpop.f32.mrf.mxu0 }
 0xe7b   :  { %v7972_v6 = vpop.f32.mrf.mxu0 }
 0xe7f   :  { %v7743_v35 = vpop.f32.mrf.mxu3 }
 0xe80   :  { %v8017_v34 = vadd.f32 %v8002_v46, %v7743_v35  ;;  %v7865_v46 = vpop.f32.mrf.mxu1 }
 0xe81   :  { %v7866_v19 = vadd.f32 %v7865_v46, %v17855_v7 }
 0xe82   :  { %v8032_v16 = vadd.f32 %v8017_v34, %v7049_v17  ;;  %v7860_v17 = vadd.f32 %v7859_v39, %v17821_v24  ;;  %v6929_v39 = vpop.permute.xlu2 %6928 }
 0xe83   :  { %v7975_v59 = vpop.f32.mrf.mxu0  ;;  %v7061_v49 = vadd.f32 %v17650_v43, %v6929_v39 }
 0xe84   :  { %v8047_v63 = vmax.f32 %v8032_v16, 0.0  ;;  %v8005_v41 = vadd.f32 %v7967_v38, %v7860_v17  ;;  %v7976_v43 = vadd.f32 %v7975_v59, %v17876_v37 }
 0xe86   :  { %8062 = vxpose.xlu1.b32.start [1/15] (short) (narrow) %v8047_v63, 8  ;;  %v7055_v63 = vadd.f32 %v17612_v53, %v6919_v42  ;;  %v7970_v53 = vadd.f32 %v7969_v32, %v17844_v30  ;;  %v7064_v30 = vadd.f32 %v17660_v61, %v6934_v10 }
 0xe87   :  { %v7746_v27 = vpop.f32.mrf.mxu3 }
 0xe88   :  { %v8018_v29 = vadd.f32 %v8003_v56, %v7746_v27  ;;  %v6924_v56 = vpop.permute.xlu1 %6923  ;;  %v7868_v4 = vpop.f32.mrf.mxu1  ;;  %v8006_v24 = vadd.f32 %v7970_v53, %v7863_v25 }
 0xe89   :  { %v7058_v34 = vadd.f32 %v17631_v44, %v6924_v56  ;;  %v7973_v44 = vadd.f32 %v7972_v6, %v17860_v21  ;;  %v6949_v53 = vpop.permute.xlu0 %6948 }
 0xe8a   :  { %v8033_v28 = vadd.f32 %v8018_v29, %v7052_v12  ;;  %v7073_v39 = vadd.f32 %v17698_v2, %v6949_v53 }
 0xe8b   :  { %v8007_v52 = vadd.f32 %v7973_v44, %v7866_v19 }
 0xe8c   :  { %v8048_v9 = vmax.f32 %v8033_v28, 0.0  ;;  %v7978_v28 = vpop.f32.mrf.mxu0 }
 0xe8d   :  { %v7979_v61 = vadd.f32 %v7978_v28, %v17892_v18 }
 0xe8e   :  { %8063 = vxpose.xlu1.b32.cont [2/15] (short) (narrow) %v8048_v9, 8 }
 0xe8f   :  { %v7749_v0 = vpop.f32.mrf.mxu3 }
 0xe90   :  { %v8019_v22 = vadd.f32 %v8004_v62, %v7749_v0  ;;  %v7871_v29 = vpop.f32.mrf.mxu1  ;;  %v7869_v0 = vadd.f32 %v7868_v4, %v17871_v20  ;;  %v6939_v46 = vpop.permute.xlu1 %6938 }
 0xe91   :  { %v7067_v6 = vadd.f32 %v17673_v8, %v6939_v46  ;;  %v6944_v4 = vpop.permute.xlu2 %6943 }
 0xe92   :  { %v8034_v35 = vadd.f32 %v8019_v22, %v7055_v63  ;;  %v8008_v7 = vadd.f32 %v7976_v43, %v7869_v0  ;;  %v7070_v59 = vadd.f32 %v17686_v58, %v6944_v4 }
 0xe94   :  { %v8049_v60 = vmax.f32 %v8034_v35, 0.0  ;;  %v7981_v22 = vpop.f32.mrf.mxu0 }
 0xe95   :  { %v7982_v8 = vadd.f32 %v7981_v22, %v17908_v26 }
 0xe96   :  { %8064 = vxpose.xlu1.b32.cont [3/15] (short) (narrow) %v8049_v60, 8  ;;  %v7872_v60 = vadd.f32 %v7871_v29, %v17887_v57 }
 0xe97   :  { %v7752_v5 = vpop.f32.mrf.mxu3 }
 0xe98   :  { %v8020_v16 = vadd.f32 %v8005_v41, %v7752_v5  ;;  %v7874_v63 = vpop.f32.mrf.mxu1  ;;  %v8009_v37 = vadd.f32 %v7979_v61, %v7872_v60  ;;  %v6954_v28 = vpop.permute.xlu1 %6953  ;;  %v8105_v60 = vld [vmem:[%s18169_s18 + $0x58] sm:$0xff] }
 0xe9a   :  { %v8035_v54 = vadd.f32 %v8020_v16, %v7058_v34 }
 0xe9c   :  { %v8050_v27 = vmax.f32 %v8035_v54, 0.0  ;;  %v7984_v20 = vpop.f32.mrf.mxu0  ;;  %v7875_v54 = vadd.f32 %v7874_v63, %v17903_v15 }
 0xe9d   :  { %v7985_v58 = vadd.f32 %v7984_v20, %v17924_v23 }
 0xe9e   :  { %8065 = vxpose.xlu1.b32.cont [4/15] (short) (narrow) %v8050_v27, 8  ;;  %v8010_v57 = vadd.f32 %v7982_v8, %v7875_v54  ;;  %v8101_v8 = vld [vmem:[%s18169_s18 + $0x38] sm:$0xff] }
 0xe9f   :  { %v7755_v3 = vpop.f32.mrf.mxu3 }
 0xea0   :  { %v8021_v12 = vadd.f32 %v8006_v24, %v7755_v3  ;;  %v7877_v41 = vpop.f32.mrf.mxu1 }
 0xea2   :  { %v8036_v45 = vadd.f32 %v8021_v12, %v7061_v49  ;;  %v7878_v12 = vadd.f32 %v7877_v41, %v17919_v13 }
 0xea4   :  { %v8051_v9 = vmax.f32 %v8036_v45, 0.0  ;;  %v7987_v24 = vpop.f32.mrf.mxu0  ;;  %v8011_v15 = vadd.f32 %v7985_v58, %v7878_v12  ;;  %v7076_v45 = vadd.f32 %v17710_v31, %v6954_v28  ;;  %v19051_v58 = vld [vmem:[#allocation69_spill] sm:$0xff] }
 0xea5   :  { %v7988_v2 = vadd.f32 %v7987_v24, %v17940_v11  ;;  %v8108_v11 = vld [vmem:[%s18169_s18 + $0x70] sm:$0xff]  ;;  %v19050_v24 = vld [vmem:[#allocation99_spill] sm:$0xff] }
 0xea6   :  { %8066 = vxpose.xlu1.b32.cont [5/15] (short) (narrow) %v8051_v9, 8  ;;  %8118 = vmatpush.msra.mxu3 %v8108_v11  ;;  %v8139_v11 = vld [vmem:[%s18170_s20 + $0x8] sm:$0xff] }
 0xea7   :  { %v7758_v32 = vpop.f32.mrf.mxu3 }
 0xea8   :  { %v8022_v62 = vadd.f32 %v8007_v52, %v7758_v32  ;;  %v7880_v18 = vpop.f32.mrf.mxu1 }
 0xea9   :  { %v7881_v10 = vadd.f32 %v7880_v18, %v17935_v40 }
 0xeaa   :  { %v8037_v42 = vadd.f32 %v8022_v62, %v7064_v30  ;;  %v6959_v30 = vpop.permute.xlu2 %6958 }
 0xeab   :  { %v8012_v13 = vadd.f32 %v7988_v2, %v7881_v10  ;;  %v7079_v62 = vadd.f32 %v17727_v1, %v6959_v30  ;;  %v6964_v1 = vpop.permute.xlu0 %6963  ;;  %v19053_v2 = vld [vmem:[#allocation63_spill] sm:$0xff]  ;;  %v8094_v30 = vld [vmem:[%s18169_s18] sm:$0xff] }
 0xeac   :  { %v8052_v35 = vmax.f32 %v8037_v42, 0.0  ;;  %v7990_v9 = vpop.f32.mrf.mxu0 }
 0xead   :  { %v7991_v31 = vadd.f32 %v7990_v9, %v17956_v14  ;;  %v8106_v14 = vld [vmem:[%s18169_s18 + $0x60] sm:$0xff]  ;;  %v8095_v9 = vld [vmem:[%s18169_s18 + $0x8] sm:$0xff] }
 0xeae   :  { %8067 = vxpose.xlu1.b32.cont [6/15] (short) (narrow) %v8052_v35, 8 }
 0xeaf   :  { %v7761_v21 = vpop.f32.mrf.mxu3 }
 0xeb0   :  { %v8023_v17 = vadd.f32 %v8008_v7, %v7761_v21  ;;  %v7883_v44 = vpop.f32.mrf.mxu1  ;;  %v8107_v7 = vld [vmem:[%s18169_s18 + $0x68] sm:$0xff] }
 0xeb1   :  { %v7884_v43 = vadd.f32 %v7883_v44, %v17951_v36  ;;  %v7082_v36 = vadd.f32 %v17743_v33, %v6964_v1  ;;  %8119 = vmatpush.msra.mxu3 %v8107_v7  ;;  %v8104_v33 = vld [vmem:[%s18169_s18 + $0x50] sm:$0xff]  ;;  %v8138_v7 = vld [vmem:[%s18170_s20] sm:$0xff] }
 0xeb2   :  { %v8038_v38 = vadd.f32 %v8023_v17, %v7067_v6  ;;  %v6974_v53 = vpop.permute.xlu2 %6973 }
 0xeb3   :  { %v8013_v40 = vadd.f32 %v7991_v31, %v7884_v43  ;;  %8120 = vmatpush.msra.mxu3 %v8106_v14  ;;  %v8145_v43 = vld [vmem:[%s18170_s20 + $0x38] sm:$0xff]  ;;  %v8144_v31 = vld [vmem:[%s18170_s20 + $0x30] sm:$0xff] }
 0xeb4   :  { %v8053_v56 = vmax.f32 %v8038_v38, 0.0  ;;  %v7993_v22 = vpop.f32.mrf.mxu0 }
 0xeb5   :  { %v7994_v38 = vadd.f32 %v7993_v22, %v17976_v55  ;;  %8121 = vmatpush.msra.mxu3 %v8105_v60  ;;  %v6969_v55 = vpop.permute.xlu1 %6968  ;;  %v8142_v22 = vld [vmem:[%s18170_s20 + $0x20] sm:$0xff] }
 0xeb6   :  { %8068 = vxpose.xlu1.b32.cont [7/15] (short) (narrow) %v8053_v56, 8  ;;  %v7085_v4 = vadd.f32 %v17755_v50, %v6969_v55  ;;  %v8100_v50 = vld [vmem:[%s18169_s18 + $0x30] sm:$0xff] }
 0xeb7   :  { %v7764_v5 = vpop.f32.mrf.mxu3  ;;  %8122 = vmatpush.msra.mxu3 %v8104_v33 }
 0xeb8   :  { %v8024_v34 = vadd.f32 %v8009_v37, %v7764_v5  ;;  %v7886_v63 = vpop.f32.mrf.mxu1 }
 0xeb9   :  { %v7887_v17 = vadd.f32 %v7886_v63, %v17974_v48  ;;  %v8103_v48 = vld [vmem:[%s18169_s18 + $0x48] sm:$0xff] }
 0xeba   :  { %v8039_v16 = vadd.f32 %v8024_v34, %v7070_v59  ;;  %v8102_v59 = vld [vmem:[%s18169_s18 + $0x40] sm:$0xff]  ;;  %8123 = vmatpush.msra.mxu3 %v8103_v48  ;;  %v8143_v63 = vld [vmem:[%s18170_s20 + $0x28] sm:$0xff] }
 0xebb   :  { %v8014_v20 = vadd.f32 %v7994_v38, %v7887_v17 }
 0xebc   :  { %v8054_v25 = vmax.f32 %v8039_v16, 0.0  ;;  %v7996_v41 = vpop.f32.mrf.mxu0  ;;  %8124 = vmatpush.msra.mxu3 %v8102_v59 }
 0xebd   :  { %v7997_v54 = vadd.f32 %v7996_v41, %v17994_v47 }
 0xebe   :  { %8069 = vxpose.xlu1.b32.cont [8/15] (short) (narrow) %v8054_v25, 8  ;;  %8125 = vmatpush.msra.mxu3 %v8101_v8 }
 0xebf   :  { %v7767_v27 = vpop.f32.mrf.mxu3 }
 0xec0   :  { %v8025_v3 = vadd.f32 %v8010_v57, %v7767_v27  ;;  %v7889_v56 = vpop.f32.mrf.mxu1  ;;  %8126 = vmatpush.msra.mxu3 %v8100_v50 }
 0xec1   :  { %v7890_v16 = vadd.f32 %v7889_v56, %v17991_v51  ;;  %v8099_v51 = vld [vmem:[%s18169_s18 + $0x28] sm:$0xff] }
 0xec2   :  { %v8040_v49 = vadd.f32 %v8025_v3, %v7073_v39  ;;  %v7088_v39 = vadd.f32 %v19050_v24, %v6974_v53  ;;  %8127 = vmatpush.msra.mxu3 %v8099_v51 }
 0xec3   :  { %v8015_v57 = vadd.f32 %v7997_v54, %v7890_v16 }
 0xec4   :  { %v8055_v29 = vmax.f32 %v8040_v49, 0.0  ;;  %v7999_v27 = vpop.f32.mrf.mxu0  ;;  %v8098_v49 = vld [vmem:[%s18169_s18 + $0x20] sm:$0xff] }
 0xec5   :  { %8128 = vmatpush.msra.mxu3 %v8098_v49 }
 0xec6   :  { %8070 = vxpose.xlu1.b32.cont [9/15] (short) (narrow) %v8055_v29, 8 }
 0xec7   :  { %v7770_v26 = vpop.f32.mrf.mxu3 }
 0xec8   :  { %v8026_v19 = vadd.f32 %v8011_v15, %v7770_v26  ;;  %v7892_v18 = vpop.f32.mrf.mxu1  ;;  %v19052_v15 = vld [vmem:[#allocation39_spill] sm:$0xff]  ;;  %v8097_v26 = vld [vmem:[%s18169_s18 + $0x18] sm:$0xff] }
 0xec9   :  { %v7893_v29 = vadd.f32 %v7892_v18, %v19051_v58  ;;  %v8000_v28 = vadd.f32 %v7999_v27, %v19052_v15  ;;  %8129 = vmatpush.msra.mxu3 %v8097_v26 }
 0xeca   :  { %v8041_v52 = vadd.f32 %v8026_v19, %v7076_v45  ;;  %v8096_v19 = vld [vmem:[%s18169_s18 + $0x10] sm:$0xff] }
 0xecb   :  { %v8016_v44 = vadd.f32 %v8000_v28, %v7893_v29  ;;  %8130 = vmatpush.msra.mxu3 %v8096_v19 }
 0xecc   :  { %v8056_v32 = vmax.f32 %v8041_v52, 0.0  ;;  %v6979_v52 = vpop.permute.xlu0 %6978 }
 0xecd   :  { %8131 = vmatpush.msra.mxu3 %v8095_v9 }
 0xece   :  { %8071 = vxpose.xlu1.b32.cont [10/15] (short) (narrow) %v8056_v32, 8  ;;  %v7091_v32 = vadd.f32 %v19053_v2, %v6979_v52 }
 0xecf   :  { %v7773_v23 = vpop.f32.mrf.mxu3  ;;  %8132 = vmatpush.msra.mxu3 %v8094_v30 }
 0xed0   :  { %v8027_v42 = vadd.f32 %v8012_v13, %v7773_v23 }
 0xed2   :  { %v8042_v0 = vadd.f32 %v8027_v42, %v7079_v62  ;;  %v8147_v42 = vld [vmem:[%s18170_s20 + $0x48] sm:$0xff] }
 0xed3   :  { %8161 = vmatpush.msrb.mxu2 %v8147_v42 }
 0xed4   :  { %v8057_v35 = vmax.f32 %v8042_v0, 0.0  ;;  %v8146_v0 = vld [vmem:[%s18170_s20 + $0x40] sm:$0xff] }
 0xed5   :  { %8162 = vmatpush.msrb.mxu2 %v8146_v0 }
 0xed6   :  { %8072 = vxpose.xlu1.b32.cont [11/15] (short) (narrow) %v8057_v35, 8  ;;  %v8141_v35 = vld [vmem:[%s18170_s20 + $0x18] sm:$0xff] }
 0xed7   :  { %v7776_v46 = vpop.f32.mrf.mxu3  ;;  %8163 = vmatpush.msrb.mxu2 %v8145_v43 }
 0xed8   :  { %v8028_v21 = vadd.f32 %v8013_v40, %v7776_v46  ;;  %v8140_v40 = vld [vmem:[%s18170_s20 + $0x10] sm:$0xff]  ;;  %v9588_v46 = vld [vmem:[%s18168_s19] ss:$0 sm:$0xff] }
 0xed9   :  { %8164 = vmatpush.msrb.mxu2 %v8144_v31 }
 0xeda   :  { %v8043_v6 = vadd.f32 %v8028_v21, %v7082_v36 }
 0xedb   :  { %8165 = vmatpush.msrb.mxu2 %v8143_v63 }
 0xedc   :  { %v8058_v61 = vmax.f32 %v8043_v6, 0.0  ;;  %v9589_v6 = vld [vmem:[%s18171_s21] ss:$0 sm:$0xff] }
 0xedd   :  { %8166 = vmatpush.msrb.mxu2 %v8142_v22 }
 0xede   :  { %8073 = vxpose.xlu1.b32.cont [12/15] (short) (narrow) %v8058_v61, 8 }
 0xedf   :  { %v7779_v37 = vpop.f32.mrf.mxu3  ;;  %8167 = vmatpush.msrb.mxu2 %v8141_v35 }
 0xee0   :  { %v8029_v5 = vadd.f32 %v8014_v20, %v7779_v37 }
 0xee1   :  { %8168 = vmatpush.msrb.mxu2 %v8140_v40 }
 0xee2   :  { %v8044_v34 = vadd.f32 %v8029_v5, %v7085_v4 }
 0xee3   :  { %8169 = vmatpush.msrb.mxu2 %v8139_v11 }
 0xee4   :  { %v8059_v25 = vmax.f32 %v8044_v34, 0.0 }
 0xee5   :  { %8170 = vmatpush.msrb.mxu2 %v8138_v7 }
 0xee6   :  { %8074 = vxpose.xlu1.b32.cont [13/15] (short) (narrow) %v8059_v25, 8 }
 0xee7   :  { %v7782_v47 = vpop.f32.mrf.mxu3 }
 0xee8   :  { %v8030_v3 = vadd.f32 %v8015_v57, %v7782_v47 }
 0xeea   :  { %v8045_v12 = vadd.f32 %v8030_v3, %v7088_v39 }
 0xeec   :  { %v8060_v45 = vmax.f32 %v8045_v12, 0.0 }
 0xeee   :  { %8075 = vxpose.xlu1.b32.cont [14/15] (short) (narrow) %v8060_v45, 8 }
 0xeef   :  { %v7785_v10 = vpop.f32.mrf.mxu3 }
 0xef0   :  { %v8031_v13 = vadd.f32 %v8016_v44, %v7785_v10 }
 0xef2   :  { %v8046_v23 = vadd.f32 %v8031_v13, %v7091_v32 }
 0xef4   :  { %v8061_v62 = vmax.f32 %v8046_v23, 0.0 }
 0xef6   :  { %8076 = vxpose.xlu1.b32.end [15/15] (short) (narrow) %v8061_v62, 8 }
 0xf2a   :  { %v8078_v1 = vpop.trf.xlu1 }
 0xf2b   :  { %9551 = vmatmul.msk.f32.vlgmr.msra.gmra.mxu3 %vm8113_vm6, %v8078_v1 }
 0xfae   :  { %v8134_v36 = vpop.f32.mrf.mxu3 }
 0xfaf   :  { %v8135_v21 = vadd.f32 %v9588_v46, %v8134_v36 }
 0xfb1   :  { %v8137_v14 = vmax.f32 %v8135_v21, 0.0 }
 0xfb3   :  { %9552 = vmatmul.msk.f32.vlgmr.msrb.gmra.mxu2 %vm151_vm0, %v8137_v14 }
0x1036   :  { %v8172_v17 = vpop.f32.mrf.mxu2 }
0x1037   :  { %v8173_v38 = vadd.f32 %v9589_v6, %v8172_v17 }
0x1039   :  { %8175 = vst [vmem:[%s18172_s22] sm:$0xff] %v8173_v38 }

</bundles_post_ra>
